<compile_context>
chip_gen: v6e
topology: v6e:2x2x1
jax: 0.10.0
libtpu: 0.0.40
codegen_flags: <defaults>
</compile_context>

<pallas_src>
import functools

import numpy as np
import jax
import jax.numpy as jnp
from jax import lax
from jax.experimental import pallas as pl
from jax.experimental.pallas import tpu as pltpu


def _pick_tile_rows(H, W, C, acc_budget_bytes=128 * 1024):
    """Pick a row-tile TR that divides H.

    Preference order:
      1. TR*W multiple of 8 (sublane-aligned M: no relayout copies on the
         (TR, W, C) <-> (TR*W, C) reshapes, no masked MXU rows) AND the f32
         accumulator (TR*W, C) fits in `acc_budget_bytes` (bounds vreg /
         spill pressure of the 9-tap accumulation).  Largest such TR.
      2. Same but without the multiple-of-8 requirement.
      3. TR = 1.
    """
    divs = [d for d in range(1, H + 1) if H % d == 0]
    within = [d for d in divs if d * W * C * 4 <= acc_budget_bytes]
    aligned = [d for d in within if (d * W) % 8 == 0]
    if aligned:
        return max(aligned)
    if within:
        return max(within)
    return 1


def _block_kernel(x_ref, w1_ref, w2_ref, s1_ref, b1_ref, s2_ref, b2_ref,
                  out_ref, xpad_ref, mid_ref, *, tr):
    # x_ref    : (1, H, W, C)   bf16 input tile, NHWC
    # w1/w2    : (9, C, C)      bf16 conv weights, tap index = kh*3 + kw
    # s*/b*    : (1, C)         f32 folded BN scale / bias
    # out_ref  : (1, H, W, C)   bf16 output tile
    # xpad_ref : (H+2, W+2, C)  bf16 scratch: zero-bordered input
    # mid_ref  : (H+2, W+2, C)  bf16 scratch: zero-bordered conv1 output
    H = out_ref.shape[1]
    W = out_ref.shape[2]
    C = out_ref.shape[3]
    n_blocks = H // tr
    f32 = jnp.float32
    bdt = xpad_ref.dtype

    def _zero_border(ref):
        # Only the 1-pixel halo; the interior is fully overwritten below.
        # Done every iteration so it is correct under megacore ("parallel")
        # sharding of the batch axis (scratch is per-core).
        ref[0:1, :, :] = jnp.zeros((1, W + 2, C), bdt)
        ref[H + 1:H + 2, :, :] = jnp.zeros((1, W + 2, C), bdt)
        ref[1:1 + H, 0:1, :] = jnp.zeros((H, 1, C), bdt)
        ref[1:1 + H, W + 1:W + 2, :] = jnp.zeros((H, 1, C), bdt)

    _zero_border(xpad_ref)
    _zero_border(mid_ref)

    # Stage x once into the zero-bordered scratch (single HBM read of x per
    # grid step; the residual identity is read from x_ref directly).
    # TODO(synk): this VMEM->VMEM copy could be removed entirely by masking
    # the boundary taps of the first/last row block against x_ref.
    xpad_ref[1:1 + H, 1:1 + W, :] = x_ref[0]

    s1 = s1_ref[0]
    b1 = b1_ref[0]
    s2 = s2_ref[0]
    b2 = b2_ref[0]

    def _conv3x3(src_ref, w_ref, row0):
        # Direct 9-tap accumulation: nine (tr*W, C) x (C, C) bf16 matmuls
        # accumulated in f32.  No im2col slab -> nothing extra travels through
        # the vector-store slot and no lane-misaligned tap writes.
        acc = None
        for kh in range(3):
            for kw in range(3):
                patch = src_ref[pl.ds(row0 + kh, tr), kw:kw + W, :]
                d = jnp.dot(patch.reshape(tr * W, C), w_ref[kh * 3 + kw],
                            preferred_element_type=f32)
                acc = d if acc is None else acc + d
        return acc

    # ---- pass 1: conv1 -> bn1 -> relu, written into mid_ref interior -------
    def _pass1(b):
        row0 = b * tr
        y1 = _conv3x3(xpad_ref, w1_ref, row0)
        y1 = jnp.maximum(y1 * s1 + b1, 0.0)
        mid_ref[pl.ds(1 + row0, tr), 1:1 + W, :] = (
            y1.reshape(tr, W, C).astype(bdt))

    # ---- pass 2: conv2 -> bn2 -> + identity -> relu -------------------------
    def _pass2(b):
        row0 = b * tr
        y2 = _conv3x3(mid_ref, w2_ref, row0)
        identity = x_ref[0, pl.ds(row0, tr), :, :].astype(f32).reshape(tr * W, C)
        y2 = jnp.maximum(y2 * s2 + b2 + identity, 0.0)
        out_ref[0, pl.ds(row0, tr), :, :] = (
            y2.reshape(tr, W, C).astype(out_ref.dtype))

    def _for_each_block(body):
        # Fully unroll small static trip counts (LLO scheduler can overlap
        # block b+1 loads with block b matmuls); bound code size for very
        # tall images with a partially unrolled fori_loop.
        if n_blocks <= 8:
            for b in range(n_blocks):
                body(b)
        else:
            def wrapped(b, carry):
                body(b)
                return carry
            lax.fori_loop(0, n_blocks, wrapped, 0, unroll=2)

    # TODO(synk): fuse the two passes with a one-block lag + rolling mid
    # window to interleave conv1/conv2 and trim VMEM further on v7x.
    _for_each_block(_pass1)
    _for_each_block(_pass2)


def _fold_bn(bn, C, eps):
    gamma, beta, mean, var = bn
    gamma = gamma.astype(jnp.float32)
    beta = beta.astype(jnp.float32)
    mean = mean.astype(jnp.float32)
    var = var.astype(jnp.float32)
    scale = gamma / jnp.sqrt(var + eps)
    bias = beta - mean * scale
    return scale.reshape(1, C), bias.reshape(1, C)


def basic_block_b_nhwc(x_nhwc, w1_hwio, w2_hwio, bn1, bn2, eps=1e-5):
    """Fused BasicBlock_B (stride=1) on NHWC activations.  Returns bf16 NHWC."""
    N, H, W, C = x_nhwc.shape
    assert w1_hwio.shape == (3, 3, C, C) and w2_hwio.shape == (3, 3, C, C), (
        "only the stride=1 (inplanes -> inplanes) branch is implemented")

    cdt = jnp.bfloat16
    x = x_nhwc.astype(cdt)
    # (3, 3, Cin, Cout) -> (9, Cin, Cout); tap index = kh*3 + kw.
    w1 = w1_hwio.astype(cdt).reshape(9, C, C)
    w2 = w2_hwio.astype(cdt).reshape(9, C, C)
    s1, b1 = _fold_bn(bn1, C, eps)
    s2, b2 = _fold_bn(bn2, C, eps)

    TR = _pick_tile_rows(H, W, C)

    # Explicit VMEM budget: double-buffered x/out tiles, weights and BN
    # vectors plus the two padded bf16 scratches, with 2x headroom; clamped
    # so it stays safe on v7x's 64 MiB physical VMEM.
    esz = 2  # bf16 bytes
    need = (2 * 2 * H * W * C * esz            # x + out tiles, double-buffered
            + 2 * 2 * 9 * C * C * esz          # w1 + w2, double-buffered
            + 2 * 4 * C * 4                    # 4 BN vectors (f32)
            + 2 * (H + 2) * (W + 2) * C * esz)  # padded scratches
    vmem_limit = int(min(max(2 * need, 32 << 20), 56 << 20))

    kernel = functools.partial(_block_kernel, tr=TR)

    out = pl.pallas_call(
        kernel,
        out_shape=jax.ShapeDtypeStruct((N, H, W, C), cdt),
        grid_spec=pltpu.PrefetchScalarGridSpec(
            num_scalar_prefetch=0,
            grid=(N,),
            in_specs=[
                pl.BlockSpec((1, H, W, C), lambda n: (n, 0, 0, 0)),
                # TODO(synk): pipeline_mode=pl.Buffered(1) on the two constant
                # weight blocks would halve their VMEM at large C.
                pl.BlockSpec((9, C, C),    lambda n: (0, 0, 0)),
                pl.BlockSpec((9, C, C),    lambda n: (0, 0, 0)),
                pl.BlockSpec((1, C),       lambda n: (0, 0)),
                pl.BlockSpec((1, C),       lambda n: (0, 0)),
                pl.BlockSpec((1, C),       lambda n: (0, 0)),
                pl.BlockSpec((1, C),       lambda n: (0, 0)),
            ],
            out_specs=pl.BlockSpec((1, H, W, C), lambda n: (n, 0, 0, 0)),
            scratch_shapes=[
                pltpu.VMEM((H + 2, W + 2, C), cdt),   # zero-bordered input
                pltpu.VMEM((H + 2, W + 2, C), cdt),   # zero-bordered conv1 out
            ],
        ),
        compiler_params=pltpu.CompilerParams(
            dimension_semantics=("parallel",),
            vmem_limit_bytes=vmem_limit),
    )(x, w1, w2, s1, b1, s2, b2)
    return out


def basic_block_b(x_nchw, w1_hwio, w2_hwio, bn1, bn2, eps=1e-5):
    """PyTorch-layout entry point: (N, C, H, W) in -> (N, C, H, W) f32 out."""
    # TODO(synk): for a chain of blocks keep the model in NHWC/bf16 and call
    # basic_block_b_nhwc directly; these transposes are extra HBM passes.
    x = jnp.transpose(x_nchw, (0, 2, 3, 1))
    out = basic_block_b_nhwc(x, w1_hwio, w2_hwio, bn1, bn2, eps)
    return jnp.transpose(out, (0, 3, 1, 2)).astype(jnp.float32)


def _reference(x_nchw, w1_hwio, w2_hwio, bn1, bn2, eps=1e-5):
    """Pure-JAX f32 reference for verification (same NHWC/HWIO weights)."""
    x = jnp.transpose(x_nchw, (0, 2, 3, 1)).astype(jnp.float32)

    def bn_apply(y, bn):
        gamma, beta, mean, var = bn
        return (y - mean) / jnp.sqrt(var + eps) * gamma + beta

    dn = lax.conv_dimension_numbers(x.shape, w1_hwio.shape, ("NHWC", "HWIO", "NHWC"))
    out = lax.conv_general_dilated(x, w1_hwio.astype(jnp.float32), (1, 1), "SAME",
                                   dimension_numbers=dn)
    out = jnp.maximum(bn_apply(out, bn1), 0.0)
    out = lax.conv_general_dilated(out, w2_hwio.astype(jnp.float32), (1, 1), "SAME",
                                   dimension_numbers=dn)
    out = bn_apply(out, bn2) + x
    out = jnp.maximum(out, 0.0)
    return jnp.transpose(out, (0, 3, 1, 2))


if __name__ == "__main__":
    key = jax.random.PRNGKey(0)
    N, C, H, W = 2, 4, 16, 16  # inplanes = 4, stride = 1

    k = jax.random.split(key, 7)
    x = jax.random.normal(k[0], (N, C, H, W), jnp.float32)

    # conv weights generated directly in HWIO layout (3, 3, Cin, Cout)
    w1 = jax.random.normal(k[1], (3, 3, C, C), jnp.float32) * 0.1
    w2 = jax.random.normal(k[2], (3, 3, C, C), jnp.float32) * 0.1

    # BatchNorm params: gamma, beta, running_mean, running_var
    bn1 = (jax.random.uniform(k[3], (C,), jnp.float32, 0.5, 1.5),
           jax.random.normal(k[4], (C,), jnp.float32) * 0.1,
           jax.random.normal(k[5], (C,), jnp.float32) * 0.1,
           jax.random.uniform(k[6], (C,), jnp.float32, 0.5, 1.5))
    k2 = jax.random.split(k[6], 4)
    bn2 = (jax.random.uniform(k2[0], (C,), jnp.float32, 0.5, 1.5),
           jax.random.normal(k2[1], (C,), jnp.float32) * 0.1,
           jax.random.normal(k2[2], (C,), jnp.float32) * 0.1,
           jax.random.uniform(k2[3], (C,), jnp.float32, 0.5, 1.5))

    out = jax.block_until_ready(basic_block_b(x, w1, w2, bn1, bn2))
    ref = jax.block_until_ready(_reference(x, w1, w2, bn1, bn2))
    # bf16 activations/weights (f32 accumulation) vs f32 reference -> loosened
    # tolerance, as flagged in the review.
    np.testing.assert_allclose(np.asarray(out), np.asarray(ref),
                               rtol=3e-2, atol=3e-2)

    print("KERNEL_OK")
</pallas_src>

<mosaic_0001>
module attributes {stable_mosaic.version = 11 : i64} {
  func.func @_block_kernel(%arg0: i32, %arg1: memref<1x16x16x4xbf16, #tpu.memory_space<vmem>>, %arg2: memref<9x4x4xbf16, #tpu.memory_space<vmem>>, %arg3: memref<9x4x4xbf16, #tpu.memory_space<vmem>>, %arg4: memref<1x4xf32, #tpu.memory_space<vmem>>, %arg5: memref<1x4xf32, #tpu.memory_space<vmem>>, %arg6: memref<1x4xf32, #tpu.memory_space<vmem>>, %arg7: memref<1x4xf32, #tpu.memory_space<vmem>>, %arg8: memref<1x16x16x4xbf16, #tpu.memory_space<vmem>>, %arg9: memref<18x18x4xbf16, #tpu.memory_space<vmem>>, %arg10: memref<18x18x4xbf16, #tpu.memory_space<vmem>>) attributes {dimension_semantics = [#tpu.dimension_semantics<parallel>], iteration_bounds = array<i64: 2>, scalar_prefetch = 0 : i64, scratch_operands = 2 : i64, tpu.core_type = #tpu.core_type<tc>, window_params = [{transform_indices = @transform_0, window_bounds = array<i64: 1, 16, 16, 4>}, {pipeline_mode = #tpu.pipeline_mode<synchronous>, transform_indices = @transform_1, window_bounds = array<i64: 9, 4, 4>}, {pipeline_mode = #tpu.pipeline_mode<synchronous>, transform_indices = @transform_2, window_bounds = array<i64: 9, 4, 4>}, {pipeline_mode = #tpu.pipeline_mode<synchronous>, transform_indices = @transform_3, window_bounds = array<i64: 1, 4>}, {pipeline_mode = #tpu.pipeline_mode<synchronous>, transform_indices = @transform_4, window_bounds = array<i64: 1, 4>}, {pipeline_mode = #tpu.pipeline_mode<synchronous>, transform_indices = @transform_5, window_bounds = array<i64: 1, 4>}, {pipeline_mode = #tpu.pipeline_mode<synchronous>, transform_indices = @transform_6, window_bounds = array<i64: 1, 4>}, {transform_indices = @transform_7, window_bounds = array<i64: 1, 16, 16, 4>}]} {
    %cst = arith.constant 0.000000e+00 : bf16
    %0 = vector.broadcast %cst : bf16 to vector<1x18x4xbf16>
    %c0 = arith.constant 0 : index
    %c0_0 = arith.constant 0 : index
    %c0_1 = arith.constant 0 : index
    %1 = vector.load %arg9[%c0, %c0_0, %c0_1] : memref<18x18x4xbf16, #tpu.memory_space<vmem>>, vector<1x18x4xbf16>
    tpu.vector_store %arg9[%c0, %c0_0, %c0_1], %0 {strides = array<i32>} : memref<18x18x4xbf16, #tpu.memory_space<vmem>>, vector<1x18x4xbf16>,
    %cst_2 = arith.constant 0.000000e+00 : bf16
    %2 = vector.broadcast %cst_2 : bf16 to vector<1x18x4xbf16>
    %c17 = arith.constant 17 : index
    %c0_3 = arith.constant 0 : index
    %c0_4 = arith.constant 0 : index
    %3 = vector.load %arg9[%c17, %c0_3, %c0_4] : memref<18x18x4xbf16, #tpu.memory_space<vmem>>, vector<1x18x4xbf16>
    tpu.vector_store %arg9[%c17, %c0_3, %c0_4], %2 {strides = array<i32>} : memref<18x18x4xbf16, #tpu.memory_space<vmem>>, vector<1x18x4xbf16>,
    %cst_5 = arith.constant 0.000000e+00 : bf16
    %4 = vector.broadcast %cst_5 : bf16 to vector<16x1x4xbf16>
    %c1 = arith.constant 1 : index
    %c0_6 = arith.constant 0 : index
    %c0_7 = arith.constant 0 : index
    %5 = vector.load %arg9[%c1, %c0_6, %c0_7] : memref<18x18x4xbf16, #tpu.memory_space<vmem>>, vector<16x1x4xbf16>
    tpu.vector_store %arg9[%c1, %c0_6, %c0_7], %4 {strides = array<i32>} : memref<18x18x4xbf16, #tpu.memory_space<vmem>>, vector<16x1x4xbf16>,
    %cst_8 = arith.constant 0.000000e+00 : bf16
    %6 = vector.broadcast %cst_8 : bf16 to vector<16x1x4xbf16>
    %c1_9 = arith.constant 1 : index
    %c17_10 = arith.constant 17 : index
    %c0_11 = arith.constant 0 : index
    %7 = vector.load %arg9[%c1_9, %c17_10, %c0_11] : memref<18x18x4xbf16, #tpu.memory_space<vmem>>, vector<16x1x4xbf16>
    tpu.vector_store %arg9[%c1_9, %c17_10, %c0_11], %6 {strides = array<i32>} : memref<18x18x4xbf16, #tpu.memory_space<vmem>>, vector<16x1x4xbf16>,
    %cst_12 = arith.constant 0.000000e+00 : bf16
    %8 = vector.broadcast %cst_12 : bf16 to vector<1x18x4xbf16>
    %c0_13 = arith.constant 0 : index
    %c0_14 = arith.constant 0 : index
    %c0_15 = arith.constant 0 : index
    %9 = vector.load %arg10[%c0_13, %c0_14, %c0_15] : memref<18x18x4xbf16, #tpu.memory_space<vmem>>, vector<1x18x4xbf16>
    tpu.vector_store %arg10[%c0_13, %c0_14, %c0_15], %8 {strides = array<i32>} : memref<18x18x4xbf16, #tpu.memory_space<vmem>>, vector<1x18x4xbf16>,
    %cst_16 = arith.constant 0.000000e+00 : bf16
    %10 = vector.broadcast %cst_16 : bf16 to vector<1x18x4xbf16>
    %c17_17 = arith.constant 17 : index
    %c0_18 = arith.constant 0 : index
    %c0_19 = arith.constant 0 : index
    %11 = vector.load %arg10[%c17_17, %c0_18, %c0_19] : memref<18x18x4xbf16, #tpu.memory_space<vmem>>, vector<1x18x4xbf16>
    tpu.vector_store %arg10[%c17_17, %c0_18, %c0_19], %10 {strides = array<i32>} : memref<18x18x4xbf16, #tpu.memory_space<vmem>>, vector<1x18x4xbf16>,
    %cst_20 = arith.constant 0.000000e+00 : bf16
    %12 = vector.broadcast %cst_20 : bf16 to vector<16x1x4xbf16>
    %c1_21 = arith.constant 1 : index
    %c0_22 = arith.constant 0 : index
    %c0_23 = arith.constant 0 : index
    %13 = vector.load %arg10[%c1_21, %c0_22, %c0_23] : memref<18x18x4xbf16, #tpu.memory_space<vmem>>, vector<16x1x4xbf16>
    tpu.vector_store %arg10[%c1_21, %c0_22, %c0_23], %12 {strides = array<i32>} : memref<18x18x4xbf16, #tpu.memory_space<vmem>>, vector<16x1x4xbf16>,
    %cst_24 = arith.constant 0.000000e+00 : bf16
    %14 = vector.broadcast %cst_24 : bf16 to vector<16x1x4xbf16>
    %c1_25 = arith.constant 1 : index
    %c17_26 = arith.constant 17 : index
    %c0_27 = arith.constant 0 : index
    %15 = vector.load %arg10[%c1_25, %c17_26, %c0_27] : memref<18x18x4xbf16, #tpu.memory_space<vmem>>, vector<16x1x4xbf16>
    tpu.vector_store %arg10[%c1_25, %c17_26, %c0_27], %14 {strides = array<i32>} : memref<18x18x4xbf16, #tpu.memory_space<vmem>>, vector<16x1x4xbf16>,
    %c0_28 = arith.constant 0 : index
    %c0_29 = arith.constant 0 : index
    %c0_30 = arith.constant 0 : index
    %c0_31 = arith.constant 0 : index
    %16 = vector.load %arg1[%c0_28, %c0_29, %c0_30, %c0_31] : memref<1x16x16x4xbf16, #tpu.memory_space<vmem>>, vector<1x16x16x4xbf16>
    %17 = vector.shape_cast %16 : vector<1x16x16x4xbf16> to vector<16x16x4xbf16>
    %c1_32 = arith.constant 1 : index
    %c1_33 = arith.constant 1 : index
    %c0_34 = arith.constant 0 : index
    %18 = vector.load %arg9[%c1_32, %c1_33, %c0_34] : memref<18x18x4xbf16, #tpu.memory_space<vmem>>, vector<16x16x4xbf16>
    tpu.vector_store %arg9[%c1_32, %c1_33, %c0_34], %17 {strides = array<i32>} : memref<18x18x4xbf16, #tpu.memory_space<vmem>>, vector<16x16x4xbf16>,
    %c0_35 = arith.constant 0 : index
    %c0_36 = arith.constant 0 : index
    %19 = vector.load %arg4[%c0_35, %c0_36] : memref<1x4xf32, #tpu.memory_space<vmem>>, vector<1x4xf32>
    %20 = vector.shape_cast %19 : vector<1x4xf32> to vector<4xf32>
    %c0_37 = arith.constant 0 : index
    %c0_38 = arith.constant 0 : index
    %21 = vector.load %arg5[%c0_37, %c0_38] : memref<1x4xf32, #tpu.memory_space<vmem>>, vector<1x4xf32>
    %22 = vector.shape_cast %21 : vector<1x4xf32> to vector<4xf32>
    %c0_39 = arith.constant 0 : index
    %c0_40 = arith.constant 0 : index
    %23 = vector.load %arg6[%c0_39, %c0_40] : memref<1x4xf32, #tpu.memory_space<vmem>>, vector<1x4xf32>
    %24 = vector.shape_cast %23 : vector<1x4xf32> to vector<4xf32>
    %c0_41 = arith.constant 0 : index
    %c0_42 = arith.constant 0 : index
    %25 = vector.load %arg7[%c0_41, %c0_42] : memref<1x4xf32, #tpu.memory_space<vmem>>, vector<1x4xf32>
    %26 = vector.shape_cast %25 : vector<1x4xf32> to vector<4xf32>
    %c0_43 = arith.constant 0 : index
    %c0_44 = arith.constant 0 : index
    %c0_45 = arith.constant 0 : index
    %27 = vector.load %arg9[%c0_43, %c0_44, %c0_45] : memref<18x18x4xbf16, #tpu.memory_space<vmem>>, vector<16x16x4xbf16>
    %28 = vector.shape_cast %27 : vector<16x16x4xbf16> to vector<256x4xbf16>
    %c0_46 = arith.constant 0 : index
    %c0_47 = arith.constant 0 : index
    %c0_48 = arith.constant 0 : index
    %29 = vector.load %arg2[%c0_46, %c0_47, %c0_48] : memref<9x4x4xbf16, #tpu.memory_space<vmem>>, vector<1x4x4xbf16>
    %30 = vector.shape_cast %29 : vector<1x4x4xbf16> to vector<4x4xbf16>
    %cst_49 = arith.constant dense<0.000000e+00> : vector<256x4xf32>
    %31 = tpu.matmul %28, %30, %cst_49 {dimension_numbers = #tpu.dot_dimension_numbers<[1], [0], [0], [1], [0, 0, 1, 1], [], []>} : vector<256x4xbf16>, vector<4x4xbf16>, vector<256x4xf32> -> vector<256x4xf32>
    %c0_50 = arith.constant 0 : index
    %c1_51 = arith.constant 1 : index
    %c0_52 = arith.constant 0 : index
    %32 = vector.load %arg9[%c0_50, %c1_51, %c0_52] : memref<18x18x4xbf16, #tpu.memory_space<vmem>>, vector<16x16x4xbf16>
    %33 = vector.shape_cast %32 : vector<16x16x4xbf16> to vector<256x4xbf16>
    %c1_53 = arith.constant 1 : index
    %c0_54 = arith.constant 0 : index
    %c0_55 = arith.constant 0 : index
    %34 = vector.load %arg2[%c1_53, %c0_54, %c0_55] : memref<9x4x4xbf16, #tpu.memory_space<vmem>>, vector<1x4x4xbf16>
    %35 = vector.shape_cast %34 : vector<1x4x4xbf16> to vector<4x4xbf16>
    %cst_56 = arith.constant dense<0.000000e+00> : vector<256x4xf32>
    %36 = tpu.matmul %33, %35, %cst_56 {dimension_numbers = #tpu.dot_dimension_numbers<[1], [0], [0], [1], [0, 0, 1, 1], [], []>} : vector<256x4xbf16>, vector<4x4xbf16>, vector<256x4xf32> -> vector<256x4xf32>
    %37 = arith.addf %31, %36 : vector<256x4xf32>
    %c0_57 = arith.constant 0 : index
    %c2 = arith.constant 2 : index
    %c0_58 = arith.constant 0 : index
    %38 = vector.load %arg9[%c0_57, %c2, %c0_58] : memref<18x18x4xbf16, #tpu.memory_space<vmem>>, vector<16x16x4xbf16>
    %39 = vector.shape_cast %38 : vector<16x16x4xbf16> to vector<256x4xbf16>
    %c2_59 = arith.constant 2 : index
    %c0_60 = arith.constant 0 : index
    %c0_61 = arith.constant 0 : index
    %40 = vector.load %arg2[%c2_59, %c0_60, %c0_61] : memref<9x4x4xbf16, #tpu.memory_space<vmem>>, vector<1x4x4xbf16>
    %41 = vector.shape_cast %40 : vector<1x4x4xbf16> to vector<4x4xbf16>
    %cst_62 = arith.constant dense<0.000000e+00> : vector<256x4xf32>
    %42 = tpu.matmul %39, %41, %cst_62 {dimension_numbers = #tpu.dot_dimension_numbers<[1], [0], [0], [1], [0, 0, 1, 1], [], []>} : vector<256x4xbf16>, vector<4x4xbf16>, vector<256x4xf32> -> vector<256x4xf32>
    %43 = arith.addf %37, %42 : vector<256x4xf32>
    %c1_63 = arith.constant 1 : index
    %c0_64 = arith.constant 0 : index
    %c0_65 = arith.constant 0 : index
    %44 = vector.load %arg9[%c1_63, %c0_64, %c0_65] : memref<18x18x4xbf16, #tpu.memory_space<vmem>>, vector<16x16x4xbf16>
    %45 = vector.shape_cast %44 : vector<16x16x4xbf16> to vector<256x4xbf16>
    %c3 = arith.constant 3 : index
    %c0_66 = arith.constant 0 : index
    %c0_67 = arith.constant 0 : index
    %46 = vector.load %arg2[%c3, %c0_66, %c0_67] : memref<9x4x4xbf16, #tpu.memory_space<vmem>>, vector<1x4x4xbf16>
    %47 = vector.shape_cast %46 : vector<1x4x4xbf16> to vector<4x4xbf16>
    %cst_68 = arith.constant dense<0.000000e+00> : vector<256x4xf32>
    %48 = tpu.matmul %45, %47, %cst_68 {dimension_numbers = #tpu.dot_dimension_numbers<[1], [0], [0], [1], [0, 0, 1, 1], [], []>} : vector<256x4xbf16>, vector<4x4xbf16>, vector<256x4xf32> -> vector<256x4xf32>
    %49 = arith.addf %43, %48 : vector<256x4xf32>
    %c1_69 = arith.constant 1 : index
    %c1_70 = arith.constant 1 : index
    %c0_71 = arith.constant 0 : index
    %50 = vector.load %arg9[%c1_69, %c1_70, %c0_71] : memref<18x18x4xbf16, #tpu.memory_space<vmem>>, vector<16x16x4xbf16>
    %51 = vector.shape_cast %50 : vector<16x16x4xbf16> to vector<256x4xbf16>
    %c4 = arith.constant 4 : index
    %c0_72 = arith.constant 0 : index
    %c0_73 = arith.constant 0 : index
    %52 = vector.load %arg2[%c4, %c0_72, %c0_73] : memref<9x4x4xbf16, #tpu.memory_space<vmem>>, vector<1x4x4xbf16>
    %53 = vector.shape_cast %52 : vector<1x4x4xbf16> to vector<4x4xbf16>
    %cst_74 = arith.constant dense<0.000000e+00> : vector<256x4xf32>
    %54 = tpu.matmul %51, %53, %cst_74 {dimension_numbers = #tpu.dot_dimension_numbers<[1], [0], [0], [1], [0, 0, 1, 1], [], []>} : vector<256x4xbf16>, vector<4x4xbf16>, vector<256x4xf32> -> vector<256x4xf32>
    %55 = arith.addf %49, %54 : vector<256x4xf32>
    %c1_75 = arith.constant 1 : index
    %c2_76 = arith.constant 2 : index
    %c0_77 = arith.constant 0 : index
    %56 = vector.load %arg9[%c1_75, %c2_76, %c0_77] : memref<18x18x4xbf16, #tpu.memory_space<vmem>>, vector<16x16x4xbf16>
    %57 = vector.shape_cast %56 : vector<16x16x4xbf16> to vector<256x4xbf16>
    %c5 = arith.constant 5 : index
    %c0_78 = arith.constant 0 : index
    %c0_79 = arith.constant 0 : index
    %58 = vector.load %arg2[%c5, %c0_78, %c0_79] : memref<9x4x4xbf16, #tpu.memory_space<vmem>>, vector<1x4x4xbf16>
    %59 = vector.shape_cast %58 : vector<1x4x4xbf16> to vector<4x4xbf16>
    %cst_80 = arith.constant dense<0.000000e+00> : vector<256x4xf32>
    %60 = tpu.matmul %57, %59, %cst_80 {dimension_numbers = #tpu.dot_dimension_numbers<[1], [0], [0], [1], [0, 0, 1, 1], [], []>} : vector<256x4xbf16>, vector<4x4xbf16>, vector<256x4xf32> -> vector<256x4xf32>
    %61 = arith.addf %55, %60 : vector<256x4xf32>
    %c2_81 = arith.constant 2 : index
    %c0_82 = arith.constant 0 : index
    %c0_83 = arith.constant 0 : index
    %62 = vector.load %arg9[%c2_81, %c0_82, %c0_83] : memref<18x18x4xbf16, #tpu.memory_space<vmem>>, vector<16x16x4xbf16>
    %63 = vector.shape_cast %62 : vector<16x16x4xbf16> to vector<256x4xbf16>
    %c6 = arith.constant 6 : index
    %c0_84 = arith.constant 0 : index
    %c0_85 = arith.constant 0 : index
    %64 = vector.load %arg2[%c6, %c0_84, %c0_85] : memref<9x4x4xbf16, #tpu.memory_space<vmem>>, vector<1x4x4xbf16>
    %65 = vector.shape_cast %64 : vector<1x4x4xbf16> to vector<4x4xbf16>
    %cst_86 = arith.constant dense<0.000000e+00> : vector<256x4xf32>
    %66 = tpu.matmul %63, %65, %cst_86 {dimension_numbers = #tpu.dot_dimension_numbers<[1], [0], [0], [1], [0, 0, 1, 1], [], []>} : vector<256x4xbf16>, vector<4x4xbf16>, vector<256x4xf32> -> vector<256x4xf32>
    %67 = arith.addf %61, %66 : vector<256x4xf32>
    %c2_87 = arith.constant 2 : index
    %c1_88 = arith.constant 1 : index
    %c0_89 = arith.constant 0 : index
    %68 = vector.load %arg9[%c2_87, %c1_88, %c0_89] : memref<18x18x4xbf16, #tpu.memory_space<vmem>>, vector<16x16x4xbf16>
    %69 = vector.shape_cast %68 : vector<16x16x4xbf16> to vector<256x4xbf16>
    %c7 = arith.constant 7 : index
    %c0_90 = arith.constant 0 : index
    %c0_91 = arith.constant 0 : index
    %70 = vector.load %arg2[%c7, %c0_90, %c0_91] : memref<9x4x4xbf16, #tpu.memory_space<vmem>>, vector<1x4x4xbf16>
    %71 = vector.shape_cast %70 : vector<1x4x4xbf16> to vector<4x4xbf16>
    %cst_92 = arith.constant dense<0.000000e+00> : vector<256x4xf32>
    %72 = tpu.matmul %69, %71, %cst_92 {dimension_numbers = #tpu.dot_dimension_numbers<[1], [0], [0], [1], [0, 0, 1, 1], [], []>} : vector<256x4xbf16>, vector<4x4xbf16>, vector<256x4xf32> -> vector<256x4xf32>
    %73 = arith.addf %67, %72 : vector<256x4xf32>
    %c2_93 = arith.constant 2 : index
    %c2_94 = arith.constant 2 : index
    %c0_95 = arith.constant 0 : index
    %74 = vector.load %arg9[%c2_93, %c2_94, %c0_95] : memref<18x18x4xbf16, #tpu.memory_space<vmem>>, vector<16x16x4xbf16>
    %75 = vector.shape_cast %74 : vector<16x16x4xbf16> to vector<256x4xbf16>
    %c8 = arith.constant 8 : index
    %c0_96 = arith.constant 0 : index
    %c0_97 = arith.constant 0 : index
    %76 = vector.load %arg2[%c8, %c0_96, %c0_97] : memref<9x4x4xbf16, #tpu.memory_space<vmem>>, vector<1x4x4xbf16>
    %77 = vector.shape_cast %76 : vector<1x4x4xbf16> to vector<4x4xbf16>
    %cst_98 = arith.constant dense<0.000000e+00> : vector<256x4xf32>
    %78 = tpu.matmul %75, %77, %cst_98 {dimension_numbers = #tpu.dot_dimension_numbers<[1], [0], [0], [1], [0, 0, 1, 1], [], []>} : vector<256x4xbf16>, vector<4x4xbf16>, vector<256x4xf32> -> vector<256x4xf32>
    %79 = arith.addf %73, %78 : vector<256x4xf32>
    %80 = vector.shape_cast %20 : vector<4xf32> to vector<1x4xf32>
    %81 = vector.broadcast %80 : vector<1x4xf32> to vector<256x4xf32>
    %82 = arith.mulf %79, %81 : vector<256x4xf32>
    %83 = vector.shape_cast %22 : vector<4xf32> to vector<1x4xf32>
    %84 = vector.broadcast %83 : vector<1x4xf32> to vector<256x4xf32>
    %85 = arith.addf %82, %84 : vector<256x4xf32>
    %cst_99 = arith.constant 0.000000e+00 : f32
    %86 = vector.broadcast %cst_99 : f32 to vector<256x4xf32>
    %87 = arith.maximumf %85, %86 : vector<256x4xf32>
    %88 = vector.shape_cast %87 : vector<256x4xf32> to vector<16x16x4xf32>
    %89 = arith.truncf %88 : vector<16x16x4xf32> to vector<16x16x4xbf16>
    %c1_100 = arith.constant 1 : index
    %c1_101 = arith.constant 1 : index
    %c0_102 = arith.constant 0 : index
    %90 = vector.load %arg10[%c1_100, %c1_101, %c0_102] : memref<18x18x4xbf16, #tpu.memory_space<vmem>>, vector<16x16x4xbf16>
    tpu.vector_store %arg10[%c1_100, %c1_101, %c0_102], %89 {strides = array<i32>} : memref<18x18x4xbf16, #tpu.memory_space<vmem>>, vector<16x16x4xbf16>,
    %c0_103 = arith.constant 0 : index
    %c0_104 = arith.constant 0 : index
    %c0_105 = arith.constant 0 : index
    %91 = vector.load %arg10[%c0_103, %c0_104, %c0_105] : memref<18x18x4xbf16, #tpu.memory_space<vmem>>, vector<16x16x4xbf16>
    %92 = vector.shape_cast %91 : vector<16x16x4xbf16> to vector<256x4xbf16>
    %c0_106 = arith.constant 0 : index
    %c0_107 = arith.constant 0 : index
    %c0_108 = arith.constant 0 : index
    %93 = vector.load %arg3[%c0_106, %c0_107, %c0_108] : memref<9x4x4xbf16, #tpu.memory_space<vmem>>, vector<1x4x4xbf16>
    %94 = vector.shape_cast %93 : vector<1x4x4xbf16> to vector<4x4xbf16>
    %cst_109 = arith.constant dense<0.000000e+00> : vector<256x4xf32>
    %95 = tpu.matmul %92, %94, %cst_109 {dimension_numbers = #tpu.dot_dimension_numbers<[1], [0], [0], [1], [0, 0, 1, 1], [], []>} : vector<256x4xbf16>, vector<4x4xbf16>, vector<256x4xf32> -> vector<256x4xf32>
    %c0_110 = arith.constant 0 : index
    %c1_111 = arith.constant 1 : index
    %c0_112 = arith.constant 0 : index
    %96 = vector.load %arg10[%c0_110, %c1_111, %c0_112] : memref<18x18x4xbf16, #tpu.memory_space<vmem>>, vector<16x16x4xbf16>
    %97 = vector.shape_cast %96 : vector<16x16x4xbf16> to vector<256x4xbf16>
    %c1_113 = arith.constant 1 : index
    %c0_114 = arith.constant 0 : index
    %c0_115 = arith.constant 0 : index
    %98 = vector.load %arg3[%c1_113, %c0_114, %c0_115] : memref<9x4x4xbf16, #tpu.memory_space<vmem>>, vector<1x4x4xbf16>
    %99 = vector.shape_cast %98 : vector<1x4x4xbf16> to vector<4x4xbf16>
    %cst_116 = arith.constant dense<0.000000e+00> : vector<256x4xf32>
    %100 = tpu.matmul %97, %99, %cst_116 {dimension_numbers = #tpu.dot_dimension_numbers<[1], [0], [0], [1], [0, 0, 1, 1], [], []>} : vector<256x4xbf16>, vector<4x4xbf16>, vector<256x4xf32> -> vector<256x4xf32>
    %101 = arith.addf %95, %100 : vector<256x4xf32>
    %c0_117 = arith.constant 0 : index
    %c2_118 = arith.constant 2 : index
    %c0_119 = arith.constant 0 : index
    %102 = vector.load %arg10[%c0_117, %c2_118, %c0_119] : memref<18x18x4xbf16, #tpu.memory_space<vmem>>, vector<16x16x4xbf16>
    %103 = vector.shape_cast %102 : vector<16x16x4xbf16> to vector<256x4xbf16>
    %c2_120 = arith.constant 2 : index
    %c0_121 = arith.constant 0 : index
    %c0_122 = arith.constant 0 : index
    %104 = vector.load %arg3[%c2_120, %c0_121, %c0_122] : memref<9x4x4xbf16, #tpu.memory_space<vmem>>, vector<1x4x4xbf16>
    %105 = vector.shape_cast %104 : vector<1x4x4xbf16> to vector<4x4xbf16>
    %cst_123 = arith.constant dense<0.000000e+00> : vector<256x4xf32>
    %106 = tpu.matmul %103, %105, %cst_123 {dimension_numbers = #tpu.dot_dimension_numbers<[1], [0], [0], [1], [0, 0, 1, 1], [], []>} : vector<256x4xbf16>, vector<4x4xbf16>, vector<256x4xf32> -> vector<256x4xf32>
    %107 = arith.addf %101, %106 : vector<256x4xf32>
    %c1_124 = arith.constant 1 : index
    %c0_125 = arith.constant 0 : index
    %c0_126 = arith.constant 0 : index
    %108 = vector.load %arg10[%c1_124, %c0_125, %c0_126] : memref<18x18x4xbf16, #tpu.memory_space<vmem>>, vector<16x16x4xbf16>
    %109 = vector.shape_cast %108 : vector<16x16x4xbf16> to vector<256x4xbf16>
    %c3_127 = arith.constant 3 : index
    %c0_128 = arith.constant 0 : index
    %c0_129 = arith.constant 0 : index
    %110 = vector.load %arg3[%c3_127, %c0_128, %c0_129] : memref<9x4x4xbf16, #tpu.memory_space<vmem>>, vector<1x4x4xbf16>
    %111 = vector.shape_cast %110 : vector<1x4x4xbf16> to vector<4x4xbf16>
    %cst_130 = arith.constant dense<0.000000e+00> : vector<256x4xf32>
    %112 = tpu.matmul %109, %111, %cst_130 {dimension_numbers = #tpu.dot_dimension_numbers<[1], [0], [0], [1], [0, 0, 1, 1], [], []>} : vector<256x4xbf16>, vector<4x4xbf16>, vector<256x4xf32> -> vector<256x4xf32>
    %113 = arith.addf %107, %112 : vector<256x4xf32>
    %c1_131 = arith.constant 1 : index
    %c1_132 = arith.constant 1 : index
    %c0_133 = arith.constant 0 : index
    %114 = vector.load %arg10[%c1_131, %c1_132, %c0_133] : memref<18x18x4xbf16, #tpu.memory_space<vmem>>, vector<16x16x4xbf16>
    %115 = vector.shape_cast %114 : vector<16x16x4xbf16> to vector<256x4xbf16>
    %c4_134 = arith.constant 4 : index
    %c0_135 = arith.constant 0 : index
    %c0_136 = arith.constant 0 : index
    %116 = vector.load %arg3[%c4_134, %c0_135, %c0_136] : memref<9x4x4xbf16, #tpu.memory_space<vmem>>, vector<1x4x4xbf16>
    %117 = vector.shape_cast %116 : vector<1x4x4xbf16> to vector<4x4xbf16>
    %cst_137 = arith.constant dense<0.000000e+00> : vector<256x4xf32>
    %118 = tpu.matmul %115, %117, %cst_137 {dimension_numbers = #tpu.dot_dimension_numbers<[1], [0], [0], [1], [0, 0, 1, 1], [], []>} : vector<256x4xbf16>, vector<4x4xbf16>, vector<256x4xf32> -> vector<256x4xf32>
    %119 = arith.addf %113, %118 : vector<256x4xf32>
    %c1_138 = arith.constant 1 : index
    %c2_139 = arith.constant 2 : index
    %c0_140 = arith.constant 0 : index
    %120 = vector.load %arg10[%c1_138, %c2_139, %c0_140] : memref<18x18x4xbf16, #tpu.memory_space<vmem>>, vector<16x16x4xbf16>
    %121 = vector.shape_cast %120 : vector<16x16x4xbf16> to vector<256x4xbf16>
    %c5_141 = arith.constant 5 : index
    %c0_142 = arith.constant 0 : index
    %c0_143 = arith.constant 0 : index
    %122 = vector.load %arg3[%c5_141, %c0_142, %c0_143] : memref<9x4x4xbf16, #tpu.memory_space<vmem>>, vector<1x4x4xbf16>
    %123 = vector.shape_cast %122 : vector<1x4x4xbf16> to vector<4x4xbf16>
    %cst_144 = arith.constant dense<0.000000e+00> : vector<256x4xf32>
    %124 = tpu.matmul %121, %123, %cst_144 {dimension_numbers = #tpu.dot_dimension_numbers<[1], [0], [0], [1], [0, 0, 1, 1], [], []>} : vector<256x4xbf16>, vector<4x4xbf16>, vector<256x4xf32> -> vector<256x4xf32>
    %125 = arith.addf %119, %124 : vector<256x4xf32>
    %c2_145 = arith.constant 2 : index
    %c0_146 = arith.constant 0 : index
    %c0_147 = arith.constant 0 : index
    %126 = vector.load %arg10[%c2_145, %c0_146, %c0_147] : memref<18x18x4xbf16, #tpu.memory_space<vmem>>, vector<16x16x4xbf16>
    %127 = vector.shape_cast %126 : vector<16x16x4xbf16> to vector<256x4xbf16>
    %c6_148 = arith.constant 6 : index
    %c0_149 = arith.constant 0 : index
    %c0_150 = arith.constant 0 : index
    %128 = vector.load %arg3[%c6_148, %c0_149, %c0_150] : memref<9x4x4xbf16, #tpu.memory_space<vmem>>, vector<1x4x4xbf16>
    %129 = vector.shape_cast %128 : vector<1x4x4xbf16> to vector<4x4xbf16>
    %cst_151 = arith.constant dense<0.000000e+00> : vector<256x4xf32>
    %130 = tpu.matmul %127, %129, %cst_151 {dimension_numbers = #tpu.dot_dimension_numbers<[1], [0], [0], [1], [0, 0, 1, 1], [], []>} : vector<256x4xbf16>, vector<4x4xbf16>, vector<256x4xf32> -> vector<256x4xf32>
    %131 = arith.addf %125, %130 : vector<256x4xf32>
    %c2_152 = arith.constant 2 : index
    %c1_153 = arith.constant 1 : index
    %c0_154 = arith.constant 0 : index
    %132 = vector.load %arg10[%c2_152, %c1_153, %c0_154] : memref<18x18x4xbf16, #tpu.memory_space<vmem>>, vector<16x16x4xbf16>
    %133 = vector.shape_cast %132 : vector<16x16x4xbf16> to vector<256x4xbf16>
    %c7_155 = arith.constant 7 : index
    %c0_156 = arith.constant 0 : index
    %c0_157 = arith.constant 0 : index
    %134 = vector.load %arg3[%c7_155, %c0_156, %c0_157] : memref<9x4x4xbf16, #tpu.memory_space<vmem>>, vector<1x4x4xbf16>
    %135 = vector.shape_cast %134 : vector<1x4x4xbf16> to vector<4x4xbf16>
    %cst_158 = arith.constant dense<0.000000e+00> : vector<256x4xf32>
    %136 = tpu.matmul %133, %135, %cst_158 {dimension_numbers = #tpu.dot_dimension_numbers<[1], [0], [0], [1], [0, 0, 1, 1], [], []>} : vector<256x4xbf16>, vector<4x4xbf16>, vector<256x4xf32> -> vector<256x4xf32>
    %137 = arith.addf %131, %136 : vector<256x4xf32>
    %c2_159 = arith.constant 2 : index
    %c2_160 = arith.constant 2 : index
    %c0_161 = arith.constant 0 : index
    %138 = vector.load %arg10[%c2_159, %c2_160, %c0_161] : memref<18x18x4xbf16, #tpu.memory_space<vmem>>, vector<16x16x4xbf16>
    %139 = vector.shape_cast %138 : vector<16x16x4xbf16> to vector<256x4xbf16>
    %c8_162 = arith.constant 8 : index
    %c0_163 = arith.constant 0 : index
    %c0_164 = arith.constant 0 : index
    %140 = vector.load %arg3[%c8_162, %c0_163, %c0_164] : memref<9x4x4xbf16, #tpu.memory_space<vmem>>, vector<1x4x4xbf16>
    %141 = vector.shape_cast %140 : vector<1x4x4xbf16> to vector<4x4xbf16>
    %cst_165 = arith.constant dense<0.000000e+00> : vector<256x4xf32>
    %142 = tpu.matmul %139, %141, %cst_165 {dimension_numbers = #tpu.dot_dimension_numbers<[1], [0], [0], [1], [0, 0, 1, 1], [], []>} : vector<256x4xbf16>, vector<4x4xbf16>, vector<256x4xf32> -> vector<256x4xf32>
    %143 = arith.addf %137, %142 : vector<256x4xf32>
    %c0_166 = arith.constant 0 : index
    %c0_167 = arith.constant 0 : index
    %c0_168 = arith.constant 0 : index
    %c0_169 = arith.constant 0 : index
    %144 = vector.load %arg1[%c0_166, %c0_167, %c0_168, %c0_169] : memref<1x16x16x4xbf16, #tpu.memory_space<vmem>>, vector<1x16x16x4xbf16>
    %145 = vector.shape_cast %144 : vector<1x16x16x4xbf16> to vector<16x16x4xbf16>
    %146 = arith.extf %145 : vector<16x16x4xbf16> to vector<16x16x4xf32>
    %147 = vector.shape_cast %146 : vector<16x16x4xf32> to vector<256x4xf32>
    %148 = vector.shape_cast %24 : vector<4xf32> to vector<1x4xf32>
    %149 = vector.broadcast %148 : vector<1x4xf32> to vector<256x4xf32>
    %150 = arith.mulf %143, %149 : vector<256x4xf32>
    %151 = vector.shape_cast %26 : vector<4xf32> to vector<1x4xf32>
    %152 = vector.broadcast %151 : vector<1x4xf32> to vector<256x4xf32>
    %153 = arith.addf %150, %152 : vector<256x4xf32>
    %154 = arith.addf %153, %147 : vector<256x4xf32>
    %cst_170 = arith.constant 0.000000e+00 : f32
    %155 = vector.broadcast %cst_170 : f32 to vector<256x4xf32>
    %156 = arith.maximumf %154, %155 : vector<256x4xf32>
    %157 = vector.shape_cast %156 : vector<256x4xf32> to vector<16x16x4xf32>
    %158 = arith.truncf %157 : vector<16x16x4xf32> to vector<16x16x4xbf16>
    %c0_171 = arith.constant 0 : index
    %c0_172 = arith.constant 0 : index
    %c0_173 = arith.constant 0 : index
    %c0_174 = arith.constant 0 : index
    %159 = vector.load %arg8[%c0_171, %c0_172, %c0_173, %c0_174] : memref<1x16x16x4xbf16, #tpu.memory_space<vmem>>, vector<1x16x16x4xbf16>
    %160 = vector.shape_cast %159 : vector<1x16x16x4xbf16> to vector<16x16x4xbf16>
    %161 = vector.shape_cast %158 : vector<16x16x4xbf16> to vector<1x16x16x4xbf16>
    tpu.vector_store %arg8[%c0_171, %c0_172, %c0_173, %c0_174], %161 {strides = array<i32>} : memref<1x16x16x4xbf16, #tpu.memory_space<vmem>>, vector<1x16x16x4xbf16>,
    return
  }
  func.func @transform_0(%arg0: i32) -> (i32, i32, i32, i32) {
    %c0_i32 = arith.constant 0 : i32
    %c0_i32_0 = arith.constant 0 : i32
    %c0_i32_1 = arith.constant 0 : i32
    %c0_i32_2 = arith.constant 0 : i32
    return %arg0, %c0_i32, %c0_i32_0, %c0_i32_1 : i32, i32, i32, i32
  }
  func.func @transform_1(%arg0: i32) -> (i32, i32, i32) {
    %c0_i32 = arith.constant 0 : i32
    %c0_i32_0 = arith.constant 0 : i32
    %c0_i32_1 = arith.constant 0 : i32
    %c0_i32_2 = arith.constant 0 : i32
    return %c0_i32, %c0_i32_0, %c0_i32_1 : i32, i32, i32
  }
  func.func @transform_2(%arg0: i32) -> (i32, i32, i32) {
    %c0_i32 = arith.constant 0 : i32
    %c0_i32_0 = arith.constant 0 : i32
    %c0_i32_1 = arith.constant 0 : i32
    %c0_i32_2 = arith.constant 0 : i32
    return %c0_i32, %c0_i32_0, %c0_i32_1 : i32, i32, i32
  }
  func.func @transform_3(%arg0: i32) -> (i32, i32) {
    %c0_i32 = arith.constant 0 : i32
    %c0_i32_0 = arith.constant 0 : i32
    %c0_i32_1 = arith.constant 0 : i32
    return %c0_i32, %c0_i32_0 : i32, i32
  }
  func.func @transform_4(%arg0: i32) -> (i32, i32) {
    %c0_i32 = arith.constant 0 : i32
    %c0_i32_0 = arith.constant 0 : i32
    %c0_i32_1 = arith.constant 0 : i32
    return %c0_i32, %c0_i32_0 : i32, i32
  }
  func.func @transform_5(%arg0: i32) -> (i32, i32) {
    %c0_i32 = arith.constant 0 : i32
    %c0_i32_0 = arith.constant 0 : i32
    %c0_i32_1 = arith.constant 0 : i32
    return %c0_i32, %c0_i32_0 : i32, i32
  }
  func.func @transform_6(%arg0: i32) -> (i32, i32) {
    %c0_i32 = arith.constant 0 : i32
    %c0_i32_0 = arith.constant 0 : i32
    %c0_i32_1 = arith.constant 0 : i32
    return %c0_i32, %c0_i32_0 : i32, i32
  }
  func.func @transform_7(%arg0: i32) -> (i32, i32, i32, i32) {
    %c0_i32 = arith.constant 0 : i32
    %c0_i32_0 = arith.constant 0 : i32
    %c0_i32_1 = arith.constant 0 : i32
    %c0_i32_2 = arith.constant 0 : i32
    return %arg0, %c0_i32, %c0_i32_0, %c0_i32_1 : i32, i32, i32, i32
  }
}

</mosaic_0001>

<bundles_post_ra>
// kernel: tpu_custom_call.1
= control target key start
LH: loop header
LB: loop body
LE: loop exit
PB: predicated region body
PF: predicated region fallthrough
CT: control target
= control target key end

     0   :  { %s13156_s24 = smov 0   ;;  %s18547_s0 = inlined_call_operand.vmem [shape: bf16[2,16,16,4], index: 0, kind: input, shape index: {}]   ;;  %s18548_s1 = inlined_call_operand.vmem [shape: bf16[9,4,4], index: 1, kind: input, shape index: {}]   ;;  %s18549_s2 = inlined_call_operand.vmem [shape: bf16[9,4,4], index: 2, kind: input, shape index: {}]   ;;  %s18550_s3 = inlined_call_operand.vmem [shape: f32[1,4], index: 3, kind: input, shape index: {}]   ;;  %s18551_s4 = inlined_call_operand.vmem [shape: f32[1,4], index: 4, kind: input, shape index: {}]   ;;  %s18552_s5 = inlined_call_operand.vmem [shape: f32[1,4], index: 5, kind: input, shape index: {}]   ;;  %s18553_s6 = inlined_call_operand.vmem [shape: f32[1,4], index: 6, kind: input, shape index: {}]   ;;  %s18554_s7 = inlined_call_operand.vmem [shape: bf16[2,16,16,4], index: 7, kind: output, shape index: {}]  }
   0x1 LB: > { %s11130_s25 = sadd.s32 4294967295, %s13113_s24   ;;  %p11134_p0 = scmp.ge.s32.totalorder %s13113_s24, 1  ;;  %s13113_s24 = sphi %s13156_s24, %s17_s24  }
   0x2   : > { %p237_p1 = scmp.lt.s32.totalorder %s13113_s24, 3 }
   0x4   : > { %p238_p2 = pnand %p11134_p0, %p237_p1 }
   0x6   : > { %241 = sbr.rel (%p238_p2) target bundleno = 1225 (0x4c9), region = 48 }
   0xb   : > { %v11139_v0 = vld [vmem:[%s18548_s1 + $0x2] sm:$0x3]  ;;  %vm1502_vm0 = vcmask 1041408   ;;  %v999_v1 = vld [vmem:[%s18548_s1] sm:$0x3]  ;;  %vm280_vm1 = vcmask 27648  }
   0xc   : > { %12960 = vmatprep.subr.msk.bf16.mxu0 %vm1502_vm0, %v11139_v0  ;;  %v1504_v2 = vsel %vm1502_vm0, %v11139_v0, 0  ;;  %12961 = vmatprep.subr.msk.bf16.mxu1 %vm1502_vm0, %v999_v1  ;;  %v1796_v3 = vsel %vm1502_vm0, %v999_v1, 0  ;;  %vm283_vm2 = vcmask 24576   ;;  %v13177_v4 = vld [vmem:[%s18548_s1 + $0x4] sm:$0x3]  ;;  %v13115_v5 = vmov 0  }
   0xd   : > { %12349 = vmatpush3.bf16.msra.mxu0 %v1504_v2  ;;  %12383 = vmatpush3.bf16.msra.mxu1 %v1796_v3  ;;  %281 = vst.msk [vmem:[#allocation2] sm:$0xf] %vm280_vm1, %v13115_v5  ;;  %282 = vst.msk [vmem:[#allocation2 + $0x4] sm:$0xf] %vm280_vm1, %v13115_v5  ;;  %vm291_vm3 = vsmask.f32 256 }
   0xe   : > { %284 = vst.msk [vmem:[#allocation2 + $0x8] sm:$0x1] %vm283_vm2, %v13115_v5  ;;  %vm341_vm4 = vsmask.f32 7938  ;;  %288 = vst.msk [vmem:[#allocation2 + $0xd4] sm:$0x1] %vm283_vm2, %v13115_v5  ;;  %12962 = vmatprep.subr.msk.bf16.mxu0 %vm1502_vm0, %v13177_v4 }
   0xf   : > { %286 = vst.msk [vmem:[#allocation2 + $0xcc] sm:$0xf] %vm280_vm1, %v13115_v5  ;;  %287 = vst.msk [vmem:[#allocation2 + $0xd0] sm:$0xf] %vm280_vm1, %v13115_v5  ;;  %v18590_v6 = vmov 0  ;;  %p269_p3 = scmp.lt.s32.totalorder %s11130_s25, 1 }
  0x10   : > { %391 = vst.msk [vmem:[#allocation3] sm:$0xf] %vm280_vm1, %v13115_v5  ;;  %392 = vst.msk [vmem:[#allocation3 + $0x4] sm:$0xf] %vm280_vm1, %v13115_v5  ;;  %v293_v7 = vld [vmem:[#allocation2 + $0xc] sm:$0x1] }
  0x11   : > { %393 = vst.msk [vmem:[#allocation3 + $0x8] sm:$0x1] %vm283_vm2, %v13115_v5  ;;  %397 = vst.msk [vmem:[#allocation3 + $0xd4] sm:$0x1] %vm283_vm2, %v13115_v5  ;;  %v18593_v8 = vmov 0  ;;  %s19015_s25 = smov (!%p269_p3, %s11130_s25), 1 }
  0x12   : > { %395 = vst.msk [vmem:[#allocation3 + $0xcc] sm:$0xf] %vm280_vm1, %v13115_v5  ;;  %396 = vst.msk [vmem:[#allocation3 + $0xd0] sm:$0xf] %vm280_vm1, %v13115_v5  ;;  %vm1016_vm7 = vsmask.f32 3328 }
  0x13   : > { %vm13193_vm5 = vmand %vm283_vm2, %vm291_vm3  ;;  %v343_v10 = vld [vmem:[#allocation2 + $0x14] sm:$0x1]  ;;  %v296_v12 = vld [vmem:[#allocation2 + $0x18] sm:$0x1]  ;;  %s11897_s9 = sshll.u32 %s19015_s25, 7  ;;  %vm1453_vm9 = vcmask 31744  }
  0x14   : > { %v18591_v6 = vsel %vm13193_vm5, 4294967295, %v18590_v6  ;;  %vm13203_vm6 = vmand %vm283_vm2, %vm341_vm4  ;;  %v294_v9 = vsel %vm13193_vm5, 0, %v293_v7  ;;  %v346_v13 = vld [vmem:[#allocation2 + $0x20] sm:$0x1]  ;;  %v297_v14 = vsel %vm13193_vm5, 0, %v296_v12  ;;  %s13229_s12 = scalar_lea.vmem %s18547_s0, %s11897_s9  ;;  %v18596_v47 = vmov 0  ;;  %s18287_s27 = scalar_lea.vmem %s18554_s7, %s11897_s9 }
  0x15   : > { %18592 = vst [vmem:[#allocation4_spill] sm:$0xff] %v18591_v6  ;;  %v18594_v8 = vsel %vm13203_vm6, 4294967295, %v18593_v8  ;;  %295 = vst [vmem:[#allocation2 + $0xc] sm:$0x1] %v294_v9  ;;  %v344_v11 = vsel %vm13203_vm6, 0, %v343_v10  ;;  %v347_v15 = vsel %vm13203_vm6, 0, %v346_v13 }
  0x16   : > { %18595 = vst [vmem:[#allocation5_spill] sm:$0xff] %v18594_v8  ;;  %345 = vst [vmem:[#allocation2 + $0x14] sm:$0x1] %v344_v11  ;;  %v299_v16 = vld [vmem:[#allocation2 + $0x24] sm:$0x1]  ;;  %v18599_v51 = vmov 0 }
  0x17   : > { %v349_v17 = vld [vmem:[#allocation2 + $0x2c] sm:$0x1]  ;;  %298 = vst [vmem:[#allocation2 + $0x18] sm:$0x1] %v297_v14  ;;  %348 = vst [vmem:[#allocation2 + $0x20] sm:$0x1] %v347_v15 }
  0x18   : > { %v300_v18 = vsel %vm13193_vm5, 0, %v299_v16  ;;  %v350_v19 = vsel %vm13203_vm6, 0, %v349_v17  ;;  %v302_v20 = vld [vmem:[#allocation2 + $0x30] sm:$0x1]  ;;  %vm1017_vm8 = vsmask.f32 7440  ;;  %vm13238_vm11 = vmand %vm280_vm1, %vm341_vm4 }
  0x19   : > { %vm527_vm10 = vsmask.f32 4368  ;;  %301 = vst [vmem:[#allocation2 + $0x24] sm:$0x1] %v300_v18  ;;  %351 = vst [vmem:[#allocation2 + $0x2c] sm:$0x1] %v350_v19 }
  0x1a   : > { %v303_v21 = vsel %vm13193_vm5, 0, %v302_v20  ;;  %v967_v22 = vld [vmem:[#allocation2] sm:$0xf]  ;;  %v968_v23 = vld [vmem:[#allocation2 + $0x4] sm:$0xf]  ;;  %v18597_v47 = vsel %vm13238_vm11, 4294967295, %v18596_v47  ;;  %vm13248_vm12 = vmor %vm1016_vm7, %vm1017_vm8 }
  0x1b   : > { %v1000_v24 = vld [vmem:[#allocation2 + $0x8] sm:$0x1]  ;;  %304 = vst [vmem:[#allocation2 + $0x30] sm:$0x1] %v303_v21  ;;  %v1020_v25 = vshrl.u32 %v967_v22, 16  ;;  %v1023_v26 = vshll.u32 %v967_v22, 16  ;;  %v11172_v31 = vcombine.low %v967_v22, %v968_v23  ;;  %vm13254_vm13 = vmor %vm291_vm3, %vm527_vm10 }
  0x1c   : > { %v1029_v27 = vshll.u32 %v968_v23, 16  ;;  %v1033_v28 = vshrl.u32 %v968_v23, 16  ;;  %v495_v29 = vld [vmem:[%s13229_s12] sm:$0xf]  ;;  %v1039_v30 = vshll.u32 %v1000_v24, 16  ;;  %18598 = vst [vmem:[#allocation6_spill] sm:$0xff] %v18597_v47 }
  0x1d   : > { %v496_v32 = vld [vmem:[%s13229_s12 + $0x4] sm:$0xf]  ;;  %v530_v33 = vshrl.u32 %v495_v29, 16  ;;  %v352_v34 = vld [vmem:[#allocation2 + $0x38] sm:$0x1]  ;;  %v1022_v35 = vrot.slane %v1020_v25, 4  ;;  %12384 = vmatprep.mubr.msk.bf16.mxu1 %vm1453_vm9, %v11172_v31 }
  0x1e   : > { %v1025_v36 = vrot.slane %v1023_v26, 5  ;;  %v1031_v37 = vrot.slane %v1029_v27, 5  ;;  %v1035_v38 = vrot.slane %v1033_v28, 4  ;;  %v1041_v39 = vrot.slane %v1039_v30, 5  ;;  %v851_v43 = vld [vmem:[#allocation2 + $0xc] sm:$0xf] }
  0x1f   : > { %v532_v40 = vrot.slane %v530_v33, 7  ;;  %v533_v41 = vshll.u32 %v495_v29, 16  ;;  %v538_v42 = vshrl.u32 %v496_v32, 16  ;;  %v541_v46 = vshll.u32 %v496_v32, 16  ;;  %v497_v48 = vld [vmem:[%s13229_s12 + $0x8] sm:$0xf] }
  0x20   : > { %v1026_v44 = vor.u32 %v1025_v36, %v1022_v35  ;;  %v1036_v45 = vor.u32 %v1035_v38, %v1031_v37  ;;  %v498_v49 = vld [vmem:[%s13229_s12 + $0xc] sm:$0xf]  ;;  %v353_v50 = vsel %vm13203_vm6, 0, %v352_v34  ;;  %v18600_v51 = vsel %vm13248_vm12, 4294967295, %v18599_v51  ;;  %v855_v59 = vld [vmem:[#allocation2 + $0x14] sm:$0x1] }
  0x21   : > { %18601 = vst [vmem:[#allocation7_spill] sm:$0xff] %v18600_v51  ;;  %v535_v52 = vor.u32 %v533_v41, %v532_v40  ;;  %v536_v53 = vrot.slane %v532_v40, 4  ;;  %v540_v54 = vrot.slane %v538_v42, 7  ;;  %v547_v55 = vshrl.u32 %v497_v48, 16  ;;  %354 = vst [vmem:[#allocation2 + $0x38] sm:$0x1] %v353_v50 }
  0x22   : > { %v1027_v56 = vrot.slane %v1026_v44, 4  ;;  %v1037_v57 = vrot.slane %v1036_v45, 4  ;;  %v18602_v58 = vmov 0  ;;  %v550_v60 = vshll.u32 %v497_v48, 16  ;;  %v499_v2 = vld [vmem:[%s13229_s12 + $0x10] sm:$0xf] }
  0x23   : > { %v18603_v58 = vsel %vm13254_vm13, 4294967295, %v18602_v58  ;;  %v555_v61 = vshrl.u32 %v498_v49, 16  ;;  %v543_v62 = vor.u32 %v541_v46, %v540_v54  ;;  %v545_v63 = vrot.slane %v540_v54, 4  ;;  %v858_v10 = vld [vmem:[#allocation2 + $0x18] sm:$0xf] }
  0x24   : > { %18604 = vst [vmem:[#allocation8_spill] sm:$0xff] %v18603_v58  ;;  %v852_v0 = vsel %vm13238_vm11, %v535_v52, %v851_v43  ;;  %v549_v1 = vrot.slane %v547_v55, 7  ;;  %v1032_v3 = vsel %vm13248_vm12, %v1027_v56, %v1031_v37  ;;  %v1042_v5 = vsel %vm13248_vm12, %v1037_v57, %v1041_v39  ;;  %v500_v11 = vld [vmem:[%s13229_s12 + $0x14] sm:$0xf]  ;;  %v862_v16 = vld [vmem:[#allocation2 + $0x20] sm:$0x1] }
  0x25   : > { %853 = vst [vmem:[#allocation2 + $0xc] sm:$0xf] %v852_v0  ;;  %v557_v7 = vrot.slane %v555_v61, 7  ;;  %v558_v9 = vshll.u32 %v498_v49, 16  ;;  %v11140_v12 = vcombine.low %v1032_v3, %v1042_v5  ;;  %v544_v13 = vsel %vm13254_vm13, %v536_v53, %v543_v62  ;;  %v501_v17 = vld [vmem:[%s13229_s12 + $0x18] sm:$0xf] }
  0x26   : > { %v856_v14 = vsel %vm13193_vm5, %v545_v63, %v855_v59  ;;  %v552_v15 = vor.u32 %v550_v60, %v549_v1  ;;  %854 = vst.msk [vmem:[#allocation2 + $0x10] sm:$0xf] %vm280_vm1, %v544_v13  ;;  %v553_v18 = vrot.slane %v549_v1, 4  ;;  %v564_v21 = vshrl.u32 %v499_v2, 16  ;;  %v502_v22 = vld [vmem:[%s13229_s12 + $0x1c] sm:$0xf] }
  0x27   : > { %857 = vst [vmem:[#allocation2 + $0x14] sm:$0x1] %v856_v14  ;;  %v560_v19 = vor.u32 %v558_v9, %v557_v7  ;;  %v562_v20 = vrot.slane %v557_v7, 4  ;;  %12350 = vmatprep.mubr.msk.bf16.mxu0 %vm1453_vm9, %v11140_v12  ;;  %v567_v24 = vshll.u32 %v499_v2, 16  ;;  %v572_v25 = vshrl.u32 %v500_v11, 16 }
  0x28   : > { %v859_v23 = vsel %vm13238_vm11, %v552_v15, %v858_v10  ;;  %v575_v26 = vshll.u32 %v500_v11, 16  ;;  %v305_v27 = vld [vmem:[#allocation2 + $0x3c] sm:$0x1]  ;;  %v566_v30 = vrot.slane %v564_v21, 7  ;;  %v581_v31 = vshrl.u32 %v501_v17, 16 }
  0x29   : > { %v561_v28 = vsel %vm13254_vm13, %v553_v18, %v560_v19  ;;  %860 = vst [vmem:[#allocation2 + $0x18] sm:$0xf] %v859_v23  ;;  %v863_v29 = vsel %vm13193_vm5, %v562_v20, %v862_v16  ;;  %v355_v32 = vld [vmem:[#allocation2 + $0x44] sm:$0x1]  ;;  %v574_v33 = vrot.slane %v572_v25, 7  ;;  %v584_v35 = vshll.u32 %v501_v17, 16 }
  0x2a   : > { %861 = vst.msk [vmem:[#allocation2 + $0x1c] sm:$0xf] %vm280_vm1, %v561_v28  ;;  %864 = vst [vmem:[#allocation2 + $0x20] sm:$0x1] %v863_v29  ;;  %v865_v34 = vld [vmem:[#allocation2 + $0x24] sm:$0xf]  ;;  %v569_v38 = vor.u32 %v567_v24, %v566_v30 }
  0x2b   : > { %v589_v36 = vshrl.u32 %v502_v22, 16  ;;  %v592_v37 = vshll.u32 %v502_v22, 16  ;;  %v570_v39 = vrot.slane %v566_v30, 4  ;;  %v869_v40 = vld [vmem:[#allocation2 + $0x2c] sm:$0x1]  ;;  %v583_v41 = vrot.slane %v581_v31, 7 }
  0x2c   : > { %v306_v42 = vsel %vm13193_vm5, 0, %v305_v27  ;;  %v969_v43 = vld [vmem:[#allocation2 + $0xc] sm:$0xf]  ;;  %v577_v44 = vor.u32 %v575_v26, %v574_v33  ;;  %v579_v45 = vrot.slane %v574_v33, 4  ;;  %v356_v48 = vsel %vm13203_vm6, 0, %v355_v32 }
  0x2d   : > { %v13283_v46 = vrot.slane %v589_v36, 7  ;;  %307 = vst [vmem:[#allocation2 + $0x3c] sm:$0x1] %v306_v42  ;;  %v1044_v49 = vshrl.u32 %v969_v43, 16  ;;  %v1047_v50 = vshll.u32 %v969_v43, 16  ;;  %v866_v52 = vsel %vm13238_vm11, %v569_v38, %v865_v34 }
  0x2e   : > { %357 = vst [vmem:[#allocation2 + $0x44] sm:$0x1] %v356_v48  ;;  %v13289_v53 = vld [vmem:[#allocation2 + $0x10] sm:$0xf]  ;;  %v13291_v54 = vld [vmem:[#allocation2 + $0x14] sm:$0x1]  ;;  %v578_v55 = vsel %vm13254_vm13, %v570_v39, %v577_v44  ;;  %v870_v56 = vsel %vm13193_vm5, %v579_v45, %v869_v40  ;;  %v586_v5 = vor.u32 %v584_v35, %v583_v41 }
  0x2f   : > { %867 = vst [vmem:[#allocation2 + $0x24] sm:$0xf] %v866_v52  ;;  %v587_v57 = vrot.slane %v583_v41, 4  ;;  %v594_v59 = vor.u32 %v592_v37, %v13283_v46  ;;  %v1046_v60 = vrot.slane %v1044_v49, 4  ;;  %v1049_v61 = vrot.slane %v1047_v50, 5 }
  0x30   : > { %v1053_v62 = vshll.u32 %v13289_v53, 16  ;;  %v1057_v63 = vshrl.u32 %v13289_v53, 16  ;;  %868 = vst.msk [vmem:[#allocation2 + $0x28] sm:$0xf] %vm280_vm1, %v578_v55  ;;  %871 = vst [vmem:[#allocation2 + $0x2c] sm:$0x1] %v870_v56  ;;  %v11173_v1 = vcombine.low %v969_v43, %v13289_v53 }
  0x31   : > { %v1063_v0 = vshll.u32 %v13291_v54, 16  ;;  %v2221_v2 = vsel %vm1502_vm0, %v13177_v4, 0  ;;  %v971_v3 = vld [vmem:[#allocation2 + $0x18] sm:$0xf]  ;;  %v1050_v7 = vor.u32 %v1049_v61, %v1046_v60  ;;  %v972_v11 = vld [vmem:[#allocation2 + $0x1c] sm:$0xf]  ;;  %v595_v13 = vsel %vm13254_vm13, %v587_v57, %v594_v59 }
  0x32   : > { %v1055_v9 = vrot.slane %v1053_v62, 5  ;;  %v1059_v10 = vrot.slane %v1057_v63, 4  ;;  %v1002_v12 = vld [vmem:[#allocation2 + $0x20] sm:$0x1]  ;;  %12385 = vmatmul.mubr.msk.bf16.vlgmr.msra.gmra.mxu1 %vm1453_vm9, %v11173_v1  ;;  %v1068_v15 = vshrl.u32 %v971_v3, 16  ;;  %v1071_v16 = vshll.u32 %v971_v3, 16 }
  0x33   : > { %v1065_v14 = vrot.slane %v1063_v0, 5  ;;  %v1077_v17 = vshll.u32 %v972_v11, 16  ;;  %875 = vst.msk [vmem:[#allocation2 + $0x34] sm:$0xf] %vm280_vm1, %v595_v13  ;;  %v1051_v18 = vrot.slane %v1050_v7, 4  ;;  %v1081_v19 = vshrl.u32 %v972_v11, 16 }
  0x34   : > { %v1060_v4 = vor.u32 %v1059_v10, %v1055_v9  ;;  %v1087_v20 = vshll.u32 %v1002_v12, 16  ;;  %v872_v21 = vld [vmem:[#allocation2 + $0x30] sm:$0xf]  ;;  %v1070_v22 = vrot.slane %v1068_v15, 4  ;;  %v1073_v23 = vrot.slane %v1071_v16, 5 }
  0x35   : > { %v1079_v24 = vrot.slane %v1077_v17, 5  ;;  %v11174_v25 = vcombine.low %v971_v3, %v972_v11  ;;  %v1056_v26 = vsel %vm13248_vm12, %v1051_v18, %v1055_v9  ;;  %v1083_v28 = vrot.slane %v1081_v19, 4  ;;  %v876_v45 = vld [vmem:[#allocation2 + $0x38] sm:$0x1]  ;;  %v503_v61 = vld [vmem:[%s13229_s12 + $0x20] sm:$0xf] }
  0x36   : > { %v1061_v27 = vrot.slane %v1060_v4, 4  ;;  %v1089_v29 = vrot.slane %v1087_v20, 5  ;;  %v973_v30 = vld [vmem:[#allocation2 + $0x24] sm:$0xf]  ;;  %v1074_v31 = vor.u32 %v1073_v23, %v1070_v22  ;;  %v873_v36 = vsel %vm13238_vm11, %v586_v5, %v872_v21  ;;  %v308_v11 = vld [vmem:[#allocation2 + $0x48] sm:$0x1] }
  0x37   : > { %12388 = vmatprep.mubr.msk.bf16.mxu1 %vm1453_vm9, %v11174_v25  ;;  %v974_v32 = vld [vmem:[#allocation2 + $0x28] sm:$0xf]  ;;  %v1003_v33 = vld [vmem:[#allocation2 + $0x2c] sm:$0x1]  ;;  %v1092_v34 = vshrl.u32 %v973_v30, 16  ;;  %v1095_v35 = vshll.u32 %v973_v30, 16  ;;  %v1084_v38 = vor.u32 %v1083_v28, %v1079_v24 }
  0x38   : > { %v1066_v37 = vsel %vm13248_vm12, %v1061_v27, %v1065_v14  ;;  %v1101_v39 = vshll.u32 %v974_v32, 16  ;;  %v1105_v40 = vshrl.u32 %v974_v32, 16  ;;  %874 = vst [vmem:[#allocation2 + $0x30] sm:$0xf] %v873_v36  ;;  %v1075_v42 = vrot.slane %v1074_v31, 4 }
  0x39   : > { %v11141_v41 = vcombine.low %v1056_v26, %v1066_v37  ;;  %v1094_v43 = vrot.slane %v1092_v34, 4  ;;  %v1097_v44 = vrot.slane %v1095_v35, 5  ;;  %v1085_v48 = vrot.slane %v1084_v38, 4  ;;  %v504_v3 = vld [vmem:[%s13229_s12 + $0x24] sm:$0xf] }
  0x3a   : > { %v1103_v49 = vrot.slane %v1101_v39, 5  ;;  %v1107_v50 = vrot.slane %v1105_v40, 4  ;;  %v1111_v52 = vshll.u32 %v1003_v33, 16  ;;  %v976_v55 = vld [vmem:[#allocation2 + $0x34] sm:$0xf]  ;;  %v1080_v56 = vsel %vm13248_vm12, %v1075_v42, %v1079_v24 }
  0x3b   : > { %12351 = vmatmul.mubr.msk.bf16.vlgmr.msra.gmra.mxu0 %vm1453_vm9, %v11141_v41  ;;  %v1098_v57 = vor.u32 %v1097_v44, %v1094_v43  ;;  %v11175_v59 = vcombine.low %v973_v30, %v974_v32  ;;  %v596_v60 = vrot.slane %v13283_v46, 4  ;;  %v1090_v62 = vsel %vm13248_vm12, %v1085_v48, %v1089_v29  ;;  %v358_v14 = vld [vmem:[#allocation2 + $0x50] sm:$0x1]  ;;  %v505_v27 = vld [vmem:[%s13229_s12 + $0x28] sm:$0xf] }
  0x3c   : > { %12417 = vmatpush3.bf16.msra.mxu0 %v2221_v2  ;;  %v1108_v63 = vor.u32 %v1107_v50, %v1103_v49  ;;  %v1113_v0 = vrot.slane %v1111_v52, 5  ;;  %v1125_v1 = vshll.u32 %v976_v55, 16  ;;  %v11142_v5 = vcombine.low %v1080_v56, %v1090_v62  ;;  %v506_v28 = vld [vmem:[%s13229_s12 + $0x2c] sm:$0xf]  ;;  %v879_v31 = vld [vmem:[#allocation2 + $0x3c] sm:$0xf] }
  0x3d   : > { %v1099_v7 = vrot.slane %v1098_v57, 4  ;;  %12389 = vmatmul.mubr.msk.bf16.gmra.mxu1 %vm1453_vm9, %v11175_v59  ;;  %v877_v9 = vsel %vm13193_vm5, %v596_v60, %v876_v45  ;;  %v1129_v10 = vshrl.u32 %v976_v55, 16  ;;  %v598_v2 = vshrl.u32 %v503_v61, 16  ;;  %v311_v34 = vld [vmem:[#allocation2 + $0x54] sm:$0x1] }
  0x3e   : > { %v1109_v12 = vrot.slane %v1108_v63, 4  ;;  %878 = vst [vmem:[#allocation2 + $0x38] sm:$0x1] %v877_v9  ;;  %v13327_v46 = vrot.slane %v1125_v1, 5  ;;  %v601_v13 = vshll.u32 %v503_v61, 16  ;;  %12354 = vmatprep.mubr.msk.bf16.mxu0 %vm1453_vm9, %v11142_v5  ;;  %v606_v18 = vshrl.u32 %v504_v3, 16 }
  0x3f   : > { %v1104_v15 = vsel %vm13248_vm12, %v1099_v7, %v1103_v49  ;;  %v975_v16 = vld [vmem:[#allocation2 + $0x30] sm:$0xf]  ;;  %v1131_v17 = vrot.slane %v1129_v10, 4  ;;  %v609_v4 = vshll.u32 %v504_v3, 16  ;;  %v600_v25 = vrot.slane %v598_v2, 7 }
  0x40   : > { %v1114_v19 = vsel %vm13248_vm12, %v1109_v12, %v1113_v0  ;;  %v1116_v20 = vshrl.u32 %v975_v16, 16  ;;  %v1119_v21 = vshll.u32 %v975_v16, 16  ;;  %v11176_v22 = vcombine.low %v975_v16, %v976_v55  ;;  %v883_v39 = vld [vmem:[#allocation2 + $0x44] sm:$0x1]  ;;  %v361_v40 = vld [vmem:[#allocation2 + $0x5c] sm:$0x1] }
  0x41   : > { %v11143_v23 = vcombine.low %v1104_v15, %v1114_v19  ;;  %v1132_v24 = vor.u32 %v1131_v17, %v13327_v46  ;;  %v608_v26 = vrot.slane %v606_v18, 7  ;;  %v309_v32 = vsel %vm13193_vm5, 0, %v308_v11  ;;  %v507_v45 = vld [vmem:[%s13229_s12 + $0x30] sm:$0xf]  ;;  %v508_v0 = vld [vmem:[%s13229_s12 + $0x34] sm:$0xf] }
  0x42   : > { %v1118_v29 = vrot.slane %v1116_v20, 4  ;;  %v1121_v30 = vrot.slane %v1119_v21, 5  ;;  %12392 = vmatprep.mubr.msk.bf16.mxu1 %vm1453_vm9, %v11176_v22  ;;  %v359_v33 = vsel %vm13203_vm6, 0, %v358_v14  ;;  %v603_v36 = vor.u32 %v601_v13, %v600_v25  ;;  %310 = vst [vmem:[#allocation2 + $0x48] sm:$0x1] %v309_v32 }
  0x43   : > { %12355 = vmatmul.mubr.msk.bf16.gmra.mxu0 %vm1453_vm9, %v11143_v23  ;;  %v1133_v35 = vrot.slane %v1132_v24, 4  ;;  %v604_v37 = vrot.slane %v600_v25, 4  ;;  %v611_v38 = vor.u32 %v609_v4, %v608_v26  ;;  %360 = vst [vmem:[#allocation2 + $0x50] sm:$0x1] %v359_v33  ;;  %v613_v42 = vrot.slane %v608_v26, 4 }
  0x44   : > { %v1122_v41 = vor.u32 %v1121_v30, %v1118_v29  ;;  %v615_v43 = vshrl.u32 %v505_v27, 16  ;;  %v618_v44 = vshll.u32 %v505_v27, 16  ;;  %v880_v50 = vsel %vm13238_vm11, %v603_v36, %v879_v31  ;;  %v314_v10 = vld [vmem:[#allocation2 + $0x60] sm:$0x1]  ;;  %v364_v11 = vld [vmem:[#allocation2 + $0x68] sm:$0x1] }
  0x45   : > { %v1004_v48 = vld [vmem:[#allocation2 + $0x38] sm:$0x1]  ;;  %v612_v49 = vsel %vm13254_vm13, %v604_v37, %v611_v38  ;;  %v623_v52 = vshrl.u32 %v506_v28, 16  ;;  %v626_v55 = vshll.u32 %v506_v28, 16  ;;  %881 = vst [vmem:[#allocation2 + $0x3c] sm:$0xf] %v880_v50  ;;  %v884_v59 = vsel %vm13193_vm5, %v613_v42, %v883_v39 }
  0x46   : > { %v1123_v56 = vrot.slane %v1122_v41, 4  ;;  %v1135_v57 = vshll.u32 %v1004_v48, 16  ;;  %882 = vst.msk [vmem:[#allocation2 + $0x40] sm:$0xf] %vm280_vm1, %v612_v49  ;;  %v617_v60 = vrot.slane %v615_v43, 7  ;;  %v312_v62 = vsel %vm13193_vm5, 0, %v311_v34 }
  0x47   : > { %885 = vst [vmem:[#allocation2 + $0x44] sm:$0x1] %v884_v59  ;;  %v625_v61 = vrot.slane %v623_v52, 7  ;;  %v362_v63 = vsel %vm13203_vm6, 0, %v361_v40  ;;  %v632_v1 = vshrl.u32 %v507_v45, 16  ;;  %v635_v14 = vshll.u32 %v507_v45, 16 }
  0x48   : > { %v1128_v3 = vsel %vm13248_vm12, %v1123_v56, %v13327_v46  ;;  %v1137_v5 = vrot.slane %v1135_v57, 5  ;;  %v620_v7 = vor.u32 %v618_v44, %v617_v60  ;;  %v621_v9 = vrot.slane %v617_v60, 4  ;;  %313 = vst [vmem:[#allocation2 + $0x54] sm:$0x1] %v312_v62  ;;  %363 = vst [vmem:[#allocation2 + $0x5c] sm:$0x1] %v362_v63 }
  0x49   : > { %v628_v12 = vor.u32 %v626_v55, %v625_v61  ;;  %v630_v2 = vrot.slane %v625_v61, 4  ;;  %v634_v13 = vrot.slane %v632_v1, 7  ;;  %v13360_v15 = vld [vmem:[%s13229_s12 + $0x38] sm:$0xf]  ;;  %v886_v17 = vld [vmem:[#allocation2 + $0x48] sm:$0xf] }
  0x4a   : > { %v1138_v16 = vsel %vm13248_vm12, %v1133_v35, %v1137_v5  ;;  %v890_v18 = vld [vmem:[#allocation2 + $0x50] sm:$0x1]  ;;  %v640_v4 = vshrl.u32 %v508_v0, 16  ;;  %v643_v46 = vshll.u32 %v508_v0, 16  ;;  %v887_v21 = vsel %vm13238_vm11, %v620_v7, %v886_v17 }
  0x4b   : > { %v11144_v19 = vcombine.low %v1128_v3, %v1138_v16  ;;  %v629_v20 = vsel %vm13254_vm13, %v621_v9, %v628_v12  ;;  %v891_v22 = vsel %vm13193_vm5, %v630_v2, %v890_v18  ;;  %v2019_v23 = vrot.slane %v13289_v53, 5  ;;  %888 = vst [vmem:[#allocation2 + $0x48] sm:$0xf] %v887_v21  ;;  %v510_v12 = vld [vmem:[%s13229_s12 + $0x3c] sm:$0xf] }
  0x4c   : > { %889 = vst.msk [vmem:[#allocation2 + $0x4c] sm:$0xf] %vm280_vm1, %v629_v20  ;;  %892 = vst [vmem:[#allocation2 + $0x50] sm:$0x1] %v891_v22  ;;  %v638_v24 = vrot.slane %v634_v13, 4  ;;  %v642_v25 = vrot.slane %v640_v4, 7  ;;  %v637_v29 = vor.u32 %v635_v14, %v634_v13 }
  0x4d   : > { %v315_v26 = vsel %vm13193_vm5, 0, %v314_v10  ;;  %12358 = vmatprep.mubr.msk.bf16.mxu0 %vm1453_vm9, %v11144_v19  ;;  %v977_v27 = vld [vmem:[#allocation2 + $0x3c] sm:$0xf]  ;;  %v978_v28 = vld [vmem:[#allocation2 + $0x40] sm:$0xf]  ;;  %v365_v30 = vsel %vm13203_vm6, 0, %v364_v11 }
  0x4e   : > { %316 = vst [vmem:[#allocation2 + $0x60] sm:$0x1] %v315_v26  ;;  %v649_v31 = vshrl.u32 %v13360_v15, 16  ;;  %v1005_v32 = vld [vmem:[#allocation2 + $0x44] sm:$0x1]  ;;  %v1140_v33 = vshrl.u32 %v977_v27, 16  ;;  %v11177_v38 = vcombine.low %v977_v27, %v978_v28  ;;  %v645_v39 = vor.u32 %v643_v46, %v642_v25 }
  0x4f   : > { %v1143_v34 = vshll.u32 %v977_v27, 16  ;;  %v1149_v35 = vshll.u32 %v978_v28, 16  ;;  %v1153_v36 = vshrl.u32 %v978_v28, 16  ;;  %366 = vst [vmem:[#allocation2 + $0x68] sm:$0x1] %v365_v30  ;;  %v1159_v37 = vshll.u32 %v1005_v32, 16 }
  0x50   : > { %v647_v40 = vrot.slane %v642_v25, 4  ;;  %v893_v41 = vld [vmem:[#allocation2 + $0x54] sm:$0xf]  ;;  %v897_v42 = vld [vmem:[#allocation2 + $0x5c] sm:$0x1]  ;;  %v1142_v43 = vrot.slane %v1140_v33, 4  ;;  %12393 = vmatmul.mubr.msk.bf16.gmra.mxu1 %vm1453_vm9, %v11177_v38  ;;  %v646_v50 = vsel %vm13254_vm13, %v638_v24, %v645_v39 }
  0x51   : > { %v1145_v44 = vrot.slane %v1143_v34, 5  ;;  %v1151_v45 = vrot.slane %v1149_v35, 5  ;;  %v1155_v48 = vrot.slane %v1153_v36, 4  ;;  %v1161_v49 = vrot.slane %v1159_v37, 5  ;;  %896 = vst.msk [vmem:[#allocation2 + $0x58] sm:$0xf] %vm280_vm1, %v646_v50 }
  0x52   : > { %v894_v52 = vsel %vm13238_vm11, %v637_v29, %v893_v41  ;;  %v898_v55 = vsel %vm13193_vm5, %v647_v40, %v897_v42  ;;  %v13386_v59 = vrot.slane %v649_v31, 7  ;;  %v652_v60 = vshll.u32 %v13360_v15, 16  ;;  %v979_v61 = vld [vmem:[#allocation2 + $0x48] sm:$0xf]  ;;  %v13397_v16 = vld [vmem:[%s18548_s1 + $0x6] sm:$0x3] }
  0x53   : > { %v1146_v56 = vor.u32 %v1145_v44, %v1142_v43  ;;  %v1156_v57 = vor.u32 %v1155_v48, %v1151_v45  ;;  %895 = vst [vmem:[#allocation2 + $0x54] sm:$0xf] %v894_v52  ;;  %899 = vst [vmem:[#allocation2 + $0x5c] sm:$0x1] %v898_v55  ;;  %v980_v62 = vld [vmem:[#allocation2 + $0x4c] sm:$0xf]  ;;  %12963 = vmatprep.subr.msk.bf16.mxu1 %vm1502_vm0, %v13397_v16 }
  0x54   : > { %v1006_v63 = vld [vmem:[#allocation2 + $0x50] sm:$0x1]  ;;  %v1164_v3 = vshrl.u32 %v979_v61, 16  ;;  %v1167_v5 = vshll.u32 %v979_v61, 16  ;;  %v1173_v7 = vshll.u32 %v980_v62, 16  ;;  %v1177_v9 = vshrl.u32 %v980_v62, 16 }
  0x55   : > { %v1147_v0 = vrot.slane %v1146_v56, 4  ;;  %v1157_v1 = vrot.slane %v1156_v57, 4  ;;  %v1183_v10 = vshll.u32 %v1006_v63, 16  ;;  %v11178_v11 = vcombine.low %v979_v61, %v980_v62  ;;  %v13407_v24 = vld [vmem:[%s18548_s1 + $0x8] sm:$0x3] }
  0x56   : > { %v1166_v14 = vrot.slane %v1164_v3, 4  ;;  %v1169_v15 = vrot.slane %v1167_v5, 5  ;;  %v2022_v17 = vrot.slane %v13291_v54, 5  ;;  %v1175_v4 = vrot.slane %v1173_v7, 5  ;;  %v900_v30 = vld [vmem:[#allocation2 + $0x60] sm:$0xf]  ;;  %12964 = vmatprep.subr.msk.bf16.mxu0 %vm1502_vm0, %v13407_v24 }
  0x57   : > { %v1152_v2 = vsel %vm13248_vm12, %v1147_v0, %v1151_v45  ;;  %v1162_v13 = vsel %vm13248_vm12, %v1157_v1, %v1161_v49  ;;  %v1179_v46 = vrot.slane %v1177_v9, 4  ;;  %12396 = vmatprep.mubr.msk.bf16.mxu1 %vm1453_vm9, %v11178_v11  ;;  %v1185_v20 = vrot.slane %v1183_v10, 5  ;;  %v317_v35 = vld [vmem:[#allocation2 + $0x6c] sm:$0x1]  ;;  %v367_v36 = vld [vmem:[#allocation2 + $0x74] sm:$0x1] }
  0x58   : > { %v11145_v18 = vcombine.low %v1152_v2, %v1162_v13  ;;  %v1170_v19 = vor.u32 %v1169_v15, %v1166_v14  ;;  %v655_v21 = vrot.slane %v13386_v59, 4  ;;  %v657_v22 = vshrl.u32 %v510_v12, 16  ;;  %v13410_v27 = vld [vmem:[#allocation2 + $0x58] sm:$0xf]  ;;  %v511_v41 = vld [vmem:[%s13229_s12 + $0x40] sm:$0xf] }
  0x59   : > { %v1180_v25 = vor.u32 %v1179_v46, %v1175_v4  ;;  %v654_v29 = vor.u32 %v652_v60, %v13386_v59  ;;  %v1197_v34 = vshll.u32 %v13410_v27, 16  ;;  %v1201_v38 = vshrl.u32 %v13410_v27, 16  ;;  %v512_v48 = vld [vmem:[%s13229_s12 + $0x44] sm:$0xf]  ;;  %v320_v56 = vld [vmem:[#allocation2 + $0x78] sm:$0x1] }
  0x5a   : > { %12359 = vmatmul.mubr.msk.bf16.gmra.mxu0 %vm1453_vm9, %v11145_v18  ;;  %v981_v26 = vld [vmem:[#allocation2 + $0x54] sm:$0xf]  ;;  %v13412_v28 = vld [vmem:[#allocation2 + $0x5c] sm:$0x1]  ;;  %v1171_v31 = vrot.slane %v1170_v19, 4  ;;  %v659_v55 = vrot.slane %v657_v22, 7 }
  0x5b   : > { %v1188_v32 = vshrl.u32 %v981_v26, 16  ;;  %v1191_v33 = vshll.u32 %v981_v26, 16  ;;  %v1181_v37 = vrot.slane %v1180_v25, 4  ;;  %v1207_v39 = vshll.u32 %v13412_v28, 16  ;;  %v904_v62 = vld [vmem:[#allocation2 + $0x68] sm:$0x1] }
  0x5c   : > { %v11179_v40 = vcombine.low %v981_v26, %v13410_v27  ;;  %v1176_v42 = vsel %vm13248_vm12, %v1171_v31, %v1175_v4  ;;  %v1199_v45 = vrot.slane %v1197_v34, 5  ;;  %v1203_v50 = vrot.slane %v1201_v38, 4  ;;  %v370_v63 = vld [vmem:[#allocation2 + $0x80] sm:$0x1]  ;;  %v513_v0 = vld [vmem:[%s13229_s12 + $0x48] sm:$0xf] }
  0x5d   : > { %v1190_v43 = vrot.slane %v1188_v32, 4  ;;  %v1193_v44 = vrot.slane %v1191_v33, 5  ;;  %v1186_v49 = vsel %vm13248_vm12, %v1181_v37, %v1185_v20  ;;  %v1209_v52 = vrot.slane %v1207_v39, 5  ;;  %v514_v2 = vld [vmem:[%s13229_s12 + $0x4c] sm:$0xf] }
  0x5e   : > { %12397 = vmatmul.mubr.msk.bf16.gmra.mxu1 %vm1453_vm9, %v11179_v40  ;;  %v11146_v57 = vcombine.low %v1176_v42, %v1186_v49  ;;  %v660_v60 = vshll.u32 %v510_v12, 16  ;;  %v901_v61 = vsel %vm13238_vm11, %v654_v29, %v900_v30  ;;  %v1204_v1 = vor.u32 %v1203_v50, %v1199_v45  ;;  %v323_v4 = vld [vmem:[#allocation2 + $0x84] sm:$0x1]  ;;  %v373_v25 = vld [vmem:[#allocation2 + $0x8c] sm:$0x1] }
  0x5f   : > { %v1194_v59 = vor.u32 %v1193_v44, %v1190_v43  ;;  %v664_v3 = vrot.slane %v659_v55, 4  ;;  %902 = vst [vmem:[#allocation2 + $0x60] sm:$0xf] %v901_v61  ;;  %v318_v5 = vsel %vm13193_vm5, 0, %v317_v35  ;;  %v368_v7 = vsel %vm13203_vm6, 0, %v367_v36 }
  0x60   : > { %12362 = vmatprep.mubr.msk.bf16.mxu0 %vm1453_vm9, %v11146_v57  ;;  %v662_v10 = vor.u32 %v660_v60, %v659_v55  ;;  %319 = vst [vmem:[#allocation2 + $0x6c] sm:$0x1] %v318_v5  ;;  %369 = vst [vmem:[#allocation2 + $0x74] sm:$0x1] %v368_v7  ;;  %v666_v11 = vshrl.u32 %v511_v41, 16  ;;  %v669_v12 = vshll.u32 %v511_v41, 16 }
  0x61   : > { %v1195_v9 = vrot.slane %v1194_v59, 4  ;;  %v1205_v13 = vrot.slane %v1204_v1, 4  ;;  %v905_v14 = vsel %vm13193_vm5, %v664_v3, %v904_v62  ;;  %v674_v15 = vshrl.u32 %v512_v48, 16  ;;  %v515_v32 = vld [vmem:[%s13229_s12 + $0x50] sm:$0xf] }
  0x62   : > { %v677_v18 = vshll.u32 %v512_v48, 16  ;;  %v663_v19 = vsel %vm13254_vm13, %v655_v21, %v662_v10  ;;  %906 = vst [vmem:[#allocation2 + $0x68] sm:$0x1] %v905_v14  ;;  %v668_v20 = vrot.slane %v666_v11, 7  ;;  %v321_v22 = vsel %vm13193_vm5, 0, %v320_v56 }
  0x63   : > { %v1200_v46 = vsel %vm13248_vm12, %v1195_v9, %v1199_v45  ;;  %v1210_v26 = vsel %vm13248_vm12, %v1205_v13, %v1209_v52  ;;  %903 = vst.msk [vmem:[#allocation2 + $0x64] sm:$0xf] %vm280_vm1, %v663_v19  ;;  %v676_v29 = vrot.slane %v674_v15, 7  ;;  %322 = vst [vmem:[#allocation2 + $0x78] sm:$0x1] %v321_v22  ;;  %v371_v30 = vsel %vm13203_vm6, 0, %v370_v63 }
  0x64   : > { %v683_v31 = vshrl.u32 %v513_v0, 16  ;;  %v11147_v33 = vcombine.low %v1200_v46, %v1210_v26  ;;  %v671_v21 = vor.u32 %v669_v12, %v668_v20  ;;  %v672_v34 = vrot.slane %v668_v20, 4  ;;  %372 = vst [vmem:[#allocation2 + $0x80] sm:$0x1] %v371_v30  ;;  %v376_v20 = vld [vmem:[#allocation2 + $0x98] sm:$0x1] }
  0x65   : > { %v686_v35 = vshll.u32 %v513_v0, 16  ;;  %v679_v36 = vor.u32 %v677_v18, %v676_v29  ;;  %v681_v37 = vrot.slane %v676_v29, 4  ;;  %v691_v39 = vshrl.u32 %v514_v2, 16  ;;  %v13466_v0 = vld [vmem:[%s13229_s12 + $0x54] sm:$0xf] }
  0x66   : > { %v685_v38 = vrot.slane %v683_v31, 7  ;;  %12363 = vmatmul.mubr.msk.bf16.gmra.mxu0 %vm1453_vm9, %v11147_v33  ;;  %v983_v40 = vld [vmem:[#allocation2 + $0x60] sm:$0xf]  ;;  %v694_v41 = vshll.u32 %v514_v2, 16  ;;  %v324_v42 = vsel %vm13193_vm5, 0, %v323_v4  ;;  %v374_v43 = vsel %vm13203_vm6, 0, %v373_v25 }
  0x67   : > { %v700_v44 = vshrl.u32 %v515_v32, 16  ;;  %v1212_v45 = vshrl.u32 %v983_v40, 16  ;;  %v1215_v48 = vshll.u32 %v983_v40, 16  ;;  %v680_v49 = vsel %vm13254_vm13, %v672_v34, %v679_v36  ;;  %v907_v50 = vld [vmem:[#allocation2 + $0x6c] sm:$0xf] }
  0x68   : > { %v911_v52 = vld [vmem:[#allocation2 + $0x74] sm:$0x1]  ;;  %v688_v55 = vor.u32 %v686_v35, %v685_v38  ;;  %325 = vst [vmem:[#allocation2 + $0x84] sm:$0x1] %v324_v42  ;;  %375 = vst [vmem:[#allocation2 + $0x8c] sm:$0x1] %v374_v43  ;;  %v908_v56 = vsel %vm13238_vm11, %v671_v21, %v907_v50 }
  0x69   : > { %910 = vst.msk [vmem:[#allocation2 + $0x70] sm:$0xf] %vm280_vm1, %v680_v49  ;;  %v912_v57 = vsel %vm13193_vm5, %v681_v37, %v911_v52  ;;  %v689_v59 = vrot.slane %v685_v38, 4  ;;  %v693_v60 = vrot.slane %v691_v39, 7  ;;  %v13463_v61 = vld [vmem:[#allocation2 + $0x68] sm:$0x1] }
  0x6a   : > { %v1214_v62 = vrot.slane %v1212_v45, 4  ;;  %v1217_v63 = vrot.slane %v1215_v48, 5  ;;  %909 = vst [vmem:[#allocation2 + $0x6c] sm:$0xf] %v908_v56  ;;  %913 = vst [vmem:[#allocation2 + $0x74] sm:$0x1] %v912_v57 }
  0x6b   : > { %v13468_v1 = vrot.slane %v700_v44, 7  ;;  %v703_v3 = vshll.u32 %v515_v32, 16  ;;  %v13470_v5 = vld [vmem:[#allocation2 + $0x64] sm:$0xf]  ;;  %v1231_v7 = vshll.u32 %v13463_v61, 16  ;;  %v696_v9 = vor.u32 %v694_v41, %v693_v60 }
  0x6c   : > { %v698_v10 = vrot.slane %v693_v60, 4  ;;  %v914_v11 = vld [vmem:[#allocation2 + $0x78] sm:$0xf]  ;;  %v1218_v12 = vor.u32 %v1217_v63, %v1214_v62  ;;  %v1221_v2 = vshll.u32 %v13470_v5, 16  ;;  %v1225_v13 = vshrl.u32 %v13470_v5, 16 }
  0x6d   : > { %v11180_v14 = vcombine.low %v983_v40, %v13470_v5  ;;  %v918_v15 = vld [vmem:[#allocation2 + $0x80] sm:$0x1]  ;;  %v326_v18 = vld [vmem:[#allocation2 + $0x90] sm:$0x1]  ;;  %v697_v4 = vsel %vm13254_vm13, %v689_v59, %v696_v9  ;;  %v915_v46 = vsel %vm13238_vm11, %v688_v55, %v914_v11  ;;  %v705_v29 = vor.u32 %v703_v3, %v13468_v1 }
  0x6e   : > { %v919_v19 = vsel %vm13193_vm5, %v698_v10, %v918_v15  ;;  %v1219_v22 = vrot.slane %v1218_v12, 4  ;;  %v1223_v25 = vrot.slane %v1221_v2, 5  ;;  %v1227_v26 = vrot.slane %v1225_v13, 4  ;;  %916 = vst [vmem:[#allocation2 + $0x78] sm:$0xf] %v915_v46 }
  0x6f   : > { %12400 = vmatprep.mubr.msk.bf16.mxu1 %vm1453_vm9, %v11180_v14  ;;  %917 = vst.msk [vmem:[#allocation2 + $0x7c] sm:$0xf] %vm280_vm1, %v697_v4  ;;  %920 = vst [vmem:[#allocation2 + $0x80] sm:$0x1] %v919_v19  ;;  %v1233_v30 = vrot.slane %v1231_v7, 5  ;;  %v706_v31 = vrot.slane %v13468_v1, 4 }
  0x70   : > { %v708_v32 = vshrl.u32 %v13466_v0, 16  ;;  %v921_v33 = vld [vmem:[#allocation2 + $0x84] sm:$0xf]  ;;  %v327_v21 = vsel %vm13193_vm5, 0, %v326_v18  ;;  %v1228_v34 = vor.u32 %v1227_v26, %v1223_v25  ;;  %v13489_v35 = vld [vmem:[#allocation2 + $0x70] sm:$0xf]  ;;  %v1224_v39 = vsel %vm13248_vm12, %v1219_v22, %v1223_v25 }
  0x71   : > { %v711_v36 = vshll.u32 %v13466_v0, 16  ;;  %v922_v37 = vsel %vm13238_vm11, %v705_v29, %v921_v33  ;;  %328 = vst [vmem:[#allocation2 + $0x90] sm:$0x1] %v327_v21  ;;  %v377_v38 = vsel %vm13203_vm6, 0, %v376_v20  ;;  %v985_v40 = vld [vmem:[#allocation2 + $0x6c] sm:$0xf] }
  0x72   : > { %v13498_v41 = vld [vmem:[#allocation2 + $0x74] sm:$0x1]  ;;  %v1245_v42 = vshll.u32 %v13489_v35, 16  ;;  %v1249_v43 = vshrl.u32 %v13489_v35, 16  ;;  %923 = vst [vmem:[#allocation2 + $0x84] sm:$0xf] %v922_v37  ;;  %v11181_v55 = vcombine.low %v985_v40, %v13489_v35 }
  0x73   : > { %378 = vst [vmem:[#allocation2 + $0x98] sm:$0x1] %v377_v38  ;;  %v1229_v44 = vrot.slane %v1228_v34, 4  ;;  %v1236_v45 = vshrl.u32 %v985_v40, 16  ;;  %v1239_v48 = vshll.u32 %v985_v40, 16  ;;  %v1255_v49 = vshll.u32 %v13498_v41, 16 }
  0x74   : > { %v1247_v50 = vrot.slane %v1245_v42, 5  ;;  %v1251_v52 = vrot.slane %v1249_v43, 4  ;;  %v710_v56 = vrot.slane %v708_v32, 7  ;;  %12401 = vmatmul.mubr.msk.bf16.gmra.mxu1 %vm1453_vm9, %v11181_v55  ;;  %v517_v4 = vld [vmem:[%s13229_s12 + $0x58] sm:$0xf]  ;;  %vm2007_vm14 = vcmask 1042432  }
  0x75   : > { %v1234_v57 = vsel %vm13248_vm12, %v1229_v44, %v1233_v30  ;;  %v1238_v59 = vrot.slane %v1236_v45, 4  ;;  %v1241_v60 = vrot.slane %v1239_v48, 5  ;;  %v1257_v62 = vrot.slane %v1255_v49, 5  ;;  %v987_v1 = vld [vmem:[#allocation2 + $0x78] sm:$0xf] }
  0x76   : > { %v11148_v63 = vcombine.low %v1224_v39, %v1234_v57  ;;  %v1252_v0 = vor.u32 %v1251_v52, %v1247_v50  ;;  %v13507_v3 = vld [vmem:[#allocation2 + $0x7c] sm:$0xf]  ;;  %v13509_v7 = vld [vmem:[#allocation2 + $0x80] sm:$0x1]  ;;  %v713_v9 = vor.u32 %v711_v36, %v710_v56  ;;  %v1260_v11 = vshrl.u32 %v987_v1, 16 }
  0x77   : > { %v1242_v10 = vor.u32 %v1241_v60, %v1238_v59  ;;  %v1263_v12 = vshll.u32 %v987_v1, 16  ;;  %v1269_v2 = vshll.u32 %v13507_v3, 16  ;;  %v1273_v14 = vshrl.u32 %v13507_v3, 16  ;;  %v518_v26 = vld [vmem:[%s13229_s12 + $0x5c] sm:$0xf] }
  0x78   : > { %12366 = vmatprep.mubr.msk.bf16.mxu0 %vm1453_vm9, %v11148_v63  ;;  %v1253_v13 = vrot.slane %v1252_v0, 4  ;;  %v1279_v15 = vshll.u32 %v13509_v7, 16  ;;  %v11182_v18 = vcombine.low %v987_v1, %v13507_v3  ;;  %v1262_v19 = vrot.slane %v1260_v11, 4  ;;  %v925_v21 = vld [vmem:[#allocation2 + $0x8c] sm:$0x1] }
  0x79   : > { %v1243_v46 = vrot.slane %v1242_v10, 4  ;;  %v1265_v20 = vrot.slane %v1263_v12, 5  ;;  %v1271_v22 = vrot.slane %v1269_v2, 5  ;;  %v13517_v25 = vld [vmem:[#allocation2 + $0x84] sm:$0xf]  ;;  %v1275_v30 = vrot.slane %v1273_v14, 4 }
  0x7a   : > { %v1258_v29 = vsel %vm13248_vm12, %v1253_v13, %v1257_v62  ;;  %v1281_v32 = vrot.slane %v1279_v15, 5  ;;  %12404 = vmatprep.mubr.msk.bf16.mxu1 %vm1453_vm9, %v11182_v18  ;;  %v714_v33 = vsel %vm13254_vm13, %v706_v31, %v713_v9  ;;  %v329_v34 = vld [vmem:[#allocation2 + $0x9c] sm:$0x1]  ;;  %v715_v38 = vrot.slane %v710_v56, 4  ;;  %v379_v45 = vld [vmem:[#allocation2 + $0xa4] sm:$0x1] }
  0x7b   : > { %v1248_v36 = vsel %vm13248_vm12, %v1243_v46, %v1247_v50  ;;  %v1266_v37 = vor.u32 %v1265_v20, %v1262_v19  ;;  %924 = vst.msk [vmem:[#allocation2 + $0x88] sm:$0xf] %vm280_vm1, %v714_v33  ;;  %v1284_v39 = vshrl.u32 %v13517_v25, 16  ;;  %v1276_v42 = vor.u32 %v1275_v30, %v1271_v22  ;;  %v519_v48 = vld [vmem:[%s13229_s12 + $0x60] sm:$0xf] }
  0x7c   : > { %v11149_v40 = vcombine.low %v1248_v36, %v1258_v29  ;;  %v1287_v43 = vshll.u32 %v13517_v25, 16  ;;  %v717_v44 = vshrl.u32 %v517_v4, 16  ;;  %v926_v49 = vsel %vm13193_vm5, %v715_v38, %v925_v21  ;;  %v520_v60 = vld [vmem:[%s13229_s12 + $0x64] sm:$0xf]  ;;  %v928_v0 = vld [vmem:[#allocation2 + $0x90] sm:$0xf] }
  0x7d   : > { %v1267_v31 = vrot.slane %v1266_v37, 4  ;;  %v1286_v52 = vrot.slane %v1284_v39, 4  ;;  %v720_v50 = vshll.u32 %v517_v4, 16  ;;  %v1277_v55 = vrot.slane %v1276_v42, 4  ;;  %927 = vst [vmem:[#allocation2 + $0x8c] sm:$0x1] %v926_v49 }
  0x7e   : > { %12367 = vmatmul.mubr.msk.bf16.gmra.mxu0 %vm1453_vm9, %v11149_v40  ;;  %v1289_v56 = vrot.slane %v1287_v43, 5  ;;  %v719_v57 = vrot.slane %v717_v44, 7  ;;  %v725_v59 = vshrl.u32 %v518_v26, 16  ;;  %v728_v63 = vshll.u32 %v518_v26, 16  ;;  %v332_v13 = vld [vmem:[#allocation2 + $0xa8] sm:$0x1] }
  0x7f   : > { %v1272_v62 = vsel %vm13248_vm12, %v1267_v31, %v1271_v22  ;;  %v330_v1 = vsel %vm13193_vm5, 0, %v329_v34  ;;  %v380_v9 = vsel %vm13203_vm6, 0, %v379_v45  ;;  %v1282_v10 = vsel %vm13248_vm12, %v1277_v55, %v1281_v32  ;;  %v382_v46 = vld [vmem:[#allocation2 + $0xb0] sm:$0x1]  ;;  %v932_v34 = vld [vmem:[#allocation2 + $0x98] sm:$0x1] }
  0x80   : > { %v1290_v11 = vor.u32 %v1289_v56, %v1286_v52  ;;  %v722_v12 = vor.u32 %v720_v50, %v719_v57  ;;  %v723_v2 = vrot.slane %v719_v57, 4  ;;  %331 = vst [vmem:[#allocation2 + $0x9c] sm:$0x1] %v330_v1  ;;  %381 = vst [vmem:[#allocation2 + $0xa4] sm:$0x1] %v380_v9  ;;  %v11150_v14 = vcombine.low %v1272_v62, %v1282_v10 }
  0x81   : > { %v727_v15 = vrot.slane %v725_v59, 7  ;;  %v734_v18 = vshrl.u32 %v519_v48, 16  ;;  %v737_v4 = vshll.u32 %v519_v48, 16  ;;  %v742_v26 = vshrl.u32 %v520_v60, 16  ;;  %v521_v36 = vld [vmem:[%s13229_s12 + $0x68] sm:$0xf] }
  0x82   : > { %v13543_v19 = vld [vmem:[#allocation2 + $0x88] sm:$0xf]  ;;  %v13545_v20 = vrot.slane %v1290_v11, 4  ;;  %v929_v22 = vsel %vm13238_vm11, %v722_v12, %v928_v0  ;;  %v745_v29 = vshll.u32 %v520_v60, 16  ;;  %12370 = vmatprep.mubr.msk.bf16.mxu0 %vm1453_vm9, %v11150_v14  ;;  %v333_v40 = vsel %vm13193_vm5, 0, %v332_v13 }
  0x83   : > { %v1293_v30 = vshll.u32 %v13543_v19, 16  ;;  %v1297_v32 = vshrl.u32 %v13543_v19, 16  ;;  %v11183_v33 = vcombine.low %v13517_v25, %v13543_v19  ;;  %v730_v21 = vor.u32 %v728_v63, %v727_v15  ;;  %930 = vst [vmem:[#allocation2 + $0x90] sm:$0xf] %v929_v22  ;;  %v522_v42 = vld [vmem:[%s13229_s12 + $0x6c] sm:$0xf] }
  0x84   : > { %v732_v37 = vrot.slane %v727_v15, 4  ;;  %v736_v38 = vrot.slane %v734_v18, 7  ;;  %v744_v39 = vrot.slane %v742_v26, 7  ;;  %v13558_v43 = vld [vmem:[#allocation2 + $0x8c] sm:$0x1]  ;;  %v383_v48 = vsel %vm13203_vm6, 0, %v382_v46 }
  0x85   : > { %v1295_v44 = vrot.slane %v1293_v30, 5  ;;  %v1299_v45 = vrot.slane %v1297_v32, 4  ;;  %12405 = vmatmul.mubr.msk.bf16.gmra.mxu1 %vm1453_vm9, %v11183_v33  ;;  %v731_v25 = vsel %vm13254_vm13, %v723_v2, %v730_v21  ;;  %334 = vst [vmem:[#allocation2 + $0xa8] sm:$0x1] %v333_v40  ;;  %v1303_v31 = vshll.u32 %v13558_v43, 16 }
  0x86   : > { %931 = vst.msk [vmem:[#allocation2 + $0x94] sm:$0xf] %vm280_vm1, %v731_v25  ;;  %v933_v49 = vsel %vm13193_vm5, %v732_v37, %v932_v34  ;;  %v739_v52 = vor.u32 %v737_v4, %v736_v38  ;;  %v740_v50 = vrot.slane %v736_v38, 4  ;;  %384 = vst [vmem:[#allocation2 + $0xb0] sm:$0x1] %v383_v48  ;;  %v747_v60 = vor.u32 %v745_v29, %v744_v39 }
  0x87   : > { %v335_v55 = vld [vmem:[#allocation2 + $0xb4] sm:$0x1]  ;;  %v385_v56 = vld [vmem:[#allocation2 + $0xbc] sm:$0x1]  ;;  %v1296_v57 = vsel %vm13248_vm12, %v13545_v20, %v1295_v44  ;;  %v1300_v59 = vor.u32 %v1299_v45, %v1295_v44  ;;  %934 = vst [vmem:[#allocation2 + $0x98] sm:$0x1] %v933_v49 }
  0x88   : > { %v749_v62 = vrot.slane %v744_v39, 4  ;;  %v935_v63 = vld [vmem:[#allocation2 + $0x9c] sm:$0xf]  ;;  %v939_v0 = vld [vmem:[#allocation2 + $0xa4] sm:$0x1]  ;;  %v1305_v1 = vrot.slane %v1303_v31, 5  ;;  %v748_v2 = vsel %vm13254_vm13, %v740_v50, %v747_v60 }
  0x89   : > { %v936_v9 = vsel %vm13238_vm11, %v739_v52, %v935_v63  ;;  %v751_v10 = vshrl.u32 %v521_v36, 16  ;;  %v754_v11 = vshll.u32 %v521_v36, 16  ;;  %v1301_v12 = vrot.slane %v1300_v59, 4  ;;  %v13579_v15 = vld [vmem:[%s13229_s12 + $0x70] sm:$0xf] }
  0x8a   : > { %937 = vst [vmem:[#allocation2 + $0x9c] sm:$0xf] %v936_v9  ;;  %v940_v13 = vsel %vm13193_vm5, %v749_v62, %v939_v0  ;;  %v759_v14 = vshrl.u32 %v522_v42, 16  ;;  %v991_v18 = vld [vmem:[#allocation2 + $0x90] sm:$0xf]  ;;  %v762_v46 = vshll.u32 %v522_v42, 16 }
  0x8b   : > { %938 = vst.msk [vmem:[#allocation2 + $0xa0] sm:$0xf] %vm280_vm1, %v748_v2  ;;  %941 = vst [vmem:[#allocation2 + $0xa4] sm:$0x1] %v940_v13  ;;  %v753_v4 = vrot.slane %v751_v10, 7  ;;  %v336_v20 = vsel %vm13193_vm5, 0, %v335_v55  ;;  %v1306_v26 = vsel %vm13248_vm12, %v1301_v12, %v1305_v1 }
  0x8c   : > { %v386_v22 = vsel %vm13203_vm6, 0, %v385_v56  ;;  %v1308_v29 = vshrl.u32 %v991_v18, 16  ;;  %v1311_v30 = vshll.u32 %v991_v18, 16  ;;  %v761_v32 = vrot.slane %v759_v14, 7  ;;  %337 = vst [vmem:[#allocation2 + $0xb4] sm:$0x1] %v336_v20 }
  0x8d   : > { %387 = vst [vmem:[#allocation2 + $0xbc] sm:$0x1] %v386_v22  ;;  %v11151_v33 = vcombine.low %v1296_v57, %v1306_v26  ;;  %v756_v21 = vor.u32 %v754_v11, %v753_v4  ;;  %v757_v34 = vrot.slane %v753_v4, 4  ;;  %v942_v36 = vld [vmem:[#allocation2 + $0xa8] sm:$0xf]  ;;  %v768_v37 = vshrl.u32 %v13579_v15, 16 }
  0x8e   : > { %v13589_v38 = vld [vmem:[#allocation2 + $0x94] sm:$0xf]  ;;  %v1310_v39 = vrot.slane %v1308_v29, 4  ;;  %v1313_v40 = vrot.slane %v1311_v30, 5  ;;  %v764_v42 = vor.u32 %v762_v46, %v761_v32  ;;  %v766_v44 = vrot.slane %v761_v32, 4 }
  0x8f   : > { %12371 = vmatmul.mubr.msk.bf16.gmra.mxu0 %vm1453_vm9, %v11151_v33  ;;  %v13592_v45 = vld [vmem:[#allocation2 + $0x98] sm:$0x1]  ;;  %v1317_v25 = vshll.u32 %v13589_v38, 16  ;;  %v1321_v48 = vshrl.u32 %v13589_v38, 16  ;;  %v11184_v31 = vcombine.low %v991_v18, %v13589_v38  ;;  %v943_v49 = vsel %vm13238_vm11, %v756_v21, %v942_v36  ;;  %v946_v52 = vld [vmem:[#allocation2 + $0xb0] sm:$0x1] }
  0x90   : > { %v1314_v50 = vor.u32 %v1313_v40, %v1310_v39  ;;  %v1327_v55 = vshll.u32 %v13592_v45, 16  ;;  %v765_v56 = vsel %vm13254_vm13, %v757_v34, %v764_v42  ;;  %944 = vst [vmem:[#allocation2 + $0xa8] sm:$0xf] %v943_v49  ;;  %v947_v57 = vsel %vm13193_vm5, %v766_v44, %v946_v52  ;;  %v524_v20 = vld [vmem:[%s13229_s12 + $0x74] sm:$0xf] }
  0x91   : > { %v1319_v59 = vrot.slane %v1317_v25, 5  ;;  %v1323_v60 = vrot.slane %v1321_v48, 4  ;;  %12408 = vmatprep.mubr.msk.bf16.mxu1 %vm1453_vm9, %v11184_v31  ;;  %v993_v62 = vld [vmem:[#allocation2 + $0x9c] sm:$0xf]  ;;  %945 = vst.msk [vmem:[#allocation2 + $0xac] sm:$0xf] %vm280_vm1, %v765_v56 }
  0x92   : > { %948 = vst [vmem:[#allocation2 + $0xb0] sm:$0x1] %v947_v57  ;;  %v13606_v63 = vrot.slane %v768_v37, 7  ;;  %v771_v0 = vshll.u32 %v13579_v15, 16  ;;  %v1315_v1 = vrot.slane %v1314_v50, 4  ;;  %v1329_v9 = vrot.slane %v1327_v55, 5 }
  0x93   : > { %v13609_v10 = vld [vmem:[#allocation2 + $0xa0] sm:$0xf]  ;;  %v13611_v11 = vld [vmem:[#allocation2 + $0xa4] sm:$0x1]  ;;  %v1324_v12 = vor.u32 %v1323_v60, %v1319_v59  ;;  %v1332_v2 = vshrl.u32 %v993_v62, 16  ;;  %v1335_v13 = vshll.u32 %v993_v62, 16 }
  0x94   : > { %v1341_v14 = vshll.u32 %v13609_v10, 16  ;;  %v1320_v18 = vsel %vm13248_vm12, %v1315_v1, %v1319_v59  ;;  %v1345_v4 = vshrl.u32 %v13609_v10, 16  ;;  %v1351_v46 = vshll.u32 %v13611_v11, 16  ;;  %v949_v44 = vld [vmem:[#allocation2 + $0xb4] sm:$0xf] }
  0x95   : > { %v11185_v15 = vcombine.low %v993_v62, %v13609_v10  ;;  %v1325_v22 = vrot.slane %v1324_v12, 4  ;;  %v1334_v26 = vrot.slane %v1332_v2, 4  ;;  %v1337_v29 = vrot.slane %v1335_v13, 5  ;;  %v1959_v13 = vld [vmem:[#allocation2] sm:$0xe] }
  0x96   : > { %v1343_v30 = vrot.slane %v1341_v14, 5  ;;  %v1347_v32 = vrot.slane %v1345_v4, 4  ;;  %v1353_v33 = vrot.slane %v1351_v46, 5  ;;  %v773_v21 = vor.u32 %v771_v0, %v13606_v63 }
  0x97   : > { %12409 = vmatmul.mubr.msk.bf16.gmra.mxu1 %vm1453_vm9, %v11185_v15  ;;  %v774_v34 = vrot.slane %v13606_v63, 4  ;;  %v1330_v36 = vsel %vm13248_vm12, %v1325_v22, %v1329_v9  ;;  %v1338_v37 = vor.u32 %v1337_v29, %v1334_v26  ;;  %v995_v39 = vld [vmem:[#allocation2 + $0xa8] sm:$0xf]  ;;  %v776_v40 = vshrl.u32 %v524_v20, 16  ;;  %v1960_v15 = vld [vmem:[#allocation2 + $0xc] sm:$0xe] }
  0x98   : > { %v779_v42 = vshll.u32 %v524_v20, 16  ;;  %v11152_v25 = vcombine.low %v1320_v18, %v1330_v36  ;;  %v1348_v48 = vor.u32 %v1347_v32, %v1343_v30  ;;  %v13625_v31 = vld [vmem:[#allocation2 + $0xac] sm:$0xf]  ;;  %v1356_v52 = vshrl.u32 %v995_v39, 16  ;;  %v13644_v20 = vld [vmem:[%s18548_s1 + $0xa] sm:$0x3] }
  0x99   : > { %v13627_v49 = vld [vmem:[#allocation2 + $0xb0] sm:$0x1]  ;;  %v1359_v50 = vshll.u32 %v995_v39, 16  ;;  %v1339_v55 = vrot.slane %v1338_v37, 4  ;;  %v1365_v56 = vshll.u32 %v13625_v31, 16  ;;  %v1369_v57 = vshrl.u32 %v13625_v31, 16 }
  0x9a   : > { %v1375_v59 = vshll.u32 %v13627_v49, 16  ;;  %12374 = vmatprep.mubr.msk.bf16.mxu0 %vm1453_vm9, %v11152_v25  ;;  %v1349_v60 = vrot.slane %v1348_v48, 4  ;;  %v1358_v62 = vrot.slane %v1356_v52, 4  ;;  %v11186_v0 = vcombine.low %v995_v39, %v13625_v31  ;;  %v953_v29 = vld [vmem:[#allocation2 + $0xbc] sm:$0x1] }
  0x9b   : > { %v1361_v63 = vrot.slane %v1359_v50, 5  ;;  %v1344_v1 = vsel %vm13248_vm12, %v1339_v55, %v1343_v30  ;;  %v1367_v9 = vrot.slane %v1365_v56, 5  ;;  %v1371_v12 = vrot.slane %v1369_v57, 4  ;;  %v13083_v50 = vld [vmem:[#allocation2 + $0x8] sm:$0x1] }
  0x9c   : > { %v1377_v2 = vrot.slane %v1375_v59, 5  ;;  %v1354_v14 = vsel %vm13248_vm12, %v1349_v60, %v1353_v33  ;;  %12412 = vmatprep.mubr.msk.bf16.mxu1 %vm1453_vm9, %v11186_v0  ;;  %v778_v4 = vrot.slane %v776_v40, 7  ;;  %v950_v46 = vsel %vm13238_vm11, %v773_v21, %v949_v44  ;;  %v13082_v40 = vld [vmem:[#allocation2 + $0x4] sm:$0xf]  ;;  %v1961_v59 = vld [vmem:[#allocation2 + $0x18] sm:$0xe] }
  0x9d   : > { %v1362_v18 = vor.u32 %v1361_v63, %v1358_v62  ;;  %v11153_v22 = vcombine.low %v1344_v1, %v1354_v14  ;;  %v1372_v26 = vor.u32 %v1371_v12, %v1367_v9  ;;  %951 = vst [vmem:[#allocation2 + $0xb4] sm:$0xf] %v950_v46  ;;  %v2579_v30 = vsel %vm1502_vm0, %v13397_v16, 0  ;;  %v1962_v60 = vld [vmem:[#allocation2 + $0x24] sm:$0xe] }
  0x9e   : > { %v781_v33 = vor.u32 %v779_v42, %v778_v4  ;;  %v783_v36 = vrot.slane %v778_v4, 4  ;;  %12451 = vmatpush3.bf16.msra.mxu1 %v2579_v30  ;;  %vm2008_vm15 = vcmask 1046532   ;;  %v18605_v37 = vmov 0  ;;  %v13084_v1 = vld [vmem:[#allocation2 + $0x1c] sm:$0xf] }
  0x9f   : > { %v1363_v32 = vrot.slane %v1362_v18, 4  ;;  %12375 = vmatmul.mubr.msk.bf16.gmra.mxu0 %vm1453_vm9, %v11153_v22  ;;  %v1373_v21 = vrot.slane %v1372_v26, 4  ;;  %vm13649_vm2 = vmor %vm2007_vm14, %vm2008_vm15  ;;  %v11204_v39 = vrot.slane %v1959_v13, 9  ;;  %v2012_v44 = vrot.slane %v13082_v40, 5  ;;  %12965 = vmatprep.subr.msk.bf16.mxu1 %vm1502_vm0, %v13644_v20  ;;  %v13085_v13 = vld [vmem:[#allocation2 + $0x20] sm:$0x1] }
  0xa0   : > { %v18606_v37 = vsel %vm13649_vm2, 4294967295, %v18605_v37  ;;  %v11205_v25 = vrot.slane %v1960_v15, 9  ;;  %v782_v42 = vsel %vm13254_vm13, %v774_v34, %v781_v33  ;;  %v954_v48 = vsel %vm13193_vm5, %v783_v36, %v953_v29  ;;  %v13086_v18 = vld [vmem:[#allocation2 + $0x28] sm:$0xf]  ;;  %v13087_v29 = vld [vmem:[#allocation2 + $0x2c] sm:$0x1] }
  0xa1   : > { %18607 = vst [vmem:[#allocation9_spill] sm:$0xff] %v18606_v37  ;;  %v1368_v16 = vsel %vm13248_vm12, %v1363_v32, %v1367_v9  ;;  %v2021_v52 = vrot.slane %v2019_v23, 4  ;;  %v2015_v55 = vrot.slane %v13083_v50, 5  ;;  %v1378_v56 = vsel %vm13248_vm12, %v1373_v21, %v1377_v2  ;;  %952 = vst.msk [vmem:[#allocation2 + $0xb8] sm:$0xf] %vm280_vm1, %v782_v42 }
  0xa2   : > { %955 = vst [vmem:[#allocation2 + $0xbc] sm:$0x1] %v954_v48  ;;  %v2014_v57 = vrot.slane %v2012_v44, 4  ;;  %v13670_v34 = vsel %vm13649_vm2, %v11205_v25, %v2019_v23  ;;  %v11154_v62 = vcombine.low %v1368_v16, %v1378_v56  ;;  %v13680_v0 = vsel %vm13649_vm2, %v11204_v39, %v2012_v44  ;;  %v1963_v23 = vld [vmem:[#allocation2 + $0x30] sm:$0xe] }
  0xa3   : > { %v13676_v63 = vsel %vm13649_vm2, %v2021_v52, %v2022_v17  ;;  %v2026_v9 = vrot.slane %v13084_v1, 5  ;;  %v11206_v2 = vrot.slane %v1961_v59, 9  ;;  %v2029_v54 = vrot.slane %v13085_v13, 5  ;;  %v13088_v32 = vld [vmem:[#allocation2 + $0x34] sm:$0xf] }
  0xa4   : > { %v11222_v53 = vcombine.low %v13670_v34, %v13676_v63  ;;  %12378 = vmatprep.mubr.msk.bf16.mxu0 %vm1453_vm9, %v11154_v62  ;;  %v997_v12 = vld [vmem:[#allocation2 + $0xb4] sm:$0xf]  ;;  %v11207_v14 = vrot.slane %v1962_v60, 9  ;;  %v2033_v17 = vrot.slane %v13086_v18, 5  ;;  %v13687_v15 = vsel %vm13649_vm2, %v2014_v57, %v2015_v55  ;;  %v1964_v44 = vld [vmem:[#allocation2 + $0x3c] sm:$0xe] }
  0xa5   : > { %v1380_v4 = vshrl.u32 %v997_v12, 16  ;;  %v1383_v46 = vshll.u32 %v997_v12, 16  ;;  %v2028_v22 = vrot.slane %v2026_v9, 4  ;;  %v2036_v30 = vrot.slane %v13087_v29, 5  ;;  %v1965_v50 = vld [vmem:[#allocation2 + $0x48] sm:$0xe] }
  0xa6   : > { %v2035_v26 = vrot.slane %v2033_v17, 4  ;;  %v2040_v33 = vrot.slane %v13088_v32, 5  ;;  %v13691_v39 = vsel %vm1502_vm0, %v13407_v24, 0  ;;  %v11208_v40 = vrot.slane %v1963_v23, 9  ;;  %v13002_v60 = vld [vmem:[#allocation2 + $0xc] sm:$0xff]  }
  0xa7   : > { %v1382_v36 = vrot.slane %v1380_v4, 4  ;;  %v1385_v21 = vrot.slane %v1383_v46, 5  ;;  %v11221_v42 = vcombine.low %v13680_v0, %v13687_v15  ;;  %v13701_v48 = vsel %vm13649_vm2, %v11206_v2, %v2026_v9  ;;  %v13089_v23 = vld [vmem:[#allocation2 + $0x38] sm:$0x1]  ;;  %v13090_v4 = vld [vmem:[#allocation2 + $0x40] sm:$0xf] }
  0xa8   : > { %v13693_v25 = vld [vmem:[#allocation2 + $0xb8] sm:$0xf]  ;;  %v13705_v52 = vsel %vm13649_vm2, %v2028_v22, %v2029_v54  ;;  %v13709_v24 = vsel %vm13649_vm2, %v11207_v14, %v2033_v17  ;;  %v13717_v1 = vsel %vm13649_vm2, %v2035_v26, %v2036_v30  ;;  %v2042_v9 = vrot.slane %v2040_v33, 4  ;;  %v1966_v26 = vld [vmem:[#allocation2 + $0x54] sm:$0xe] }
  0xa9   : > { %v13695_v16 = vld [vmem:[#allocation2 + $0xbc] sm:$0x1]  ;;  %v1386_v55 = vor.u32 %v1385_v21, %v1382_v36  ;;  %v1389_v56 = vshll.u32 %v13693_v25, 16  ;;  %v1393_v57 = vshrl.u32 %v13693_v25, 16  ;;  %v11187_v62 = vcombine.low %v997_v12, %v13693_v25  ;;  %v13091_v12 = vld [vmem:[#allocation2 + $0x44] sm:$0x1] }
  0xaa   : > { %v1399_v59 = vshll.u32 %v13695_v16, 16  ;;  %v2043_v2 = vrot.slane %v13089_v23, 5  ;;  %v13721_v18 = vsel %vm13649_vm2, %v11208_v40, %v2040_v33  ;;  %v11209_v17 = vrot.slane %v1964_v44, 9  ;;  %v13092_v36 = vld [vmem:[#allocation2 + $0x4c] sm:$0xf] }
  0xab   : > { %v1387_v13 = vrot.slane %v1386_v55, 4  ;;  %v1391_v54 = vrot.slane %v1389_v56, 5  ;;  %v1395_v14 = vrot.slane %v1393_v57, 4  ;;  %12413 = vmatmul.mubr.msk.bf16.gmra.mxu1 %vm1453_vm9, %v11187_v62  ;;  %v2047_v46 = vrot.slane %v13090_v4, 5  ;;  %v13093_v55 = vld [vmem:[#allocation2 + $0x50] sm:$0x1] }
  0xac   : > { %v2050_v22 = vrot.slane %v13091_v12, 5  ;;  %v11210_v29 = vrot.slane %v1965_v50, 9  ;;  %v1401_v32 = vrot.slane %v1399_v59, 5  ;;  %12452 = vmatprep.mubr.msk.bf16.mxu1 %vm1453_vm9, %v13002_v60  ;;  %v2054_v21 = vrot.slane %v13092_v36, 5  ;;  %v1967_v60 = vld [vmem:[#allocation2 + $0x60] sm:$0xe] }
  0xad   : > { %v1396_v30 = vor.u32 %v1395_v14, %v1391_v54  ;;  %v2057_v56 = vrot.slane %v13093_v55, 5  ;;  %v1392_v33 = vsel %vm13248_vm12, %v1387_v13, %v1391_v54  ;;  %v13729_v40 = vsel %vm13649_vm2, %v2042_v9, %v2043_v2  ;;  %v13003_v14 = vld [vmem:[#allocation2 + $0x18] sm:$0xff]   ;;  %v13004_v54 = vld [vmem:[#allocation2 + $0x24] sm:$0xff]  }
  0xae   : > { %v2049_v44 = vrot.slane %v2047_v46, 4  ;;  %v2061_v57 = vrot.slane %v13410_v27, 5  ;;  %v2056_v62 = vrot.slane %v2054_v21, 4  ;;  %v11211_v23 = vrot.slane %v1966_v26, 9  ;;  %v1969_v12 = vld [vmem:[#allocation2 + $0x78] sm:$0xe] }
  0xaf   : > { %v1397_v50 = vrot.slane %v1396_v30, 4  ;;  %v2064_v59 = vrot.slane %v13412_v28, 5  ;;  %v13735_v4 = vsel %vm13649_vm2, %v11209_v17, %v2047_v46  ;;  %v13743_v9 = vsel %vm13649_vm2, %v11210_v29, %v2054_v21  ;;  %v1970_v36 = vld [vmem:[#allocation2 + $0x84] sm:$0xe]  ;;  %v1972_v15 = vld [vmem:[#allocation2 + $0x9c] sm:$0xe] }
  0xb0   : > { %v13739_v13 = vsel %vm13649_vm2, %v2049_v44, %v2050_v22  ;;  %v2063_v27 = vrot.slane %v2061_v57, 4  ;;  %v11223_v28 = vcombine.low %v13701_v48, %v13705_v52  ;;  %v13751_v17 = vsel %vm13649_vm2, %v2056_v62, %v2057_v56  ;;  %v399_v37 = vld [vmem:[#allocation3 + $0xc] sm:$0x1] }
  0xb1   : > { %v1402_v2 = vsel %vm13248_vm12, %v1397_v50, %v1401_v32  ;;  %v2068_v46 = vrot.slane %v13470_v5, 5  ;;  %v11224_v29 = vcombine.low %v13709_v24, %v13717_v1  ;;  %v11225_v26 = vcombine.low %v13721_v18, %v13729_v40  ;;  %v1968_v32 = vld [vmem:[#allocation2 + $0x6c] sm:$0xe] }
  0xb2   : > { %v11155_v22 = vcombine.low %v1392_v33, %v1402_v2  ;;  %v11212_v30 = vrot.slane %v1967_v60, 9  ;;  %v11226_v21 = vcombine.low %v13735_v4, %v13739_v13  ;;  %v11227_v55 = vcombine.low %v13743_v9, %v13751_v17 }
  0xb3   : > { %v13764_v5 = vsel %vm13649_vm2, %v11211_v23, %v2061_v57  ;;  %v13768_v56 = vsel %vm13649_vm2, %v2063_v27, %v2064_v59  ;;  %12453 = vmatmul.mubr.msk.bf16.vlgmr.msra.gmra.mxu1 %vm1453_vm9, %v13003_v14  ;;  %v2070_v33 = vrot.slane %v2068_v46, 4  ;;  %v2071_v44 = vrot.slane %v13463_v61, 5  ;;  %v1971_v14 = vld [vmem:[#allocation2 + $0x90] sm:$0xe] }
  0xb4   : > { %12379 = vmatmul.mubr.msk.bf16.gmra.mxu0 %vm1453_vm9, %v11155_v22  ;;  %v11214_v50 = vrot.slane %v1969_v12, 9  ;;  %v2082_v62 = vrot.slane %v13507_v3, 5  ;;  %12456 = vmatprep.mubr.msk.bf16.mxu1 %vm1453_vm9, %v13004_v54  ;;  %v11213_v57 = vrot.slane %v1968_v32, 9  ;;  %v2085_v23 = vrot.slane %v13509_v7, 5  ;;  %v13005_v54 = vld [vmem:[#allocation2 + $0x30] sm:$0xff]  }
  0xb5   : > { %12418 = vmatprep.mubr.msk.bf16.mxu0 %vm1453_vm9, %v11221_v42  ;;  %v11215_v59 = vrot.slane %v1970_v36, 9  ;;  %v2089_v60 = vrot.slane %v13543_v19, 5  ;;  %v13783_v61 = vsel %vm13649_vm2, %v11212_v30, %v2068_v46  ;;  %v2075_v3 = vrot.slane %v13489_v35, 5  ;;  %v1973_v32 = vld [vmem:[#allocation2 + $0xa8] sm:$0xe] }
  0xb6   : > { %v2078_v27 = vrot.slane %v13498_v41, 5  ;;  %v13789_v0 = vsel %vm13649_vm2, %v11214_v50, %v2082_v62  ;;  %v2084_v42 = vrot.slane %v2082_v62, 4  ;;  %v2092_v2 = vrot.slane %v13558_v43, 5  ;;  %v1974_v50 = vld [vmem:[#allocation2 + $0xb4] sm:$0xe] }
  0xb7   : > { %v13793_v7 = vsel %vm13649_vm2, %v11215_v59, %v2089_v60  ;;  %v2091_v19 = vrot.slane %v2089_v60, 4  ;;  %v13798_v46 = vsel %vm13649_vm2, %v2070_v33, %v2071_v44  ;;  %v11216_v12 = vrot.slane %v1971_v14, 9  ;;  %v338_v59 = vld [vmem:[#allocation2 + $0xc0] sm:$0x1]  ;;  %v3501_v41 = vld [vmem:[#allocation2 + $0x18] sm:$0xe] }
  0xb8   : > { %v2096_v22 = vrot.slane %v13589_v38, 5  ;;  %v2099_v30 = vrot.slane %v13592_v45, 5  ;;  %v13806_v36 = vsel %vm13649_vm2, %v11213_v57, %v2075_v3  ;;  %v13810_v43 = vsel %vm13649_vm2, %v2084_v42, %v2085_v23  ;;  %v13006_v38 = vld [vmem:[#allocation2 + $0x3c] sm:$0xff]  }
  0xb9   : > { %v13814_v33 = vsel %vm13649_vm2, %v2091_v19, %v2092_v2  ;;  %v11217_v44 = vrot.slane %v1972_v15, 9  ;;  %v11231_v45 = vcombine.low %v13789_v0, %v13810_v43  ;;  %v2103_v60 = vrot.slane %v13609_v10, 5  ;;  %v13830_v19 = vld [vmem:[%s18548_s1 + $0xc] sm:$0x3] }
  0xba   : > { %v11232_v62 = vcombine.low %v13793_v7, %v13814_v33  ;;  %v13822_v57 = vsel %vm13649_vm2, %v11216_v12, %v2096_v22  ;;  %v2098_v23 = vrot.slane %v2096_v22, 4  ;;  %v2106_v14 = vrot.slane %v13611_v11, 5  ;;  %v525_v12 = vld [vmem:[%s13229_s12 + $0x78] sm:$0xf] }
  0xbb   : > { %v11218_v15 = vrot.slane %v1973_v32, 9  ;;  %v2110_v42 = vrot.slane %v13625_v31, 5  ;;  %12457 = vmatmul.mubr.msk.bf16.gmra.mxu1 %vm1453_vm9, %v13005_v54  ;;  %v2113_v11 = vrot.slane %v13627_v49, 5  ;;  %v11219_v2 = vrot.slane %v1974_v50, 9  ;;  %v13007_v50 = vld [vmem:[#allocation2 + $0x48] sm:$0xff]  }
  0xbc   : > { %12419 = vmatmul.mubr.msk.bf16.vlgmr.msra.gmra.mxu0 %vm1453_vm9, %v11222_v53  ;;  %v13839_v10 = vsel %vm13649_vm2, %v2098_v23, %v2099_v30  ;;  %v2117_v31 = vrot.slane %v13693_v25, 5  ;;  %v13853_v63 = vsel %vm13649_vm2, %v11217_v44, %v2103_v60  ;;  %v2105_v53 = vrot.slane %v2103_v60, 4  ;;  %v526_v25 = vld [vmem:[%s13229_s12 + $0x7c] sm:$0xf]  ;;  %12460 = vmatprep.mubr.msk.bf16.mxu1 %vm1453_vm9, %v13006_v38  ;;  %v2774_v44 = vld [vmem:[#allocation2 + $0xc] sm:$0xf] }
  0xbd   : > { %12485 = vmatpush3.bf16.msra.mxu0 %v13691_v39  ;;  %12422 = vmatprep.mubr.msk.bf16.mxu0 %vm1453_vm9, %v11223_v28  ;;  %v11233_v34 = vcombine.low %v13822_v57, %v13839_v10  ;;  %v13857_v49 = vsel %vm13649_vm2, %v11218_v15, %v2110_v42  ;;  %v2112_v39 = vrot.slane %v2110_v42, 4  ;;  %v2120_v28 = vrot.slane %v13695_v16, 5  ;;  %v13008_v38 = vld [vmem:[#allocation2 + $0x54] sm:$0xff]   ;;  %v13884_v15 = vld [vmem:[#allocation2 + $0x10] sm:$0xf] }
  0xbe   : > { %v13863_v48 = vsel %vm13649_vm2, %v11219_v2, %v2117_v31  ;;  %v2119_v52 = vrot.slane %v2117_v31, 4  ;;  %12966 = vmatprep.subr.msk.bf16.mxu0 %vm1502_vm0, %v13830_v19  ;;  %v13870_v54 = vsel %vm13649_vm2, %v2105_v53, %v2106_v14  ;;  %v339_v22 = vsel %vm13193_vm5, 0, %v338_v59  ;;  %v14119_v57 = vld [vmem:[#allocation2 + $0x64] sm:$0xf] }
  0xbf   : > { %v785_v30 = vshrl.u32 %v525_v12, 16  ;;  %v788_v32 = vshll.u32 %v525_v12, 16  ;;  %v13878_v16 = vsel %vm13649_vm2, %v2112_v39, %v2113_v11  ;;  %340 = vst [vmem:[#allocation2 + $0xc0] sm:$0x1] %v339_v22  ;;  %v793_v14 = vshrl.u32 %v526_v25, 16 }
  0xc0   : > { %v13882_v60 = vsel %vm13649_vm2, %v2119_v52, %v2120_v28  ;;  %v796_v31 = vshll.u32 %v526_v25, 16  ;;  %v13890_v12 = vld [vmem:[#allocation2 + $0x14] sm:$0x1]  ;;  %v2777_v11 = vld [vmem:[#allocation2 + $0x18] sm:$0xf]  ;;  %v3775_v39 = vsel %vm1502_vm0, %v13644_v20, 0 }
  0xc1   : > { %v787_v2 = vrot.slane %v785_v30, 7  ;;  %v13892_v53 = vrot.slane %v793_v14, 7  ;;  %v2823_v52 = vshrl.u32 %v2774_v44, 16  ;;  %v2826_v28 = vshll.u32 %v2774_v44, 16  ;;  %v13896_v22 = vld [vmem:[#allocation2 + $0x1c] sm:$0xf]  ;;  %12519 = vmatpush3.bf16.msra.mxu1 %v3775_v39 }
  0xc2   : > { %v2077_v59 = vrot.slane %v2075_v3, 4  ;;  %v2832_v30 = vshll.u32 %v13884_v15, 16  ;;  %v2836_v25 = vshrl.u32 %v13884_v15, 16  ;;  %v11401_v14 = vld [vmem:[%s18548_s1 + $0xe] sm:$0x3]  ;;  %v2842_v1 = vshll.u32 %v13890_v12, 16 }
  0xc3   : > { %v791_v23 = vrot.slane %v787_v2, 4  ;;  %12461 = vmatmul.mubr.msk.bf16.gmra.mxu1 %vm1453_vm9, %v13007_v50  ;;  %v790_v20 = vor.u32 %v788_v32, %v787_v2  ;;  %v798_v35 = vor.u32 %v796_v31, %v13892_v53  ;;  %v2825_v3 = vrot.slane %v2823_v52, 4  ;;  %v13911_v39 = vld [vmem:[#allocation2 + $0x20] sm:$0x1]  ;;  %v3500_v52 = vld [vmem:[#allocation2 + $0xc] sm:$0xe]  ;;  %12967 = vmatprep.subr.msk.bf16.mxu1 %vm1502_vm0, %v11401_v14 }
  0xc4   : > { %12423 = vmatmul.mubr.msk.bf16.gmra.mxu0 %vm1453_vm9, %v11224_v29  ;;  %v2828_v44 = vrot.slane %v2826_v28, 5  ;;  %12464 = vmatprep.mubr.msk.bf16.mxu1 %vm1453_vm9, %v13008_v38  ;;  %v2834_v42 = vrot.slane %v2832_v30, 5  ;;  %v2838_v24 = vrot.slane %v2836_v25, 4  ;;  %v2847_v29 = vshrl.u32 %v2777_v11, 16  ;;  %v13009_v30 = vld [vmem:[#allocation2 + $0x60] sm:$0xff]  }
  0xc5   : > { %12426 = vmatprep.mubr.msk.bf16.mxu0 %vm1453_vm9, %v11225_v26  ;;  %v799_v32 = vsel %vm13254_vm13, %v791_v23, %v798_v35  ;;  %v2850_v2 = vshll.u32 %v2777_v11, 16  ;;  %v2856_v31 = vshll.u32 %v13896_v22, 16  ;;  %v2844_v26 = vrot.slane %v2842_v1, 5 }
  0xc6   : > { %v2829_v50 = vor.u32 %v2828_v44, %v2825_v3  ;;  %v956_v18 = vld [vmem:[#allocation2 + $0xc0] sm:$0xf]  ;;  %959 = vst.msk [vmem:[#allocation2 + $0xc4] sm:$0xf] %vm280_vm1, %v799_v32  ;;  %v2839_v40 = vor.u32 %v2838_v24, %v2834_v42  ;;  %v2849_v38 = vrot.slane %v2847_v29, 4  ;;  %v2860_v28 = vshrl.u32 %v13896_v22, 16 }
  0xc7   : > { %v957_v25 = vsel %vm13238_vm11, %v790_v20, %v956_v18  ;;  %v2852_v35 = vrot.slane %v2850_v2, 5  ;;  %v13927_v11 = vrot.slane %v2856_v31, 5  ;;  %v13933_v14 = vsel %vm13649_vm2, %v2077_v59, %v2078_v27  ;;  %v13010_v3 = vld [vmem:[#allocation2 + $0x6c] sm:$0xff]   ;;  %v2780_v18 = vld [vmem:[#allocation2 + $0x24] sm:$0xf] }
  0xc8   : > { %v2830_v23 = vrot.slane %v2829_v50, 4  ;;  %958 = vst [vmem:[#allocation2 + $0xc0] sm:$0xf] %v957_v25  ;;  %v2840_v44 = vrot.slane %v2839_v40, 4  ;;  %v2862_v24 = vrot.slane %v2860_v28, 4  ;;  %v2866_v1 = vshll.u32 %v13911_v39, 16 }
  0xc9   : > { %v11228_v29 = vcombine.low %v13764_v5, %v13768_v56  ;;  %v11229_v20 = vcombine.low %v13783_v61, %v13798_v46  ;;  %v2853_v32 = vor.u32 %v2852_v35, %v2849_v38  ;;  %v3566_v50 = vrot.slane %v13884_v15, 5  ;;  %v13946_v40 = vld [vmem:[#allocation2 + $0x28] sm:$0xf]  ;;  %v2783_v15 = vld [vmem:[#allocation2 + $0x30] sm:$0xf] }
  0xca   : > { %v2835_v27 = vsel %vm13248_vm12, %v2830_v23, %v2834_v42  ;;  %v2845_v59 = vsel %vm13248_vm12, %v2840_v44, %v2844_v26  ;;  %v2863_v2 = vor.u32 %v2862_v24, %v13927_v11  ;;  %v11319_v31 = vrot.slane %v3500_v52, 9  ;;  %v13967_v52 = vld [vmem:[#allocation2 + $0x2c] sm:$0x1]  ;;  %v13011_v26 = vld [vmem:[#allocation2 + $0x78] sm:$0xff]   ;;  %v13012_v44 = vld [vmem:[#allocation2 + $0x84] sm:$0xff]  }
  0xcb   : > { %12465 = vmatmul.mubr.msk.bf16.gmra.mxu1 %vm1453_vm9, %v13009_v30  ;;  %v11230_v5 = vcombine.low %v13806_v36, %v13933_v14  ;;  %v13956_v61 = vrot.slane %v2853_v32, 4  ;;  %v13958_v46 = vrot.slane %v2866_v1, 5  ;;  %v3568_v13 = vrot.slane %v3566_v50, 4  ;;  %v13995_v32 = vld [vmem:[#allocation2 + $0x38] sm:$0x1] }
  0xcc   : > { %12427 = vmatmul.mubr.msk.bf16.gmra.mxu0 %vm1453_vm9, %v11226_v21  ;;  %12468 = vmatprep.mubr.msk.bf16.mxu1 %vm1453_vm9, %v13010_v3  ;;  %v2864_v4 = vrot.slane %v2863_v2, 4  ;;  %v3569_v21 = vrot.slane %v13890_v12, 5  ;;  %v3573_v42 = vrot.slane %v13896_v22, 5  ;;  %v13969_v38 = vcombine.low %v2835_v27, %v2845_v59 }
  0xcd   : > { %12430 = vmatprep.mubr.msk.bf16.mxu0 %vm1453_vm9, %v11227_v55  ;;  %v13973_v28 = vsel %vm1502_vm0, %v13830_v19, 0  ;;  %v2871_v9 = vshrl.u32 %v2780_v18, 16  ;;  %v2874_v17 = vshll.u32 %v2780_v18, 16  ;;  %v13975_v55 = vld [vmem:[#allocation2 + $0x34] sm:$0xf]  ;;  %v2859_v12 = vsel %vm13248_vm12, %v13956_v61, %v13927_v11 }
  0xce   : > { %v13983_v22 = vsel %vm13649_vm2, %v11319_v31, %v3566_v50  ;;  %v11320_v30 = vrot.slane %v3501_v41, 9  ;;  %v3576_v25 = vrot.slane %v13911_v39, 5  ;;  %v3575_v23 = vrot.slane %v3573_v42, 4 }
  0xcf   : > { %v2873_v35 = vrot.slane %v2871_v9, 4  ;;  %v2876_v19 = vrot.slane %v2874_v17, 5  ;;  %v2880_v3 = vshll.u32 %v13946_v40, 16  ;;  %v2869_v24 = vsel %vm13248_vm12, %v2864_v4, %v13958_v46  ;;  %v3502_v46 = vld [vmem:[#allocation2 + $0x24] sm:$0xe] }
  0xd0   : > { %v13992_v11 = vsel %vm13649_vm2, %v3568_v13, %v3569_v21  ;;  %v2884_v1 = vshrl.u32 %v13946_v40, 16  ;;  %v2895_v50 = vshrl.u32 %v2783_v15, 16  ;;  %v2890_v27 = vshll.u32 %v13967_v52, 16 }
  0xd1   : > { %v2877_v39 = vor.u32 %v2876_v19, %v2873_v35  ;;  %v2882_v41 = vrot.slane %v2880_v3, 5  ;;  %v2898_v59 = vshll.u32 %v2783_v15, 16  ;;  %v14000_v2 = vsel %vm13649_vm2, %v11320_v30, %v3573_v42  ;;  %v13013_v30 = vld [vmem:[#allocation2 + $0x90] sm:$0xff]   ;;  %v2786_v3 = vld [vmem:[#allocation2 + $0x3c] sm:$0xf] }
  0xd2   : > { %v2886_v31 = vrot.slane %v2884_v1, 4  ;;  %v2897_v18 = vrot.slane %v2895_v50, 4  ;;  %v2904_v61 = vshll.u32 %v13975_v55, 16  ;;  %v14007_v4 = vsel %vm13649_vm2, %v3575_v23, %v3576_v25  ;;  %v13014_v1 = vld [vmem:[#allocation2 + $0x9c] sm:$0xff]  }
  0xd3   : > { %12469 = vmatmul.mubr.msk.bf16.gmra.mxu1 %vm1453_vm9, %v13011_v26  ;;  %v2900_v13 = vrot.slane %v2898_v59, 5  ;;  %v2908_v15 = vshrl.u32 %v13975_v55, 16  ;;  %v2914_v21 = vshll.u32 %v13995_v32, 16  ;;  %v2878_v42 = vrot.slane %v2877_v39, 4  ;;  %v3503_v26 = vld [vmem:[#allocation2 + $0x30] sm:$0xe] }
  0xd4   : > { %12431 = vmatmul.mubr.msk.bf16.gmra.mxu0 %vm1453_vm9, %v11228_v29  ;;  %12472 = vmatprep.mubr.msk.bf16.mxu1 %vm1453_vm9, %v13012_v44  ;;  %v2887_v9 = vor.u32 %v2886_v31, %v2882_v41  ;;  %v14013_v17 = vrot.slane %v2904_v61, 5  ;;  %v3580_v29 = vrot.slane %v13946_v40, 5  ;;  %v2892_v35 = vrot.slane %v2890_v27, 5  ;;  %v14019_v39 = vld [vmem:[#allocation2 + $0x40] sm:$0xf] }
  0xd5   : > { %12434 = vmatprep.mubr.msk.bf16.mxu0 %vm1453_vm9, %v11229_v20  ;;  %v2901_v25 = vor.u32 %v2900_v13, %v2897_v18  ;;  %v2910_v23 = vrot.slane %v2908_v15, 4  ;;  %v11321_v19 = vrot.slane %v3502_v46, 9  ;;  %v11336_v50 = vcombine.low %v13983_v22, %v13992_v11  ;;  %v14027_v18 = vld [vmem:[#allocation2 + $0x44] sm:$0x1]  ;;  %v2798_v11 = vld [vmem:[#allocation2 + $0x6c] sm:$0xf] }
  0xd6   : > { %v2888_v20 = vrot.slane %v2887_v9, 4  ;;  %v3582_v59 = vrot.slane %v3580_v29, 4  ;;  %v3583_v44 = vrot.slane %v13967_v52, 5  ;;  %v14021_v31 = vcombine.low %v2859_v12, %v2869_v24  ;;  %v2789_v9 = vld [vmem:[#allocation2 + $0x48] sm:$0xf] }
  0xd7   : > { %v2911_v40 = vor.u32 %v2910_v23, %v14013_v17  ;;  %v14024_v61 = vrot.slane %v2914_v21, 5  ;;  %v3587_v27 = vrot.slane %v13975_v55, 5  ;;  %v11337_v46 = vcombine.low %v14000_v2, %v14007_v4 }
  0xd8   : > { %v2883_v13 = vsel %vm13248_vm12, %v2878_v42, %v2882_v41  ;;  %v14033_v15 = vrot.slane %v2901_v25, 4  ;;  %v2919_v52 = vshrl.u32 %v2786_v3, 16  ;;  %v2893_v12 = vsel %vm13248_vm12, %v2888_v20, %v2892_v35 }
  0xd9   : > { %v2912_v24 = vrot.slane %v2911_v40, 4  ;;  %v14039_v21 = vsel %vm13649_vm2, %v11321_v19, %v3580_v29  ;;  %v11322_v55 = vrot.slane %v3503_v26, 9  ;;  %v14043_v23 = vsel %vm13649_vm2, %v3582_v59, %v3583_v44  ;;  %v14054_v19 = vld [vmem:[#allocation2 + $0x4c] sm:$0xf] }
  0xda   : > { %v3590_v56 = vrot.slane %v13995_v32, 5  ;;  %v2921_v41 = vrot.slane %v2919_v52, 4  ;;  %v2922_v42 = vshll.u32 %v2786_v3, 16  ;;  %v3589_v35 = vrot.slane %v3587_v27, 4  ;;  %v14067_v32 = vld [vmem:[#allocation2 + $0x50] sm:$0x1] }
  0xdb   : > { %12473 = vmatmul.mubr.msk.bf16.gmra.mxu1 %vm1453_vm9, %v13013_v30  ;;  %v2928_v29 = vshll.u32 %v14019_v39, 16  ;;  %v2932_v26 = vshrl.u32 %v14019_v39, 16  ;;  %v2938_v25 = vshll.u32 %v14027_v18, 16  ;;  %v14061_v36 = vcombine.low %v2883_v13, %v2893_v12  ;;  %v13015_v40 = vld [vmem:[#allocation2 + $0xa8] sm:$0xff]   ;;  %v13016_v13 = vld [vmem:[#allocation2 + $0xb4] sm:$0xff]  }
  0xdc   : > { %12435 = vmatmul.mubr.msk.bf16.gmra.mxu0 %vm1453_vm9, %v11230_v5  ;;  %12476 = vmatprep.mubr.msk.bf16.mxu1 %vm1453_vm9, %v13014_v1  ;;  %v2907_v14 = vsel %vm13248_vm12, %v14033_v15, %v14013_v17  ;;  %v2924_v5 = vrot.slane %v2922_v42, 5  ;;  %v2943_v30 = vshrl.u32 %v2789_v9, 16  ;;  %v2917_v3 = vsel %vm13248_vm12, %v2912_v24, %v14024_v61  ;;  %v3504_v1 = vld [vmem:[#allocation2 + $0x3c] sm:$0xe] }
  0xdd   : > { %12438 = vmatprep.mubr.msk.bf16.mxu0 %vm1453_vm9, %v11231_v45  ;;  %v14074_v0 = vsel %vm13649_vm2, %v11322_v55, %v3587_v27  ;;  %v2930_v43 = vrot.slane %v2928_v29, 5  ;;  %v2934_v45 = vrot.slane %v2932_v26, 4  ;;  %v2946_v44 = vshll.u32 %v2789_v9, 16 }
  0xde   : > { %v2925_v20 = vor.u32 %v2924_v5, %v2921_v41  ;;  %v2945_v59 = vrot.slane %v2943_v30, 4  ;;  %v2952_v17 = vshll.u32 %v14054_v19, 16  ;;  %v14079_v15 = vsel %vm13649_vm2, %v3589_v35, %v3590_v56  ;;  %v3505_v5 = vld [vmem:[#allocation2 + $0x48] sm:$0xe] }
  0xdf   : > { %v2935_v52 = vor.u32 %v2934_v45, %v2930_v43  ;;  %v2940_v61 = vrot.slane %v2938_v25, 5  ;;  %v2956_v12 = vshrl.u32 %v14054_v19, 16  ;;  %v2948_v24 = vrot.slane %v2946_v44, 5  ;;  %v2792_v45 = vld [vmem:[#allocation2 + $0x54] sm:$0xf] }
  0xe0   : > { %v2926_v27 = vrot.slane %v2925_v20, 4  ;;  %v14082_v55 = vrot.slane %v2952_v17, 5  ;;  %v3594_v41 = vrot.slane %v14019_v39, 5  ;;  %v2962_v29 = vshll.u32 %v14067_v32, 16  ;;  %v2795_v17 = vld [vmem:[#allocation2 + $0x60] sm:$0xf] }
  0xe1   : > { %v2936_v42 = vrot.slane %v2935_v52, 4  ;;  %v2958_v9 = vrot.slane %v2956_v12, 4  ;;  %v11323_v26 = vrot.slane %v3504_v1, 9  ;;  %v2949_v35 = vor.u32 %v2948_v24, %v2945_v59  ;;  %v14100_v59 = vld [vmem:[#allocation2 + $0x58] sm:$0xf] }
  0xe2   : > { %v2931_v56 = vsel %vm13248_vm12, %v2926_v27, %v2930_v43  ;;  %v3596_v30 = vrot.slane %v3594_v41, 4  ;;  %v3597_v25 = vrot.slane %v14027_v18, 5  ;;  %v11338_v39 = vcombine.low %v14039_v21, %v14043_v23  ;;  %v14102_v18 = vld [vmem:[#allocation2 + $0x5c] sm:$0x1] }
  0xe3   : > { %12477 = vmatmul.mubr.msk.bf16.gmra.mxu1 %vm1453_vm9, %v13015_v40  ;;  %v2941_v1 = vsel %vm13248_vm12, %v2936_v42, %v2940_v61  ;;  %v2959_v43 = vor.u32 %v2958_v9, %v14082_v55  ;;  %v3601_v20 = vrot.slane %v14054_v19, 5  ;;  %v14109_v7 = vcombine.low %v2907_v14, %v2917_v3 }
  0xe4   : > { %12439 = vmatmul.mubr.msk.bf16.gmra.mxu0 %vm1453_vm9, %v11232_v62  ;;  %12480 = vmatprep.mubr.msk.bf16.mxu1 %vm1453_vm9, %v13016_v13  ;;  %v11339_v33 = vcombine.low %v14074_v0, %v14079_v15  ;;  %v2950_v62 = vrot.slane %v2949_v35, 4  ;;  %v11324_v44 = vrot.slane %v3505_v5, 9  ;;  %v14113_v19 = vcombine.low %v2931_v56, %v2941_v1  ;;  %v13017_v13 = vld [vmem:[#allocation2 + $0xc0] sm:$0xff]  }
  0xe5   : > { %12442 = vmatprep.mubr.msk.bf16.mxu0 %vm1453_vm9, %v11233_v34  ;;  %v2960_v40 = vrot.slane %v2959_v43, 4  ;;  %v2964_v52 = vrot.slane %v2962_v29, 5  ;;  %v14117_v61 = vsel %vm13649_vm2, %v11323_v26, %v3594_v41  ;;  %v14123_v10 = vsel %vm13649_vm2, %v3596_v30, %v3597_v25  ;;  %v3506_v43 = vld [vmem:[#allocation2 + $0x54] sm:$0xe] }
  0xe6   : > { %v2967_v34 = vshrl.u32 %v2792_v45, 16  ;;  %v2970_v14 = vshll.u32 %v2792_v45, 16  ;;  %v2976_v3 = vshll.u32 %v14100_v59, 16  ;;  %v3603_v12 = vrot.slane %v3601_v20, 4 }
  0xe7   : > { %v3604_v27 = vrot.slane %v14067_v32, 5  ;;  %v2980_v24 = vshrl.u32 %v14100_v59, 16  ;;  %v2986_v42 = vshll.u32 %v14102_v18, 16  ;;  %v2955_v41 = vsel %vm13248_vm12, %v2950_v62, %v14082_v55  ;;  %v14138_v32 = vld [vmem:[#allocation2 + $0x68] sm:$0x1] }
  0xe8   : > { %v14134_v9 = vsel %vm13649_vm2, %v11324_v44, %v3601_v20  ;;  %v2969_v29 = vrot.slane %v2967_v34, 4  ;;  %v2972_v26 = vrot.slane %v2970_v14, 5  ;;  %v2965_v5 = vsel %vm13248_vm12, %v2960_v40, %v2964_v52 }
  0xe9   : > { %v2978_v56 = vrot.slane %v2976_v3, 5  ;;  %v2982_v35 = vrot.slane %v2980_v24, 4  ;;  %v2991_v30 = vshrl.u32 %v2795_v17, 16  ;;  %v2994_v45 = vshll.u32 %v2795_v17, 16  ;;  %v3507_v17 = vld [vmem:[#allocation2 + $0x60] sm:$0xe] }
  0xea   : > { %v2973_v25 = vor.u32 %v2972_v26, %v2969_v29  ;;  %v3000_v1 = vshll.u32 %v14119_v57, 16  ;;  %v3004_v55 = vshrl.u32 %v14119_v57, 16  ;;  %v18608_v20 = vcombine.low %v13853_v63, %v13870_v54 }
  0xeb   : > { %12481 = vmatmul.mubr.msk.bf16.gmra.mxu1 %vm1453_vm9, %v13017_v13  ;;  %v14149_v62 = vsel %vm13649_vm2, %v3603_v12, %v3604_v27  ;;  %v2983_v44 = vor.u32 %v2982_v35, %v2978_v56  ;;  %v2988_v40 = vrot.slane %v2986_v42, 5  ;;  %v2993_v52 = vrot.slane %v2991_v30, 4  ;;  %v14170_v30 = vld [vmem:[#allocation2 + $0x70] sm:$0xf] }
  0xec   : > { %12443 = vmatmul.mubr.msk.bf16.gmra.mxu0 %vm1453_vm9, %v18608_v20  ;;  %v18609_v34 = vcombine.low %v13857_v49, %v13878_v16  ;;  %12520 = vmatprep.mubr.msk.bf16.mxu1 %vm1453_vm9, %v11336_v50  ;;  %v2974_v63 = vrot.slane %v2973_v25, 4  ;;  %v2996_v54 = vrot.slane %v2994_v45, 5  ;;  %v14159_v14 = vrot.slane %v3000_v1, 5  ;;  %v2801_v1 = vld [vmem:[#allocation2 + $0x78] sm:$0xf] }
  0xed   : > { %v3006_v3 = vrot.slane %v3004_v55, 4  ;;  %v2984_v13 = vrot.slane %v2983_v44, 4  ;;  %v3010_v12 = vshll.u32 %v14138_v32, 16  ;;  %v11325_v27 = vrot.slane %v3506_v43, 9 }
  0xee   : > { %12446 = vmatprep.mubr.msk.bf16.mxu0 %vm1453_vm9, %v18609_v34  ;;  %v3608_v24 = vrot.slane %v14100_v59, 5  ;;  %v2979_v49 = vsel %vm13248_vm12, %v2974_v63, %v2978_v56  ;;  %v2997_v16 = vor.u32 %v2996_v54, %v2993_v52  ;;  %v3611_v22 = vrot.slane %v14102_v18, 5  ;;  %v14178_v18 = vld [vmem:[#allocation2 + $0x74] sm:$0x1] }
  0xef   : > { %v3007_v42 = vor.u32 %v3006_v3, %v14159_v14  ;;  %v2989_v50 = vsel %vm13248_vm12, %v2984_v13, %v2988_v40  ;;  %v11326_v26 = vrot.slane %v3507_v17, 9  ;;  %v3615_v35 = vrot.slane %v14119_v57, 5  ;;  %v14181_v57 = vld [vmem:[#allocation2 + $0x7c] sm:$0xf]  ;;  %v14219_v3 = vld [vmem:[#allocation2 + $0x80] sm:$0x1] }
  0xf0   : > { %v3610_v29 = vrot.slane %v3608_v24, 4  ;;  %v14172_v25 = vcombine.low %v2955_v41, %v2965_v5  ;;  %v11340_v59 = vcombine.low %v14117_v61, %v14123_v10  ;;  %v11341_v56 = vcombine.low %v14134_v9, %v14149_v62  ;;  %v2807_v61 = vld [vmem:[#allocation2 + $0x90] sm:$0xf] }
  0xf1   : > { %v2998_v45 = vrot.slane %v2997_v16, 4  ;;  %v3008_v55 = vrot.slane %v3007_v42, 4  ;;  %v3012_v43 = vrot.slane %v3010_v12, 5  ;;  %v3618_v20 = vrot.slane %v14138_v32, 5 }
  0xf2   : > { %v3015_v44 = vshrl.u32 %v2798_v11, 16  ;;  %v14183_v40 = vcombine.low %v2979_v49, %v2989_v50  ;;  %v14187_v41 = vsel %vm13649_vm2, %v11325_v27, %v3608_v24  ;;  %v3617_v5 = vrot.slane %v3615_v35, 4  ;;  %v3508_v27 = vld [vmem:[#allocation2 + $0x6c] sm:$0xe] }
  0xf3   : > { %v3018_v52 = vshll.u32 %v2798_v11, 16  ;;  %v18610_v17 = vcombine.low %v13863_v48, %v13882_v60  ;;  %12521 = vmatmul.mubr.msk.bf16.vlgmr.msra.gmra.mxu1 %vm1453_vm9, %v11337_v46  ;;  %v14199_v32 = vsel %vm13649_vm2, %v3610_v29, %v3611_v22  ;;  %v14203_v34 = vsel %vm13649_vm2, %v11326_v26, %v3615_v35  ;;  %v3509_v22 = vld [vmem:[#allocation2 + $0x78] sm:$0xe]  ;;  %v2804_v35 = vld [vmem:[#allocation2 + $0x84] sm:$0xf] }
  0xf4   : > { %v3017_v63 = vrot.slane %v3015_v44, 4  ;;  %v3024_v54 = vshll.u32 %v14170_v30, 16  ;;  %12524 = vmatprep.mubr.msk.bf16.mxu1 %vm1453_vm9, %v11338_v39  ;;  %v3003_v48 = vsel %vm13248_vm12, %v2998_v45, %v14159_v14  ;;  %v3028_v2 = vshrl.u32 %v14170_v30, 16  ;;  %v14243_v44 = vpop.f32.mrf.mxu1 }
  0xf5   : > { %12447 = vmatmul.mubr.msk.bf16.gmra.mxu0 %vm1453_vm9, %v18610_v17  ;;  %v3020_v60 = vrot.slane %v3018_v52, 5  ;;  %v3034_v4 = vshll.u32 %v14178_v18, 16  ;;  %v3039_v13 = vshrl.u32 %v2801_v1, 16  ;;  %v3048_v12 = vshll.u32 %v14181_v57, 16 }
  0xf6   : > { %12486 = vmatprep.mubr.msk.bf16.mxu0 %vm1453_vm9, %v13969_v38  ;;  %v14217_v46 = vrot.slane %v3024_v54, 5  ;;  %v3042_v38 = vshll.u32 %v2801_v1, 16  ;;  %v3013_v21 = vsel %vm13248_vm12, %v3008_v55, %v3012_v43  ;;  %v3030_v39 = vrot.slane %v3028_v2, 4  ;;  %v14251_v54 = vld [vmem:[#allocation2 + $0x88] sm:$0xf]  ;;  %v14289_v10 = vpop.f32.mrf.mxu1 }
  0xf7   : > { %v3021_v23 = vor.u32 %v3020_v60, %v3017_v63  ;;  %v3052_v14 = vshrl.u32 %v14181_v57, 16  ;;  %v14227_v24 = vsel %vm13649_vm2, %v3617_v5, %v3618_v20  ;;  %v3041_v49 = vrot.slane %v3039_v13, 4  ;;  %v14241_v20 = vld [vmem:[%s18548_s1 + $0x10] sm:$0x3] }
  0xf8   : > { %v3044_v16 = vrot.slane %v3042_v38, 5  ;;  %v14229_v42 = vrot.slane %v3048_v12, 5  ;;  %v3031_v11 = vor.u32 %v3030_v39, %v14217_v46  ;;  %v14232_v50 = vrot.slane %v3034_v4, 5  ;;  %v14306_v39 = vld [vmem:[#allocation2 + $0x94] sm:$0xf] }
  0xf9   : > { %v3054_v29 = vrot.slane %v3052_v14, 4  ;;  %v3058_v26 = vshll.u32 %v14219_v3, 16  ;;  %v14235_v45 = vrot.slane %v3021_v23, 4  ;;  %v11327_v55 = vrot.slane %v3508_v27, 9 }
  0xfa   : > { %v3045_v1 = vor.u32 %v3044_v16, %v3041_v49  ;;  %v3622_v43 = vrot.slane %v14170_v30, 5  ;;  %v11342_v5 = vcombine.low %v14187_v41, %v14199_v32  ;;  %v14247_v52 = vrot.slane %v3031_v11, 4 }
  0xfb   : > { %v3055_v17 = vor.u32 %v3054_v29, %v14229_v42  ;;  %v3625_v63 = vrot.slane %v14178_v18, 5  ;;  %12525 = vmatmul.mubr.msk.bf16.gmra.mxu1 %vm1453_vm9, %v11339_v33  ;;  %v14259_v30 = vcombine.low %v3003_v48, %v3013_v21  ;;  %v3629_v32 = vrot.slane %v14181_v57, 5  ;;  %v14287_v48 = vld [vmem:[#allocation2 + $0x8c] sm:$0x1]  ;;  %v14302_v13 = vpop.f32.mrf.mxu0  ;;  %v3510_v29 = vld [vmem:[#allocation2 + $0x84] sm:$0xe] }
  0xfc   : > { %v14261_v60 = vrot.slane %v3045_v1, 4  ;;  %v3624_v41 = vrot.slane %v3622_v43, 4  ;;  %v14269_v18 = vrot.slane %v3058_v26, 5  ;;  %v11328_v0 = vrot.slane %v3509_v22, 9  ;;  %12528 = vmatprep.mubr.msk.bf16.mxu1 %vm1453_vm9, %v11340_v59  ;;  %v14318_v26 = vpop.f32.mrf.mxu1 }
  0xfd   : > { %12487 = vmatmul.mubr.msk.bf16.vlgmr.msra.gmra.mxu0 %vm1453_vm9, %v14021_v31  ;;  %v11343_v31 = vcombine.low %v14203_v34, %v14227_v24  ;;  %v3063_v15 = vshrl.u32 %v2804_v35, 16  ;;  %v3056_v33 = vrot.slane %v3055_v17, 4  ;;  %v14285_v57 = vsel %vm13649_vm2, %v11327_v55, %v3622_v43  ;;  %v14325_v43 = vpop.f32.mrf.mxu0 }
  0xfe   : > { %12553 = vmatpush3.bf16.msra.mxu0 %v13973_v28  ;;  %12490 = vmatprep.mubr.msk.bf16.mxu0 %vm1453_vm9, %v14061_v36  ;;  %v3027_v28 = vsel %vm13248_vm12, %v14235_v45, %v14217_v46  ;;  %v3037_v36 = vsel %vm13248_vm12, %v14247_v52, %v14232_v50  ;;  %v3051_v59 = vsel %vm13248_vm12, %v14261_v60, %v14229_v42  ;;  %v3631_v4 = vrot.slane %v3629_v32, 4 }
  0xff   : > { %v14297_v2 = vsel %vm13649_vm2, %v3624_v41, %v3625_v63  ;;  %v3632_v46 = vrot.slane %v14219_v3, 5  ;;  %12968 = vmatprep.subr.msk.bf16.mxu0 %vm1502_vm0, %v14241_v20  ;;  %v3065_v38 = vrot.slane %v3063_v15, 4  ;;  %v3066_v12 = vshll.u32 %v2804_v35, 16  ;;  %v14313_v3 = vld [vmem:[#allocation2 + $0x98] sm:$0x1]  ;;  %v14343_v15 = vpop.f32.mrf.mxu1 }
 0x100   : > { %v3072_v21 = vshll.u32 %v14251_v54, 16  ;;  %v3076_v23 = vshrl.u32 %v14251_v54, 16  ;;  %v14310_v14 = vsel %vm13649_vm2, %v11328_v0, %v3629_v32  ;;  %v3082_v27 = vshll.u32 %v14287_v48, 16  ;;  %18611 = vst [vmem:[#allocation10_spill] sm:$0xff] %v14343_v15 }
 0x101   : > { %v3087_v49 = vshrl.u32 %v2807_v61, 16  ;;  %v3090_v16 = vshll.u32 %v2807_v61, 16  ;;  %v3061_v42 = vsel %vm13248_vm12, %v3056_v33, %v14269_v18  ;;  %v3068_v22 = vrot.slane %v3066_v12, 5 }
 0x102   : > { %v3074_v11 = vrot.slane %v3072_v21, 5  ;;  %v3078_v50 = vrot.slane %v3076_v23, 4  ;;  %v14322_v35 = vsel %vm13649_vm2, %v3631_v4, %v3632_v46  ;;  %v3096_v55 = vshll.u32 %v14306_v39, 16  ;;  %v3511_v4 = vld [vmem:[#allocation2 + $0x90] sm:$0xe] }
 0x103   : > { %v3089_v45 = vrot.slane %v3087_v49, 4  ;;  %v3092_v1 = vrot.slane %v3090_v16, 5  ;;  %12529 = vmatmul.mubr.msk.bf16.gmra.mxu1 %vm1453_vm9, %v11341_v56  ;;  %v3069_v52 = vor.u32 %v3068_v22, %v3065_v38  ;;  %v3100_v63 = vshrl.u32 %v14306_v39, 16  ;;  %v2810_v46 = vld [vmem:[#allocation2 + $0x9c] sm:$0xf]  ;;  %v14348_v38 = vpop.f32.mrf.mxu0  ;;  %v14375_v22 = vpop.f32.mrf.mxu1 }
 0x104   : > { %v3079_v17 = vor.u32 %v3078_v50, %v3074_v11  ;;  %v3106_v60 = vshll.u32 %v14313_v3, 16  ;;  %12532 = vmatprep.mubr.msk.bf16.mxu1 %vm1453_vm9, %v11342_v5  ;;  %v3084_v41 = vrot.slane %v3082_v27, 5  ;;  %v14338_v32 = vrot.slane %v3096_v55, 5  ;;  %v14368_v23 = vld [vmem:[#allocation2 + $0xa4] sm:$0x1] }
 0x105   : > { %12491 = vmatmul.mubr.msk.bf16.gmra.mxu0 %vm1453_vm9, %v14109_v7  ;;  %v11329_v7 = vrot.slane %v3510_v29, 9  ;;  %v3636_v18 = vrot.slane %v14251_v54, 5  ;;  %v14341_v9 = vcombine.low %v3027_v28, %v3037_v36  ;;  %v3070_v62 = vrot.slane %v3069_v52, 4 }
 0x106   : > { %12494 = vmatprep.mubr.msk.bf16.mxu0 %vm1453_vm9, %v14113_v19  ;;  %v3080_v56 = vrot.slane %v3079_v17, 4  ;;  %v3102_v0 = vrot.slane %v3100_v63, 4  ;;  %v11344_v33 = vcombine.low %v14285_v57, %v14297_v2  ;;  %v3093_v61 = vor.u32 %v3092_v1, %v3089_v45  ;;  %v14360_v57 = vld [vmem:[#allocation2 + $0xa0] sm:$0xf]  ;;  %v2813_v1 = vld [vmem:[#allocation2 + $0xa8] sm:$0xf] }
 0x107   : > { %v3638_v19 = vrot.slane %v3636_v18, 4  ;;  %v3639_v5 = vrot.slane %v14287_v48, 5  ;;  %v14350_v12 = vcombine.low %v3051_v59, %v3061_v42  ;;  %v11345_v54 = vcombine.low %v14310_v14, %v14322_v35  ;;  %v2814_v63 = vld [vmem:[#allocation2 + $0xac] sm:$0xf] }
 0x108   : > { %v14354_v28 = vrot.slane %v3106_v60, 5  ;;  %v14358_v36 = vsel %vm13649_vm2, %v11329_v7, %v3636_v18  ;;  %v3075_v48 = vsel %vm13248_vm12, %v3070_v62, %v3074_v11  ;;  %v3085_v2 = vsel %vm13248_vm12, %v3080_v56, %v3084_v41  ;;  %v14411_v62 = vpop.f32.mrf.mxu1 }
 0x109   : > { %v3103_v59 = vor.u32 %v3102_v0, %v14338_v32  ;;  %v3643_v21 = vrot.slane %v14306_v39, 5  ;;  %v14372_v27 = vsel %vm13649_vm2, %v3638_v19, %v3639_v5  ;;  %v11330_v49 = vrot.slane %v3511_v4, 9  ;;  %v14380_v39 = vpop.f32.mrf.mxu0  ;;  %v3512_v19 = vld [vmem:[#allocation2 + $0x9c] sm:$0xe] }
 0x10a   : > { %v3646_v16 = vrot.slane %v14313_v3, 5  ;;  %v3111_v42 = vshrl.u32 %v2810_v46, 16  ;;  %v14377_v11 = vrot.slane %v3093_v61, 4  ;;  %v3114_v29 = vshll.u32 %v2810_v46, 16  ;;  %18612 = vst [vmem:[#allocation11_spill] sm:$0xff] %v14380_v39 }
 0x10b   : > { %v3645_v50 = vrot.slane %v3643_v21, 4  ;;  %v3120_v45 = vshll.u32 %v14360_v57, 16  ;;  %12533 = vmatmul.mubr.msk.bf16.gmra.mxu1 %vm1453_vm9, %v11343_v31  ;;  %v14388_v3 = vcombine.low %v3075_v48, %v3085_v2  ;;  %v3124_v52 = vshrl.u32 %v14360_v57, 16  ;;  %v14401_v31 = vld [vmem:[#allocation2 + $0xb0] sm:$0x1]  ;;  %v14413_v5 = vpop.f32.mrf.mxu0 }
 0x10c   : > { %v3113_v55 = vrot.slane %v3111_v42, 4  ;;  %v3130_v17 = vshll.u32 %v14368_v23, 16  ;;  %12536 = vmatprep.mubr.msk.bf16.mxu1 %vm1453_vm9, %v11344_v33  ;;  %v14395_v60 = vrot.slane %v3103_v59, 4  ;;  %v3116_v34 = vrot.slane %v3114_v29, 5  ;;  %v3513_v2 = vld [vmem:[#allocation2 + $0xa8] sm:$0xe] }
 0x10d   : > { %12495 = vmatmul.mubr.msk.bf16.gmra.mxu0 %vm1453_vm9, %v14172_v25  ;;  %v11346_v25 = vcombine.low %v14358_v36, %v14372_v27  ;;  %v14399_v24 = vrot.slane %v3120_v45, 5  ;;  %v14405_v41 = vsel %vm13649_vm2, %v11330_v49, %v3643_v21  ;;  %v14409_v7 = vsel %vm13649_vm2, %v3645_v50, %v3646_v16  ;;  %v14427_v45 = vpop.f32.mrf.mxu1 }
 0x10e   : > { %12498 = vmatprep.mubr.msk.bf16.mxu0 %vm1453_vm9, %v14183_v40  ;;  %v3126_v40 = vrot.slane %v3124_v52, 4  ;;  %v3135_v18 = vshrl.u32 %v2813_v1, 16  ;;  %v3117_v56 = vor.u32 %v3116_v34, %v3113_v55  ;;  %v3138_v0 = vshll.u32 %v2813_v1, 16  ;;  %v2816_v34 = vld [vmem:[#allocation2 + $0xb4] sm:$0xf] }
 0x10f   : > { %v3144_v33 = vshll.u32 %v2814_v63, 16  ;;  %v3148_v61 = vshrl.u32 %v2814_v63, 16  ;;  %v14416_v46 = vrot.slane %v3130_v17, 5  ;;  %v3154_v48 = vshll.u32 %v14401_v31, 16 }
 0x110   : > { %v3127_v4 = vor.u32 %v3126_v40, %v14399_v24  ;;  %v3137_v36 = vrot.slane %v3135_v18, 4  ;;  %v14419_v59 = vrot.slane %v3117_v56, 4  ;;  %v3140_v21 = vrot.slane %v3138_v0, 5  ;;  %v14434_v40 = vpop.f32.mrf.mxu0 }
 0x111   : > { %v14421_v27 = vrot.slane %v3144_v33, 5  ;;  %v3150_v49 = vrot.slane %v3148_v61, 4  ;;  %v11331_v42 = vrot.slane %v3512_v19, 9  ;;  %v3650_v50 = vrot.slane %v14360_v57, 5 }
 0x112   : > { %v14423_v16 = vrot.slane %v3127_v4, 4  ;;  %v3653_v29 = vrot.slane %v14368_v23, 5  ;;  %v3099_v1 = vsel %vm13248_vm12, %v14377_v11, %v14338_v32  ;;  %v3141_v55 = vor.u32 %v3140_v21, %v3137_v36  ;;  %v2819_v4 = vld [vmem:[#allocation2 + $0xc0] sm:$0xf]  ;;  %v14488_v21 = vld [vmem:[#allocation2 + $0xc4] sm:$0xf] }
 0x113   : > { %v3151_v52 = vor.u32 %v3150_v49, %v14421_v27  ;;  %v11332_v17 = vrot.slane %v3513_v2, 9  ;;  %12537 = vmatmul.mubr.msk.bf16.gmra.mxu1 %vm1453_vm9, %v11345_v54  ;;  %v3109_v57 = vsel %vm13248_vm12, %v14395_v60, %v14354_v28  ;;  %v14446_v23 = vrot.slane %v3154_v48, 5  ;;  %v2817_v28 = vld [vmem:[#allocation2 + $0xb8] sm:$0xf] }
 0x114   : > { %v3652_v18 = vrot.slane %v3650_v50, 4  ;;  %v3657_v56 = vrot.slane %v2814_v63, 5  ;;  %12540 = vmatprep.mubr.msk.bf16.mxu1 %vm1453_vm9, %v11346_v25  ;;  %v3123_v14 = vsel %vm13248_vm12, %v14419_v59, %v14399_v24  ;;  %v14457_v35 = vrot.slane %v3141_v55, 4  ;;  %v14469_v25 = vld [vmem:[#allocation2 + $0xbc] sm:$0x1] }
 0x115   : > { %12499 = vmatmul.mubr.msk.bf16.gmra.mxu0 %vm1453_vm9, %v14259_v30  ;;  %v11347_v30 = vcombine.low %v14405_v41, %v14409_v7  ;;  %v14459_v54 = vrot.slane %v3151_v52, 4  ;;  %v3651_v63 = vsel %vm13649_vm2, %v11331_v42, %v3650_v50  ;;  %v3159_v41 = vshrl.u32 %v2816_v34, 16  ;;  %v388_v24 = vld [vmem:[#allocation2 + $0xc8] sm:$0x1]  ;;  %v14471_v7 = vpop.f32.mrf.mxu1  ;;  %v3514_v50 = vld [vmem:[#allocation2 + $0xb4] sm:$0xe] }
 0x116   : > { %12502 = vmatprep.mubr.msk.bf16.mxu0 %vm1453_vm9, %v14341_v9  ;;  %v3133_v9 = vsel %vm13248_vm12, %v14423_v16, %v14416_v46  ;;  %v3654_v60 = vsel %vm13649_vm2, %v3652_v18, %v3653_v29  ;;  %18613 = vst [vmem:[#allocation12_spill] sm:$0xff] %v14471_v7  ;;  %v14475_v0 = vsel %vm13649_vm2, %v11332_v17, %v3657_v56  ;;  %v3659_v33 = vrot.slane %v3657_v56, 4  ;;  %v14478_v46 = vpop.f32.mrf.mxu0  ;;  %v4329_v11 = vld [vmem:[#allocation2 + $0x18] sm:$0xf] }
 0x117   : > { %v3660_v61 = vrot.slane %v14401_v31, 5  ;;  %v3162_v19 = vshll.u32 %v2816_v34, 16  ;;  %v3147_v36 = vsel %vm13248_vm12, %v14457_v35, %v14421_v27  ;;  %v3157_v48 = vsel %vm13248_vm12, %v14459_v54, %v14446_v23  ;;  %v14493_v17 = vpop.f32.mrf.mxu1 }
 0x118   : > { %v3161_v2 = vrot.slane %v3159_v41, 4  ;;  %v3168_v59 = vshll.u32 %v2817_v28, 16  ;;  %v11348_v49 = vcombine.low %v3651_v63, %v3654_v60  ;;  %v3172_v16 = vshrl.u32 %v2817_v28, 16  ;;  %v14498_v35 = vpop.f32.mrf.mxu0 }
 0x119   : > { %v3164_v31 = vrot.slane %v3162_v19, 5  ;;  %v3178_v42 = vshll.u32 %v14469_v25, 16  ;;  %v389_v55 = vsel %vm13203_vm6, 0, %v388_v24  ;;  %v3183_v27 = vshrl.u32 %v2819_v4, 16  ;;  %18614 = vst [vmem:[#allocation13_spill] sm:$0xff] %v14498_v35 }
 0x11a   : > { %v3170_v29 = vrot.slane %v3168_v59, 5  ;;  %v3186_v52 = vshll.u32 %v2819_v4, 16  ;;  %v3661_v34 = vsel %vm13649_vm2, %v3659_v33, %v3660_v61  ;;  %v3174_v18 = vrot.slane %v3172_v16, 4  ;;  %390 = vst [vmem:[#allocation2 + $0xc8] sm:$0x1] %v389_v55  ;;  %v14510_v59 = vpop.f32.mrf.mxu1 }
 0x11b   : > { %v3165_v23 = vor.u32 %v3164_v31, %v3161_v2  ;;  %v3192_v56 = vshll.u32 %v14488_v21, 16  ;;  %12541 = vmatmul.mubr.msk.bf16.gmra.mxu1 %vm1453_vm9, %v11347_v30  ;;  %v3185_v54 = vrot.slane %v3183_v27, 4  ;;  %v3196_v60 = vshrl.u32 %v14488_v21, 16  ;;  %v13094_v27 = vld [vmem:[%s18548_s1 + $0xe] sm:$0x3] }
 0x11c   : > { %v3188_v63 = vrot.slane %v3186_v52, 5  ;;  %v11333_v41 = vrot.slane %v3514_v50, 9  ;;  %12544 = vmatprep.mubr.msk.bf16.mxu1 %vm1453_vm9, %v11348_v49  ;;  %v3175_v33 = vor.u32 %v3174_v18, %v3170_v29  ;;  %v3180_v61 = vrot.slane %v3178_v42, 5  ;;  %v14519_v42 = vpop.f32.mrf.mxu0  ;;  %v4332_v18 = vld [vmem:[#allocation2 + $0x24] sm:$0xf] }
 0x11d   : > { %12503 = vmatmul.mubr.msk.bf16.gmra.mxu0 %vm1453_vm9, %v14350_v12  ;;  %v3166_v24 = vrot.slane %v3165_v23, 4  ;;  %v3664_v19 = vrot.slane %v2817_v28, 5  ;;  %v14507_v2 = vrot.slane %v3192_v56, 5  ;;  %v3198_v12 = vrot.slane %v3196_v60, 4  ;;  %v3515_v28 = vld [vmem:[#allocation2 + $0xc0] sm:$0xe]  ;;  %v14545_v56 = vpop.f32.mrf.mxu1 }
 0x11e   : > { %12506 = vmatprep.mubr.msk.bf16.mxu0 %vm1453_vm9, %v14388_v3  ;;  %v3189_v4 = vor.u32 %v3188_v63, %v3185_v54  ;;  %v3667_v30 = vrot.slane %v14469_v25, 5  ;;  %v11298_v3 = vcombine.low %v3099_v1, %v3109_v57  ;;  %v3176_v31 = vrot.slane %v3175_v33, 4  ;;  %v14717_v35 = vld [vmem:[#allocation2 + $0x70] sm:$0xf] }
 0x11f   : > { %v3665_v49 = vsel %vm13649_vm2, %v11333_v41, %v3664_v19  ;;  %v3666_v16 = vrot.slane %v3664_v19, 4  ;;  %v11299_v50 = vcombine.low %v3123_v14, %v3133_v9  ;;  %v11349_v55 = vcombine.low %v14475_v0, %v3661_v34  ;;  %v14538_v0 = vld [vmem:[#allocation2 + $0x1c] sm:$0xf]  ;;  %v14552_v41 = vpop.f32.mrf.mxu0  ;;  %v14559_v19 = vld [vmem:[#allocation2 + $0x28] sm:$0xf] }
 0x120   : > { %v3171_v25 = vsel %vm13248_vm12, %v3166_v24, %v3170_v29  ;;  %v4860_v32 = vsel %vm1502_vm0, %v13094_v27, 0  ;;  %v14528_v1 = vcombine.low %v3147_v36, %v3157_v48  ;;  %v3181_v57 = vsel %vm13248_vm12, %v3176_v31, %v3180_v61  ;;  %v14540_v29 = vld [vmem:[#allocation2 + $0x20] sm:$0x1] }
 0x121   : > { %v3668_v14 = vsel %vm13649_vm2, %v3666_v16, %v3667_v30  ;;  %12587 = vmatpush3.bf16.msra.mxu1 %v4860_v32  ;;  %v14536_v9 = vadd.f32 %v14243_v44, %v14302_v13  ;;  %v960_v52 = vld [vmem:[#allocation2 + $0xc8] sm:$0x1]  ;;  %v14542_v34 = vrot.slane %v3189_v4, 4  ;;  %v3199_v36 = vor.u32 %v3198_v12, %v14507_v2  ;;  %v14567_v12 = vld [vmem:[#allocation2 + $0x2c] sm:$0x1] }
 0x122   : > { %v11350_v48 = vcombine.low %v3665_v49, %v3668_v14  ;;  %v11334_v23 = vrot.slane %v3515_v28, 9  ;;  %v11301_v54 = vcombine.low %v3171_v25, %v3181_v57  ;;  %v18615_v63 = vrot.slane %v13892_v53, 4 }
 0x123   : > { %v3671_v13 = vrot.slane %v14488_v21, 5  ;;  %v4378_v60 = vshrl.u32 %v4329_v11, 16  ;;  %12545 = vmatmul.mubr.msk.bf16.gmra.mxu1 %vm1453_vm9, %v11349_v55  ;;  %v4381_v24 = vshll.u32 %v4329_v11, 16  ;;  %v4387_v33 = vshll.u32 %v14538_v0, 16  ;;  %v14569_v55 = vpop.f32.mrf.mxu1  ;;  %v14573_v11 = vpop.f32.mrf.mxu0 }
 0x124   : > { %v961_v44 = vsel %vm13193_vm5, %v18615_v63, %v960_v52  ;;  %v4391_v61 = vshrl.u32 %v14538_v0, 16  ;;  %v4397_v53 = vshll.u32 %v14540_v29, 16  ;;  %12548 = vmatprep.mubr.msk.bf16.mxu1 %vm1453_vm9, %v11350_v48  ;;  %v14565_v4 = vadd.f32 %v14289_v10, %v14325_v43  ;;  %18616 = vst [vmem:[#allocation14_spill] sm:$0xff] %v14569_v55  ;;  %v4347_v55 = vld [vmem:[#allocation2 + $0x60] sm:$0xf] }
 0x125   : > { %12507 = vmatmul.mubr.msk.bf16.gmra.mxu0 %vm1453_vm9, %v11298_v3  ;;  %962 = vst [vmem:[#allocation2 + $0xc8] sm:$0x1] %v961_v44  ;;  %v4380_v21 = vrot.slane %v4378_v60, 4  ;;  %v4402_v30 = vshrl.u32 %v4332_v18, 16  ;;  %v4405_v3 = vshll.u32 %v4332_v18, 16  ;;  %v3200_v31 = vrot.slane %v3199_v36, 4 }
 0x126   : > { %12510 = vmatprep.mubr.msk.bf16.mxu0 %vm1453_vm9, %v11299_v50  ;;  %v4383_v49 = vrot.slane %v4381_v24, 5  ;;  %v4389_v16 = vrot.slane %v4387_v33, 5  ;;  %v4393_v28 = vrot.slane %v4391_v61, 4  ;;  %v4411_v50 = vshll.u32 %v14559_v19, 16  ;;  %v4335_v33 = vld [vmem:[#allocation2 + $0x30] sm:$0xf]  ;;  %v14584_v61 = vpop.f32.mrf.mxu1 }
 0x127   : > { %v4404_v25 = vrot.slane %v4402_v30, 4  ;;  %v4407_v27 = vrot.slane %v4405_v3, 5  ;;  %v4415_v32 = vshrl.u32 %v14559_v19, 16  ;;  %v4399_v57 = vrot.slane %v4397_v53, 5 }
 0x128   : > { %v4384_v10 = vor.u32 %v4383_v49, %v4380_v21  ;;  %v4394_v43 = vor.u32 %v4393_v28, %v4389_v16  ;;  %v4421_v14 = vshll.u32 %v14567_v12, 16  ;;  %v3672_v52 = vsel %vm13649_vm2, %v11334_v23, %v3671_v13  ;;  %v14591_v49 = vld [vmem:[#allocation2 + $0x34] sm:$0xf] }
 0x129   : > { %v4408_v36 = vor.u32 %v4407_v27, %v4404_v25  ;;  %v14578_v48 = vrot.slane %v4411_v50, 5  ;;  %v4417_v18 = vrot.slane %v4415_v32, 4  ;;  %v3673_v63 = vrot.slane %v3671_v13, 4  ;;  %v14593_v13 = vpop.f32.mrf.mxu0 }
 0x12a   : > { %v4385_v44 = vrot.slane %v4384_v10, 4  ;;  %v4395_v60 = vrot.slane %v4394_v43, 4  ;;  %v14582_v24 = vadd.f32 %v14318_v26, %v14348_v38  ;;  %v4423_v3 = vrot.slane %v4421_v14, 5  ;;  %18617 = vst [vmem:[#allocation15_spill] sm:$0xff] %v14593_v13  ;;  %v14608_v10 = vld [vmem:[#allocation2 + $0x38] sm:$0x1] }
 0x12b   : > { %v4409_v21 = vrot.slane %v4408_v36, 4  ;;  %v4418_v30 = vor.u32 %v4417_v18, %v14578_v48  ;;  %v14589_v23 = vadd.f32 %v14375_v22, %v14413_v5  ;;  %v3195_v22 = vsel %vm13248_vm12, %v14542_v34, %v14507_v2  ;;  %v4338_v36 = vld [vmem:[#allocation2 + $0x3c] sm:$0xf]  ;;  %v14617_v18 = vld [vmem:[#allocation2 + $0x40] sm:$0xf] }
 0x12c   : > { %v2821_v53 = vld [vmem:[#allocation2 + $0xc8] sm:$0x1]  ;;  %v4390_v28 = vsel %vm13248_vm12, %v4385_v44, %v4389_v16  ;;  %v4400_v25 = vsel %vm13248_vm12, %v4395_v60, %v4399_v57  ;;  %v4426_v50 = vshrl.u32 %v4335_v33, 16  ;;  %v4429_v16 = vshll.u32 %v4335_v33, 16  ;;  %v14611_v57 = vpop.f32.mrf.mxu1  ;;  %v14619_v44 = vpop.f32.mrf.mxu0 }
 0x12d   : > { %12511 = vmatmul.mubr.msk.bf16.gmra.mxu0 %vm1453_vm9, %v14528_v1  ;;  %v3202_v26 = vshll.u32 %v2821_v53, 16  ;;  %v3674_v38 = vrot.slane %v2821_v53, 5  ;;  %v11402_v5 = vcombine.low %v4390_v28, %v4400_v25  ;;  %v4419_v27 = vrot.slane %v4418_v30, 4  ;;  %v14625_v53 = vld [vmem:[#allocation2 + $0x44] sm:$0x1] }
 0x12e   : > { %12514 = vmatprep.mubr.msk.bf16.mxu0 %vm1453_vm9, %v11301_v54  ;;  %v4435_v43 = vshll.u32 %v14591_v49, 16  ;;  %v4414_v14 = vsel %vm13248_vm12, %v4409_v21, %v14578_v48  ;;  %v4428_v2 = vrot.slane %v4426_v50, 4  ;;  %v4439_v34 = vshrl.u32 %v14591_v49, 16  ;;  %v13018_v48 = vld [vmem:[#allocation2 + $0x18] sm:$0xff]  }
 0x12f   : > { %v3204_v32 = vrot.slane %v3202_v26, 5  ;;  %v3675_v1 = vsel %vm13649_vm2, %v3673_v63, %v3674_v38  ;;  %v4424_v60 = vsel %vm13248_vm12, %v4419_v27, %v4423_v3  ;;  %v4431_v33 = vrot.slane %v4429_v16, 5  ;;  %v14635_v27 = vpop.f32.mrf.mxu1  ;;  %v14639_v16 = vpop.f32.mrf.mxu0 }
 0x130   : > { %v11351_v54 = vcombine.low %v3672_v52, %v3675_v1  ;;  %v4437_v52 = vrot.slane %v4435_v43, 5  ;;  %v4441_v21 = vrot.slane %v4439_v34, 4  ;;  %v4445_v26 = vshll.u32 %v14608_v10, 16 }
 0x131   : > { %v3205_v63 = vsel %vm13248_vm12, %v3200_v31, %v3204_v32  ;;  %v14631_v38 = vadd.f32 %v14411_v62, %v14434_v40  ;;  %v4432_v31 = vor.u32 %v4431_v33, %v4428_v2  ;;  %v4450_v28 = vshrl.u32 %v4338_v36, 16  ;;  %v14645_v33 = vld [vmem:[#allocation2 + $0x4c] sm:$0xf] }
 0x132   : > { %v11302_v30 = vcombine.low %v3195_v22, %v3205_v63  ;;  %12549 = vmatmul.mubr.msk.bf16.gmra.mxu1 %vm1453_vm9, %v11351_v54  ;;  %v4453_v3 = vshll.u32 %v4338_v36, 16  ;;  %v4459_v25 = vshll.u32 %v14617_v18, 16  ;;  %v4442_v22 = vor.u32 %v4441_v21, %v4437_v52  ;;  %v4341_v54 = vld [vmem:[#allocation2 + $0x48] sm:$0xf] }
 0x133   : > { %12588 = vmatprep.mubr.msk.bf16.mxu1 %vm1453_vm9, %v11402_v5  ;;  %v4447_v50 = vrot.slane %v4445_v26, 5  ;;  %v4463_v32 = vshrl.u32 %v14617_v18, 16  ;;  %v4469_v1 = vshll.u32 %v14625_v53, 16  ;;  %v4433_v62 = vrot.slane %v4432_v31, 4 }
 0x134   : > { %v4452_v40 = vrot.slane %v4450_v28, 4  ;;  %v4455_v5 = vrot.slane %v4453_v3, 5  ;;  %v4461_v43 = vrot.slane %v4459_v25, 5  ;;  %v5330_v2 = vsel %vm1502_vm0, %v14241_v20, 0  ;;  %v14653_v28 = vld [vmem:[#allocation2 + $0x50] sm:$0x1]  ;;  %v14663_v25 = vpop.f32.mrf.mxu0 }
 0x135   : > { %12515 = vmatmul.mubr.msk.bf16.gmra.mxu0 %vm1453_vm9, %v11302_v30  ;;  %v11403_v34 = vcombine.low %v4414_v14, %v4424_v60  ;;  %v4443_v36 = vrot.slane %v4442_v22, 4  ;;  %v4465_v63 = vrot.slane %v4463_v32, 4  ;;  %v4438_v21 = vsel %vm13248_vm12, %v4433_v62, %v4437_v52  ;;  %v13019_v3 = vld [vmem:[#allocation2 + $0x24] sm:$0xff]   ;;  %v13020_v22 = vld [vmem:[#allocation2 + $0x30] sm:$0xff]  }
 0x136   : > { %12554 = vmatprep.mubr.msk.bf16.mxu0 %vm1453_vm9, %v13018_v48  ;;  %v4456_v26 = vor.u32 %v4455_v5, %v4452_v40  ;;  %v4471_v30 = vrot.slane %v4469_v1, 5  ;;  %v14651_v31 = vadd.f32 %v14427_v45, %v14478_v46  ;;  %v14655_v48 = vpop.f32.mrf.mxu1  ;;  %v14661_v60 = vadd.f32 %v14493_v17, %v14519_v42  ;;  %v4344_v62 = vld [vmem:[#allocation2 + $0x54] sm:$0xf]  ;;  %v14669_v17 = vld [vmem:[#allocation2 + $0x58] sm:$0xf] }
 0x137   : > { %v4448_v20 = vsel %vm13248_vm12, %v4443_v36, %v4447_v50  ;;  %v4466_v14 = vor.u32 %v4465_v63, %v4461_v43  ;;  %v4474_v52 = vshrl.u32 %v4341_v54, 16  ;;  %v4477_v46 = vshll.u32 %v4341_v54, 16 }
 0x138   : > { %v11404_v32 = vcombine.low %v4438_v21, %v4448_v20  ;;  %v4457_v45 = vrot.slane %v4456_v26, 4  ;;  %v4483_v1 = vshll.u32 %v14645_v33, 16  ;;  %v4487_v50 = vshrl.u32 %v14645_v33, 16  ;;  %v14680_v26 = vpop.f32.mrf.mxu1 }
 0x139   : > { %v4467_v40 = vrot.slane %v4466_v14, 4  ;;  %v4476_v5 = vrot.slane %v4474_v52, 4  ;;  %v4493_v36 = vshll.u32 %v14653_v28, 16  ;;  %v4479_v63 = vrot.slane %v4477_v46, 5 }
 0x13a   : > { %12589 = vmatmul.mubr.msk.bf16.vlgmr.msra.gmra.mxu1 %vm1453_vm9, %v11403_v34  ;;  %v4462_v42 = vsel %vm13248_vm12, %v4457_v45, %v4461_v43  ;;  %v4485_v54 = vrot.slane %v4483_v1, 5  ;;  %v14676_v21 = vadd.f32 %v14510_v59, %v14552_v41  ;;  %v14678_v34 = vld [vmem:[#allocation2 + $0x5c] sm:$0x1]  ;;  %v4489_v14 = vrot.slane %v4487_v50, 4  ;;  %v14691_v13 = vpop.f32.mrf.mxu1 }
 0x13b   : > { %12592 = vmatprep.mubr.msk.bf16.mxu1 %vm1453_vm9, %v11404_v32  ;;  %v4472_v20 = vsel %vm13248_vm12, %v4467_v40, %v4471_v30  ;;  %v4495_v52 = vrot.slane %v4493_v36, 5  ;;  %v4498_v58 = vshrl.u32 %v4344_v62, 16  ;;  %v14684_v32 = vpop.f32.mrf.mxu0  ;;  %v4480_v45 = vor.u32 %v4479_v63, %v4476_v5 }
 0x13c   : > { %v11405_v43 = vcombine.low %v4462_v42, %v4472_v20  ;;  %v4501_v46 = vshll.u32 %v4344_v62, 16  ;;  %v4507_v59 = vshll.u32 %v14669_v17, 16  ;;  %v4490_v41 = vor.u32 %v4489_v14, %v4485_v54 }
 0x13d   : > { %12555 = vmatmul.mubr.msk.bf16.vlgmr.msra.gmra.mxu0 %vm1453_vm9, %v13019_v3  ;;  %v4500_v1 = vrot.slane %v4498_v58, 4  ;;  %v4511_v47 = vshrl.u32 %v14669_v17, 16  ;;  %v4517_v30 = vshll.u32 %v14678_v34, 16  ;;  %v4481_v40 = vrot.slane %v4480_v45, 4  ;;  %v13021_v58 = vld [vmem:[#allocation2 + $0x3c] sm:$0xff]  }
 0x13e   : > { %12621 = vmatpush3.bf16.msra.mxu0 %v5330_v2  ;;  %12558 = vmatprep.mubr.msk.bf16.mxu0 %vm1453_vm9, %v13020_v22  ;;  %v4503_v50 = vrot.slane %v4501_v46, 5  ;;  %v4509_v36 = vrot.slane %v4507_v59, 5  ;;  %v4491_v3 = vrot.slane %v4490_v41, 4  ;;  %v14695_v62 = vadd.f32 %v14545_v56, %v14573_v11  ;;  %v14697_v2 = vld [vmem:[#allocation2 + $0x64] sm:$0xf]  ;;  %v14699_v22 = vpop.f32.mrf.mxu0 }
 0x13f   : > { %v4513_v5 = vrot.slane %v4511_v47, 4  ;;  %v4486_v42 = vsel %vm13248_vm12, %v4481_v40, %v4485_v54  ;;  %v4519_v20 = vrot.slane %v4517_v30, 5  ;;  %v14705_v14 = vadd.f32 %v14584_v61, %v14619_v44  ;;  %v14707_v45 = vld [vmem:[#allocation2 + $0x68] sm:$0x1]  ;;  %v4350_v30 = vld [vmem:[#allocation2 + $0x6c] sm:$0xf]  ;;  %v14714_v61 = vpop.f32.mrf.mxu1 }
 0x140   : > { %v4504_v63 = vor.u32 %v4503_v50, %v4500_v1  ;;  %v13022_v47 = vld [vmem:[#allocation2 + $0x48] sm:$0xff]   ;;  %v4496_v56 = vsel %vm13248_vm12, %v4491_v3, %v4495_v52  ;;  %v4522_v46 = vshrl.u32 %v4347_v55, 16  ;;  %v4525_v59 = vshll.u32 %v4347_v55, 16  ;;  %v1604_v52 = vpop.f32.mrf.mxu0 }
 0x141   : > { %18618 = vst [vmem:[#allocation16_spill] sm:$0xff] %v14705_v14  ;;  %v4514_v11 = vor.u32 %v4513_v5, %v4509_v36  ;;  %v11406_v41 = vcombine.low %v4486_v42, %v4496_v56  ;;  %v4531_v54 = vshll.u32 %v14697_v2, 16  ;;  %v4535_v1 = vshrl.u32 %v14697_v2, 16 }
 0x142   : > { %12593 = vmatmul.mubr.msk.bf16.gmra.mxu1 %vm1453_vm9, %v11405_v43  ;;  %v4505_v7 = vrot.slane %v4504_v63, 4  ;;  %v4524_v40 = vrot.slane %v4522_v46, 4  ;;  %v4527_v50 = vrot.slane %v4525_v59, 5  ;;  %v4541_v43 = vshll.u32 %v14707_v45, 16  ;;  %v14727_v63 = vld [vmem:[#allocation2 + $0x74] sm:$0x1]  ;;  %v12369_v8 = vpop.f32.mrf.mxu0 }
 0x143   : > { %v4515_v44 = vrot.slane %v4514_v11, 4  ;;  %12596 = vmatprep.mubr.msk.bf16.mxu1 %vm1453_vm9, %v11406_v41  ;;  %v4533_v3 = vrot.slane %v4531_v54, 5  ;;  %v4537_v5 = vrot.slane %v4535_v1, 4  ;;  %v14725_v42 = vadd.f32 %v14611_v57, %v14639_v16  ;;  %v13023_v54 = vld [vmem:[#allocation2 + $0x54] sm:$0xff]   ;;  %v13024_v57 = vld [vmem:[#allocation2 + $0x60] sm:$0xff]  }
 0x144   : > { %v4510_v55 = vsel %vm13248_vm12, %v4505_v7, %v4509_v36  ;;  %v4528_v11 = vor.u32 %v4527_v50, %v4524_v40  ;;  %v4546_v46 = vshrl.u32 %v4350_v30, 16  ;;  %v4549_v15 = vshll.u32 %v4350_v30, 16  ;;  %v14733_v36 = vpop.f32.mrf.mxu1 }
 0x145   : > { %12559 = vmatmul.mubr.msk.bf16.gmra.mxu0 %vm1453_vm9, %v13021_v58  ;;  %18619 = vst [vmem:[#allocation17_spill] sm:$0xff] %v14725_v42  ;;  %v4520_v56 = vsel %vm13248_vm12, %v4515_v44, %v4519_v20  ;;  %v4543_v58 = vrot.slane %v4541_v43, 5  ;;  %v4538_v41 = vor.u32 %v4537_v5, %v4533_v3  ;;  %v4555_v7 = vshll.u32 %v14717_v35, 16  ;;  %18620 = vst [vmem:[#allocation18_spill] sm:$0xff] %v14733_v36  ;;  %v4353_v43 = vld [vmem:[#allocation2 + $0x78] sm:$0xf] }
 0x146   : > { %12562 = vmatprep.mubr.msk.bf16.mxu0 %vm1453_vm9, %v13022_v47  ;;  %v11407_v59 = vcombine.low %v4510_v55, %v4520_v56  ;;  %v4529_v16 = vrot.slane %v4528_v11, 4  ;;  %v4548_v1 = vrot.slane %v4546_v46, 4  ;;  %v4559_v39 = vshrl.u32 %v14717_v35, 16  ;;  %v14745_v11 = vld [vmem:[#allocation2 + $0x7c] sm:$0xf] }
 0x147   : > { %v4565_v47 = vshll.u32 %v14727_v63, 16  ;;  %v4539_v44 = vrot.slane %v4538_v41, 4  ;;  %v4551_v40 = vrot.slane %v4549_v15, 5  ;;  %v4557_v50 = vrot.slane %v4555_v7, 5  ;;  %v14747_v46 = vld [vmem:[#allocation2 + $0x80] sm:$0x1] }
 0x148   : > { %v4534_v30 = vsel %vm13248_vm12, %v4529_v16, %v4533_v3  ;;  %v4561_v55 = vrot.slane %v4559_v39, 4  ;;  %v14743_v56 = vadd.f32 %v14635_v27, %v14663_v25  ;;  %v14757_v39 = vadd.f32 %v14680_v26, %v14699_v22  ;;  %v12406_v3 = vpop.f32.mrf.mxu1 }
 0x149   : > { %v4567_v5 = vrot.slane %v4565_v47, 5  ;;  %v4544_v15 = vsel %vm13248_vm12, %v4539_v44, %v4543_v58  ;;  %v4552_v41 = vor.u32 %v4551_v40, %v4548_v1  ;;  %v4570_v25 = vshrl.u32 %v4353_v43, 16  ;;  %v14759_v47 = vpop.f32.mrf.mxu0 }
 0x14a   : > { %12597 = vmatmul.mubr.msk.bf16.gmra.mxu1 %vm1453_vm9, %v11407_v59  ;;  %18621 = vst [vmem:[#allocation19_spill] sm:$0xff] %v14743_v56  ;;  %v14753_v59 = vadd.f32 %v14655_v48, %v14684_v32  ;;  %18623 = vst [vmem:[#allocation21_spill] sm:$0xff] %v14757_v39  ;;  %v11408_v7 = vcombine.low %v4534_v30, %v4544_v15  ;;  %v4562_v27 = vor.u32 %v4561_v55, %v4557_v50  ;;  %v4356_v32 = vld [vmem:[#allocation2 + $0x84] sm:$0xf]  ;;  %v1912_v36 = vpop.f32.mrf.mxu1  ;;  %v4359_v39 = vld [vmem:[#allocation2 + $0x90] sm:$0xf] }
 0x14b   : > { %v4573_v16 = vshll.u32 %v4353_v43, 16  ;;  %18624 = vst [vmem:[#allocation22_spill] sm:$0xff] %v14759_v47  ;;  %v4553_v20 = vrot.slane %v4552_v41, 4  ;;  %v4579_v58 = vshll.u32 %v14745_v11, 16  ;;  %v4583_v1 = vshrl.u32 %v14745_v11, 16  ;;  %v13026_v47 = vld [vmem:[#allocation2 + $0x78] sm:$0xff]  }
 0x14c   : > { %18622 = vst [vmem:[#allocation20_spill] sm:$0xff] %v14753_v59  ;;  %v4589_v48 = vshll.u32 %v14747_v46, 16  ;;  %12600 = vmatprep.mubr.msk.bf16.mxu1 %vm1453_vm9, %v11408_v7  ;;  %v4563_v26 = vrot.slane %v4562_v27, 4  ;;  %v4572_v22 = vrot.slane %v4570_v25, 4  ;;  %v14768_v40 = vadd.f32 %v14691_v13, %v1604_v52  ;;  %v14770_v43 = vld [vmem:[#allocation2 + $0x88] sm:$0xf] }
 0x14d   : > { %12563 = vmatmul.mubr.msk.bf16.gmra.mxu0 %vm1453_vm9, %v13023_v54  ;;  %v4575_v44 = vrot.slane %v4573_v16, 5  ;;  %v4558_v54 = vsel %vm13248_vm12, %v4553_v20, %v4557_v50  ;;  %v4581_v30 = vrot.slane %v4579_v58, 5  ;;  %v4585_v55 = vrot.slane %v4583_v1, 4  ;;  %v14774_v41 = vld [vmem:[#allocation2 + $0x8c] sm:$0x1] }
 0x14e   : > { %12566 = vmatprep.mubr.msk.bf16.mxu0 %vm1453_vm9, %v13024_v57  ;;  %18625 = vst [vmem:[#allocation23_spill] sm:$0xff] %v14768_v40  ;;  %v4591_v15 = vrot.slane %v4589_v48, 5  ;;  %v4568_v57 = vsel %vm13248_vm12, %v4563_v26, %v4567_v5  ;;  %v4594_v27 = vshrl.u32 %v4356_v32, 16  ;;  %v4597_v25 = vshll.u32 %v4356_v32, 16  ;;  %v13025_v13 = vld [vmem:[#allocation2 + $0x6c] sm:$0xff]  }
 0x14f   : > { %v4576_v7 = vor.u32 %v4575_v44, %v4572_v22  ;;  %v12372_v16 = vpop.f32.mrf.mxu0  ;;  %v11409_v52 = vcombine.low %v4558_v54, %v4568_v57  ;;  %v4586_v6 = vor.u32 %v4585_v55, %v4581_v30  ;;  %v4603_v40 = vshll.u32 %v14770_v43, 16  ;;  %v14785_v44 = vld [vmem:[#allocation2 + $0x94] sm:$0xf]  ;;  %v12407_v54 = vpop.f32.mrf.mxu1 }
 0x150   : > { %v4607_v20 = vshrl.u32 %v14770_v43, 16  ;;  %v4596_v58 = vrot.slane %v4594_v27, 4  ;;  %v4599_v1 = vrot.slane %v4597_v25, 5  ;;  %v4613_v48 = vshll.u32 %v14774_v41, 16  ;;  %v14790_v25 = vld [vmem:[#allocation2 + $0x98] sm:$0x1] }
 0x151   : > { %v4577_v50 = vrot.slane %v4576_v7, 4  ;;  %v4587_v5 = vrot.slane %v4586_v6, 4  ;;  %v4605_v26 = vrot.slane %v4603_v40, 5  ;;  %v14783_v22 = vadd.f32 %v14714_v61, %v12369_v8  ;;  %v1620_v59 = vpop.f32.mrf.mxu0 }
 0x152   : > { %12601 = vmatmul.mubr.msk.bf16.gmra.mxu1 %vm1453_vm9, %v11409_v52  ;;  %v4609_v32 = vrot.slane %v4607_v20, 4  ;;  %v4600_v7 = vor.u32 %v4599_v1, %v4596_v58  ;;  %v4615_v27 = vrot.slane %v4613_v48, 5  ;;  %v14795_v61 = vadd.f32 %v12406_v3, %v12372_v16 }
 0x153   : > { %18626 = vst [vmem:[#allocation24_spill] sm:$0xff] %v14783_v22  ;;  %v4582_v57 = vsel %vm13248_vm12, %v4577_v50, %v4581_v30  ;;  %v4592_v6 = vsel %vm13248_vm12, %v4587_v5, %v4591_v15  ;;  %v4618_v40 = vshrl.u32 %v4359_v39, 16  ;;  %v4621_v55 = vshll.u32 %v4359_v39, 16  ;;  %v4362_v50 = vld [vmem:[#allocation2 + $0x9c] sm:$0xf]  ;;  %v14803_v15 = vpop.f32.mrf.mxu1 }
 0x154   : > { %v4610_v8 = vor.u32 %v4609_v32, %v4605_v26  ;;  %18627 = vst [vmem:[#allocation25_spill] sm:$0xff] %v14795_v61  ;;  %v11410_v52 = vcombine.low %v4582_v57, %v4592_v6  ;;  %v4601_v20 = vrot.slane %v4600_v7, 4  ;;  %v4627_v30 = vshll.u32 %v14785_v44, 16  ;;  %v14801_v22 = vld [vmem:[#allocation2 + $0xa0] sm:$0xf]  ;;  %18628 = vst [vmem:[#allocation26_spill] sm:$0xff] %v14803_v15  ;;  %v12373_v32 = vpop.f32.mrf.mxu0 }
 0x155   : > { %12567 = vmatmul.mubr.msk.bf16.gmra.mxu0 %vm1453_vm9, %v13025_v13  ;;  %v4620_v1 = vrot.slane %v4618_v40, 4  ;;  %v4631_v48 = vshrl.u32 %v14785_v44, 16  ;;  %v4637_v13 = vshll.u32 %v14790_v25, 16  ;;  %v14808_v16 = vadd.f32 %v1912_v36, %v1620_v59  ;;  %v14810_v5 = vld [vmem:[#allocation2 + $0xa4] sm:$0x1]  ;;  %v13028_v61 = vld [vmem:[#allocation2 + $0x90] sm:$0xff]  }
 0x156   : > { %12570 = vmatprep.mubr.msk.bf16.mxu0 %vm1453_vm9, %v13026_v47  ;;  %v4611_v58 = vrot.slane %v4610_v8, 4  ;;  %12604 = vmatprep.mubr.msk.bf16.mxu1 %vm1453_vm9, %v11410_v52  ;;  %v4606_v3 = vsel %vm13248_vm12, %v4601_v20, %v4605_v26  ;;  %v4623_v47 = vrot.slane %v4621_v55, 5  ;;  %v4629_v39 = vrot.slane %v4627_v30, 5  ;;  %v13027_v57 = vld [vmem:[#allocation2 + $0x84] sm:$0xff]  }
 0x157   : > { %18629 = vst [vmem:[#allocation27_spill] sm:$0xff] %v14808_v16  ;;  %v4633_v6 = vrot.slane %v4631_v48, 4  ;;  %v4639_v8 = vrot.slane %v4637_v13, 5  ;;  %v4642_v40 = vshrl.u32 %v4362_v50, 16  ;;  %v4645_v56 = vshll.u32 %v4362_v50, 16  ;;  %v12410_v30 = vpop.f32.mrf.mxu1 }
 0x158   : > { %v4616_v7 = vsel %vm13248_vm12, %v4611_v58, %v4615_v27  ;;  %v4624_v52 = vor.u32 %v4623_v47, %v4620_v1  ;;  %v4651_v26 = vshll.u32 %v14801_v22, 16  ;;  %v4655_v36 = vshrl.u32 %v14801_v22, 16  ;;  %v4365_v16 = vld [vmem:[#allocation2 + $0xa8] sm:$0xf]  ;;  %v14822_v50 = vld [vmem:[#allocation2 + $0xac] sm:$0xf] }
 0x159   : > { %v11411_v15 = vcombine.low %v4606_v3, %v4616_v7  ;;  %v4634_v55 = vor.u32 %v4633_v6, %v4629_v39  ;;  %v4644_v20 = vrot.slane %v4642_v40, 4  ;;  %v4661_v59 = vshll.u32 %v14810_v5, 16  ;;  %v14820_v3 = vpop.f32.mrf.mxu0  ;;  %18632 = vst [vmem:[#allocation30_spill] sm:$0xff] %v14822_v50 }
 0x15a   : > { %v4625_v27 = vrot.slane %v4624_v52, 4  ;;  %v4647_v58 = vrot.slane %v4645_v56, 5  ;;  %v4653_v48 = vrot.slane %v4651_v26, 5  ;;  %v14818_v13 = vadd.f32 %v12407_v54, %v12373_v32  ;;  %18631 = vst [vmem:[#allocation29_spill] sm:$0xff] %v14820_v3  ;;  %v14831_v26 = vld [vmem:[#allocation2 + $0xb0] sm:$0x1] }
 0x15b   : > { %12605 = vmatmul.mubr.msk.bf16.gmra.mxu1 %vm1453_vm9, %v11411_v15  ;;  %v4635_v47 = vrot.slane %v4634_v55, 4  ;;  %v4657_v7 = vrot.slane %v4655_v36, 4  ;;  %v4663_v6 = vrot.slane %v4661_v59, 5  ;;  %v4666_v40 = vshrl.u32 %v4365_v16, 16  ;;  %18633 = vst [vmem:[#allocation31_spill] sm:$0xff] %v14831_v26  ;;  %v1928_v55 = vpop.f32.mrf.mxu1 }
 0x15c   : > { %18630 = vst [vmem:[#allocation28_spill] sm:$0xff] %v14818_v13  ;;  %v4630_v15 = vsel %vm13248_vm12, %v4625_v27, %v4629_v39  ;;  %v4648_v56 = vor.u32 %v4647_v58, %v4644_v20  ;;  %v4669_v54 = vshll.u32 %v4365_v16, 16  ;;  %v4675_v1 = vshll.u32 %v14822_v50, 16  ;;  %v4368_v36 = vld [vmem:[#allocation2 + $0xb4] sm:$0xf]  ;;  %v13029_v20 = vld [vmem:[#allocation2 + $0x9c] sm:$0xff]  }
 0x15d   : > { %12571 = vmatmul.mubr.msk.bf16.gmra.mxu0 %vm1453_vm9, %v13027_v57  ;;  %v4640_v32 = vsel %vm13248_vm12, %v4635_v47, %v4639_v8  ;;  %v4658_v52 = vor.u32 %v4657_v7, %v4653_v48  ;;  %v4679_v57 = vshrl.u32 %v14822_v50, 16  ;;  %v4668_v13 = vrot.slane %v4666_v40, 4  ;;  %v13030_v7 = vld [vmem:[#allocation2 + $0xa8] sm:$0xff]  }
 0x15e   : > { %12574 = vmatprep.mubr.msk.bf16.mxu0 %vm1453_vm9, %v13028_v61  ;;  %v11412_v59 = vcombine.low %v4630_v15, %v4640_v32  ;;  %v4649_v61 = vrot.slane %v4648_v56, 4  ;;  %v4671_v39 = vrot.slane %v4669_v54, 5  ;;  %v4677_v58 = vrot.slane %v4675_v1, 5  ;;  %v14841_v56 = vld [vmem:[#allocation2 + $0xb8] sm:$0xf] }
 0x15f   : > { %v12376_v3 = vpop.f32.mrf.mxu0  ;;  %v4659_v27 = vrot.slane %v4658_v52, 4  ;;  %v4681_v8 = vrot.slane %v4679_v57, 4  ;;  %v4685_v50 = vshll.u32 %v14831_v26, 16  ;;  %18635 = vst [vmem:[#allocation33_spill] sm:$0xff] %v14841_v56  ;;  %v4690_v40 = vshrl.u32 %v4368_v36, 16  ;;  %v12411_v52 = vpop.f32.mrf.mxu1 }
 0x160   : > { %v14835_v16 = vadd.f32 %v12410_v30, %v12376_v3  ;;  %12608 = vmatprep.mubr.msk.bf16.mxu1 %vm1453_vm9, %v11412_v59  ;;  %v4654_v47 = vsel %vm13248_vm12, %v4649_v61, %v4653_v48  ;;  %v4672_v42 = vor.u32 %v4671_v39, %v4668_v13  ;;  %v14847_v1 = vld [vmem:[#allocation2 + $0xbc] sm:$0x1]  ;;  %v4693_v32 = vshll.u32 %v4368_v36, 16  ;;  %v4371_v57 = vld [vmem:[#allocation2 + $0xc0] sm:$0xf] }
 0x161   : > { %v1636_v15 = vpop.f32.mrf.mxu0  ;;  %v4664_v54 = vsel %vm13248_vm12, %v4659_v27, %v4663_v6  ;;  %v4682_v30 = vor.u32 %v4681_v8, %v4677_v58  ;;  %18637 = vst [vmem:[#allocation35_spill] sm:$0xff] %v14847_v1  ;;  %v4687_v13 = vrot.slane %v4685_v50, 5  ;;  %v4692_v61 = vrot.slane %v4690_v40, 4  ;;  %v14859_v36 = vld [vmem:[#allocation2 + $0xc4] sm:$0xf] }
 0x162   : > { %18634 = vst [vmem:[#allocation32_spill] sm:$0xff] %v14835_v16  ;;  %v14845_v3 = vadd.f32 %v1928_v55, %v1636_v15  ;;  %v11413_v48 = vcombine.low %v4654_v47, %v4664_v54  ;;  %v4673_v59 = vrot.slane %v4672_v42, 4  ;;  %v4695_v26 = vrot.slane %v4693_v32, 5  ;;  %18639 = vst [vmem:[#allocation37_spill] sm:$0xff] %v14859_v36  ;;  %v14863_v40 = vld [vmem:[#allocation2 + $0xc8] sm:$0x1] }
 0x163   : > { %v12377_v39 = vpop.f32.mrf.mxu0  ;;  %v4683_v16 = vrot.slane %v4682_v30, 4  ;;  %v4699_v14 = vshll.u32 %v14841_v56, 16  ;;  %v4703_v6 = vshrl.u32 %v14841_v56, 16  ;;  %v4709_v42 = vshll.u32 %v14847_v1, 16  ;;  %18640 = vst [vmem:[#allocation38_spill] sm:$0xff] %v14863_v40 }
 0x164   : > { %18636 = vst [vmem:[#allocation34_spill] sm:$0xff] %v14845_v3  ;;  %12609 = vmatmul.mubr.msk.bf16.gmra.mxu1 %vm1453_vm9, %v11413_v48  ;;  %v4678_v55 = vsel %vm13248_vm12, %v4673_v59, %v4677_v58  ;;  %v14857_v50 = vadd.f32 %v12411_v52, %v12377_v39  ;;  %v4696_v8 = vor.u32 %v4695_v26, %v4692_v61  ;;  %v4374_v54 = vld [vmem:[#allocation2 + $0xcc] sm:$0xf]  ;;  %v13031_v48 = vld [vmem:[#allocation2 + $0xb4] sm:$0xff]   ;;  %v14866_v39 = vpop.f32.mrf.mxu1  ;;  %v4717_v3 = vshll.u32 %v4371_v57, 16 }
 0x165   : > { %12575 = vmatmul.mubr.msk.bf16.gmra.mxu0 %vm1453_vm9, %v13029_v20  ;;  %v4714_v20 = vshrl.u32 %v4371_v57, 16  ;;  %v4688_v27 = vsel %vm13248_vm12, %v4683_v16, %v4687_v13  ;;  %v4701_v47 = vrot.slane %v4699_v14, 5  ;;  %v4705_v15 = vrot.slane %v4703_v6, 4  ;;  %18641 = vst [vmem:[#allocation39_spill] sm:$0xff] %v14866_v39  ;;  %v14872_v13 = vld [vmem:[#allocation2 + $0xd0] sm:$0xf] }
 0x166   : > { %12578 = vmatprep.mubr.msk.bf16.mxu0 %vm1453_vm9, %v13030_v7  ;;  %18638 = vst [vmem:[#allocation36_spill] sm:$0xff] %v14857_v50  ;;  %v11414_v30 = vcombine.low %v4678_v55, %v4688_v27  ;;  %v4711_v58 = vrot.slane %v4709_v42, 5  ;;  %v4697_v52 = vrot.slane %v4696_v8, 4  ;;  %v13032_v50 = vld [vmem:[#allocation2 + $0xc0] sm:$0xff]   ;;  %v4723_v16 = vshll.u32 %v14859_v36, 16 }
 0x167   : > { %v4716_v32 = vrot.slane %v4714_v20, 4  ;;  %v4706_v59 = vor.u32 %v4705_v15, %v4701_v47  ;;  %v4727_v14 = vshrl.u32 %v14859_v36, 16  ;;  %v4733_v26 = vshll.u32 %v14863_v40, 16  ;;  %v14876_v8 = vld [vmem:[#allocation2 + $0xd4] sm:$0x1] }
 0x168   : > { %12612 = vmatprep.mubr.msk.bf16.mxu1 %vm1453_vm9, %v11414_v30  ;;  %v4738_v61 = vshrl.u32 %v4374_v54, 16  ;;  %v4741_v6 = vshll.u32 %v4374_v54, 16  ;;  %v4702_v55 = vsel %vm13248_vm12, %v4697_v52, %v4701_v47  ;;  %v4719_v20 = vrot.slane %v4717_v3, 5  ;;  %v5055_v39 = vld [vmem:[#allocation2 + $0x18] sm:$0xe] }
 0x169   : > { %v4707_v42 = vrot.slane %v4706_v59, 4  ;;  %v4725_v27 = vrot.slane %v4723_v16, 5  ;;  %v4729_v57 = vrot.slane %v4727_v14, 4  ;;  %v4735_v15 = vrot.slane %v4733_v26, 5  ;;  %v5056_v14 = vld [vmem:[#allocation2 + $0x24] sm:$0xe] }
 0x16a   : > { %v4740_v7 = vrot.slane %v4738_v61, 4  ;;  %v4743_v30 = vrot.slane %v4741_v6, 5  ;;  %v4720_v54 = vor.u32 %v4719_v20, %v4716_v32  ;;  %v4747_v36 = vshll.u32 %v14872_v13, 16 }
 0x16b   : > { %v4712_v40 = vsel %vm13248_vm12, %v4707_v42, %v4711_v58  ;;  %v12414_v1 = vpop.f32.mrf.mxu1  ;;  %v4751_v47 = vshrl.u32 %v14872_v13, 16  ;;  %v4730_v52 = vor.u32 %v4729_v57, %v4725_v27  ;;  %v4757_v16 = vshll.u32 %v14876_v8, 16 }
 0x16c   : > { %v11415_v3 = vcombine.low %v4702_v55, %v4712_v40  ;;  %v4744_v59 = vor.u32 %v4743_v30, %v4740_v7  ;;  %v4721_v26 = vrot.slane %v4720_v54, 4  ;;  %v11434_v56 = vrot.slane %v5055_v39, 9  ;;  %v14887_v40 = vpop.f32.mrf.mxu0  ;;  %v5057_v54 = vld [vmem:[#allocation2 + $0x30] sm:$0xe] }
 0x16d   : > { %12579 = vmatmul.mubr.msk.bf16.gmra.mxu0 %vm1453_vm9, %v13031_v48  ;;  %v1944_v61 = vpop.f32.mrf.mxu1  ;;  %v4749_v48 = vrot.slane %v4747_v36, 5  ;;  %v4753_v6 = vrot.slane %v4751_v47, 4  ;;  %v4731_v58 = vrot.slane %v4730_v52, 4  ;;  %v4759_v42 = vrot.slane %v4757_v16, 5  ;;  %v5058_v52 = vld [vmem:[#allocation2 + $0x3c] sm:$0xe] }
 0x16e   : > { %12582 = vmatprep.mubr.msk.bf16.mxu0 %vm1453_vm9, %v13032_v50  ;;  %12613 = vmatmul.mubr.msk.bf16.gmra.mxu1 %vm1453_vm9, %v11415_v3  ;;  %v4745_v32 = vrot.slane %v4744_v59, 4  ;;  %v5121_v20 = vrot.slane %v14538_v0, 5  ;;  %v13033_v50 = vld [vmem:[#allocation2 + $0xcc] sm:$0xff]   ;;  %v4726_v7 = vsel %vm13248_vm12, %v4721_v26, %v4725_v27  ;;  %v5124_v30 = vrot.slane %v14540_v29, 5 }
 0x16f   : > { %v4754_v55 = vor.u32 %v4753_v6, %v4749_v48  ;;  %v12415_v57 = vpop.f32.mrf.mxu1  ;;  %v11435_v36 = vrot.slane %v5056_v14, 9  ;;  %v4736_v39 = vsel %vm13248_vm12, %v4731_v58, %v4735_v15  ;;  %v18642_v26 = vrot.slane %v14559_v19, 5 }
 0x170   : > { %v4750_v47 = vsel %vm13248_vm12, %v4745_v32, %v4749_v48  ;;  %v5122_v0 = vsel %vm13649_vm2, %v11434_v56, %v5121_v20  ;;  %v5123_v3 = vrot.slane %v5121_v20, 4  ;;  %v11416_v59 = vcombine.low %v4726_v7, %v4736_v39  ;;  %v5059_v32 = vld [vmem:[#allocation2 + $0x48] sm:$0xe] }
 0x171   : > { %v4755_v16 = vrot.slane %v4754_v55, 4  ;;  %v14898_v27 = vpop.f32.mrf.mxu1  ;;  %v5129_v29 = vsel %vm13649_vm2, %v11435_v36, %v18642_v26  ;;  %v18643_v14 = vmov %v18642_v26  ;;  %v11436_v6 = vrot.slane %v5057_v54, 9 }
 0x172   : > { %v5130_v15 = vrot.slane %v18643_v14, 4  ;;  %v5125_v48 = vsel %vm13649_vm2, %v5123_v3, %v5124_v30  ;;  %v5135_v56 = vrot.slane %v14591_v49, 5  ;;  %v5138_v58 = vrot.slane %v14608_v10, 5  ;;  %12616 = vmatprep.mubr.msk.bf16.mxu1 %vm1453_vm9, %v11416_v59  ;;  %v5060_v49 = vld [vmem:[#allocation2 + $0x54] sm:$0xe] }
 0x173   : > { %v4760_v7 = vsel %vm13248_vm12, %v4755_v16, %v4759_v42  ;;  %v11451_v55 = vcombine.low %v5122_v0, %v5125_v48  ;;  %v18644_v19 = vrot.slane %v14567_v12, 5  ;;  %v12454_v36 = vpop.f32.mrf.mxu1  ;;  %v11437_v54 = vrot.slane %v5058_v52, 9  ;;  %v5061_v14 = vld [vmem:[#allocation2 + $0x60] sm:$0xe] }
 0x174   : > { %v12380_v20 = vpop.f32.mrf.mxu0  ;;  %v11417_v10 = vcombine.low %v4750_v47, %v4760_v7  ;;  %v5137_v0 = vrot.slane %v5135_v56, 4  ;;  %v5142_v12 = vrot.slane %v14617_v18, 5  ;;  %v11438_v16 = vrot.slane %v5059_v32, 9 }
 0x175   : > { %12583 = vmatmul.mubr.msk.bf16.gmra.mxu0 %vm1453_vm9, %v13033_v50  ;;  %v5132_v30 = vsel %vm13649_vm2, %v5130_v15, %v18644_v19  ;;  %v14918_v39 = vadd.f32 %v12414_v1, %v12380_v20  ;;  %v5136_v50 = vsel %vm13649_vm2, %v11436_v6, %v5135_v56  ;;  %v14923_v42 = vpop.f32.mrf.mxu1  ;;  %v5149_v26 = vrot.slane %v14645_v33, 5 }
 0x176   : > { %v11452_v3 = vcombine.low %v5129_v29, %v5132_v30  ;;  %v1652_v59 = vpop.f32.mrf.mxu0  ;;  %12622 = vmatprep.mubr.msk.bf16.mxu0 %vm1453_vm9, %v11451_v55  ;;  %12617 = vmatmul.mubr.msk.bf16.gmra.mxu1 %vm1453_vm9, %v11417_v10  ;;  %v5152_v1 = vrot.slane %v14653_v28, 5  ;;  %v11439_v47 = vrot.slane %v5060_v49, 9  ;;  %v5156_v29 = vrot.slane %v14669_v17, 5 }
 0x177   : > { %v14927_v52 = vadd.f32 %v1944_v61, %v1652_v59  ;;  %v12455_v48 = vpop.f32.mrf.mxu1  ;;  %v5139_v6 = vsel %vm13649_vm2, %v5137_v0, %v5138_v58  ;;  %v5143_v18 = vsel %vm13649_vm2, %v11437_v54, %v5142_v12  ;;  %v5144_v56 = vrot.slane %v5142_v12, 4  ;;  %v5062_v54 = vld [vmem:[#allocation2 + $0x6c] sm:$0xe]  ;;  %v5063_v0 = vld [vmem:[#allocation2 + $0x78] sm:$0xe] }
 0x178   : > { %v12381_v15 = vpop.f32.mrf.mxu0  ;;  %v14938_v33 = vsel %vm13649_vm2, %v11438_v16, %v5149_v26  ;;  %v11453_v28 = vcombine.low %v5136_v50, %v5139_v6  ;;  %v5151_v32 = vrot.slane %v5149_v26, 4  ;;  %v14944_v17 = vsel %vm13649_vm2, %v11439_v47, %v5156_v29 }
 0x179   : > { %v14940_v61 = vadd.f32 %v12415_v57, %v12381_v15  ;;  %v14948_v7 = vpop.f32.mrf.mxu1  ;;  %v18645_v58 = vrot.slane %v14625_v53, 5  ;;  %v5158_v19 = vrot.slane %v5156_v29, 4  ;;  %v11440_v30 = vrot.slane %v5061_v14, 9 }
 0x17a   : > { %v14946_v20 = vpop.f32.mrf.mxu0  ;;  %v5163_v57 = vrot.slane %v14697_v2, 5  ;;  %v5173_v49 = vrot.slane %v14727_v63, 5  ;;  %v5153_v50 = vsel %vm13649_vm2, %v5151_v32, %v5152_v1  ;;  %v5166_v59 = vrot.slane %v14707_v45, 5 }
 0x17b   : > { %v5146_v55 = vsel %vm13649_vm2, %v5144_v56, %v18645_v58  ;;  %v12458_v53 = vpop.f32.mrf.mxu1  ;;  %v11455_v16 = vcombine.low %v14938_v33, %v5153_v50  ;;  %v18646_v26 = vrot.slane %v14678_v34, 5  ;;  %v11441_v47 = vrot.slane %v5062_v54, 9  ;;  %v5064_v34 = vld [vmem:[#allocation2 + $0x84] sm:$0xe] }
 0x17c   : > { %v11454_v10 = vcombine.low %v5143_v18, %v5146_v55  ;;  %v12420_v12 = vpop.f32.mrf.mxu0  ;;  %v14969_v63 = vsel %vm13649_vm2, %v11440_v30, %v5163_v57  ;;  %v5165_v1 = vrot.slane %v5163_v57, 4  ;;  %v5170_v29 = vrot.slane %v14717_v35, 5 }
 0x17d   : > { %12623 = vmatmul.mubr.msk.bf16.vlgmr.msra.gmra.mxu0 %vm1453_vm9, %v11452_v3  ;;  %v14965_v2 = vsel %vm13649_vm2, %v5158_v19, %v18646_v26  ;;  %v2386_v45 = vadd.f32 %v12420_v12, %v14536_v9  ;;  %v2631_v15 = vpop.f32.mrf.mxu1  ;;  %v11442_v18 = vrot.slane %v5063_v0, 9  ;;  %v5177_v56 = vrot.slane %v14745_v11, 5  ;;  %v5066_v12 = vld [vmem:[#allocation2 + $0x9c] sm:$0xe] }
 0x17e   : > { %12626 = vmatprep.mubr.msk.bf16.mxu0 %vm1453_vm9, %v11453_v28  ;;  %v11456_v3 = vcombine.low %v14944_v17, %v14965_v2  ;;  %v2257_v14 = vpop.f32.mrf.mxu0  ;;  %v5167_v6 = vsel %vm13649_vm2, %v5165_v1, %v5166_v59  ;;  %v5180_v33 = vrot.slane %v14747_v46, 5  ;;  %v14986_v35 = vsel %vm13649_vm2, %v11441_v47, %v5170_v29 }
 0x17f   : > { %v2384_v9 = vadd.f32 %v2257_v14, %v14565_v4  ;;  %v14981_v28 = vadd.f32 %v12454_v36, %v2386_v45  ;;  %v11457_v32 = vcombine.low %v14969_v63, %v5167_v6  ;;  %v12459_v58 = vpop.f32.mrf.mxu1  ;;  %v5172_v55 = vrot.slane %v5170_v29, 4 }
 0x180   : > { %v12421_v17 = vpop.f32.mrf.mxu0  ;;  %v14990_v19 = vsel %vm13649_vm2, %v11442_v18, %v5177_v56  ;;  %v5179_v11 = vrot.slane %v5177_v56, 4  ;;  %v11443_v30 = vrot.slane %v5064_v34, 9  ;;  %v5184_v36 = vrot.slane %v14770_v43, 5 }
 0x181   : > { %v2387_v46 = vadd.f32 %v12421_v17, %v14582_v24  ;;  %v14994_v4 = vadd.f32 %v14923_v42, %v2384_v9  ;;  %v14999_v54 = vpop.f32.mrf.mxu1  ;;  %v5174_v50 = vsel %vm13649_vm2, %v5172_v55, %v5173_v49  ;;  %v5187_v0 = vrot.slane %v14774_v41, 5 }
 0x182   : > { %v14997_v57 = vpop.f32.mrf.mxu0  ;;  %v5181_v59 = vsel %vm13649_vm2, %v5179_v11, %v5180_v33  ;;  %v11458_v24 = vcombine.low %v14986_v35, %v5174_v50  ;;  %v15013_v63 = vsel %vm13649_vm2, %v11443_v30, %v5184_v36  ;;  %v5186_v49 = vrot.slane %v5184_v36, 4 }
 0x183   : > { %v15006_v26 = vadd.f32 %v12455_v48, %v2387_v46  ;;  %v11459_v42 = vcombine.low %v14990_v19, %v5181_v59  ;;  %v12462_v2 = vpop.f32.mrf.mxu1  ;;  %v11445_v41 = vrot.slane %v5066_v12, 9  ;;  %v5198_v29 = vrot.slane %v14801_v22, 5 }
 0x184   : > { %v12424_v43 = vpop.f32.mrf.mxu0  ;;  %v15019_v47 = vsel %vm13649_vm2, %v5186_v49, %v5187_v0  ;;  %v5191_v11 = vrot.slane %v14785_v44, 5 }
 0x185   : > { %12627 = vmatmul.mubr.msk.bf16.gmra.mxu0 %vm1453_vm9, %v11454_v10  ;;  %v2390_v1 = vadd.f32 %v12424_v43, %v14589_v23  ;;  %v2647_v45 = vpop.f32.mrf.mxu1  ;;  %v5201_v10 = vrot.slane %v14810_v5, 5  ;;  %v11460_v23 = vcombine.low %v15013_v63, %v15019_v47  ;;  %v15030_v18 = vsel %vm13649_vm2, %v11445_v41, %v5198_v29  ;;  %v18647_v63 = vld [vmem:[#allocation16_spill] sm:$0xff]  ;;  %v18649_v47 = vld [vmem:[#allocation17_spill] sm:$0xff] }
 0x186   : > { %12630 = vmatprep.mubr.msk.bf16.mxu0 %vm1453_vm9, %v11455_v16  ;;  %v2273_v48 = vpop.f32.mrf.mxu0  ;;  %v5200_v56 = vrot.slane %v5198_v29, 4  ;;  %v5193_v12 = vrot.slane %v5191_v11, 4  ;;  %v5194_v43 = vrot.slane %v14790_v25, 5 }
 0x187   : > { %v2388_v34 = vadd.f32 %v2273_v48, %v14631_v38  ;;  %v15024_v14 = vadd.f32 %v12458_v53, %v2390_v1  ;;  %v12463_v16 = vpop.f32.mrf.mxu1 }
 0x188   : > { %v12425_v6 = vpop.f32.mrf.mxu0  ;;  %v15041_v38 = vsel %vm13649_vm2, %v5200_v56, %v5201_v10  ;;  %v5195_v48 = vsel %vm13649_vm2, %v5193_v12, %v5194_v43  ;;  %v18653_v43 = vld [vmem:[#allocation21_spill] sm:$0xff] }
 0x189   : > { %v2391_v33 = vadd.f32 %v12425_v6, %v14651_v31  ;;  %v15033_v9 = vadd.f32 %v2631_v15, %v2388_v34  ;;  %v15037_v5 = vpop.f32.mrf.mxu1  ;;  %v11462_v35 = vcombine.low %v15030_v18, %v15041_v38 }
 0x18a   : > { %v15035_v22 = vpop.f32.mrf.mxu0 }
 0x18b   : > { %v15043_v53 = vadd.f32 %v12459_v58, %v2391_v33  ;;  %v12466_v55 = vpop.f32.mrf.mxu1  ;;  %v5065_v58 = vld [vmem:[#allocation2 + $0x90] sm:$0xe] }
 0x18c   : > { %v12428_v17 = vpop.f32.mrf.mxu0 }
 0x18d   : > { %12631 = vmatmul.mubr.msk.bf16.gmra.mxu0 %vm1453_vm9, %v11456_v3  ;;  %v2394_v31 = vadd.f32 %v12428_v17, %v14661_v60  ;;  %v2663_v19 = vpop.f32.mrf.mxu1 }
 0x18e   : > { %12634 = vmatprep.mubr.msk.bf16.mxu0 %vm1453_vm9, %v11457_v32  ;;  %v2289_v15 = vpop.f32.mrf.mxu0  ;;  %v11444_v32 = vrot.slane %v5065_v58, 9 }
 0x18f   : > { %v2392_v30 = vadd.f32 %v2289_v15, %v14676_v21  ;;  %v15052_v46 = vadd.f32 %v12462_v2, %v2394_v31  ;;  %v12467_v50 = vpop.f32.mrf.mxu1 }
 0x190   : > { %v12429_v36 = vpop.f32.mrf.mxu0  ;;  %v5192_v41 = vsel %vm13649_vm2, %v11444_v32, %v5191_v11 }
 0x191   : > { %v2395_v59 = vadd.f32 %v12429_v36, %v14695_v62  ;;  %v15055_v0 = vadd.f32 %v2647_v45, %v2392_v30  ;;  %v15059_v60 = vpop.f32.mrf.mxu1  ;;  %v18648_v45 = vld [vmem:[#allocation30_spill] sm:$0xff]  ;;  %v11461_v33 = vcombine.low %v5192_v41, %v5195_v48  ;;  %v18651_v30 = vld [vmem:[#allocation31_spill] sm:$0xff]  ;;  %v18652_v36 = vld [vmem:[#allocation20_spill] sm:$0xff] }
 0x192   : > { %v15057_v3 = vpop.f32.mrf.mxu0  ;;  %v5205_v25 = vrot.slane %v18648_v45, 5  ;;  %v5208_v58 = vrot.slane %v18651_v30, 5  ;;  %v18655_v45 = vld [vmem:[#allocation37_spill] sm:$0xff] }
 0x193   : > { %v15062_v44 = vadd.f32 %v12463_v16, %v2395_v59  ;;  %v12470_v2 = vpop.f32.mrf.mxu1  ;;  %v18650_v16 = vld [vmem:[#allocation19_spill] sm:$0xff] }
 0x194   : > { %v12432_v21 = vpop.f32.mrf.mxu0  ;;  %v5207_v11 = vrot.slane %v5205_v25, 4 }
 0x195   : > { %12635 = vmatmul.mubr.msk.bf16.gmra.mxu0 %vm1453_vm9, %v11458_v24  ;;  %v2398_v49 = vadd.f32 %v12432_v21, %v18647_v63  ;;  %v2679_v1 = vpop.f32.mrf.mxu1  ;;  %v5067_v24 = vld [vmem:[#allocation2 + $0xa8] sm:$0xe]  ;;  %v5068_v21 = vld [vmem:[#allocation2 + $0xb4] sm:$0xe]  ;;  %v18654_v63 = vld [vmem:[#allocation33_spill] sm:$0xff] }
 0x196   : > { %12638 = vmatprep.mubr.msk.bf16.mxu0 %vm1453_vm9, %v11459_v42  ;;  %v2305_v62 = vpop.f32.mrf.mxu0  ;;  %v11446_v15 = vrot.slane %v5067_v24, 9 }
 0x197   : > { %v2396_v29 = vadd.f32 %v2305_v62, %v18649_v47  ;;  %v15073_v10 = vadd.f32 %v12466_v55, %v2398_v49  ;;  %v12471_v6 = vpop.f32.mrf.mxu1  ;;  %v5212_v49 = vrot.slane %v18654_v63, 5  ;;  %v5219_v47 = vrot.slane %v18655_v45, 5 }
 0x198   : > { %v12433_v34 = vpop.f32.mrf.mxu0  ;;  %v5206_v48 = vsel %vm13649_vm2, %v11446_v15, %v5205_v25 }
 0x199   : > { %v2399_v56 = vadd.f32 %v12433_v34, %v18650_v16  ;;  %v15076_v42 = vadd.f32 %v2663_v19, %v2396_v29  ;;  %v15078_v31 = vpop.f32.mrf.mxu1  ;;  %v18656_v29 = vld [vmem:[#allocation23_spill] sm:$0xff]  ;;  %v5069_v34 = vld [vmem:[#allocation2 + $0xc0] sm:$0xe]  ;;  %v5214_v15 = vrot.slane %v5212_v49, 4 }
 0x19a   : > { %v2308_v17 = vpop.f32.mrf.mxu0 }
 0x19b   : > { %v15082_v59 = vadd.f32 %v2308_v17, %v18652_v36  ;;  %v15084_v55 = vadd.f32 %v12467_v50, %v2399_v56  ;;  %v12474_v12 = vpop.f32.mrf.mxu1  ;;  %v5209_v50 = vsel %vm13649_vm2, %v5207_v11, %v5208_v58  ;;  %v18657_v17 = vld [vmem:[#allocation35_spill] sm:$0xff]  ;;  %v18658_v36 = vld [vmem:[#allocation24_spill] sm:$0xff]  ;;  %v11448_v58 = vrot.slane %v5069_v34, 9 }
 0x19c   : > { %v12436_v32 = vpop.f32.mrf.mxu0  ;;  %v5215_v30 = vrot.slane %v18657_v17, 5  ;;  %v11463_v25 = vcombine.low %v5206_v48, %v5209_v50  ;;  %v18660_v48 = vld [vmem:[#allocation25_spill] sm:$0xff]  ;;  %v5070_v34 = vld [vmem:[#allocation2 + $0xcc] sm:$0xe] }
 0x19d   : > { %12639 = vmatmul.mubr.msk.bf16.gmra.mxu0 %vm1453_vm9, %v11460_v23  ;;  %v2402_v19 = vadd.f32 %v12436_v32, %v18653_v43  ;;  %v2695_v41 = vpop.f32.mrf.mxu1  ;;  %v5220_v18 = vsel %vm13649_vm2, %v11448_v58, %v5219_v47  ;;  %v18662_v58 = vld [vmem:[#allocation28_spill] sm:$0xff] }
 0x19e   : > { %12642 = vmatprep.mubr.msk.bf16.mxu0 %vm1453_vm9, %v11461_v33  ;;  %v2321_v62 = vpop.f32.mrf.mxu0  ;;  %v11447_v33 = vrot.slane %v5068_v21, 9  ;;  %v5226_v21 = vrot.slane %v14872_v13, 5  ;;  %v18661_v13 = vld [vmem:[#allocation27_spill] sm:$0xff] }
 0x19f   : > { %v2400_v23 = vadd.f32 %v2321_v62, %v18656_v29  ;;  %v15096_v24 = vadd.f32 %v12470_v2, %v2402_v19  ;;  %v12475_v56 = vpop.f32.mrf.mxu1  ;;  %v5221_v62 = vrot.slane %v5219_v47, 4  ;;  %v18659_v2 = vld [vmem:[#allocation38_spill] sm:$0xff] }
 0x1a0   : > { %v12437_v16 = vpop.f32.mrf.mxu0  ;;  %v5222_v19 = vrot.slane %v18659_v2, 5 }
 0x1a1   : > { %v2403_v32 = vadd.f32 %v12437_v16, %v18658_v36  ;;  %v15100_v43 = vadd.f32 %v2679_v1, %v2400_v23  ;;  %v15104_v11 = vpop.f32.mrf.mxu1  ;;  %v5213_v23 = vsel %vm13649_vm2, %v11447_v33, %v5212_v49  ;;  %v11517_v49 = vld [vmem:[%s18549_s2 + $0x2] sm:$0x3] }
 0x1a2   : > { %v15102_v63 = vpop.f32.mrf.mxu0  ;;  %v5223_v38 = vsel %vm13649_vm2, %v5221_v62, %v5222_v19  ;;  %12969 = vmatprep.subr.msk.bf16.mxu1 %vm1502_vm0, %v11517_v49  ;;  %v6693_v47 = vsel %vm1502_vm0, %v11517_v49, 0 }
 0x1a3   : > { %v15107_v45 = vadd.f32 %v12471_v6, %v2403_v32  ;;  %v12478_v1 = vpop.f32.mrf.mxu1  ;;  %v5216_v6 = vsel %vm13649_vm2, %v5214_v15, %v5215_v30  ;;  %v5228_v15 = vrot.slane %v5226_v21, 4  ;;  %v11465_v19 = vcombine.low %v5220_v18, %v5223_v38  ;;  %12655 = vmatpush3.bf16.msra.mxu1 %v6693_v47  ;;  %v18665_v47 = vld [vmem:[#allocation36_spill] sm:$0xff] }
 0x1a4   : > { %v12440_v29 = vpop.f32.mrf.mxu0  ;;  %v11464_v32 = vcombine.low %v5213_v23, %v5216_v6 }
 0x1a5   : > { %12643 = vmatmul.mubr.msk.bf16.gmra.mxu0 %vm1453_vm9, %v11462_v35  ;;  %v2406_v50 = vadd.f32 %v12440_v29, %v18660_v48  ;;  %v2711_v17 = vpop.f32.mrf.mxu1 }
 0x1a6   : > { %12646 = vmatprep.mubr.msk.bf16.mxu0 %vm1453_vm9, %v11463_v25  ;;  %v2337_v16 = vpop.f32.mrf.mxu0  ;;  %v11449_v25 = vrot.slane %v5070_v34, 9  ;;  %v18663_v34 = vld [vmem:[#allocation32_spill] sm:$0xff] }
 0x1a7   : > { %v2404_v35 = vadd.f32 %v2337_v16, %v18661_v13  ;;  %v15125_v36 = vadd.f32 %v12474_v12, %v2406_v50  ;;  %v12479_v30 = vpop.f32.mrf.mxu1  ;;  %v5229_v12 = vrot.slane %v14876_v8, 5  ;;  %v18664_v13 = vld [vmem:[#allocation34_spill] sm:$0xff] }
 0x1a8   : > { %v12441_v33 = vpop.f32.mrf.mxu0 }
 0x1a9   : > { %v2407_v2 = vadd.f32 %v12441_v33, %v18662_v58  ;;  %v15133_v62 = vadd.f32 %v2695_v41, %v2404_v35  ;;  %v15138_v48 = vpop.f32.mrf.mxu1  ;;  %v5227_v41 = vsel %vm13649_vm2, %v11449_v25, %v5226_v21  ;;  %v5230_v8 = vsel %vm13649_vm2, %v5228_v15, %v5229_v12 }
 0x1aa   : > { %v15136_v29 = vpop.f32.mrf.mxu0  ;;  %v11466_v33 = vcombine.low %v5227_v41, %v5230_v8 }
 0x1ab   : > { %v15140_v50 = vadd.f32 %v12475_v56, %v2407_v2  ;;  %v12482_v6 = vpop.f32.mrf.mxu1 }
 0x1ac   : > { %v12444_v23 = vpop.f32.mrf.mxu0 }
 0x1ad   : > { %12647 = vmatmul.mubr.msk.bf16.gmra.mxu0 %vm1453_vm9, %v11464_v32  ;;  %v2410_v16 = vadd.f32 %v12444_v23, %v18663_v34  ;;  %v2727_v38 = vpop.f32.mrf.mxu1 }
 0x1ae   : > { %12650 = vmatprep.mubr.msk.bf16.mxu0 %vm1453_vm9, %v11465_v19  ;;  %v2353_v18 = vpop.f32.mrf.mxu0 }
 0x1af   : > { %v2408_v35 = vadd.f32 %v2353_v18, %v18664_v13  ;;  %v15150_v56 = vadd.f32 %v12478_v1, %v2410_v16  ;;  %v12483_v32 = vpop.f32.mrf.mxu1 }
 0x1b0   : > { %v12445_v49 = vpop.f32.mrf.mxu0 }
 0x1b1   : > { %v2411_v58 = vadd.f32 %v12445_v49, %v18665_v47  ;;  %v15153_v2 = vadd.f32 %v2711_v17, %v2408_v35  ;;  %v15157_v23 = vpop.f32.mrf.mxu1 }
 0x1b2   : > { %v15155_v19 = vpop.f32.mrf.mxu0 }
 0x1b3   : > { %v15159_v21 = vadd.f32 %v12479_v30, %v2411_v58  ;;  %v15162_v15 = vpop.f32.mrf.mxu1  ;;  %v402_v58 = vld [vmem:[#allocation3 + $0x18] sm:$0x1] }
 0x1b5   : > { %v12448_v25 = vpop.f32.mrf.mxu0  ;;  %12651 = vmatmul.mubr.msk.bf16.gmra.mxu0 %vm1453_vm9, %v11466_v33  ;;  %v15165_v34 = vpop.f32.mrf.mxu1 }
 0x1b6   : > { %v2414_v1 = vadd.f32 %v12448_v25, %v14918_v39  ;;  %18666 = vst [vmem:[#allocation16_spill] sm:$0xff] %v15165_v34  ;;  %v403_v25 = vsel %vm13193_vm5, 0, %v402_v58 }
 0x1b7   : > { %v2369_v12 = vpop.f32.mrf.mxu0  ;;  %v15170_v8 = vpop.f32.mrf.mxu1  ;;  %404 = vst [vmem:[#allocation3 + $0x18] sm:$0x1] %v403_v25  ;;  %v400_v25 = vsel %vm13193_vm5, 0, %v399_v37 }
 0x1b8   : > { %v2412_v16 = vadd.f32 %v2369_v12, %v14927_v52  ;;  %v15168_v17 = vadd.f32 %v12482_v6, %v2414_v1  ;;  %18667 = vst [vmem:[#allocation30_spill] sm:$0xff] %v15170_v8  ;;  %401 = vst [vmem:[#allocation3 + $0xc] sm:$0x1] %v400_v25  ;;  %v408_v25 = vld [vmem:[#allocation3 + $0x30] sm:$0x1] }
 0x1b9   : > { %v12449_v41 = vpop.f32.mrf.mxu0  ;;  %v15177_v35 = vpop.f32.mrf.mxu1 }
 0x1ba   : > { %v2415_v30 = vadd.f32 %v12449_v41, %v14940_v61  ;;  %v15173_v18 = vadd.f32 %v2727_v38, %v2412_v16  ;;  %18668 = vst [vmem:[#allocation17_spill] sm:$0xff] %v15177_v35 }
 0x1bb   : > { %v15175_v13 = vpop.f32.mrf.mxu0  ;;  %v15181_v33 = vpop.f32.mrf.mxu1 }
 0x1bc   : > { %v15179_v49 = vadd.f32 %v12483_v32, %v2415_v30  ;;  %18669 = vst [vmem:[#allocation19_spill] sm:$0xff] %v15181_v33 }
 0x1bd   : > { %v12488_v39 = vpop.f32.mrf.mxu0  ;;  %v15186_v47 = vpop.f32.mrf.mxu1 }
 0x1be   : > { %v15184_v52 = vadd.f32 %v12488_v39, %v14981_v28  ;;  %18670 = vst [vmem:[#allocation31_spill] sm:$0xff] %v15186_v47  ;;  %v450_v47 = vld [vmem:[#allocation3 + $0x20] sm:$0x1]  ;;  %v6056_v33 = vld [vmem:[#allocation3 + $0x18] sm:$0xf] }
 0x1bf   : > { %v3341_v6 = vpop.f32.mrf.mxu0  ;;  %v12527_v12 = vpop.f32.mrf.mxu1  ;;  %v451_v35 = vsel %vm13203_vm6, 0, %v450_v47  ;;  %v409_v47 = vsel %vm13193_vm5, 0, %v408_v25 }
 0x1c0   : > { %v15189_v61 = vadd.f32 %v3341_v6, %v14994_v4  ;;  %452 = vst [vmem:[#allocation3 + $0x20] sm:$0x1] %v451_v35  ;;  %410 = vst [vmem:[#allocation3 + $0x30] sm:$0x1] %v409_v47 }
 0x1c1   : > { %v12489_v1 = vpop.f32.mrf.mxu0  ;;  %v15198_v28 = vpop.f32.mrf.mxu1 }
 0x1c2   : > { %18671 = vst [vmem:[#allocation20_spill] sm:$0xff] %v15189_v61  ;;  %v15194_v32 = vadd.f32 %v12489_v1, %v15006_v26  ;;  %18674 = vst [vmem:[#allocation33_spill] sm:$0xff] %v15198_v28 }
 0x1c3   : > { %v15196_v16 = vpop.f32.mrf.mxu0  ;;  %v12530_v30 = vpop.f32.mrf.mxu1 }
 0x1c4   : > { %18673 = vst [vmem:[#allocation21_spill] sm:$0xff] %v15194_v32 }
 0x1c5   : > { %v12492_v41 = vpop.f32.mrf.mxu0  ;;  %v3843_v6 = vpop.f32.mrf.mxu1 }
 0x1c6   : > { %v15201_v39 = vadd.f32 %v12492_v41, %v15024_v14 }
 0x1c7   : > { %v3357_v4 = vpop.f32.mrf.mxu0  ;;  %v12531_v1 = vpop.f32.mrf.mxu1 }
 0x1c8   : > { %18675 = vst [vmem:[#allocation37_spill] sm:$0xff] %v15201_v39  ;;  %v15204_v58 = vadd.f32 %v3357_v4, %v15033_v9  ;;  %v447_v39 = vld [vmem:[#allocation3 + $0x14] sm:$0x1] }
 0x1c9   : > { %v12493_v26 = vpop.f32.mrf.mxu0  ;;  %v15213_v41 = vpop.f32.mrf.mxu1  ;;  %v448_v37 = vsel %vm13203_vm6, 0, %v447_v39 }
 0x1ca   : > { %18676 = vst [vmem:[#allocation23_spill] sm:$0xff] %v15204_v58  ;;  %v3475_v28 = vadd.f32 %v12493_v26, %v15043_v53  ;;  %18678 = vst [vmem:[#allocation35_spill] sm:$0xff] %v15213_v41  ;;  %v405_v41 = vld [vmem:[#allocation3 + $0x24] sm:$0x1] }
 0x1cb   : > { %v15211_v14 = vpop.f32.mrf.mxu0  ;;  %v12534_v58 = vpop.f32.mrf.mxu1  ;;  %449 = vst [vmem:[#allocation3 + $0x14] sm:$0x1] %v448_v37 }
 0x1cc   : > { %v15215_v9 = vadd.f32 %v12527_v12, %v3475_v28  ;;  %v406_v28 = vsel %vm13193_vm5, 0, %v405_v41 }
 0x1cd   : > { %v12496_v4 = vpop.f32.mrf.mxu0  ;;  %v3859_v8 = vpop.f32.mrf.mxu1  ;;  %407 = vst [vmem:[#allocation3 + $0x24] sm:$0x1] %v406_v28 }
 0x1ce   : > { %v3478_v53 = vadd.f32 %v12496_v4, %v15052_v46  ;;  %v456_v4 = vld [vmem:[#allocation3 + $0x38] sm:$0x1] }
 0x1cf   : > { %v3373_v26 = vpop.f32.mrf.mxu0  ;;  %v12535_v32 = vpop.f32.mrf.mxu1 }
 0x1d0   : > { %v3476_v35 = vadd.f32 %v3373_v26, %v15055_v0  ;;  %v15223_v12 = vadd.f32 %v12530_v30, %v3478_v53  ;;  %v457_v0 = vsel %vm13203_vm6, 0, %v456_v4  ;;  %v453_v26 = vld [vmem:[#allocation3 + $0x2c] sm:$0x1] }
 0x1d1   : > { %v12497_v39 = vpop.f32.mrf.mxu0  ;;  %v15232_v34 = vpop.f32.mrf.mxu1  ;;  %458 = vst [vmem:[#allocation3 + $0x38] sm:$0x1] %v457_v0 }
 0x1d2   : > { %v3479_v37 = vadd.f32 %v12497_v39, %v15062_v44  ;;  %v15228_v46 = vadd.f32 %v3843_v6, %v3476_v35  ;;  %18680 = vst [vmem:[#allocation38_spill] sm:$0xff] %v15232_v34  ;;  %v454_v6 = vsel %vm13203_vm6, 0, %v453_v26 }
 0x1d3   : > { %v15230_v25 = vpop.f32.mrf.mxu0  ;;  %v12538_v41 = vpop.f32.mrf.mxu1  ;;  %455 = vst [vmem:[#allocation3 + $0x2c] sm:$0x1] %v454_v6 }
 0x1d4   : > { %18679 = vst [vmem:[#allocation24_spill] sm:$0xff] %v15230_v25  ;;  %v15236_v30 = vadd.f32 %v12531_v1, %v3479_v37 }
 0x1d5   : > { %v12500_v53 = vpop.f32.mrf.mxu0  ;;  %v3875_v44 = vpop.f32.mrf.mxu1 }
 0x1d6   : > { %v3482_v47 = vadd.f32 %v12500_v53, %v15073_v10  ;;  %v414_v53 = vld [vmem:[#allocation3 + $0x48] sm:$0x1] }
 0x1d7   : > { %v3389_v28 = vpop.f32.mrf.mxu0  ;;  %v12539_v4 = vpop.f32.mrf.mxu1  ;;  %v415_v26 = vsel %vm13193_vm5, 0, %v414_v53 }
 0x1d8   : > { %v3480_v35 = vadd.f32 %v3389_v28, %v15076_v42  ;;  %v15242_v39 = vadd.f32 %v12534_v58, %v3482_v47  ;;  %416 = vst [vmem:[#allocation3 + $0x48] sm:$0x1] %v415_v26  ;;  %v411_v47 = vld [vmem:[#allocation3 + $0x3c] sm:$0x1] }
 0x1d9   : > { %v12501_v34 = vpop.f32.mrf.mxu0  ;;  %v15249_v10 = vpop.f32.mrf.mxu1 }
 0x1da   : > { %v3483_v1 = vadd.f32 %v12501_v34, %v15084_v55  ;;  %v15245_v37 = vadd.f32 %v3859_v8, %v3480_v35  ;;  %18682 = vst [vmem:[#allocation27_spill] sm:$0xff] %v15249_v10  ;;  %v412_v55 = vsel %vm13193_vm5, 0, %v411_v47 }
 0x1db   : > { %v15247_v0 = vpop.f32.mrf.mxu0  ;;  %v12542_v58 = vpop.f32.mrf.mxu1  ;;  %413 = vst [vmem:[#allocation3 + $0x3c] sm:$0x1] %v412_v55 }
 0x1dc   : > { %18681 = vst [vmem:[#allocation25_spill] sm:$0xff] %v15247_v0  ;;  %v15251_v61 = vadd.f32 %v12535_v32, %v3483_v1  ;;  %v462_v32 = vld [vmem:[#allocation3 + $0x50] sm:$0x1] }
 0x1dd   : > { %v12504_v42 = vpop.f32.mrf.mxu0  ;;  %v3891_v8 = vpop.f32.mrf.mxu1  ;;  %v463_v53 = vsel %vm13203_vm6, 0, %v462_v32 }
 0x1de   : > { %v3486_v28 = vadd.f32 %v12504_v42, %v15096_v24  ;;  %464 = vst [vmem:[#allocation3 + $0x50] sm:$0x1] %v463_v53  ;;  %v459_v24 = vld [vmem:[#allocation3 + $0x44] sm:$0x1] }
 0x1df   : > { %v3405_v34 = vpop.f32.mrf.mxu0  ;;  %v12543_v10 = vpop.f32.mrf.mxu1 }
 0x1e0   : > { %v3484_v6 = vadd.f32 %v3405_v34, %v15100_v43  ;;  %v15259_v35 = vadd.f32 %v12538_v41, %v3486_v28  ;;  %v460_v43 = vsel %vm13203_vm6, 0, %v459_v24  ;;  %v420_v28 = vld [vmem:[#allocation3 + $0x60] sm:$0x1]  ;;  %v6193_v24 = vld [vmem:[%s18549_s2] sm:$0x3] }
 0x1e1   : > { %v12505_v1 = vpop.f32.mrf.mxu0  ;;  %v15268_v47 = vpop.f32.mrf.mxu1  ;;  %461 = vst [vmem:[#allocation3 + $0x44] sm:$0x1] %v460_v43  ;;  %12970 = vmatprep.subr.msk.bf16.mxu0 %vm1502_vm0, %v6193_v24 }
 0x1e2   : > { %v3487_v26 = vadd.f32 %v12505_v1, %v15107_v45  ;;  %v15264_v0 = vadd.f32 %v3875_v44, %v3484_v6  ;;  %18684 = vst [vmem:[#allocation32_spill] sm:$0xff] %v15268_v47  ;;  %v421_v45 = vsel %vm13193_vm5, 0, %v420_v28  ;;  %v417_v1 = vld [vmem:[#allocation3 + $0x54] sm:$0x1] }
 0x1e3   : > { %v15266_v42 = vpop.f32.mrf.mxu0  ;;  %v12546_v34 = vpop.f32.mrf.mxu1  ;;  %422 = vst [vmem:[#allocation3 + $0x60] sm:$0x1] %v421_v45 }
 0x1e4   : > { %18683 = vst [vmem:[#allocation28_spill] sm:$0xff] %v15266_v42  ;;  %v15272_v41 = vadd.f32 %v12539_v4, %v3487_v26  ;;  %v418_v4 = vsel %vm13193_vm5, 0, %v417_v1  ;;  %v468_v1 = vld [vmem:[#allocation3 + $0x68] sm:$0x1] }
 0x1e5   : > { %v12508_v55 = vpop.f32.mrf.mxu0  ;;  %v3907_v32 = vpop.f32.mrf.mxu1  ;;  %419 = vst [vmem:[#allocation3 + $0x54] sm:$0x1] %v418_v4 }
 0x1e6   : > { %v3490_v44 = vadd.f32 %v12508_v55, %v15125_v36  ;;  %v6162_v55 = vld [vmem:[#allocation3 + $0x4] sm:$0xf] }
 0x1e7   : > { %v3421_v6 = vpop.f32.mrf.mxu0  ;;  %v12547_v28 = vpop.f32.mrf.mxu1 }
 0x1e8   : > { %v3488_v53 = vadd.f32 %v3421_v6, %v15133_v62  ;;  %v15278_v47 = vadd.f32 %v12542_v58, %v3490_v44  ;;  %v6985_v62 = vsel %vm1502_vm0, %v6193_v24, 0  ;;  %v6161_v58 = vld [vmem:[#allocation3] sm:$0xf] }
 0x1e9   : > { %v12509_v26 = vpop.f32.mrf.mxu0  ;;  %12689 = vmatpush3.bf16.msra.mxu0 %v6985_v62  ;;  %v11550_v44 = vcombine.low %v6161_v58, %v6162_v55 }
 0x1ea   : > { %v3491_v43 = vadd.f32 %v12509_v26, %v15140_v50  ;;  %v15286_v36 = vadd.f32 %v3891_v8, %v3488_v53  ;;  %v469_v50 = vsel %vm13203_vm6, 0, %v468_v1  ;;  %v15298_v53 = vpop.f32.mrf.mxu1  ;;  %v465_v26 = vld [vmem:[#allocation3 + $0x5c] sm:$0x1] }
 0x1eb   : > { %v15290_v45 = vpop.f32.mrf.mxu0  ;;  %12690 = vmatprep.mubr.msk.bf16.mxu0 %vm1453_vm9, %v11550_v44  ;;  %18686 = vst [vmem:[#allocation36_spill] sm:$0xff] %v15298_v53  ;;  %470 = vst [vmem:[#allocation3 + $0x68] sm:$0x1] %v469_v50  ;;  %v466_v62 = vsel %vm13203_vm6, 0, %v465_v26 }
 0x1ec   : > { %18685 = vst [vmem:[#allocation34_spill] sm:$0xff] %v15290_v45  ;;  %v15292_v6 = vadd.f32 %v12543_v10, %v3491_v43  ;;  %467 = vst [vmem:[#allocation3 + $0x5c] sm:$0x1] %v466_v62 }
 0x1ed   : > { %v12512_v4 = vpop.f32.mrf.mxu0 }
 0x1ee   : > { %v3494_v8 = vadd.f32 %v12512_v4, %v15150_v56  ;;  %v426_v4 = vld [vmem:[#allocation3 + $0x78] sm:$0x1] }
 0x1ef   : > { %v3437_v24 = vpop.f32.mrf.mxu0  ;;  %v427_v26 = vsel %vm13193_vm5, 0, %v426_v4 }
 0x1f0   : > { %v3492_v10 = vadd.f32 %v3437_v24, %v15153_v2  ;;  %v15303_v43 = vadd.f32 %v12546_v34, %v3494_v8  ;;  %428 = vst [vmem:[#allocation3 + $0x78] sm:$0x1] %v427_v26  ;;  %v6211_v2 = vshrl.u32 %v6161_v58, 16  ;;  %v423_v34 = vld [vmem:[#allocation3 + $0x6c] sm:$0x1] }
 0x1f1   : > { %v12513_v45 = vpop.f32.mrf.mxu0 }
 0x1f2   : > { %v3495_v1 = vadd.f32 %v12513_v45, %v15159_v21  ;;  %v15306_v42 = vadd.f32 %v3907_v32, %v3492_v10  ;;  %v12550_v44 = vpop.f32.mrf.mxu1  ;;  %v6214_v21 = vshll.u32 %v6161_v58, 16  ;;  %v424_v32 = vsel %vm13193_vm5, 0, %v423_v34 }
 0x1f3   : > { %v15308_v56 = vpop.f32.mrf.mxu0  ;;  %425 = vst [vmem:[#allocation3 + $0x6c] sm:$0x1] %v424_v32  ;;  %v6213_v26 = vrot.slane %v6211_v2, 4  ;;  %v6220_v58 = vshll.u32 %v6162_v55, 16 }
 0x1f4   : > { %18687 = vst [vmem:[#allocation4_spill] sm:$0xff] %v15308_v56  ;;  %v15310_v50 = vadd.f32 %v12547_v28, %v3495_v1  ;;  %v3923_v53 = vpop.f32.mrf.mxu1  ;;  %v6224_v1 = vshrl.u32 %v6162_v55, 16 }
 0x1f5   : > { %v12516_v25 = vpop.f32.mrf.mxu0 }
 0x1f6   : > { %18688 = vst [vmem:[#allocation5_spill] sm:$0xff] %v15310_v50  ;;  %v3498_v8 = vadd.f32 %v12516_v25, %v15168_v17  ;;  %v12551_v24 = vpop.f32.mrf.mxu1  ;;  %v6216_v25 = vrot.slane %v6214_v21, 5 }
 0x1f7   : > { %v3453_v45 = vpop.f32.mrf.mxu0 }
 0x1f8   : > { %v3496_v28 = vadd.f32 %v3453_v45, %v15173_v18  ;;  %v15318_v62 = vadd.f32 %v12550_v44, %v3498_v8  ;;  %v15320_v10 = vpop.f32.mrf.mxu1  ;;  %v474_v44 = vld [vmem:[#allocation3 + $0x80] sm:$0x1]  ;;  %v6222_v8 = vrot.slane %v6220_v58, 5  ;;  %v6226_v45 = vrot.slane %v6224_v1, 4 }
 0x1f9   : > { %18689 = vst [vmem:[#allocation40_spill] sm:$0xff] %v15320_v10  ;;  %v12517_v4 = vpop.f32.mrf.mxu0  ;;  %v6217_v21 = vor.u32 %v6216_v25, %v6213_v26 }
 0x1fa   : > { %v3499_v56 = vadd.f32 %v12517_v4, %v15179_v49  ;;  %v15323_v50 = vadd.f32 %v3923_v53, %v3496_v28  ;;  %v15325_v17 = vpop.f32.mrf.mxu1  ;;  %v475_v49 = vsel %vm13203_vm6, 0, %v474_v44  ;;  %v6194_v53 = vld [vmem:[#allocation3 + $0x8] sm:$0x1]  ;;  %v6227_v55 = vor.u32 %v6226_v45, %v6222_v8 }
 0x1fb   : > { %18690 = vst [vmem:[#allocation41_spill] sm:$0xff] %v15325_v17  ;;  %v15327_v34 = vpop.f32.mrf.mxu0  ;;  %476 = vst [vmem:[#allocation3 + $0x80] sm:$0x1] %v475_v49  ;;  %v6218_v4 = vrot.slane %v6217_v21, 4 }
 0x1fc   : > { %v15329_v32 = vadd.f32 %v12551_v24, %v3499_v56  ;;  %v15331_v18 = vpop.f32.mrf.mxu1  ;;  %v6230_v56 = vshll.u32 %v6194_v53, 16 }
 0x1fd   : > { %18692 = vst [vmem:[#allocation43_spill] sm:$0xff] %v15331_v18  ;;  %v15333_v10 = vpop.f32.mrf.mxu0  ;;  %v6228_v18 = vrot.slane %v6227_v55, 4  ;;  %v6223_v44 = vsel %vm13248_vm12, %v6218_v4, %v6222_v8 }
 0x1fe   : > { %18691 = vst [vmem:[#allocation42_spill] sm:$0xff] %v15329_v32  ;;  %v15337_v2 = vpop.f32.mrf.mxu1  ;;  %v6232_v1 = vrot.slane %v6230_v56, 5  ;;  %v471_v56 = vld [vmem:[#allocation3 + $0x74] sm:$0x1] }
 0x1ff   : > { %v15339_v28 = vpop.f32.mrf.mxu0  ;;  %v472_v4 = vsel %vm13203_vm6, 0, %v471_v56  ;;  %v15380_v56 = vld [vmem:[%s18549_s2 + $0x4] sm:$0x3] }
 0x200   : > { %v15341_v24 = vpop.f32.mrf.mxu1  ;;  %v6233_v26 = vsel %vm13248_vm12, %v6228_v18, %v6232_v1  ;;  %473 = vst [vmem:[#allocation3 + $0x74] sm:$0x1] %v472_v4  ;;  %18698 = vst [vmem:[#allocation49_spill] sm:$0xff] %v15380_v56  ;;  %12971 = vmatprep.subr.msk.bf16.mxu1 %vm1502_vm0, %v15380_v56 }
 0x201   : > { %v15343_v58 = vpop.f32.mrf.mxu0  ;;  %v11518_v45 = vcombine.low %v6223_v44, %v6233_v26  ;;  %v432_v44 = vld [vmem:[#allocation3 + $0x90] sm:$0x1] }
 0x202   : > { %v15345_v32 = vpop.f32.mrf.mxu1 }
 0x203   : > { %v15349_v17 = vpop.f32.mrf.mxu0  ;;  %12656 = vmatprep.mubr.msk.bf16.mxu1 %vm1453_vm9, %v11518_v45  ;;  %v433_v45 = vsel %vm13193_vm5, 0, %v432_v44 }
 0x204   : > { %v15353_v25 = vpop.f32.mrf.mxu1  ;;  %434 = vst [vmem:[#allocation3 + $0x90] sm:$0x1] %v433_v45 }
 0x205   : > { %v15355_v49 = vpop.f32.mrf.mxu0 }
 0x206   : > { %v15357_v53 = vpop.f32.mrf.mxu1 }
 0x207   : > { %18693 = vst [vmem:[#allocation44_spill] sm:$0xff] %v15357_v53  ;;  %v15360_v21 = vpop.f32.mrf.mxu0 }
 0x208   : > { %v15362_v55 = vpop.f32.mrf.mxu1 }
 0x209   : > { %18694 = vst [vmem:[#allocation45_spill] sm:$0xff] %v15362_v55  ;;  %v12561_v8 = vpop.f32.mrf.mxu0  ;;  %v429_v55 = vld [vmem:[#allocation3 + $0x84] sm:$0x1] }
 0x20a   : > { %v15367_v18 = vadd.f32 %v12561_v8, %v15215_v9  ;;  %v15369_v1 = vpop.f32.mrf.mxu1  ;;  %v430_v8 = vsel %vm13193_vm5, 0, %v429_v55 }
 0x20b   : > { %18696 = vst [vmem:[#allocation47_spill] sm:$0xff] %v15369_v1  ;;  %v15371_v26 = vpop.f32.mrf.mxu0  ;;  %431 = vst [vmem:[#allocation3 + $0x84] sm:$0x1] %v430_v8 }
 0x20c   : > { %18695 = vst [vmem:[#allocation46_spill] sm:$0xff] %v15367_v18  ;;  %v15375_v51 = vpop.f32.mrf.mxu1 }
 0x20d   : > { %18697 = vst [vmem:[#allocation48_spill] sm:$0xff] %v15375_v51  ;;  %v12564_v9 = vpop.f32.mrf.mxu0  ;;  %v480_v51 = vld [vmem:[#allocation3 + $0x98] sm:$0x1] }
 0x20e   : > { %v15387_v4 = vadd.f32 %v12564_v9, %v15223_v12  ;;  %v15389_v44 = vpop.f32.mrf.mxu1  ;;  %v481_v18 = vsel %vm13203_vm6, 0, %v480_v51 }
 0x20f   : > { %18699 = vst [vmem:[#allocation50_spill] sm:$0xff] %v15389_v44  ;;  %v4202_v45 = vpop.f32.mrf.mxu0  ;;  %482 = vst [vmem:[#allocation3 + $0x98] sm:$0x1] %v481_v18 }
 0x210   : > { %v15392_v1 = vadd.f32 %v4202_v45, %v15228_v46  ;;  %v15394_v53 = vpop.f32.mrf.mxu1 }
 0x211   : > { %18701 = vst [vmem:[#allocation52_spill] sm:$0xff] %v15394_v53  ;;  %v12565_v55 = vpop.f32.mrf.mxu0 }
 0x212   : > { %18700 = vst [vmem:[#allocation51_spill] sm:$0xff] %v15392_v1  ;;  %v15399_v56 = vadd.f32 %v12565_v55, %v15236_v30  ;;  %v15403_v9 = vpop.f32.mrf.mxu1 }
 0x213   : > { %v15401_v12 = vpop.f32.mrf.mxu0  ;;  %18703 = vst [vmem:[#allocation54_spill] sm:$0xff] %v15403_v9 }
 0x214   : > { %18702 = vst [vmem:[#allocation53_spill] sm:$0xff] %v15399_v56  ;;  %v15405_v44 = vpop.f32.mrf.mxu1  ;;  %v477_v56 = vld [vmem:[#allocation3 + $0x8c] sm:$0x1] }
 0x215   : > { %v12568_v8 = vpop.f32.mrf.mxu0  ;;  %18704 = vst [vmem:[#allocation55_spill] sm:$0xff] %v15405_v44 }
 0x216   : > { %v15408_v46 = vadd.f32 %v12568_v8, %v15242_v39  ;;  %v15410_v53 = vpop.f32.mrf.mxu1 }
 0x217   : > { %v4218_v45 = vpop.f32.mrf.mxu0  ;;  %18706 = vst [vmem:[#allocation57_spill] sm:$0xff] %v15410_v53 }
 0x218   : > { %18705 = vst [vmem:[#allocation56_spill] sm:$0xff] %v15408_v46  ;;  %v15413_v51 = vadd.f32 %v4218_v45, %v15245_v37  ;;  %v15415_v1 = vpop.f32.mrf.mxu1  ;;  %v478_v37 = vsel %vm13203_vm6, 0, %v477_v56  ;;  %v438_v45 = vld [vmem:[#allocation3 + $0xa8] sm:$0x1] }
 0x219   : > { %v12569_v18 = vpop.f32.mrf.mxu0  ;;  %18708 = vst [vmem:[#allocation59_spill] sm:$0xff] %v15415_v1  ;;  %479 = vst [vmem:[#allocation3 + $0x8c] sm:$0x1] %v478_v37  ;;  %v18725_v46 = vld [vmem:[#allocation14_spill] sm:$0xff] }
 0x21a   : > { %18707 = vst [vmem:[#allocation58_spill] sm:$0xff] %v15413_v51  ;;  %v15418_v30 = vadd.f32 %v12569_v18, %v15251_v61  ;;  %v439_v61 = vsel %vm13193_vm5, 0, %v438_v45  ;;  %v435_v18 = vld [vmem:[#allocation3 + $0x9c] sm:$0x1]  ;;  %v486_v45 = vld [vmem:[#allocation3 + $0xb0] sm:$0x1] }
 0x21b   : > { %v15420_v55 = vpop.f32.mrf.mxu0  ;;  %v15422_v9 = vpop.f32.mrf.mxu1  ;;  %440 = vst [vmem:[#allocation3 + $0xa8] sm:$0x1] %v439_v61  ;;  %v18718_v61 = vld [vmem:[#allocation10_spill] sm:$0xff]  ;;  %v18724_v51 = vld [vmem:[#allocation15_spill] sm:$0xff] }
 0x21c   : > { %18709 = vst [vmem:[#allocation60_spill] sm:$0xff] %v15418_v30  ;;  %18710 = vst [vmem:[#allocation61_spill] sm:$0xff] %v15422_v9 }
 0x21d   : > { %v12572_v44 = vpop.f32.mrf.mxu0  ;;  %v15427_v8 = vpop.f32.mrf.mxu1 }
 0x21e   : > { %v15425_v39 = vadd.f32 %v12572_v44, %v15259_v35  ;;  %18712 = vst [vmem:[#allocation63_spill] sm:$0xff] %v15427_v8  ;;  %v436_v35 = vsel %vm13193_vm5, 0, %v435_v18 }
 0x21f   : > { %v4234_v53 = vpop.f32.mrf.mxu0  ;;  %v15436_v9 = vpop.f32.mrf.mxu1  ;;  %437 = vst [vmem:[#allocation3 + $0x9c] sm:$0x1] %v436_v35 }
 0x220   : > { %18711 = vst [vmem:[#allocation62_spill] sm:$0xff] %v15425_v39  ;;  %v15434_v1 = vadd.f32 %v4234_v53, %v15264_v0  ;;  %18714 = vst [vmem:[#allocation65_spill] sm:$0xff] %v15436_v9  ;;  %v487_v0 = vsel %vm13203_vm6, 0, %v486_v45  ;;  %v18717_v9 = vld [vmem:[#allocation11_spill] sm:$0xff] }
 0x221   : > { %v12573_v44 = vpop.f32.mrf.mxu0  ;;  %v15443_v8 = vpop.f32.mrf.mxu1  ;;  %488 = vst [vmem:[#allocation3 + $0xb0] sm:$0x1] %v487_v0 }
 0x222   : > { %18713 = vst [vmem:[#allocation64_spill] sm:$0xff] %v15434_v1  ;;  %v15441_v56 = vadd.f32 %v12573_v44, %v15272_v41  ;;  %18716 = vst [vmem:[#allocation67_spill] sm:$0xff] %v15443_v8  ;;  %v1836_v1 = vadd.f32 %v18718_v61, %v18717_v9  ;;  %v18720_v44 = vld [vmem:[#allocation13_spill] sm:$0xff]  ;;  %v1868_v9 = vadd.f32 %v18725_v46, %v18724_v51 }
 0x223   : > { %v15445_v37 = vpop.f32.mrf.mxu0 }
 0x224   : > { %18715 = vst [vmem:[#allocation66_spill] sm:$0xff] %v15441_v56  ;;  %v15454_v35 = vpop.f32.mrf.mxu1  ;;  %v18721_v56 = vld [vmem:[#allocation12_spill] sm:$0xff]  ;;  %v2385_v39 = vadd.f32 %v14997_v57, %v1836_v1  ;;  %v18728_v57 = vld [vmem:[#allocation29_spill] sm:$0xff]  ;;  %v18729_v1 = vld [vmem:[#allocation26_spill] sm:$0xff] }
 0x225   : > { %v12576_v53 = vpop.f32.mrf.mxu0  ;;  %18719 = vst [vmem:[#allocation11_spill] sm:$0xff] %v15454_v35  ;;  %v1852_v8 = vadd.f32 %v18721_v56, %v18720_v44  ;;  %v18726_v35 = vld [vmem:[#allocation22_spill] sm:$0xff] }
 0x226   : > { %v15452_v18 = vadd.f32 %v12576_v53, %v15278_v47  ;;  %v15462_v45 = vpop.f32.mrf.mxu1  ;;  %v18727_v56 = vld [vmem:[#allocation18_spill] sm:$0xff] }
 0x227   : > { %v4250_v41 = vpop.f32.mrf.mxu0  ;;  %18723 = vst [vmem:[#allocation13_spill] sm:$0xff] %v15462_v45  ;;  %v2389_v47 = vadd.f32 %v15035_v22, %v1852_v8  ;;  %v1900_v44 = vadd.f32 %v18727_v56, %v18726_v35  ;;  %v2743_v22 = vadd.f32 %v14948_v7, %v2385_v39 }
 0x228   : > { %v15460_v30 = vadd.f32 %v4250_v41, %v15286_v36  ;;  %v15470_v61 = vpop.f32.mrf.mxu1  ;;  %v1916_v36 = vadd.f32 %v18729_v1, %v18728_v57  ;;  %v18730_v41 = vld [vmem:[#allocation39_spill] sm:$0xff] }
 0x229   : > { %v12577_v0 = vpop.f32.mrf.mxu0  ;;  %v1932_v45 = vadd.f32 %v18730_v41, %v14887_v40  ;;  %v2401_v8 = vadd.f32 %v15102_v63, %v1900_v44  ;;  %v2747_v57 = vadd.f32 %v14999_v54, %v2389_v47  ;;  %v2755_v63 = vadd.f32 %v15059_v60, %v15082_v59  ;;  %v18731_v59 = vld [vmem:[#allocation24_spill] sm:$0xff]  ;;  %v18735_v44 = vld [vmem:[#allocation21_spill] sm:$0xff] }
 0x22a   : > { %18722 = vst [vmem:[#allocation10_spill] sm:$0xff] %v15460_v30  ;;  %v15468_v53 = vadd.f32 %v12577_v0, %v15292_v6  ;;  %v1948_v30 = vadd.f32 %v14898_v27, %v14946_v20  ;;  %v2393_v6 = vadd.f32 %v15057_v3, %v1868_v9  ;;  %v15484_v51 = vpop.f32.mrf.mxu1  ;;  %v2405_v35 = vadd.f32 %v15136_v29, %v1916_v36  ;;  %v18734_v47 = vld [vmem:[#allocation16_spill] sm:$0xff]  ;;  %v18737_v36 = vld [vmem:[#allocation17_spill] sm:$0xff] }
 0x22b   : > { %v15480_v46 = vpop.f32.mrf.mxu0  ;;  %v2409_v0 = vadd.f32 %v15155_v19, %v1932_v45  ;;  %v3469_v20 = vadd.f32 %v15196_v16, %v2743_v22  ;;  %v3473_v29 = vadd.f32 %v15211_v14, %v2747_v57  ;;  %v2759_v54 = vadd.f32 %v15078_v31, %v2401_v8  ;;  %v18732_v45 = vld [vmem:[#allocation5_spill] sm:$0xff] }
 0x22c   : > { %v2413_v56 = vadd.f32 %v15175_v13, %v1948_v30  ;;  %v2751_v3 = vadd.f32 %v15037_v5, %v2393_v6  ;;  %v483_v5 = vld [vmem:[#allocation3 + $0xa4] sm:$0x1]  ;;  %v3940_v60 = vadd.f32 %v15162_v15, %v15184_v52  ;;  %v18739_v15 = vld [vmem:[#allocation19_spill] sm:$0xff]  ;;  %v444_v8 = vld [vmem:[#allocation3 + $0xc0] sm:$0x1] }
 0x22d   : > { %v12580_v40 = vpop.f32.mrf.mxu0  ;;  %v2767_v30 = vadd.f32 %v15138_v48, %v2409_v0  ;;  %v484_v31 = vsel %vm13203_vm6, 0, %v483_v5  ;;  %v3939_v41 = vadd.f32 %v18737_v36, %v3469_v20  ;;  %v18738_v22 = vld [vmem:[#allocation37_spill] sm:$0xff]  ;;  %v18741_v0 = vld [vmem:[#allocation31_spill] sm:$0xff]  ;;  %v445_v5 = vsel %vm13193_vm5, 0, %v444_v8 }
 0x22e   : > { %v15492_v27 = vadd.f32 %v12580_v40, %v15303_v43  ;;  %v15502_v13 = vpop.f32.mrf.mxu1  ;;  %v2763_v43 = vadd.f32 %v15104_v11, %v2405_v35  ;;  %v2771_v16 = vadd.f32 %v15157_v23, %v2413_v56  ;;  %v3477_v14 = vadd.f32 %v18731_v59, %v2751_v3  ;;  %v18733_v11 = vld [vmem:[#allocation20_spill] sm:$0xff]  ;;  %v18736_v23 = vld [vmem:[#allocation30_spill] sm:$0xff]  ;;  %485 = vst [vmem:[#allocation3 + $0xa4] sm:$0x1] %v484_v31  ;;  %v18740_v35 = vld [vmem:[#allocation23_spill] sm:$0xff] }
 0x22f   : > { %v4266_v7 = vpop.f32.mrf.mxu0  ;;  %v3938_v48 = vadd.f32 %v18734_v47, %v18733_v11  ;;  %v3941_v1 = vadd.f32 %v18736_v23, %v18735_v44  ;;  %v3944_v52 = vadd.f32 %v18739_v15, %v18738_v22  ;;  %v3942_v56 = vadd.f32 %v18741_v0, %v18740_v35  ;;  %v18742_v40 = vld [vmem:[#allocation33_spill] sm:$0xff]  ;;  %v441_v20 = vld [vmem:[#allocation3 + $0xb4] sm:$0x1]  ;;  %v18744_v59 = vld [vmem:[#allocation28_spill] sm:$0xff]  ;;  %446 = vst [vmem:[#allocation3 + $0xc0] sm:$0x1] %v445_v5 }
 0x230   : > { %v15500_v19 = vadd.f32 %v4266_v7, %v15306_v42  ;;  %v15514_v9 = vpop.f32.mrf.mxu1  ;;  %v3943_v57 = vadd.f32 %v18742_v40, %v3473_v29  ;;  %v18743_v7 = vld [vmem:[#allocation25_spill] sm:$0xff]  ;;  %v18745_v11 = vld [vmem:[#allocation34_spill] sm:$0xff]  ;;  %v18746_v44 = vld [vmem:[#allocation4_spill] sm:$0xff]  ;;  %v442_v36 = vsel %vm13193_vm5, 0, %v441_v20  ;;  %v4299_v15 = vadd.f32 %v15333_v10, %v3940_v60 }
 0x231   : > { %v12581_v39 = vpop.f32.mrf.mxu0  ;;  %v3481_v3 = vadd.f32 %v18743_v7, %v2755_v63  ;;  %v3489_v47 = vadd.f32 %v18745_v11, %v2763_v43  ;;  %v3493_v31 = vadd.f32 %v18746_v44, %v2767_v30  ;;  %v18747_v29 = vld [vmem:[#allocation35_spill] sm:$0xff]  ;;  %v3497_v63 = vadd.f32 %v15327_v34, %v2771_v16  ;;  %443 = vst [vmem:[#allocation3 + $0xb4] sm:$0x1] %v442_v36  ;;  %v18748_v60 = vld [vmem:[#allocation38_spill] sm:$0xff] }
 0x232   : > { %v15512_v42 = vadd.f32 %v12581_v39, %v18732_v45  ;;  %v15531_v39 = vpop.f32.mrf.mxu1  ;;  %v3485_v45 = vadd.f32 %v18744_v59, %v2759_v54  ;;  %v3947_v22 = vadd.f32 %v18747_v29, %v3477_v14  ;;  %v4297_v54 = vadd.f32 %v15339_v28, %v3938_v48  ;;  %v492_v14 = vld [vmem:[#allocation3 + $0xc8] sm:$0x1]  ;;  %v18749_v48 = vld [vmem:[#allocation27_spill] sm:$0xff]  ;;  %v18757_v29 = vld [vmem:[#allocation44_spill] sm:$0xff] }
 0x233   : > { %v15525_v6 = vpop.f32.mrf.mxu0  ;;  %v4300_v43 = vadd.f32 %v15343_v58, %v3941_v1  ;;  %v4298_v30 = vadd.f32 %v15349_v17, %v3939_v41  ;;  %v4303_v0 = vadd.f32 %v15355_v49, %v3944_v52  ;;  %v4301_v34 = vadd.f32 %v15360_v21, %v3942_v56  ;;  %v18750_v1 = vld [vmem:[#allocation32_spill] sm:$0xff]  ;;  %v18754_v5 = vld [vmem:[#allocation42_spill] sm:$0xff]  ;;  %v18755_v59 = vld [vmem:[#allocation43_spill] sm:$0xff] }
 0x234   : > { %v15546_v35 = vpop.f32.mrf.mxu1  ;;  %v4302_v10 = vadd.f32 %v15371_v26, %v3943_v57  ;;  %v493_v16 = vsel %vm13203_vm6, 0, %v492_v14  ;;  %v3951_v28 = vadd.f32 %v18748_v60, %v3481_v3  ;;  %v3955_v58 = vadd.f32 %v18749_v48, %v3485_v45  ;;  %v18751_v41 = vld [vmem:[#allocation36_spill] sm:$0xff]  ;;  %v18753_v26 = vld [vmem:[#allocation41_spill] sm:$0xff]  ;;  %v18756_v36 = vld [vmem:[#allocation46_spill] sm:$0xff] }
 0x235   : > { %v12584_v23 = vpop.f32.mrf.mxu0  ;;  %v3959_v17 = vadd.f32 %v18750_v1, %v3489_v47  ;;  %v3963_v49 = vadd.f32 %v18751_v41, %v3493_v31  ;;  %494 = vst [vmem:[#allocation3 + $0xc8] sm:$0x1] %v493_v16  ;;  %v18752_v21 = vld [vmem:[#allocation40_spill] sm:$0xff]  ;;  %v5025_v57 = vadd.f32 %v18753_v26, %v4299_v15  ;;  %v5023_v11 = vadd.f32 %v18755_v59, %v4297_v54  ;;  %v18759_v15 = vld [vmem:[#allocation47_spill] sm:$0xff]  ;;  %v18763_v14 = vld [vmem:[#allocation53_spill] sm:$0xff] }
 0x236   : > { %v15544_v8 = vadd.f32 %v12584_v23, %v15318_v62  ;;  %v12618_v52 = vpop.f32.mrf.mxu1  ;;  %v3967_v56 = vadd.f32 %v18752_v21, %v3497_v63  ;;  %v5026_v3 = vadd.f32 %v15337_v2, %v4300_v43  ;;  %v5024_v45 = vadd.f32 %v15341_v24, %v4298_v30  ;;  %v18760_v24 = vld [vmem:[#allocation51_spill] sm:$0xff]  ;;  %v18761_v54 = vld [vmem:[#allocation48_spill] sm:$0xff]  ;;  %v18771_v21 = vld [vmem:[#allocation57_spill] sm:$0xff] }
 0x237   : > { %v4282_v40 = vpop.f32.mrf.mxu0  ;;  %v4310_v47 = vadd.f32 %v15420_v55, %v3951_v28  ;;  %v5029_v31 = vadd.f32 %v15345_v32, %v4303_v0  ;;  %v15573_v23 = vadd.f32 %v15353_v25, %v4301_v34  ;;  %v15577_v63 = vadd.f32 %v18757_v29, %v18756_v36  ;;  %v15594_v25 = vld [vmem:[%s18550_s3] ss:$0 sm:$0xff]  ;;  %v18762_v0 = vld [vmem:[#allocation49_spill] sm:$0xff]  ;;  %v18766_v60 = vld [vmem:[#allocation56_spill] sm:$0xff] }
 0x238   : > { %v15555_v62 = vadd.f32 %v4282_v40, %v15323_v50  ;;  %v4306_v50 = vadd.f32 %v15401_v12, %v3947_v22  ;;  %v18758_v12 = vld [vmem:[#allocation45_spill] sm:$0xff]  ;;  %v15584_v2 = vadd.f32 %v18759_v15, %v15387_v4  ;;  %v15588_v55 = vadd.f32 %v18761_v54, %v18760_v24  ;;  %v5008_v43 = vpop.f32.mrf.mxu1  ;;  %v18764_v4 = vld [vmem:[#allocation50_spill] sm:$0xff]  ;;  %v18769_v1 = vld [vmem:[#allocation55_spill] sm:$0xff] }
 0x239   : > { %v12585_v7 = vpop.f32.mrf.mxu0  ;;  %v15580_v22 = vadd.f32 %v18758_v12, %v4302_v10  ;;  %v4314_v32 = vadd.f32 %v15445_v37, %v3955_v58  ;;  %v15598_v40 = vsel %vm1502_vm0, %v18762_v0, 0  ;;  %v15602_v34 = vadd.f32 %v18764_v4, %v18763_v14  ;;  %v18765_v10 = vld [vmem:[#allocation52_spill] sm:$0xff]  ;;  %v18767_v37 = vld [vmem:[#allocation54_spill] sm:$0xff]  ;;  %v18774_v12 = vld [vmem:[#allocation61_spill] sm:$0xff] }
 0x23a   : > { %v4328_v20 = vadd.f32 %v12585_v7, %v18754_v5  ;;  %v15605_v16 = vadd.f32 %v18765_v10, %v4306_v50  ;;  %v15609_v28 = vadd.f32 %v18767_v37, %v18766_v60  ;;  %v18768_v58 = vld [vmem:[#allocation58_spill] sm:$0xff]  ;;  %v18770_v7 = vld [vmem:[#allocation60_spill] sm:$0xff]  ;;  %v18772_v5 = vld [vmem:[#allocation59_spill] sm:$0xff]  ;;  %v4318_v36 = vadd.f32 %v15480_v46, %v3959_v17 }
 0x23b   : > { %v4285_v44 = vpop.f32.mrf.mxu0  ;;  %v15613_v41 = vadd.f32 %v18769_v1, %v18768_v58  ;;  %v15617_v26 = vadd.f32 %v18771_v21, %v18770_v7  ;;  %v15620_v59 = vadd.f32 %v18772_v5, %v4310_v47  ;;  %v15626_v50 = vld [vmem:[%s18551_s4] ss:$0 sm:$0xff]  ;;  %v18775_v24 = vld [vmem:[#allocation64_spill] sm:$0xff]  ;;  %v18776_v54 = vld [vmem:[#allocation63_spill] sm:$0xff]  ;;  %v4322_v58 = vadd.f32 %v15525_v6, %v3963_v49  ;;  %v12619_v1 = vpop.f32.mrf.mxu1 }
 0x23c   : > { %v18777_v14 = vld [vmem:[#allocation66_spill] sm:$0xff]  ;;  %v18778_v4 = vld [vmem:[#allocation65_spill] sm:$0xff]  ;;  %v18779_v17 = vld [vmem:[#allocation67_spill] sm:$0xff]  ;;  %v15664_v6 = vadd.f32 %v15502_v13, %v15492_v27  ;;  %v4326_v49 = vadd.f32 %v4285_v44, %v3967_v56 }
 0x23d   : > { %v12624_v30 = vpop.f32.mrf.mxu0  ;;  %v15639_v46 = vadd.f32 %v18778_v4, %v18777_v14  ;;  %v15642_v10 = vadd.f32 %v18779_v17, %v4314_v32  ;;  %v18780_v60 = vld [vmem:[#allocation11_spill] sm:$0xff]  ;;  %v18781_v21 = vld [vmem:[#allocation10_spill] sm:$0xff]  ;;  %v18782_v5 = vld [vmem:[#allocation13_spill] sm:$0xff]  ;;  %v15657_v32 = vadd.f32 %v15470_v61, %v15468_v53  ;;  %v15674_v53 = vadd.f32 %v15531_v39, %v15512_v42  ;;  %v5011_v27 = vpop.f32.mrf.mxu1 }
 0x23e   : > { %v5495_v48 = vadd.f32 %v12624_v30, %v5025_v57  ;;  %v18773_v57 = vld [vmem:[#allocation62_spill] sm:$0xff]  ;;  %v15634_v30 = vadd.f32 %v18776_v54, %v18775_v24  ;;  %v15646_v37 = vadd.f32 %v18780_v60, %v15452_v18  ;;  %v15660_v18 = vadd.f32 %v15484_v51, %v4318_v36  ;;  %v489_v56 = vld [vmem:[#allocation3 + $0xbc] sm:$0x1] }
 0x23f   : > { %v5366_v29 = vpop.f32.mrf.mxu0  ;;  %v15630_v15 = vadd.f32 %v18774_v12, %v18773_v57  ;;  %v15651_v57 = vadd.f32 %v18782_v5, %v18781_v21  ;;  %v15677_v61 = vadd.f32 %v15546_v35, %v4322_v58  ;;  %v15680_v51 = vadd.f32 %v12618_v52, %v15544_v8 }
 0x240   : > { %v5533_v0 = vmul.f32 %v15594_v25, %v5495_v48  ;;  %v5493_v47 = vadd.f32 %v5366_v29, %v5023_v11  ;;  %v15687_v42 = vadd.f32 %v12619_v1, %v4328_v20  ;;  %v490_v8 = vsel %vm13203_vm6, 0, %v489_v56 }
 0x241   : > { %v12625_v7 = vpop.f32.mrf.mxu0  ;;  %v15691_v52 = vadd.f32 %v5011_v27, %v4326_v49  ;;  %491 = vst [vmem:[#allocation3 + $0xbc] sm:$0x1] %v490_v8 }
 0x242   : > { %v5571_v11 = vadd.f32 %v15626_v50, %v5533_v0  ;;  %v5531_v48 = vmul.f32 %v15594_v25, %v5493_v47  ;;  %v5496_v29 = vadd.f32 %v12625_v7, %v5026_v3  ;;  %v15670_v3 = vadd.f32 %v15514_v9, %v15500_v19 }
 0x243   : > { %v5369_v12 = vpop.f32.mrf.mxu0  ;;  %v15685_v9 = vadd.f32 %v5008_v43, %v15555_v62 }
 0x244   : > { %v5603_v24 = vmax.f32 %v5571_v11, 0.0  ;;  %v5569_v54 = vadd.f32 %v15626_v50, %v5531_v48  ;;  %v5534_v0 = vmul.f32 %v15594_v25, %v5496_v29  ;;  %v5494_v47 = vadd.f32 %v5369_v12, %v5024_v45 }
 0x245   : > { %v12628_v13 = vpop.f32.mrf.mxu0 }
 0x246   : > { %v11901_v44 = vpack.c.bf16 %v5603_v24, %v5603_v24  ;;  %v5601_v36 = vmax.f32 %v5569_v54, 0.0  ;;  %v5572_v45 = vadd.f32 %v15626_v50, %v5534_v0  ;;  %v5532_v19 = vmul.f32 %v15594_v25, %v5494_v47  ;;  %v6049_v47 = vld [vmem:[#allocation3 + $0xc] sm:$0xf] }
 0x247   : > { %v5499_v39 = vadd.f32 %v12628_v13, %v5029_v31  ;;  %v5382_v35 = vpop.f32.mrf.mxu0 }
 0x248   : > { %v5747_v14 = vshrl.u32 %v11901_v44, 16  ;;  %v11899_v4 = vpack.c.bf16 %v5601_v36, %v5601_v36  ;;  %v5604_v17 = vmax.f32 %v5572_v45, 0.0  ;;  %v5750_v60 = vshll.u32 %v11901_v44, 16 }
 0x249   : > { %v5570_v58 = vadd.f32 %v15626_v50, %v5532_v19  ;;  %v5537_v7 = vmul.f32 %v15594_v25, %v5499_v39  ;;  %v5497_v62 = vadd.f32 %v5382_v35, %v15573_v23  ;;  %v12629_v20 = vpop.f32.mrf.mxu0 }
 0x24a   : > { %v5749_v43 = vrot.slane %v5747_v14, 7  ;;  %v5730_v31 = vshrl.u32 %v11899_v4, 16  ;;  %v5733_v1 = vshll.u32 %v11899_v4, 16  ;;  %v11902_v21 = vpack.c.bf16 %v5604_v17, %v5604_v17 }
 0x24b   : > { %v5602_v5 = vmax.f32 %v5570_v58, 0.0  ;;  %v5575_v11 = vadd.f32 %v15626_v50, %v5537_v7  ;;  %v5535_v48 = vmul.f32 %v15594_v25, %v5497_v62  ;;  %v5500_v29 = vadd.f32 %v12629_v20, %v15577_v63  ;;  %v5385_v49 = vpop.f32.mrf.mxu0  ;;  %v6060_v63 = vld [vmem:[#allocation3 + $0x20] sm:$0x1] }
 0x24c   : > { %v5752_v12 = vor.u32 %v5750_v60, %v5749_v43  ;;  %v5753_v24 = vrot.slane %v5749_v43, 4  ;;  %v5732_v54 = vrot.slane %v5730_v31, 7  ;;  %v5755_v0 = vshrl.u32 %v11902_v21, 16 }
 0x24d   : > { %v5758_v23 = vshll.u32 %v11902_v21, 16  ;;  %v11900_v27 = vpack.c.bf16 %v5602_v5, %v5602_v5  ;;  %v5607_v13 = vmax.f32 %v5575_v11, 0.0  ;;  %v5573_v56 = vadd.f32 %v15626_v50, %v5535_v48  ;;  %v12632_v44 = vpop.f32.mrf.mxu0 }
 0x24e   : > { %v6057_v45 = vsel %vm13238_vm11, %v5752_v12, %v6056_v33  ;;  %v5735_v19 = vor.u32 %v5733_v1, %v5732_v54  ;;  %v5736_v39 = vrot.slane %v5732_v54, 4  ;;  %v5757_v35 = vrot.slane %v5755_v0, 7  ;;  %v6053_v12 = vld [vmem:[#allocation3 + $0x14] sm:$0x1] }
 0x24f   : > { %6058 = vst [vmem:[#allocation3 + $0x18] sm:$0xf] %v6057_v45  ;;  %v5738_v8 = vshrl.u32 %v11900_v27, 16  ;;  %v5741_v14 = vshll.u32 %v11900_v27, 16  ;;  %v11905_v4 = vpack.c.bf16 %v5607_v13, %v5607_v13  ;;  %v5605_v17 = vmax.f32 %v5573_v56, 0.0  ;;  %v5398_v60 = vpop.f32.mrf.mxu0 }
 0x250   : > { %v6050_v58 = vsel %vm13238_vm11, %v5735_v19, %v6049_v47  ;;  %v5760_v7 = vor.u32 %v5758_v23, %v5757_v35  ;;  %v5762_v62 = vrot.slane %v5757_v35, 4  ;;  %v5538_v20 = vmul.f32 %v15594_v25, %v5500_v29  ;;  %v6070_v56 = vld [vmem:[#allocation3 + $0x30] sm:$0xf] }
 0x251   : > { %6051 = vst [vmem:[#allocation3 + $0xc] sm:$0xf] %v6050_v58  ;;  %v5740_v43 = vrot.slane %v5738_v8, 7  ;;  %v5781_v31 = vshrl.u32 %v11905_v4, 16  ;;  %v5784_v1 = vshll.u32 %v11905_v4, 16  ;;  %v11903_v21 = vpack.c.bf16 %v5605_v17, %v5605_v17  ;;  %v12633_v33 = vpop.f32.mrf.mxu0 }
 0x252   : > { %v5761_v11 = vsel %vm13254_vm13, %v5753_v24, %v5760_v7  ;;  %v6061_v48 = vsel %vm13193_vm5, %v5762_v62, %v6060_v63  ;;  %v5576_v54 = vadd.f32 %v15626_v50, %v5538_v20  ;;  %v5498_v0 = vadd.f32 %v5385_v49, %v15580_v22 }
 0x253   : > { %6059 = vst.msk [vmem:[#allocation3 + $0x1c] sm:$0xf] %vm280_vm1, %v5761_v11  ;;  %6062 = vst [vmem:[#allocation3 + $0x20] sm:$0x1] %v6061_v48  ;;  %v5743_v29 = vor.u32 %v5741_v14, %v5740_v43  ;;  %v5745_v47 = vrot.slane %v5740_v43, 4  ;;  %v5783_v23 = vrot.slane %v5781_v31, 7  ;;  %v5401_v13 = vpop.f32.mrf.mxu0  ;;  %v5503_v35 = vadd.f32 %v12632_v44, %v15584_v2 }
 0x254   : > { %v5764_v27 = vshrl.u32 %v11903_v21, 16  ;;  %v5767_v45 = vshll.u32 %v11903_v21, 16  ;;  %v5608_v19 = vmax.f32 %v5576_v54, 0.0  ;;  %v5536_v24 = vmul.f32 %v15594_v25, %v5498_v0  ;;  %v6063_v44 = vld [vmem:[#allocation3 + $0x24] sm:$0xf] }
 0x255   : > { %v5744_v63 = vsel %vm13254_vm13, %v5736_v39, %v5743_v29  ;;  %v6054_v22 = vsel %vm13193_vm5, %v5745_v47, %v6053_v12  ;;  %v5786_v49 = vor.u32 %v5784_v1, %v5783_v23  ;;  %v5787_v8 = vrot.slane %v5783_v23, 4  ;;  %v12636_v14 = vpop.f32.mrf.mxu0 }
 0x256   : > { %6052 = vst.msk [vmem:[#allocation3 + $0x10] sm:$0xf] %vm280_vm1, %v5744_v63  ;;  %6055 = vst [vmem:[#allocation3 + $0x14] sm:$0x1] %v6054_v22  ;;  %v15719_v4 = vrot.slane %v5764_v27, 7  ;;  %v11906_v17 = vpack.c.bf16 %v5608_v19, %v5608_v19  ;;  %v5574_v58 = vadd.f32 %v15626_v50, %v5536_v24  ;;  %v5541_v7 = vmul.f32 %v15594_v25, %v5503_v35 }
 0x257   : > { %v6071_v2 = vsel %vm13238_vm11, %v5786_v49, %v6070_v56  ;;  %v5501_v39 = vadd.f32 %v5398_v60, %v15588_v55  ;;  %v5504_v62 = vadd.f32 %v12633_v33, %v15602_v34  ;;  %v5502_v20 = vadd.f32 %v5401_v13, %v15605_v16  ;;  %v5414_v11 = vpop.f32.mrf.mxu0  ;;  %v6074_v16 = vld [vmem:[#allocation3 + $0x38] sm:$0x1] }
 0x258   : > { %6072 = vst [vmem:[#allocation3 + $0x30] sm:$0xf] %v6071_v2  ;;  %v5769_v43 = vor.u32 %v5767_v45, %v15719_v4  ;;  %v5770_v31 = vrot.slane %v15719_v4, 4  ;;  %v5789_v1 = vshrl.u32 %v11906_v17, 16  ;;  %v5792_v21 = vshll.u32 %v11906_v17, 16 }
 0x259   : > { %v5606_v48 = vmax.f32 %v5574_v58, 0.0  ;;  %v5579_v12 = vadd.f32 %v15626_v50, %v5541_v7  ;;  %v5539_v54 = vmul.f32 %v15594_v25, %v5501_v39  ;;  %v5542_v0 = vmul.f32 %v15594_v25, %v5504_v62  ;;  %v12637_v24 = vpop.f32.mrf.mxu0  ;;  %v6067_v39 = vld [vmem:[#allocation3 + $0x2c] sm:$0x1] }
 0x25a   : > { %v6064_v55 = vsel %vm13238_vm11, %v5769_v43, %v6063_v44  ;;  %v5791_v34 = vrot.slane %v5789_v1, 7  ;;  %v5540_v60 = vmul.f32 %v15594_v25, %v5502_v20  ;;  %v5507_v33 = vadd.f32 %v12636_v14, %v15609_v28 }
 0x25b   : > { %6065 = vst [vmem:[#allocation3 + $0x24] sm:$0xf] %v6064_v55  ;;  %v11904_v29 = vpack.c.bf16 %v5606_v48, %v5606_v48  ;;  %v5611_v47 = vmax.f32 %v5579_v12, 0.0  ;;  %v5577_v23 = vadd.f32 %v15626_v50, %v5539_v54  ;;  %v5580_v27 = vadd.f32 %v15626_v50, %v5542_v0  ;;  %v6084_v0 = vld [vmem:[#allocation3 + $0x48] sm:$0xf] }
 0x25c   : > { %v5794_v13 = vor.u32 %v5792_v21, %v5791_v34  ;;  %v5796_v56 = vrot.slane %v5791_v34, 4  ;;  %v5578_v45 = vadd.f32 %v15626_v50, %v5540_v60  ;;  %v5545_v19 = vmul.f32 %v15594_v25, %v5507_v33 }
 0x25d   : > { %v5772_v35 = vshrl.u32 %v11904_v29, 16  ;;  %v5775_v63 = vshll.u32 %v11904_v29, 16  ;;  %v11909_v22 = vpack.c.bf16 %v5611_v47, %v5611_v47  ;;  %v5609_v49 = vmax.f32 %v5577_v23, 0.0 }
 0x25e   : > { %v5795_v28 = vsel %vm13254_vm13, %v5787_v8, %v5794_v13  ;;  %v6075_v14 = vsel %vm13193_vm5, %v5796_v56, %v6074_v16  ;;  %v5612_v4 = vmax.f32 %v5580_v27, 0.0  ;;  %v5610_v17 = vmax.f32 %v5578_v45, 0.0  ;;  %v5417_v8 = vpop.f32.mrf.mxu0 }
 0x25f   : > { %6073 = vst.msk [vmem:[#allocation3 + $0x34] sm:$0xf] %vm280_vm1, %v5795_v28  ;;  %6076 = vst [vmem:[#allocation3 + $0x38] sm:$0x1] %v6075_v14  ;;  %v5774_v58 = vrot.slane %v5772_v35, 7  ;;  %v5815_v7 = vshrl.u32 %v11909_v22, 16  ;;  %v11907_v44 = vpack.c.bf16 %v5609_v49, %v5609_v49  ;;  %v5583_v43 = vadd.f32 %v15626_v50, %v5545_v19 }
 0x260   : > { %v5818_v2 = vshll.u32 %v11909_v22, 16  ;;  %v11910_v62 = vpack.c.bf16 %v5612_v4, %v5612_v4  ;;  %v11908_v20 = vpack.c.bf16 %v5610_v17, %v5610_v17  ;;  %v5505_v1 = vadd.f32 %v5414_v11, %v15613_v41  ;;  %v12640_v56 = vpop.f32.mrf.mxu0  ;;  %v6077_v19 = vld [vmem:[#allocation3 + $0x3c] sm:$0xf]  ;;  %v6088_v35 = vld [vmem:[#allocation3 + $0x50] sm:$0x1] }
 0x261   : > { %v5777_v21 = vor.u32 %v5775_v63, %v5774_v58  ;;  %v5779_v48 = vrot.slane %v5774_v58, 4  ;;  %v5817_v12 = vrot.slane %v5815_v7, 7  ;;  %v5798_v54 = vshrl.u32 %v11907_v44, 16  ;;  %v6081_v17 = vld [vmem:[#allocation3 + $0x44] sm:$0x1] }
 0x262   : > { %v5801_v55 = vshll.u32 %v11907_v44, 16  ;;  %v5823_v34 = vshrl.u32 %v11910_v62, 16  ;;  %v5826_v16 = vshll.u32 %v11910_v62, 16  ;;  %v5806_v60 = vshrl.u32 %v11908_v20, 16 }
 0x263   : > { %v5778_v33 = vsel %vm13254_vm13, %v5770_v31, %v5777_v21  ;;  %v6068_v29 = vsel %vm13193_vm5, %v5779_v48, %v6067_v39  ;;  %v5820_v47 = vor.u32 %v5818_v2, %v5817_v12  ;;  %v5821_v23 = vrot.slane %v5817_v12, 4  ;;  %v11631_v39 = vld [vmem:[%s18549_s2 + $0x6] sm:$0x3] }
 0x264   : > { %6066 = vst.msk [vmem:[#allocation3 + $0x28] sm:$0xf] %vm280_vm1, %v5778_v33  ;;  %6069 = vst [vmem:[#allocation3 + $0x2c] sm:$0x1] %v6068_v29  ;;  %v5800_v41 = vrot.slane %v5798_v54, 7  ;;  %v5825_v11 = vrot.slane %v5823_v34, 7  ;;  %v5543_v31 = vmul.f32 %v15594_v25, %v5505_v1  ;;  %v5508_v22 = vadd.f32 %v12637_v24, %v15617_v26  ;;  %12972 = vmatprep.subr.msk.bf16.mxu0 %vm1502_vm0, %v11631_v39 }
 0x265   : > { %v5808_v27 = vrot.slane %v5806_v60, 7  ;;  %v5809_v13 = vshll.u32 %v11908_v20, 16  ;;  %v6085_v45 = vsel %vm13238_vm11, %v5820_v47, %v6084_v0  ;;  %v5615_v63 = vmax.f32 %v5583_v43, 0.0  ;;  %v5430_v43 = vpop.f32.mrf.mxu0  ;;  %v6163_v1 = vld [vmem:[#allocation3 + $0xc] sm:$0xf] }
 0x266   : > { %6086 = vst [vmem:[#allocation3 + $0x48] sm:$0xf] %v6085_v45  ;;  %v5803_v49 = vor.u32 %v5801_v55, %v5800_v41  ;;  %v5804_v28 = vrot.slane %v5800_v41, 4  ;;  %v5828_v14 = vor.u32 %v5826_v16, %v5825_v11  ;;  %v5830_v4 = vrot.slane %v5825_v11, 4  ;;  %v6091_v39 = vld [vmem:[#allocation3 + $0x54] sm:$0xf] }
 0x267   : > { %v5811_v58 = vor.u32 %v5809_v13, %v5808_v27  ;;  %v5813_v7 = vrot.slane %v5808_v27, 4  ;;  %v11913_v2 = vpack.c.bf16 %v5615_v63, %v5615_v63  ;;  %v5581_v44 = vadd.f32 %v15626_v50, %v5543_v31  ;;  %v15781_v45 = vpop.f32.mrf.mxu0  ;;  %v15787_v31 = vld [vmem:[#allocation3 + $0x10] sm:$0xf] }
 0x268   : > { %v6078_v62 = vsel %vm13238_vm11, %v5803_v49, %v6077_v19  ;;  %v5829_v26 = vsel %vm13254_vm13, %v5821_v23, %v5828_v14  ;;  %v6089_v24 = vsel %vm13193_vm5, %v5830_v4, %v6088_v35  ;;  %v5546_v20 = vmul.f32 %v15594_v25, %v5508_v22  ;;  %v6098_v23 = vld [vmem:[#allocation3 + $0x60] sm:$0xf] }
 0x269   : > { %6079 = vst [vmem:[#allocation3 + $0x3c] sm:$0xf] %v6078_v62  ;;  %6087 = vst.msk [vmem:[#allocation3 + $0x4c] sm:$0xf] %vm280_vm1, %v5829_v26  ;;  %v5812_v21 = vsel %vm13254_vm13, %v5804_v28, %v5811_v58  ;;  %v6082_v48 = vsel %vm13193_vm5, %v5813_v7, %v6081_v17  ;;  %v5849_v12 = vshrl.u32 %v11913_v2, 16  ;;  %v5852_v54 = vshll.u32 %v11913_v2, 16 }
 0x26a   : > { %6090 = vst [vmem:[#allocation3 + $0x50] sm:$0x1] %v6089_v24  ;;  %6080 = vst.msk [vmem:[#allocation3 + $0x40] sm:$0xf] %vm280_vm1, %v5812_v21  ;;  %v5613_v0 = vmax.f32 %v5581_v44, 0.0  ;;  %v5584_v55 = vadd.f32 %v15626_v50, %v5546_v20  ;;  %v5506_v34 = vadd.f32 %v5417_v8, %v15620_v59  ;;  %v5511_v16 = vadd.f32 %v12640_v56, %v15630_v15  ;;  %v5433_v44 = vpop.f32.mrf.mxu0 }
 0x26b   : > { %6083 = vst [vmem:[#allocation3 + $0x44] sm:$0x1] %v6082_v48  ;;  %v5851_v60 = vrot.slane %v5849_v12, 7  ;;  %v5509_v33 = vadd.f32 %v5430_v43, %v15634_v30  ;;  %v6235_v29 = vshrl.u32 %v6163_v1, 16  ;;  %v6238_v47 = vshll.u32 %v6163_v1, 16 }
 0x26c   : > { %v11911_v41 = vpack.c.bf16 %v5613_v0, %v5613_v0  ;;  %v5616_v11 = vmax.f32 %v5584_v55, 0.0  ;;  %v5544_v27 = vmul.f32 %v15594_v25, %v5506_v34  ;;  %v5549_v13 = vmul.f32 %v15594_v25, %v5511_v16  ;;  %v6165_v2 = vld [vmem:[#allocation3 + $0x18] sm:$0xf] }
 0x26d   : > { %v5854_v19 = vor.u32 %v5852_v54, %v5851_v60  ;;  %v5855_v35 = vrot.slane %v5851_v60, 4  ;;  %v5547_v59 = vmul.f32 %v15594_v25, %v5509_v33  ;;  %v15784_v8 = vrot.slane %v6235_v29, 4  ;;  %v6102_v54 = vld [vmem:[#allocation3 + $0x68] sm:$0x1] }
 0x26e   : > { %v5832_v15 = vshrl.u32 %v11911_v41, 16  ;;  %v5835_v56 = vshll.u32 %v11911_v41, 16  ;;  %v11914_v30 = vpack.c.bf16 %v5616_v11, %v5616_v11  ;;  %v5582_v63 = vadd.f32 %v15626_v50, %v5544_v27 }
 0x26f   : > { %v6099_v22 = vsel %vm13238_vm11, %v5854_v19, %v6098_v23  ;;  %v5587_v49 = vadd.f32 %v15626_v50, %v5549_v13  ;;  %v5585_v28 = vadd.f32 %v15626_v50, %v5547_v59  ;;  %v15793_v14 = vrot.slane %v6238_v47, 5  ;;  %v12644_v23 = vpop.f32.mrf.mxu0  ;;  %v15800_v13 = vld [vmem:[#allocation3 + $0x1c] sm:$0xf] }
 0x270   : > { %6100 = vst [vmem:[#allocation3 + $0x60] sm:$0xf] %v6099_v22  ;;  %v5834_v4 = vrot.slane %v5832_v15, 7  ;;  %v5857_v17 = vshrl.u32 %v11914_v30, 16  ;;  %v5860_v58 = vshll.u32 %v11914_v30, 16  ;;  %v5614_v7 = vmax.f32 %v5582_v63, 0.0 }
 0x271   : > { %v5619_v62 = vmax.f32 %v5587_v49, 0.0  ;;  %v5617_v26 = vmax.f32 %v5585_v28, 0.0  ;;  %v6248_v24 = vshrl.u32 %v15787_v31, 16  ;;  %v11551_v20 = vcombine.low %v6163_v1, %v15787_v31  ;;  %v6112_v22 = vld [vmem:[#allocation3 + $0x78] sm:$0xf] }
 0x272   : > { %v5837_v43 = vor.u32 %v5835_v56, %v5834_v4  ;;  %v5838_v21 = vrot.slane %v5834_v4, 4  ;;  %v5859_v48 = vrot.slane %v5857_v17, 7  ;;  %v11912_v12 = vpack.c.bf16 %v5614_v7, %v5614_v7  ;;  %v6095_v56 = vld [vmem:[#allocation3 + $0x5c] sm:$0x1] }
 0x273   : > { %v11917_v0 = vpack.c.bf16 %v5619_v62, %v5619_v62  ;;  %v11915_v55 = vpack.c.bf16 %v5617_v26, %v5617_v26  ;;  %12691 = vmatmul.mubr.msk.bf16.vlgmr.msra.gmra.mxu0 %vm1453_vm9, %v11551_v20  ;;  %v6259_v34 = vshrl.u32 %v6165_v2, 16  ;;  %v6262_v16 = vshll.u32 %v6165_v2, 16  ;;  %v5446_v62 = vpop.f32.mrf.mxu0 }
 0x274   : > { %v6092_v60 = vsel %vm13238_vm11, %v5837_v43, %v6091_v39  ;;  %v5862_v33 = vor.u32 %v5860_v58, %v5859_v48  ;;  %v5864_v29 = vrot.slane %v5859_v48, 4  ;;  %v5840_v47 = vshrl.u32 %v11912_v12, 16  ;;  %v6105_v58 = vld [vmem:[#allocation3 + $0x6c] sm:$0xf] }
 0x275   : > { %6093 = vst [vmem:[#allocation3 + $0x54] sm:$0xf] %v6092_v60  ;;  %v5843_v1 = vshll.u32 %v11912_v12, 16  ;;  %v5883_v41 = vshrl.u32 %v11917_v0, 16  ;;  %v5886_v11 = vshll.u32 %v11917_v0, 16  ;;  %v5866_v27 = vshrl.u32 %v11915_v55, 16 }
 0x276   : > { %v5863_v19 = vsel %vm13254_vm13, %v5855_v35, %v5862_v33  ;;  %v6103_v59 = vsel %vm13193_vm5, %v5864_v29, %v6102_v54  ;;  %v5842_v15 = vrot.slane %v5840_v47, 7  ;;  %v5869_v30 = vshll.u32 %v11915_v55, 16  ;;  %v6167_v12 = vld [vmem:[#allocation3 + $0x24] sm:$0xf] }
 0x277   : > { %6101 = vst.msk [vmem:[#allocation3 + $0x64] sm:$0xf] %vm280_vm1, %v5863_v19  ;;  %6104 = vst [vmem:[#allocation3 + $0x68] sm:$0x1] %v6103_v59  ;;  %v15807_v63 = vrot.slane %v5883_v41, 7  ;;  %v15809_v49 = vrot.slane %v5866_v27, 7  ;;  %v11552_v39 = vcombine.low %v6165_v2, %v15800_v13  ;;  %v5512_v2 = vadd.f32 %v15781_v45, %v15639_v46 }
 0x278   : > { %v15811_v28 = vrot.slane %v6259_v34, 4  ;;  %v15813_v4 = vrot.slane %v6262_v16, 5  ;;  %v5845_v17 = vor.u32 %v5843_v1, %v5842_v15  ;;  %v5847_v35 = vrot.slane %v5842_v15, 4  ;;  %v15829_v34 = vld [vmem:[#allocation3 + $0x28] sm:$0xf] }
 0x279   : > { %v6272_v7 = vshrl.u32 %v15800_v13, 16  ;;  %v5888_v26 = vor.u32 %v5886_v11, %v15807_v63  ;;  %v5889_v20 = vrot.slane %v15807_v63, 4  ;;  %v5871_v43 = vor.u32 %v5869_v30, %v15809_v49  ;;  %12694 = vmatprep.mubr.msk.bf16.mxu0 %vm1453_vm9, %v11552_v39  ;;  %v6195_v11 = vld [vmem:[#allocation3 + $0x14] sm:$0x1]  ;;  %v15856_v30 = vld [vmem:[#allocation3 + $0x30] sm:$0xf] }
 0x27a   : > { %v5872_v48 = vrot.slane %v15809_v49, 4  ;;  %v5846_v54 = vsel %vm13254_vm13, %v5838_v21, %v5845_v17  ;;  %v6096_v0 = vsel %vm13193_vm5, %v5847_v35, %v6095_v56  ;;  %v5510_v55 = vadd.f32 %v5433_v44, %v15642_v10 }
 0x27b   : > { %6094 = vst.msk [vmem:[#allocation3 + $0x58] sm:$0xf] %vm280_vm1, %v5846_v54  ;;  %6097 = vst [vmem:[#allocation3 + $0x5c] sm:$0x1] %v6096_v0  ;;  %v6113_v16 = vsel %vm13238_vm11, %v5888_v26, %v6112_v22  ;;  %v6106_v21 = vsel %vm13238_vm11, %v5871_v43, %v6105_v58  ;;  %v5515_v60 = vadd.f32 %v12644_v23, %v15646_v37  ;;  %v6283_v45 = vshrl.u32 %v6167_v12, 16  ;;  %v15858_v22 = vpop.f32.mrf.mxu0 }
 0x27c   : > { %v5513_v33 = vadd.f32 %v5446_v62, %v15651_v57  ;;  %6114 = vst [vmem:[#allocation3 + $0x78] sm:$0xf] %v6113_v16  ;;  %6107 = vst [vmem:[#allocation3 + $0x6c] sm:$0xf] %v6106_v21  ;;  %v5550_v46 = vmul.f32 %v15594_v25, %v5512_v2  ;;  %v5548_v10 = vmul.f32 %v15594_v25, %v5510_v55  ;;  %v6286_v44 = vshll.u32 %v6167_v12, 16 }
 0x27d   : > { %v5553_v29 = vmul.f32 %v15594_v25, %v5515_v60  ;;  %v6296_v1 = vshrl.u32 %v15829_v34, 16  ;;  %v11553_v41 = vcombine.low %v6167_v12, %v15829_v34  ;;  %v15846_v23 = vrot.slane %v6283_v45, 4  ;;  %v15865_v45 = vld [vmem:[#allocation3 + $0x34] sm:$0xf] }
 0x27e   : > { %v5551_v47 = vmul.f32 %v15594_v25, %v5513_v33  ;;  %v5588_v37 = vadd.f32 %v15626_v50, %v5550_v46  ;;  %v5586_v57 = vadd.f32 %v15626_v50, %v5548_v10  ;;  %v15848_v27 = vrot.slane %v6286_v44, 5  ;;  %v5449_v33 = vpop.f32.mrf.mxu0  ;;  %v6116_v44 = vld [vmem:[#allocation3 + $0x80] sm:$0x1] }
 0x27f   : > { %v5591_v19 = vadd.f32 %v15626_v50, %v5553_v29  ;;  %12695 = vmatmul.mubr.msk.bf16.gmra.mxu0 %vm1453_vm9, %v11553_v41  ;;  %v6241_v15 = vor.u32 %v15793_v14, %v15784_v8  ;;  %v6244_v56 = vshll.u32 %v15787_v31, 16  ;;  %v6250_v58 = vrot.slane %v6248_v24, 4 }
 0x280   : > { %v5589_v59 = vadd.f32 %v15626_v50, %v5551_v47  ;;  %v5620_v17 = vmax.f32 %v5588_v37, 0.0  ;;  %v5618_v35 = vmax.f32 %v5586_v57, 0.0  ;;  %v6254_v39 = vshll.u32 %v6195_v11, 16 }
 0x281   : > { %v5623_v62 = vmax.f32 %v5591_v19, 0.0  ;;  %v6242_v43 = vrot.slane %v6241_v15, 4  ;;  %v6246_v12 = vrot.slane %v6244_v56, 5  ;;  %v6307_v8 = vshrl.u32 %v15856_v30, 16  ;;  %v6109_v15 = vld [vmem:[#allocation3 + $0x74] sm:$0x1] }
 0x282   : > { %v5621_v26 = vmax.f32 %v5589_v59, 0.0  ;;  %v11918_v54 = vpack.c.bf16 %v5620_v17, %v5620_v17  ;;  %v11916_v0 = vpack.c.bf16 %v5618_v35, %v5618_v35  ;;  %v6256_v2 = vrot.slane %v6254_v39, 5  ;;  %v12648_v39 = vpop.f32.mrf.mxu0 }
 0x283   : > { %v11921_v14 = vpack.c.bf16 %v5623_v62, %v5623_v62  ;;  %v6247_v21 = vsel %vm13248_vm12, %v6242_v43, %v6246_v12  ;;  %v6251_v60 = vor.u32 %v6250_v58, %v6246_v12  ;;  %v15867_v59 = vrot.slane %v6307_v8, 4 }
 0x284   : > { %v11919_v55 = vpack.c.bf16 %v5621_v26, %v5621_v26  ;;  %v5891_v46 = vshrl.u32 %v11918_v54, 16  ;;  %v5894_v31 = vshll.u32 %v11918_v54, 16  ;;  %v5874_v24 = vshrl.u32 %v11916_v0, 16  ;;  %v6126_v54 = vld [vmem:[#allocation3 + $0x90] sm:$0xf] }
 0x285   : > { %v5877_v10 = vshll.u32 %v11916_v0, 16  ;;  %v5917_v29 = vshrl.u32 %v11921_v14, 16  ;;  %v5920_v47 = vshll.u32 %v11921_v14, 16  ;;  %v6252_v19 = vrot.slane %v6251_v60, 4  ;;  %v6119_v0 = vld [vmem:[#allocation3 + $0x84] sm:$0xf] }
 0x286   : > { %v5900_v41 = vshrl.u32 %v11919_v55, 16  ;;  %v5903_v11 = vshll.u32 %v11919_v55, 16  ;;  %v5893_v37 = vrot.slane %v5891_v46, 7  ;;  %v5876_v57 = vrot.slane %v5874_v24, 7  ;;  %v6196_v46 = vld [vmem:[#allocation3 + $0x20] sm:$0x1] }
 0x287   : > { %v15869_v56 = vrot.slane %v5917_v29, 7  ;;  %v6310_v35 = vshll.u32 %v15856_v30, 16  ;;  %v6320_v58 = vshrl.u32 %v15865_v45, 16  ;;  %v6257_v49 = vsel %vm13248_vm12, %v6252_v19, %v6256_v2 }
 0x288   : > { %v15871_v17 = vrot.slane %v5900_v41, 7  ;;  %v5896_v62 = vor.u32 %v5894_v31, %v5893_v37  ;;  %v5898_v26 = vrot.slane %v5893_v37, 4  ;;  %v5879_v43 = vor.u32 %v5877_v10, %v5876_v57 }
 0x289   : > { %v5881_v12 = vrot.slane %v5876_v57, 4  ;;  %v5922_v14 = vor.u32 %v5920_v47, %v15869_v56  ;;  %v5923_v8 = vrot.slane %v15869_v56, 4  ;;  %v11519_v47 = vcombine.low %v6247_v21, %v6257_v49  ;;  %v6171_v57 = vld [vmem:[#allocation3 + $0x3c] sm:$0xf]  ;;  %v15914_v21 = vld [vmem:[%s18549_s2 + $0x8] sm:$0x3] }
 0x28a   : > { %v5905_v55 = vor.u32 %v5903_v11, %v15871_v17  ;;  %v5906_v60 = vrot.slane %v15871_v17, 4  ;;  %v5897_v24 = vsel %vm13254_vm13, %v5889_v20, %v5896_v62  ;;  %v6117_v31 = vsel %vm13193_vm5, %v5898_v26, %v6116_v44 }
 0x28b   : > { %v5880_v10 = vsel %vm13254_vm13, %v5872_v48, %v5879_v43  ;;  %v6110_v29 = vsel %vm13193_vm5, %v5881_v12, %v6109_v15  ;;  %6115 = vst.msk [vmem:[#allocation3 + $0x7c] sm:$0xf] %vm280_vm1, %v5897_v24  ;;  %6118 = vst [vmem:[#allocation3 + $0x80] sm:$0x1] %v6117_v31  ;;  %v6127_v63 = vsel %vm13238_vm11, %v5922_v14, %v6126_v54  ;;  %v15899_v44 = vrot.slane %v6310_v35, 5  ;;  %v5462_v48 = vpop.f32.mrf.mxu0 }
 0x28c   : > { %6108 = vst.msk [vmem:[#allocation3 + $0x70] sm:$0xf] %vm280_vm1, %v5880_v10  ;;  %6111 = vst [vmem:[#allocation3 + $0x74] sm:$0x1] %v6110_v29  ;;  %v6120_v20 = vsel %vm13238_vm11, %v5905_v55, %v6119_v0  ;;  %v11554_v41 = vcombine.low %v15856_v30, %v15865_v45  ;;  %v5516_v11 = vadd.f32 %v15858_v22, %v15657_v32  ;;  %v6268_v15 = vshll.u32 %v15800_v13, 16 }
 0x28d   : > { %6128 = vst [vmem:[#allocation3 + $0x90] sm:$0xf] %v6127_v63  ;;  %6121 = vst [vmem:[#allocation3 + $0x84] sm:$0xf] %v6120_v20  ;;  %v6265_v37 = vor.u32 %v15813_v4, %v15811_v28  ;;  %v6274_v2 = vrot.slane %v6272_v7, 4  ;;  %v6278_v19 = vshll.u32 %v6196_v46, 16  ;;  %v5514_v35 = vadd.f32 %v5449_v33, %v15660_v18  ;;  %12657 = vmatmul.mubr.msk.bf16.vlgmr.msra.gmra.mxu1 %vm1453_vm9, %v11519_v47  ;;  %v15943_v49 = vpop.f32.mrf.mxu0 }
 0x28e   : > { %12698 = vmatprep.mubr.msk.bf16.mxu0 %vm1453_vm9, %v11554_v41  ;;  %v5554_v32 = vmul.f32 %v15594_v25, %v5516_v11  ;;  %v5519_v4 = vadd.f32 %v12648_v39, %v15664_v6  ;;  %v5517_v13 = vadd.f32 %v5462_v48, %v15670_v3  ;;  %12723 = vmatpush3.bf16.msra.mxu1 %v15598_v40  ;;  %v6270_v7 = vrot.slane %v6268_v15, 5  ;;  %v15926_v43 = vld [vmem:[#allocation3 + $0x40] sm:$0xf] }
 0x28f   : > { %v6266_v28 = vrot.slane %v6265_v37, 4  ;;  %v6280_v18 = vrot.slane %v6278_v19, 5  ;;  %v5552_v30 = vmul.f32 %v15594_v25, %v5514_v35  ;;  %v6331_v22 = vshrl.u32 %v6171_v57, 16  ;;  %12973 = vmatprep.subr.msk.bf16.mxu1 %vm1502_vm0, %v15914_v21 }
 0x290   : > { %v5592_v33 = vadd.f32 %v15626_v50, %v5554_v32  ;;  %v5557_v62 = vmul.f32 %v15594_v25, %v5519_v4  ;;  %v5555_v26 = vmul.f32 %v15594_v25, %v5517_v13  ;;  %v6334_v12 = vshll.u32 %v6171_v57, 16 }
 0x291   : > { %v6271_v40 = vsel %vm13248_vm12, %v6266_v28, %v6270_v7  ;;  %v6275_v6 = vor.u32 %v6274_v2, %v6270_v7  ;;  %v5590_v3 = vadd.f32 %v15626_v50, %v5552_v30  ;;  %v15933_v39 = vrot.slane %v6331_v22, 4  ;;  %v15951_v2 = vld [vmem:[#allocation3 + $0x2c] sm:$0x1]  ;;  %v5465_v7 = vpop.f32.mrf.mxu0 }
 0x292   : > { %v5624_v54 = vmax.f32 %v5592_v33, 0.0  ;;  %v5595_v0 = vadd.f32 %v15626_v50, %v5557_v62  ;;  %v5593_v14 = vadd.f32 %v15626_v50, %v5555_v26  ;;  %v15937_v25 = vrot.slane %v6334_v12, 5  ;;  %v6123_v26 = vld [vmem:[#allocation3 + $0x8c] sm:$0x1] }
 0x293   : > { %v6276_v55 = vrot.slane %v6275_v6, 4  ;;  %v5622_v46 = vmax.f32 %v5590_v3, 0.0  ;;  %v6344_v24 = vshrl.u32 %v15926_v43, 16  ;;  %v11555_v31 = vcombine.low %v6171_v57, %v15926_v43 }
 0x294   : > { %v11922_v10 = vpack.c.bf16 %v5624_v54, %v5624_v54  ;;  %v5627_v29 = vmax.f32 %v5595_v0, 0.0  ;;  %v5625_v63 = vmax.f32 %v5593_v14, 0.0  ;;  %v6289_v20 = vor.u32 %v15848_v27, %v15846_v23  ;;  %v6140_v54 = vld [vmem:[#allocation3 + $0xa8] sm:$0xf] }
 0x295   : > { %v6281_v48 = vsel %vm13248_vm12, %v6276_v55, %v6280_v18  ;;  %v11920_v50 = vpack.c.bf16 %v5622_v46, %v5622_v46  ;;  %12699 = vmatmul.mubr.msk.bf16.gmra.mxu0 %vm1453_vm9, %v11555_v31  ;;  %v6292_v47 = vshll.u32 %v15829_v34, 16  ;;  %v6298_v41 = vrot.slane %v6296_v1, 4  ;;  %v6130_v18 = vld [vmem:[#allocation3 + $0x98] sm:$0x1]  ;;  %v6173_v55 = vld [vmem:[#allocation3 + $0x48] sm:$0xf] }
 0x296   : > { %v5925_v11 = vshrl.u32 %v11922_v10, 16  ;;  %v5928_v37 = vshll.u32 %v11922_v10, 16  ;;  %v11520_v57 = vcombine.low %v6271_v40, %v6281_v48  ;;  %v11925_v15 = vpack.c.bf16 %v5627_v29, %v5627_v29  ;;  %v12652_v48 = vpop.f32.mrf.mxu0 }
 0x297   : > { %v5908_v23 = vshrl.u32 %v11920_v50, 16  ;;  %v5911_v27 = vshll.u32 %v11920_v50, 16  ;;  %v11923_v19 = vpack.c.bf16 %v5625_v63, %v5625_v63  ;;  %v6290_v35 = vrot.slane %v6289_v20, 4  ;;  %v6133_v63 = vld [vmem:[#allocation3 + $0x9c] sm:$0xf] }
 0x298   : > { %v5927_v32 = vrot.slane %v5925_v11, 7  ;;  %12660 = vmatprep.mubr.msk.bf16.mxu1 %vm1453_vm9, %v11520_v57  ;;  %v5951_v28 = vshrl.u32 %v11925_v15, 16  ;;  %v5954_v4 = vshll.u32 %v11925_v15, 16  ;;  %v6294_v13 = vrot.slane %v6292_v47, 5  ;;  %v15969_v20 = vld [vmem:[#allocation3 + $0x4c] sm:$0xf] }
 0x299   : > { %v5910_v34 = vrot.slane %v5908_v23, 7  ;;  %v5934_v1 = vshrl.u32 %v11923_v19, 16  ;;  %v5937_v30 = vshll.u32 %v11923_v19, 16  ;;  %v6302_v22 = vshll.u32 %v15951_v2, 16  ;;  %v6175_v19 = vld [vmem:[#allocation3 + $0x54] sm:$0xf] }
 0x29a   : > { %v5930_v33 = vor.u32 %v5928_v37, %v5927_v32  ;;  %v5932_v62 = vrot.slane %v5927_v32, 4  ;;  %v15955_v12 = vrot.slane %v5951_v28, 7  ;;  %v6295_v40 = vsel %vm13248_vm12, %v6290_v35, %v6294_v13 }
 0x29b   : > { %v5913_v6 = vor.u32 %v5911_v27, %v5910_v34  ;;  %v5915_v3 = vrot.slane %v5910_v34, 4  ;;  %v15959_v0 = vrot.slane %v5934_v1, 7  ;;  %v6299_v14 = vor.u32 %v6298_v41, %v6294_v13  ;;  %v15987_v27 = vld [vmem:[#allocation3 + $0x38] sm:$0x1]  ;;  %v5478_v13 = vpop.f32.mrf.mxu0 }
 0x29c   : > { %v5931_v46 = vsel %vm13254_vm13, %v5923_v8, %v5930_v33  ;;  %v6131_v31 = vsel %vm13193_vm5, %v5932_v62, %v6130_v18  ;;  %v5956_v10 = vor.u32 %v5954_v4, %v15955_v12  ;;  %v5957_v29 = vrot.slane %v15955_v12, 4 }
 0x29d   : > { %6129 = vst.msk [vmem:[#allocation3 + $0x94] sm:$0xf] %vm280_vm1, %v5931_v46  ;;  %6132 = vst [vmem:[#allocation3 + $0x98] sm:$0x1] %v6131_v31  ;;  %v5914_v56 = vsel %vm13254_vm13, %v5906_v60, %v5913_v6  ;;  %v6124_v8 = vsel %vm13193_vm5, %v5915_v3, %v6123_v26  ;;  %v5939_v50 = vor.u32 %v5937_v30, %v15959_v0  ;;  %v5940_v47 = vrot.slane %v15959_v0, 4 }
 0x29e   : > { %6122 = vst.msk [vmem:[#allocation3 + $0x88] sm:$0xf] %vm280_vm1, %v5914_v56  ;;  %6125 = vst [vmem:[#allocation3 + $0x8c] sm:$0x1] %v6124_v8  ;;  %v6141_v41 = vsel %vm13238_vm11, %v5956_v10, %v6140_v54  ;;  %v6300_v11 = vrot.slane %v6299_v14, 4  ;;  %v6304_v37 = vrot.slane %v6302_v22, 5  ;;  %v11556_v23 = vcombine.low %v6173_v55, %v15969_v20 }
 0x29f   : > { %v6355_v57 = vshrl.u32 %v6173_v55, 16  ;;  %6142 = vst [vmem:[#allocation3 + $0xa8] sm:$0xf] %v6141_v41  ;;  %v6134_v17 = vsel %vm13238_vm11, %v5939_v50, %v6133_v63  ;;  %v6358_v60 = vshll.u32 %v6173_v55, 16  ;;  %v6368_v15 = vshrl.u32 %v15969_v20, 16 }
 0x2a0   : > { %6135 = vst [vmem:[#allocation3 + $0x9c] sm:$0xf] %v6134_v17  ;;  %v6305_v35 = vsel %vm13248_vm12, %v6300_v11, %v6304_v37  ;;  %v5520_v28 = vadd.f32 %v15943_v49, %v15674_v53  ;;  %v6313_v4 = vor.u32 %v15899_v44, %v15867_v59  ;;  %12702 = vmatprep.mubr.msk.bf16.mxu0 %vm1453_vm9, %v11556_v23  ;;  %v6316_v1 = vshll.u32 %v15865_v45, 16  ;;  %v16006_v22 = vld [vmem:[%s18550_s3] ss:$0 sm:$0xff] }
 0x2a1   : > { %v15991_v32 = vrot.slane %v6355_v57, 4  ;;  %v11521_v18 = vcombine.low %v6295_v40, %v6305_v35  ;;  %v15997_v34 = vrot.slane %v6358_v60, 5  ;;  %v6322_v30 = vrot.slane %v6320_v58, 4  ;;  %v16017_v26 = vld [vmem:[%s18551_s4] ss:$0 sm:$0xff] }
 0x2a2   : > { %v5558_v53 = vmul.f32 %v16006_v22, %v5520_v28  ;;  %v6314_v49 = vrot.slane %v6313_v4, 4  ;;  %v6326_v59 = vshll.u32 %v15987_v27, 16  ;;  %v5518_v44 = vadd.f32 %v5465_v7, %v15677_v61  ;;  %v16021_v54 = vld [vmem:[#allocation3 + $0x58] sm:$0xf] }
 0x2a3   : > { %12661 = vmatmul.mubr.msk.bf16.gmra.mxu1 %vm1453_vm9, %v11521_v18  ;;  %v6318_v33 = vrot.slane %v6316_v1, 5  ;;  %v5523_v62 = vadd.f32 %v12652_v48, %v15680_v51  ;;  %v5521_v45 = vadd.f32 %v5478_v13, %v15685_v9  ;;  %v6379_v58 = vshrl.u32 %v6175_v19, 16 }
 0x2a4   : > { %v5596_v40 = vadd.f32 %v16017_v26, %v5558_v53  ;;  %v6328_v6 = vrot.slane %v6326_v59, 5  ;;  %v5556_v3 = vmul.f32 %v16006_v22, %v5518_v44  ;;  %v6382_v61 = vshll.u32 %v6175_v19, 16  ;;  %v6144_v44 = vld [vmem:[#allocation3 + $0xb0] sm:$0x1] }
 0x2a5   : > { %v6319_v7 = vsel %vm13248_vm12, %v6314_v49, %v6318_v33  ;;  %v6323_v51 = vor.u32 %v6322_v30, %v6318_v33  ;;  %v5561_v9 = vmul.f32 %v16006_v22, %v5523_v62  ;;  %v5559_v14 = vmul.f32 %v16006_v22, %v5521_v45  ;;  %v16043_v49 = vld [vmem:[#allocation3 + $0x44] sm:$0x1] }
 0x2a6   : > { %v5628_v55 = vmax.f32 %v5596_v40, 0.0  ;;  %v5594_v46 = vadd.f32 %v16017_v26, %v5556_v3  ;;  %v16028_v31 = vrot.slane %v6379_v58, 4  ;;  %v16030_v10 = vrot.slane %v6382_v61, 5  ;;  %v6137_v61 = vld [vmem:[#allocation3 + $0xa4] sm:$0x1] }
 0x2a7   : > { %v6324_v63 = vrot.slane %v6323_v51, 4  ;;  %v5599_v48 = vadd.f32 %v16017_v26, %v5561_v9  ;;  %v5597_v56 = vadd.f32 %v16017_v26, %v5559_v14  ;;  %v6392_v8 = vshrl.u32 %v16021_v54, 16  ;;  %v6154_v9 = vld [vmem:[#allocation3 + $0xc0] sm:$0xf] }
 0x2a8   : > { %v11926_v50 = vpack.c.bf16 %v5628_v55, %v5628_v55  ;;  %v5626_v41 = vmax.f32 %v5594_v46, 0.0  ;;  %v11557_v11 = vcombine.low %v6175_v19, %v16021_v54  ;;  %v6337_v37 = vor.u32 %v15937_v25, %v15933_v39 }
 0x2a9   : > { %v6329_v57 = vsel %vm13248_vm12, %v6324_v63, %v6328_v6  ;;  %v5631_v17 = vmax.f32 %v5599_v48, 0.0  ;;  %v5629_v60 = vmax.f32 %v5597_v56, 0.0  ;;  %v6340_v23 = vshll.u32 %v15926_v43, 16 }
 0x2aa   : > { %v5959_v35 = vshrl.u32 %v11926_v50, 16  ;;  %v5962_v28 = vshll.u32 %v11926_v50, 16  ;;  %v11522_v4 = vcombine.low %v6319_v7, %v6329_v57  ;;  %v11924_v13 = vpack.c.bf16 %v5626_v41, %v5626_v41  ;;  %12703 = vmatmul.mubr.msk.bf16.gmra.mxu0 %vm1453_vm9, %v11557_v11  ;;  %v6147_v50 = vld [vmem:[#allocation3 + $0xb4] sm:$0xf]  ;;  %v6177_v41 = vld [vmem:[#allocation3 + $0x60] sm:$0xf]  ;;  %v12653_v11 = vpop.f32.mrf.mxu0 }
 0x2ab   : > { %v11929_v18 = vpack.c.bf16 %v5631_v17, %v5631_v17  ;;  %v11927_v1 = vpack.c.bf16 %v5629_v60, %v5629_v60  ;;  %v6338_v30 = vrot.slane %v6337_v37, 4  ;;  %v6342_v19 = vrot.slane %v6340_v23, 5 }
 0x2ac   : > { %v5961_v53 = vrot.slane %v5959_v35, 7  ;;  %12664 = vmatprep.mubr.msk.bf16.mxu1 %vm1453_vm9, %v11522_v4  ;;  %v5942_v39 = vshrl.u32 %v11924_v13, 16  ;;  %v5945_v25 = vshll.u32 %v11924_v13, 16  ;;  %v6346_v59 = vrot.slane %v6344_v24, 4  ;;  %v16073_v4 = vld [vmem:[#allocation3 + $0x50] sm:$0x1] }
 0x2ad   : > { %v5985_v33 = vshrl.u32 %v11929_v18, 16  ;;  %v5988_v62 = vshll.u32 %v11929_v18, 16  ;;  %v5968_v45 = vshrl.u32 %v11927_v1, 16  ;;  %v5971_v58 = vshll.u32 %v11927_v1, 16 }
 0x2ae   : > { %v5964_v40 = vor.u32 %v5962_v28, %v5961_v53  ;;  %v5966_v6 = vrot.slane %v5961_v53, 4  ;;  %v5944_v3 = vrot.slane %v5942_v39, 7  ;;  %v6343_v7 = vsel %vm13248_vm12, %v6338_v30, %v6342_v19  ;;  %v6179_v30 = vld [vmem:[#allocation3 + $0x6c] sm:$0xf] }
 0x2af   : > { %v16049_v51 = vrot.slane %v5985_v33, 7  ;;  %v16051_v14 = vrot.slane %v5968_v45, 7  ;;  %v6347_v55 = vor.u32 %v6346_v59, %v6342_v19  ;;  %v6350_v24 = vshll.u32 %v16043_v49, 16 }
 0x2b0   : > { %v5965_v46 = vsel %vm13254_vm13, %v5957_v29, %v5964_v40  ;;  %v6145_v63 = vsel %vm13193_vm5, %v5966_v6, %v6144_v44  ;;  %v5947_v48 = vor.u32 %v5945_v25, %v5944_v3  ;;  %v5949_v56 = vrot.slane %v5944_v3, 4  ;;  %v16065_v29 = vld [vmem:[#allocation3 + $0x64] sm:$0xf]  ;;  %v5481_v25 = vpop.f32.mrf.mxu0 }
 0x2b1   : > { %6143 = vst.msk [vmem:[#allocation3 + $0xac] sm:$0xf] %vm280_vm1, %v5965_v46  ;;  %6146 = vst [vmem:[#allocation3 + $0xb0] sm:$0x1] %v6145_v63  ;;  %v5990_v37 = vor.u32 %v5988_v62, %v16049_v51  ;;  %v5991_v57 = vrot.slane %v16049_v51, 4  ;;  %v5973_v12 = vor.u32 %v5971_v58, %v16051_v14  ;;  %v5974_v17 = vrot.slane %v16051_v14, 4 }
 0x2b2   : > { %v5948_v60 = vsel %vm13254_vm13, %v5940_v47, %v5947_v48  ;;  %v6138_v23 = vsel %vm13193_vm5, %v5949_v56, %v6137_v61  ;;  %v6348_v35 = vrot.slane %v6347_v55, 4  ;;  %v6352_v28 = vrot.slane %v6350_v24, 5  ;;  %v16091_v62 = vld [vmem:[#allocation3 + $0x70] sm:$0xf]  ;;  %v16103_v24 = vld [vmem:[#allocation3 + $0x5c] sm:$0x1] }
 0x2b3   : > { %6136 = vst.msk [vmem:[#allocation3 + $0xa0] sm:$0xf] %vm280_vm1, %v5948_v60  ;;  %6139 = vst [vmem:[#allocation3 + $0xa4] sm:$0x1] %v6138_v23  ;;  %v6155_v13 = vsel %vm13238_vm11, %v5990_v37, %v6154_v9  ;;  %v6148_v18 = vsel %vm13238_vm11, %v5973_v12, %v6147_v50  ;;  %v6403_v0 = vshrl.u32 %v6177_v41, 16  ;;  %v6406_v1 = vshll.u32 %v6177_v41, 16 }
 0x2b4   : > { %6156 = vst [vmem:[#allocation3 + $0xc0] sm:$0xf] %v6155_v13  ;;  %6149 = vst [vmem:[#allocation3 + $0xb4] sm:$0xf] %v6148_v18  ;;  %v6353_v47 = vsel %vm13248_vm12, %v6348_v35, %v6352_v28  ;;  %v6416_v19 = vshrl.u32 %v16065_v29, 16  ;;  %v11558_v53 = vcombine.low %v6177_v41, %v16065_v29  ;;  %v5524_v39 = vadd.f32 %v12653_v11, %v15687_v42 }
 0x2b5   : > { %v11523_v59 = vcombine.low %v6343_v7, %v6353_v47  ;;  %v16085_v44 = vrot.slane %v6403_v0, 4  ;;  %v16087_v36 = vrot.slane %v6406_v1, 5  ;;  %v6361_v33 = vor.u32 %v15997_v34, %v15991_v32  ;;  %v6181_v56 = vld [vmem:[#allocation3 + $0x78] sm:$0xf]  ;;  %v16121_v23 = vld [vmem:[#allocation3 + $0x7c] sm:$0xf] }
 0x2b6   : > { %12706 = vmatprep.mubr.msk.bf16.mxu0 %vm1453_vm9, %v11558_v53  ;;  %v5562_v45 = vmul.f32 %v16006_v22, %v5524_v39  ;;  %v6364_v58 = vshll.u32 %v15969_v20, 16  ;;  %v6370_v42 = vrot.slane %v6368_v15, 4  ;;  %v6374_v40 = vshll.u32 %v16073_v4, 16 }
 0x2b7   : > { %12665 = vmatmul.mubr.msk.bf16.gmra.mxu1 %vm1453_vm9, %v11523_v59  ;;  %v6362_v6 = vrot.slane %v6361_v33, 4  ;;  %v5522_v3 = vadd.f32 %v5481_v25, %v15691_v52  ;;  %v6427_v61 = vshrl.u32 %v6179_v30, 16  ;;  %v6430_v32 = vshll.u32 %v6179_v30, 16 }
 0x2b8   : > { %v5600_v34 = vadd.f32 %v16017_v26, %v5562_v45  ;;  %v6366_v7 = vrot.slane %v6364_v58, 5  ;;  %v6376_v9 = vrot.slane %v6374_v40, 5  ;;  %v6440_v55 = vshrl.u32 %v16091_v62, 16  ;;  %v16133_v40 = vld [vmem:[#allocation3 + $0x68] sm:$0x1] }
 0x2b9   : > { %v5560_v46 = vmul.f32 %v16006_v22, %v5522_v3  ;;  %v16106_v15 = vrot.slane %v6427_v61, 4  ;;  %v16108_v63 = vrot.slane %v6430_v32, 5  ;;  %v11559_v48 = vcombine.low %v6179_v30, %v16091_v62 }
 0x2ba   : > { %v5632_v52 = vmax.f32 %v5600_v34, 0.0  ;;  %v6367_v50 = vsel %vm13248_vm12, %v6362_v6, %v6366_v7  ;;  %v6371_v41 = vor.u32 %v6370_v42, %v6366_v7  ;;  %v6385_v11 = vor.u32 %v16030_v10, %v16028_v31  ;;  %v6158_v6 = vld [vmem:[#allocation3 + $0xc8] sm:$0x1] }
 0x2bb   : > { %v5598_v37 = vadd.f32 %v16017_v26, %v5560_v46  ;;  %12707 = vmatmul.mubr.msk.bf16.gmra.mxu0 %vm1453_vm9, %v11559_v48  ;;  %v6388_v22 = vshll.u32 %v16021_v54, 16  ;;  %v6394_v12 = vrot.slane %v6392_v8, 4  ;;  %v6398_v60 = vshll.u32 %v16103_v24, 16 }
 0x2bc   : > { %v11930_v35 = vpack.c.bf16 %v5632_v52, %v5632_v52  ;;  %v6372_v28 = vrot.slane %v6371_v41, 4  ;;  %v6386_v13 = vrot.slane %v6385_v11, 4  ;;  %v6451_v18 = vshrl.u32 %v6181_v56, 16 }
 0x2bd   : > { %v5630_v0 = vmax.f32 %v5598_v37, 0.0  ;;  %v6390_v1 = vrot.slane %v6388_v22, 5  ;;  %v6400_v31 = vrot.slane %v6398_v60, 5  ;;  %v6454_v10 = vshll.u32 %v6181_v56, 16  ;;  %v16145_v37 = vld [vmem:[#allocation3 + $0x88] sm:$0xf] }
 0x2be   : > { %v5993_v26 = vshrl.u32 %v11930_v35, 16  ;;  %v5996_v30 = vshll.u32 %v11930_v35, 16  ;;  %v6377_v47 = vsel %vm13248_vm12, %v6372_v28, %v6376_v9  ;;  %v16125_v53 = vrot.slane %v6451_v18, 4  ;;  %v6151_v22 = vld [vmem:[#allocation3 + $0xbc] sm:$0x1] }
 0x2bf   : > { %v11524_v8 = vcombine.low %v6367_v50, %v6377_v47  ;;  %v11928_v39 = vpack.c.bf16 %v5630_v0, %v5630_v0  ;;  %v6391_v25 = vsel %vm13248_vm12, %v6386_v13, %v6390_v1  ;;  %v6395_v59 = vor.u32 %v6394_v12, %v6390_v1  ;;  %v16153_v60 = vld [vmem:[#allocation3 + $0x74] sm:$0x1]  ;;  %v6185_v0 = vld [vmem:[#allocation3 + $0x90] sm:$0xf] }
 0x2c0   : > { %v5995_v33 = vrot.slane %v5993_v26, 7  ;;  %v16129_v45 = vrot.slane %v6454_v10, 5  ;;  %v6464_v58 = vshrl.u32 %v16121_v23, 16  ;;  %v11560_v42 = vcombine.low %v6181_v56, %v16121_v23  ;;  %v6183_v56 = vld [vmem:[#allocation3 + $0x84] sm:$0xf] }
 0x2c1   : > { %12668 = vmatprep.mubr.msk.bf16.mxu1 %vm1453_vm9, %v11524_v8  ;;  %v5976_v3 = vshrl.u32 %v11928_v39, 16  ;;  %v5979_v61 = vshll.u32 %v11928_v39, 16  ;;  %v6396_v32 = vrot.slane %v6395_v59, 4  ;;  %v6409_v34 = vor.u32 %v16087_v36, %v16085_v44  ;;  %v16160_v10 = vld [vmem:[#allocation3 + $0x94] sm:$0xf] }
 0x2c2   : > { %v5998_v7 = vor.u32 %v5996_v30, %v5995_v33  ;;  %v6000_v9 = vrot.slane %v5995_v33, 4  ;;  %12710 = vmatprep.mubr.msk.bf16.mxu0 %vm1453_vm9, %v11560_v42  ;;  %v6412_v46 = vshll.u32 %v16065_v29, 16  ;;  %v6418_v48 = vrot.slane %v6416_v19, 4  ;;  %v16177_v42 = vld [vmem:[#allocation3 + $0x80] sm:$0x1] }
 0x2c3   : > { %v5978_v52 = vrot.slane %v5976_v3, 7  ;;  %v6401_v50 = vsel %vm13248_vm12, %v6396_v32, %v6400_v31  ;;  %v6410_v41 = vrot.slane %v6409_v34, 4  ;;  %v6422_v11 = vshll.u32 %v16133_v40, 16 }
 0x2c4   : > { %v5999_v44 = vsel %vm13254_vm13, %v5991_v57, %v5998_v7  ;;  %v6159_v36 = vsel %vm13193_vm5, %v6000_v9, %v6158_v6  ;;  %v11525_v19 = vcombine.low %v6391_v25, %v6401_v50  ;;  %v6414_v12 = vrot.slane %v6412_v46, 5  ;;  %v16182_v46 = vld [vmem:[#allocation3 + $0xa0] sm:$0xf] }
 0x2c5   : > { %6157 = vst.msk [vmem:[#allocation3 + $0xc4] sm:$0xf] %vm280_vm1, %v5999_v44  ;;  %6160 = vst [vmem:[#allocation3 + $0xc8] sm:$0x1] %v6159_v36  ;;  %v5981_v35 = vor.u32 %v5979_v61, %v5978_v52  ;;  %v5983_v28 = vrot.slane %v5978_v52, 4  ;;  %v6424_v13 = vrot.slane %v6422_v11, 5  ;;  %v11561_v8 = vcombine.low %v6183_v56, %v16145_v37 }
 0x2c6   : > { %v6475_v18 = vshrl.u32 %v6183_v56, 16  ;;  %12669 = vmatmul.mubr.msk.bf16.gmra.mxu1 %vm1453_vm9, %v11525_v19  ;;  %v6415_v51 = vsel %vm13248_vm12, %v6410_v41, %v6414_v12  ;;  %v6419_v57 = vor.u32 %v6418_v48, %v6414_v12  ;;  %v6478_v1 = vshll.u32 %v6183_v56, 16 }
 0x2c7   : > { %v6488_v31 = vshrl.u32 %v16145_v37, 16  ;;  %v5982_v26 = vsel %vm13254_vm13, %v5974_v17, %v5981_v35  ;;  %v6152_v30 = vsel %vm13193_vm5, %v5983_v28, %v6151_v22  ;;  %v6433_v59 = vor.u32 %v16108_v63, %v16106_v15  ;;  %12711 = vmatmul.mubr.msk.bf16.gmra.mxu0 %vm1453_vm9, %v11561_v8  ;;  %v6187_v63 = vld [vmem:[#allocation3 + $0x9c] sm:$0xf]  ;;  %v16196_v35 = vld [vmem:[#allocation3 + $0x8c] sm:$0x1] }
 0x2c8   : > { %v6477_v47 = vrot.slane %v6475_v18, 4  ;;  %6150 = vst.msk [vmem:[#allocation3 + $0xb8] sm:$0xf] %vm280_vm1, %v5982_v26  ;;  %6153 = vst [vmem:[#allocation3 + $0xbc] sm:$0x1] %v6152_v30  ;;  %v6420_v39 = vrot.slane %v6419_v57, 4  ;;  %v11562_v56 = vcombine.low %v6185_v0, %v16160_v10  ;;  %v6457_v52 = vor.u32 %v16129_v45, %v16125_v53 }
 0x2c9   : > { %v6480_v25 = vrot.slane %v6478_v1, 5  ;;  %v6436_v33 = vshll.u32 %v16091_v62, 16  ;;  %v6442_v5 = vrot.slane %v6440_v55, 4  ;;  %v6446_v38 = vshll.u32 %v16153_v60, 16  ;;  %v6189_v18 = vld [vmem:[#allocation3 + $0xa8] sm:$0xf] }
 0x2ca   : > { %v6499_v14 = vshrl.u32 %v6185_v0, 16  ;;  %v6502_v17 = vshll.u32 %v6185_v0, 16  ;;  %v6425_v6 = vsel %vm13248_vm12, %v6420_v39, %v6424_v13  ;;  %v6434_v3 = vrot.slane %v6433_v59, 4  ;;  %12714 = vmatprep.mubr.msk.bf16.mxu0 %vm1453_vm9, %v11562_v56  ;;  %v16204_v1 = vld [vmem:[#allocation3 + $0xac] sm:$0xf] }
 0x2cb   : > { %v6438_v61 = vrot.slane %v6436_v33, 5  ;;  %v6512_v15 = vshrl.u32 %v16160_v10, 16  ;;  %v11526_v32 = vcombine.low %v6415_v51, %v6425_v6  ;;  %v6448_v34 = vrot.slane %v6446_v38, 5  ;;  %v16213_v6 = vld [vmem:[#allocation3 + $0x98] sm:$0x1] }
 0x2cc   : > { %v6501_v7 = vrot.slane %v6499_v14, 4  ;;  %v6504_v9 = vrot.slane %v6502_v17, 5  ;;  %v6460_v50 = vshll.u32 %v16121_v23, 16  ;;  %v6466_v41 = vrot.slane %v6464_v58, 4 }
 0x2cd   : > { %v6439_v55 = vsel %vm13248_vm12, %v6434_v3, %v6438_v61  ;;  %v6443_v48 = vor.u32 %v6442_v5, %v6438_v61  ;;  %12672 = vmatprep.mubr.msk.bf16.mxu1 %vm1453_vm9, %v11526_v32  ;;  %v6470_v11 = vshll.u32 %v16177_v42, 16  ;;  %v6523_v44 = vshrl.u32 %v6187_v63, 16  ;;  %v6191_v32 = vld [vmem:[#allocation3 + $0xb4] sm:$0xf] }
 0x2ce   : > { %v6458_v22 = vrot.slane %v6457_v52, 4  ;;  %v6526_v19 = vshll.u32 %v6187_v63, 16  ;;  %v6536_v12 = vshrl.u32 %v16182_v46, 16  ;;  %v6462_v53 = vrot.slane %v6460_v50, 5 }
 0x2cf   : > { %v6444_v36 = vrot.slane %v6443_v48, 4  ;;  %v6472_v45 = vrot.slane %v6470_v11, 5  ;;  %v16198_v28 = vrot.slane %v6523_v44, 4  ;;  %v11563_v13 = vcombine.low %v6187_v63, %v16182_v46  ;;  %v16221_v52 = vld [vmem:[#allocation3 + $0xb8] sm:$0xf] }
 0x2d0   : > { %v6528_v0 = vrot.slane %v6526_v19, 5  ;;  %v6481_v51 = vor.u32 %v6480_v25, %v6477_v47  ;;  %v6484_v57 = vshll.u32 %v16145_v37, 16  ;;  %v6463_v30 = vsel %vm13248_vm12, %v6458_v22, %v6462_v53 }
 0x2d1   : > { %v6449_v58 = vsel %vm13248_vm12, %v6444_v36, %v6448_v34  ;;  %v6467_v8 = vor.u32 %v6466_v41, %v6462_v53  ;;  %12715 = vmatmul.mubr.msk.bf16.gmra.mxu0 %vm1453_vm9, %v11563_v13  ;;  %v6490_v39 = vrot.slane %v6488_v31, 4  ;;  %v6494_v5 = vshll.u32 %v16196_v35, 16 }
 0x2d2   : > { %v11527_v26 = vcombine.low %v6439_v55, %v6449_v58  ;;  %v6482_v59 = vrot.slane %v6481_v51, 4  ;;  %v6486_v33 = vrot.slane %v6484_v57, 5  ;;  %v6547_v38 = vshrl.u32 %v6189_v18, 16 }
 0x2d3   : > { %v6468_v47 = vrot.slane %v6467_v8, 4  ;;  %v6550_v25 = vshll.u32 %v6189_v18, 16  ;;  %v6560_v14 = vshrl.u32 %v16204_v1, 16  ;;  %v11564_v17 = vcombine.low %v6189_v18, %v16204_v1  ;;  %v16229_v18 = vld [vmem:[#allocation3 + $0xa4] sm:$0x1] }
 0x2d4   : > { %12673 = vmatmul.mubr.msk.bf16.gmra.mxu1 %vm1453_vm9, %v11527_v26  ;;  %v6487_v3 = vsel %vm13248_vm12, %v6482_v59, %v6486_v33  ;;  %v6491_v61 = vor.u32 %v6490_v39, %v6486_v33  ;;  %v6496_v31 = vrot.slane %v6494_v5, 5  ;;  %v6549_v63 = vrot.slane %v6547_v38, 4  ;;  %v13050_v26 = vld [vmem:[#allocation3 + $0xc] sm:$0xff]  }
 0x2d5   : > { %v6473_v34 = vsel %vm13248_vm12, %v6468_v47, %v6472_v45  ;;  %v6552_v55 = vrot.slane %v6550_v25, 5  ;;  %12718 = vmatprep.mubr.msk.bf16.mxu0 %vm1453_vm9, %v11564_v17  ;;  %v6505_v48 = vor.u32 %v6504_v9, %v6501_v7  ;;  %v6508_v56 = vshll.u32 %v16160_v10, 16 }
 0x2d6   : > { %v11528_v50 = vcombine.low %v6463_v30, %v6473_v34  ;;  %v6492_v41 = vrot.slane %v6491_v61, 4  ;;  %v6514_v11 = vrot.slane %v6512_v15, 4  ;;  %v6518_v44 = vshll.u32 %v16213_v6, 16  ;;  %v16233_v30 = vld [vmem:[#allocation3 + $0xb0] sm:$0x1] }
 0x2d7   : > { %v6506_v36 = vrot.slane %v6505_v48, 4  ;;  %v6510_v22 = vrot.slane %v6508_v56, 5  ;;  %v6571_v19 = vshrl.u32 %v6191_v32, 16  ;;  %v6574_v53 = vshll.u32 %v6191_v32, 16  ;;  %v16245_v34 = vld [vmem:[#allocation3 + $0xbc] sm:$0x1] }
 0x2d8   : > { %12676 = vmatprep.mubr.msk.bf16.mxu1 %vm1453_vm9, %v11528_v50  ;;  %v6497_v45 = vsel %vm13248_vm12, %v6492_v41, %v6496_v31  ;;  %v6520_v13 = vrot.slane %v6518_v44, 5  ;;  %v6584_v7 = vshrl.u32 %v16221_v52, 16  ;;  %v11565_v9 = vcombine.low %v6191_v32, %v16221_v52  ;;  %v7148_v50 = vld [vmem:[#allocation3] sm:$0xe]  ;;  %v13097_v44 = vld [vmem:[%s18549_s2 + $0x6] sm:$0x3] }
 0x2d9   : > { %v11529_v58 = vcombine.low %v6487_v3, %v6497_v45  ;;  %v6511_v15 = vsel %vm13248_vm12, %v6506_v36, %v6510_v22  ;;  %v6515_v51 = vor.u32 %v6514_v11, %v6510_v22  ;;  %v6573_v57 = vrot.slane %v6571_v19, 4 }
 0x2da   : > { %v6576_v8 = vrot.slane %v6574_v53, 5  ;;  %12719 = vmatmul.mubr.msk.bf16.gmra.mxu0 %vm1453_vm9, %v11565_v9  ;;  %v6529_v39 = vor.u32 %v6528_v0, %v16198_v28  ;;  %v6532_v59 = vshll.u32 %v16182_v46, 16  ;;  %v6538_v33 = vrot.slane %v6536_v12, 4  ;;  %v7149_v9 = vld [vmem:[#allocation3 + $0xc] sm:$0xe] }
 0x2db   : > { %v6516_v5 = vrot.slane %v6515_v51, 4  ;;  %v6542_v38 = vshll.u32 %v16229_v18, 16  ;;  %12758 = vmatprep.mubr.msk.bf16.mxu0 %vm1453_vm9, %v13050_v26  ;;  %v6553_v47 = vor.u32 %v6552_v55, %v6549_v63  ;;  %v6556_v25 = vshll.u32 %v16204_v1, 16 }
 0x2dc   : > { %12677 = vmatmul.mubr.msk.bf16.gmra.mxu1 %vm1453_vm9, %v11529_v58  ;;  %v6530_v17 = vrot.slane %v6529_v39, 4  ;;  %v6534_v3 = vrot.slane %v6532_v59, 5  ;;  %v6562_v61 = vrot.slane %v6560_v14, 4  ;;  %v6566_v31 = vshll.u32 %v16233_v30, 16  ;;  %v16252_v14 = vld [vmem:[%s18549_s2 + $0xa] sm:$0x3] }
 0x2dd   : > { %v6521_v28 = vsel %vm13248_vm12, %v6516_v5, %v6520_v13  ;;  %v6544_v0 = vrot.slane %v6542_v38, 5  ;;  %v6554_v12 = vrot.slane %v6553_v47, 4  ;;  %v6558_v32 = vrot.slane %v6556_v25, 5  ;;  %v13098_v39 = vld [vmem:[#allocation3 + $0x4] sm:$0xf] }
 0x2de   : > { %v11530_v48 = vcombine.low %v6511_v15, %v6521_v28  ;;  %v6535_v56 = vsel %vm13248_vm12, %v6530_v17, %v6534_v3  ;;  %v6539_v63 = vor.u32 %v6538_v33, %v6534_v3  ;;  %v6568_v55 = vrot.slane %v6566_v31, 5  ;;  %v13051_v15 = vld [vmem:[#allocation3 + $0x18] sm:$0xff]   ;;  %v13052_v5 = vld [vmem:[#allocation3 + $0x24] sm:$0xff]  }
 0x2df   : > { %v6559_v41 = vsel %vm13248_vm12, %v6554_v12, %v6558_v32  ;;  %v6563_v11 = vor.u32 %v6562_v61, %v6558_v32  ;;  %v7765_v36 = vsel %vm1502_vm0, %v13097_v44, 0  ;;  %v6577_v22 = vor.u32 %v6576_v8, %v6573_v57  ;;  %v13099_v38 = vld [vmem:[#allocation3 + $0x8] sm:$0x1]  ;;  %v7150_v31 = vld [vmem:[#allocation3 + $0x18] sm:$0xe] }
 0x2e0   : > { %12680 = vmatprep.mubr.msk.bf16.mxu1 %vm1453_vm9, %v11530_v48  ;;  %v6540_v19 = vrot.slane %v6539_v63, 4  ;;  %12757 = vmatpush3.bf16.msra.mxu0 %v7765_v36  ;;  %v6580_v53 = vshll.u32 %v16221_v52, 16  ;;  %v6586_v45 = vrot.slane %v6584_v7, 4  ;;  %v6590_v13 = vshll.u32 %v16245_v34, 16  ;;  %v7151_v48 = vld [vmem:[#allocation3 + $0x24] sm:$0xe] }
 0x2e1   : > { %v6564_v58 = vrot.slane %v6563_v11, 4  ;;  %v6578_v51 = vrot.slane %v6577_v22, 4  ;;  %v11582_v26 = vrot.slane %v7148_v50, 9  ;;  %v7198_v59 = vrot.slane %v13098_v39, 5  ;;  %12974 = vmatprep.subr.msk.bf16.mxu0 %vm1502_vm0, %v16252_v14  ;;  %v13100_v63 = vld [vmem:[#allocation3 + $0x10] sm:$0xf] }
 0x2e2   : > { %v6545_v57 = vsel %vm13248_vm12, %v6540_v19, %v6544_v0  ;;  %v6582_v8 = vrot.slane %v6580_v53, 5  ;;  %v6592_v33 = vrot.slane %v6590_v13, 5  ;;  %v7201_v7 = vrot.slane %v13099_v38, 5  ;;  %v13101_v50 = vld [vmem:[#allocation3 + $0x14] sm:$0x1] }
 0x2e3   : > { %v11531_v47 = vcombine.low %v6535_v56, %v6545_v57  ;;  %v6569_v25 = vsel %vm13248_vm12, %v6564_v58, %v6568_v55  ;;  %12759 = vmatmul.mubr.msk.bf16.vlgmr.msra.gmra.mxu0 %vm1453_vm9, %v13051_v15  ;;  %v16272_v3 = vsel %vm13649_vm2, %v11582_v26, %v7198_v59  ;;  %v7200_v61 = vrot.slane %v7198_v59, 4  ;;  %v13102_v19 = vld [vmem:[#allocation3 + $0x1c] sm:$0xf]  ;;  %v13103_v58 = vld [vmem:[#allocation3 + $0x20] sm:$0x1]  ;;  %v13053_v38 = vld [vmem:[#allocation3 + $0x30] sm:$0xff]  }
 0x2e4   : > { %v11532_v28 = vcombine.low %v6559_v41, %v6569_v25  ;;  %v6583_v0 = vsel %vm13248_vm12, %v6578_v51, %v6582_v8  ;;  %v6587_v12 = vor.u32 %v6586_v45, %v6582_v8  ;;  %12762 = vmatprep.mubr.msk.bf16.mxu0 %vm1453_vm9, %v13052_v5  ;;  %v11583_v32 = vrot.slane %v7149_v9, 9  ;;  %v7152_v45 = vld [vmem:[#allocation3 + $0x30] sm:$0xe]  ;;  %v13104_v59 = vld [vmem:[#allocation3 + $0x28] sm:$0xf] }
 0x2e5   : > { %12681 = vmatmul.mubr.msk.bf16.gmra.mxu1 %vm1453_vm9, %v11531_v47  ;;  %v7202_v56 = vsel %vm13649_vm2, %v7200_v61, %v7201_v7  ;;  %v7205_v55 = vrot.slane %v13100_v63, 5  ;;  %v7208_v11 = vrot.slane %v13101_v50, 5  ;;  %v16282_v41 = vsel %vm1502_vm0, %v15914_v21, 0  ;;  %v7153_v8 = vld [vmem:[#allocation3 + $0x3c] sm:$0xe] }
 0x2e6   : > { %12684 = vmatprep.mubr.msk.bf16.mxu1 %vm1453_vm9, %v11532_v28  ;;  %v6588_v44 = vrot.slane %v6587_v12, 4  ;;  %v11599_v36 = vcombine.low %v16272_v3, %v7202_v56  ;;  %v11584_v22 = vrot.slane %v7150_v31, 9  ;;  %v7212_v53 = vrot.slane %v13102_v19, 5  ;;  %v7154_v3 = vld [vmem:[#allocation3 + $0x48] sm:$0xe]  ;;  %v13054_v61 = vld [vmem:[#allocation3 + $0x3c] sm:$0xff]  }
 0x2e7   : > { %v16288_v13 = vsel %vm13649_vm2, %v11583_v32, %v7205_v55  ;;  %v7207_v9 = vrot.slane %v7205_v55, 4  ;;  %v7215_v15 = vrot.slane %v13103_v58, 5  ;;  %v11585_v51 = vrot.slane %v7151_v48, 9  ;;  %v13105_v12 = vld [vmem:[#allocation3 + $0x34] sm:$0xf] }
 0x2e8   : > { %v6593_v21 = vsel %vm13248_vm12, %v6588_v44, %v6592_v33  ;;  %v16294_v26 = vsel %vm13649_vm2, %v11584_v22, %v7212_v53  ;;  %v7214_v39 = vrot.slane %v7212_v53, 4  ;;  %v7219_v57 = vrot.slane %v13104_v59, 5  ;;  %v7155_v63 = vld [vmem:[#allocation3 + $0x54] sm:$0xe]  ;;  %v7158_v59 = vld [vmem:[#allocation3 + $0x78] sm:$0xe] }
 0x2e9   : > { %v11533_v5 = vcombine.low %v6583_v0, %v6593_v21  ;;  %v16298_v7 = vsel %vm13649_vm2, %v7207_v9, %v7208_v11  ;;  %v7222_v47 = vrot.slane %v15951_v2, 5  ;;  %v11586_v25 = vrot.slane %v7152_v45, 9  ;;  %v7156_v45 = vld [vmem:[#allocation3 + $0x60] sm:$0xe] }
 0x2ea   : > { %v11600_v33 = vcombine.low %v16288_v13, %v16298_v7  ;;  %v16305_v31 = vsel %vm13649_vm2, %v7214_v39, %v7215_v15  ;;  %v16309_v28 = vsel %vm13649_vm2, %v11585_v51, %v7219_v57  ;;  %v7221_v0 = vrot.slane %v7219_v57, 4  ;;  %v13055_v57 = vld [vmem:[#allocation3 + $0x48] sm:$0xff]   ;;  %v13056_v7 = vld [vmem:[#allocation3 + $0x54] sm:$0xff]  }
 0x2eb   : > { %12763 = vmatmul.mubr.msk.bf16.gmra.mxu0 %vm1453_vm9, %v13053_v38  ;;  %v11601_v2 = vcombine.low %v16294_v26, %v16305_v31  ;;  %v7226_v32 = vrot.slane %v13105_v12, 5  ;;  %v7229_v48 = vrot.slane %v15987_v27, 5  ;;  %v11587_v56 = vrot.slane %v7153_v8, 9 }
 0x2ec   : > { %12766 = vmatprep.mubr.msk.bf16.mxu0 %vm1453_vm9, %v13054_v61  ;;  %v16318_v55 = vsel %vm13649_vm2, %v7221_v0, %v7222_v47  ;;  %v7233_v50 = vrot.slane %v15926_v43, 5  ;;  %v7236_v11 = vrot.slane %v16043_v49, 5  ;;  %v11588_v44 = vrot.slane %v7154_v3, 9  ;;  %v7159_v61 = vld [vmem:[#allocation3 + $0x84] sm:$0xe] }
 0x2ed   : > { %12685 = vmatmul.mubr.msk.bf16.gmra.mxu1 %vm1453_vm9, %v11533_v5  ;;  %v11602_v22 = vcombine.low %v16309_v28, %v16318_v55  ;;  %v16327_v27 = vsel %vm13649_vm2, %v11586_v25, %v7226_v32  ;;  %v7228_v19 = vrot.slane %v7226_v32, 4  ;;  %v7240_v53 = vrot.slane %v15969_v20, 5 }
 0x2ee   : > { %12724 = vmatprep.mubr.msk.bf16.mxu1 %vm1453_vm9, %v11599_v36  ;;  %v16333_v43 = vsel %vm13649_vm2, %v11587_v56, %v7233_v50  ;;  %v7235_v49 = vrot.slane %v7233_v50, 4  ;;  %v7243_v13 = vrot.slane %v16073_v4, 5  ;;  %v11589_v9 = vrot.slane %v7155_v63, 9  ;;  %v7157_v36 = vld [vmem:[#allocation3 + $0x6c] sm:$0xe] }
 0x2ef   : > { %v16338_v58 = vsel %vm13649_vm2, %v7228_v19, %v7229_v48  ;;  %v16342_v15 = vsel %vm13649_vm2, %v11588_v44, %v7240_v53  ;;  %v7242_v20 = vrot.slane %v7240_v53, 4  ;;  %v7247_v51 = vrot.slane %v16021_v54, 5  ;;  %v7160_v63 = vld [vmem:[#allocation3 + $0x90] sm:$0xe] }
 0x2f0   : > { %v11603_v21 = vcombine.low %v16327_v27, %v16338_v58  ;;  %v16349_v26 = vsel %vm13649_vm2, %v7235_v49, %v7236_v11  ;;  %v7250_v4 = vrot.slane %v16103_v24, 5  ;;  %v11590_v39 = vrot.slane %v7156_v45, 9  ;;  %v7161_v45 = vld [vmem:[#allocation3 + $0x9c] sm:$0xe] }
 0x2f1   : > { %v11604_v8 = vcombine.low %v16333_v43, %v16349_v26  ;;  %v16356_v5 = vsel %vm13649_vm2, %v7242_v20, %v7243_v13  ;;  %v16360_v54 = vsel %vm13649_vm2, %v11589_v9, %v7247_v51  ;;  %v7249_v38 = vrot.slane %v7247_v51, 4  ;;  %v8686_v13 = vld [vmem:[#allocation3 + $0xc] sm:$0xe] }
 0x2f2   : > { %v11605_v47 = vcombine.low %v16342_v15, %v16356_v5  ;;  %v7254_v24 = vrot.slane %v16065_v29, 5  ;;  %v7257_v25 = vrot.slane %v16133_v40, 5  ;;  %v11591_v3 = vrot.slane %v7157_v36, 9  ;;  %v16422_v36 = vld [vmem:[#allocation3 + $0x10] sm:$0xf] }
 0x2f3   : > { %12767 = vmatmul.mubr.msk.bf16.gmra.mxu0 %vm1453_vm9, %v13055_v57  ;;  %v16369_v31 = vsel %vm13649_vm2, %v7249_v38, %v7250_v4  ;;  %v7261_v0 = vrot.slane %v16091_v62, 5  ;;  %v7264_v12 = vrot.slane %v16153_v60, 5  ;;  %v11592_v32 = vrot.slane %v7158_v59, 9  ;;  %v16384_v62 = vld [vmem:[%s18549_s2 + $0xc] sm:$0x3]  ;;  %v13057_v4 = vld [vmem:[#allocation3 + $0x60] sm:$0xff]  }
 0x2f4   : > { %12770 = vmatprep.mubr.msk.bf16.mxu0 %vm1453_vm9, %v13056_v7  ;;  %v11606_v29 = vcombine.low %v16360_v54, %v16369_v31  ;;  %v16378_v40 = vsel %vm13649_vm2, %v11590_v39, %v7254_v24  ;;  %v7256_v48 = vrot.slane %v7254_v24, 4  ;;  %v7268_v56 = vrot.slane %v16121_v23, 5  ;;  %v7162_v7 = vld [vmem:[#allocation3 + $0xa8] sm:$0xe]  ;;  %v13058_v24 = vld [vmem:[#allocation3 + $0x6c] sm:$0xff]  }
 0x2f5   : > { %12725 = vmatmul.mubr.msk.bf16.vlgmr.msra.gmra.mxu1 %vm1453_vm9, %v11600_v33  ;;  %v16389_v60 = vsel %vm13649_vm2, %v11591_v3, %v7261_v0  ;;  %v7263_v50 = vrot.slane %v7261_v0, 4  ;;  %v7271_v11 = vrot.slane %v16177_v42, 5  ;;  %v11593_v44 = vrot.slane %v7159_v61, 9 }
 0x2f6   : > { %12791 = vmatpush3.bf16.msra.mxu1 %v16282_v41  ;;  %12728 = vmatprep.mubr.msk.bf16.mxu1 %vm1453_vm9, %v11601_v2  ;;  %v16396_v23 = vsel %vm13649_vm2, %v7256_v48, %v7257_v25  ;;  %v16400_v19 = vsel %vm13649_vm2, %v11592_v32, %v7268_v56  ;;  %v7270_v33 = vrot.slane %v7268_v56, 4  ;;  %v7275_v53 = vrot.slane %v16145_v37, 5  ;;  %v8687_v48 = vld [vmem:[#allocation3 + $0x18] sm:$0xe] }
 0x2f7   : > { %v11607_v42 = vcombine.low %v16378_v40, %v16396_v23  ;;  %v16407_v41 = vsel %vm13649_vm2, %v7263_v50, %v7264_v12  ;;  %v7278_v2 = vrot.slane %v16196_v35, 5  ;;  %v11594_v49 = vrot.slane %v7160_v63, 9  ;;  %12975 = vmatprep.subr.msk.bf16.mxu1 %vm1502_vm0, %v16384_v62  ;;  %v16424_v35 = vld [vmem:[#allocation3 + $0x14] sm:$0x1]  ;;  %v16450_v50 = vld [vmem:[#allocation3 + $0x1c] sm:$0xf] }
 0x2f8   : > { %v11608_v9 = vcombine.low %v16389_v60, %v16407_v41  ;;  %v16416_v37 = vsel %vm13649_vm2, %v7270_v33, %v7271_v11  ;;  %v16420_v20 = vsel %vm13649_vm2, %v11593_v44, %v7275_v53  ;;  %v7277_v51 = vrot.slane %v7275_v53, 4  ;;  %v8692_v60 = vld [vmem:[#allocation3 + $0x54] sm:$0xe] }
 0x2f9   : > { %v11609_v39 = vcombine.low %v16400_v19, %v16416_v37  ;;  %v7282_v59 = vrot.slane %v16160_v10, 5  ;;  %v7285_v57 = vrot.slane %v16213_v6, 5  ;;  %v11595_v38 = vrot.slane %v7161_v45, 9  ;;  %v16465_v45 = vld [vmem:[#allocation3 + $0x20] sm:$0x1] }
 0x2fa   : > { %v16432_v25 = vsel %vm13649_vm2, %v7277_v51, %v7278_v2  ;;  %v7289_v3 = vrot.slane %v16182_v46, 5  ;;  %v7292_v61 = vrot.slane %v16229_v18, 5  ;;  %v11697_v0 = vrot.slane %v8686_v13, 9  ;;  %v11779_v2 = vld [vmem:[%s18549_s2 + $0xe] sm:$0x3] }
 0x2fb   : > { %12771 = vmatmul.mubr.msk.bf16.gmra.mxu0 %vm1453_vm9, %v13057_v4  ;;  %v11610_v12 = vcombine.low %v16420_v20, %v16432_v25  ;;  %v16441_v10 = vsel %vm13649_vm2, %v11594_v49, %v7282_v59  ;;  %v7284_v6 = vrot.slane %v7282_v59, 4  ;;  %v8752_v32 = vrot.slane %v16422_v36, 5  ;;  %v7163_v49 = vld [vmem:[#allocation3 + $0xb4] sm:$0xe]  ;;  %v16493_v51 = vld [vmem:[#allocation3 + $0x28] sm:$0xf] }
 0x2fc   : > { %12774 = vmatprep.mubr.msk.bf16.mxu0 %vm1453_vm9, %v13058_v24  ;;  %v16447_v46 = vsel %vm13649_vm2, %v11595_v38, %v7289_v3  ;;  %v7291_v18 = vrot.slane %v7289_v3, 4  ;;  %v8755_v56 = vrot.slane %v16424_v35, 5  ;;  %v11596_v63 = vrot.slane %v7162_v7, 9  ;;  %v16499_v38 = vld [vmem:[#allocation3 + $0x2c] sm:$0x1]  ;;  %v13059_v7 = vld [vmem:[#allocation3 + $0x78] sm:$0xff]  }
 0x2fd   : > { %12729 = vmatmul.mubr.msk.bf16.gmra.mxu1 %vm1453_vm9, %v11602_v22  ;;  %v16458_v11 = vsel %vm13649_vm2, %v7284_v6, %v7285_v57  ;;  %v16462_v44 = vsel %vm13649_vm2, %v11697_v0, %v8752_v32  ;;  %v8754_v33 = vrot.slane %v8752_v32, 4  ;;  %v7296_v53 = vrot.slane %v16204_v1, 5  ;;  %v7960_v6 = vld [vmem:[#allocation3 + $0xc] sm:$0xf]  ;;  %v13060_v32 = vld [vmem:[#allocation3 + $0x84] sm:$0xff]  }
 0x2fe   : > { %12732 = vmatprep.mubr.msk.bf16.mxu1 %vm1453_vm9, %v11603_v21  ;;  %v11611_v28 = vcombine.low %v16441_v10, %v16458_v11  ;;  %v16478_v55 = vsel %vm13649_vm2, %v7291_v18, %v7292_v61  ;;  %v7299_v1 = vrot.slane %v16233_v30, 5  ;;  %v8961_v22 = vsel %vm1502_vm0, %v16252_v14, 0  ;;  %v8688_v30 = vld [vmem:[#allocation3 + $0x24] sm:$0xe] }
 0x2ff   : > { %v16487_v27 = vsel %vm13649_vm2, %v8754_v33, %v8755_v56  ;;  %v16491_v58 = vsel %vm13649_vm2, %v11596_v63, %v7296_v53  ;;  %v7298_v21 = vrot.slane %v7296_v53, 4  ;;  %12825 = vmatpush3.bf16.msra.mxu0 %v8961_v22  ;;  %v11698_v4 = vrot.slane %v8687_v48, 9 }
 0x300   : > { %v11714_v14 = vcombine.low %v16462_v44, %v16487_v27  ;;  %v8759_v59 = vrot.slane %v16450_v50, 5  ;;  %v8762_v57 = vrot.slane %v16465_v45, 5  ;;  %12976 = vmatprep.subr.msk.bf16.mxu0 %vm1502_vm0, %v11779_v2  ;;  %v11597_v3 = vrot.slane %v7163_v49, 9  ;;  %v8693_v27 = vld [vmem:[#allocation3 + $0x60] sm:$0xe] }
 0x301   : > { %v16504_v24 = vsel %vm13649_vm2, %v7298_v21, %v7299_v1  ;;  %v7303_v61 = vrot.slane %v16221_v52, 5  ;;  %v7306_v0 = vrot.slane %v16245_v34, 5  ;;  %v11699_v63 = vrot.slane %v8688_v30, 9  ;;  %v8689_v21 = vld [vmem:[#allocation3 + $0x30] sm:$0xe] }
 0x302   : > { %v16512_v18 = vsel %vm13649_vm2, %v11698_v4, %v8759_v59  ;;  %v8761_v56 = vrot.slane %v8759_v59, 4  ;;  %v8766_v34 = vrot.slane %v16493_v51, 5  ;;  %v8769_v53 = vrot.slane %v16499_v38, 5 }
 0x303   : > { %12775 = vmatmul.mubr.msk.bf16.gmra.mxu0 %vm1453_vm9, %v13059_v7  ;;  %v16517_v33 = vsel %vm13649_vm2, %v11597_v3, %v7303_v61  ;;  %v7305_v52 = vrot.slane %v7303_v61, 4  ;;  %v8009_v1 = vshrl.u32 %v7960_v6, 16  ;;  %v8012_v22 = vshll.u32 %v7960_v6, 16  ;;  %v16541_v7 = vld [vmem:[#allocation3 + $0x34] sm:$0xf] }
 0x304   : > { %12778 = vmatprep.mubr.msk.bf16.mxu0 %vm1453_vm9, %v13060_v32  ;;  %v16524_v2 = vsel %vm13649_vm2, %v8761_v56, %v8762_v57  ;;  %v8018_v49 = vshll.u32 %v16422_v36, 16  ;;  %v16539_v59 = vsel %vm13649_vm2, %v11699_v63, %v8766_v34  ;;  %v8768_v57 = vrot.slane %v8766_v34, 4  ;;  %v16543_v3 = vld [vmem:[#allocation3 + $0x38] sm:$0x1]  ;;  %v13061_v34 = vld [vmem:[#allocation3 + $0x90] sm:$0xff]  }
 0x305   : > { %12733 = vmatmul.mubr.msk.bf16.gmra.mxu1 %vm1453_vm9, %v11604_v8  ;;  %v11715_v30 = vcombine.low %v16512_v18, %v16524_v2  ;;  %v16535_v4 = vsel %vm13649_vm2, %v7305_v52, %v7306_v0  ;;  %v8011_v26 = vrot.slane %v8009_v1, 4  ;;  %v8014_v8 = vrot.slane %v8012_v22, 5  ;;  %v7963_v0 = vld [vmem:[#allocation3 + $0x18] sm:$0xf] }
 0x306   : > { %12736 = vmatprep.mubr.msk.bf16.mxu1 %vm1453_vm9, %v11605_v47  ;;  %v8020_v61 = vrot.slane %v8018_v49, 5  ;;  %v16553_v6 = vsel %vm13649_vm2, %v8768_v57, %v8769_v53  ;;  %v8022_v32 = vshrl.u32 %v16422_v36, 16  ;;  %v8028_v56 = vshll.u32 %v16424_v35, 16  ;;  %v8690_v53 = vld [vmem:[#allocation3 + $0x3c] sm:$0xe] }
 0x307   : > { %v11700_v63 = vrot.slane %v8689_v21, 9  ;;  %v8015_v5 = vor.u32 %v8014_v8, %v8011_v26  ;;  %v8773_v47 = vrot.slane %v16541_v7, 5  ;;  %v8776_v52 = vrot.slane %v16543_v3, 5  ;;  %v13062_v57 = vld [vmem:[#allocation3 + $0x9c] sm:$0xff]  }
 0x308   : > { %v8024_v1 = vrot.slane %v8022_v32, 4  ;;  %v8030_v22 = vrot.slane %v8028_v56, 5  ;;  %v8033_v49 = vshrl.u32 %v7963_v0, 16  ;;  %v8036_v43 = vshll.u32 %v7963_v0, 16  ;;  %v16566_v26 = vld [vmem:[#allocation3 + $0x40] sm:$0xf] }
 0x309   : > { %v8016_v48 = vrot.slane %v8015_v5, 4  ;;  %v16563_v36 = vsel %vm13649_vm2, %v11700_v63, %v8773_v47  ;;  %v8775_v35 = vrot.slane %v8773_v47, 4  ;;  %v8042_v21 = vshll.u32 %v16450_v50, 16  ;;  %v16570_v0 = vld [vmem:[#allocation3 + $0x44] sm:$0x1] }
 0x30a   : > { %v8025_v8 = vor.u32 %v8024_v1, %v8020_v61  ;;  %v8035_v13 = vrot.slane %v8033_v49, 4  ;;  %v8038_v32 = vrot.slane %v8036_v43, 5  ;;  %v8046_v56 = vshrl.u32 %v16450_v50, 16  ;;  %v7966_v49 = vld [vmem:[#allocation3 + $0x24] sm:$0xf] }
 0x30b   : > { %12779 = vmatmul.mubr.msk.bf16.gmra.mxu0 %vm1453_vm9, %v13061_v34  ;;  %v8021_v63 = vsel %vm13248_vm12, %v8016_v48, %v8020_v61  ;;  %v16577_v5 = vsel %vm13649_vm2, %v8775_v35, %v8776_v52  ;;  %v8044_v47 = vrot.slane %v8042_v21, 5  ;;  %v8052_v15 = vshll.u32 %v16465_v45, 16  ;;  %v13063_v35 = vld [vmem:[#allocation3 + $0xa8] sm:$0xff]  }
 0x30c   : > { %12782 = vmatprep.mubr.msk.bf16.mxu0 %vm1453_vm9, %v13062_v57  ;;  %v8026_v50 = vrot.slane %v8025_v8, 4  ;;  %v11717_v43 = vcombine.low %v16563_v36, %v16577_v5  ;;  %v8039_v34 = vor.u32 %v8038_v32, %v8035_v13  ;;  %v8048_v1 = vrot.slane %v8046_v56, 4  ;;  %v13064_v56 = vld [vmem:[#allocation3 + $0xb4] sm:$0xff]  }
 0x30d   : > { %12737 = vmatmul.mubr.msk.bf16.gmra.mxu1 %vm1453_vm9, %v11606_v29  ;;  %v8054_v48 = vrot.slane %v8052_v15, 5  ;;  %v11701_v61 = vrot.slane %v8690_v53, 9  ;;  %v8780_v45 = vrot.slane %v16566_v26, 5  ;;  %v8783_v54 = vrot.slane %v16570_v0, 5  ;;  %v8691_v15 = vld [vmem:[#allocation3 + $0x48] sm:$0xe] }
 0x30e   : > { %12740 = vmatprep.mubr.msk.bf16.mxu1 %vm1453_vm9, %v11607_v42  ;;  %v8031_v31 = vsel %vm13248_vm12, %v8026_v50, %v8030_v22  ;;  %v8040_v29 = vrot.slane %v8039_v34, 4  ;;  %v8049_v52 = vor.u32 %v8048_v1, %v8044_v47  ;;  %v16596_v13 = vsel %vm1502_vm0, %v16384_v62, 0  ;;  %v7969_v53 = vld [vmem:[#allocation3 + $0x30] sm:$0xf]  ;;  %v16607_v62 = vld [vmem:[#allocation3 + $0x4c] sm:$0xf] }
 0x30f   : > { %v16598_v57 = vcombine.low %v8021_v63, %v8031_v31  ;;  %v16602_v40 = vsel %vm13649_vm2, %v11701_v61, %v8780_v45  ;;  %v8782_v23 = vrot.slane %v8780_v45, 4  ;;  %v8057_v42 = vshrl.u32 %v7966_v49, 16  ;;  %v16615_v61 = vld [vmem:[#allocation3 + $0x50] sm:$0x1] }
 0x310   : > { %v8045_v22 = vsel %vm13248_vm12, %v8040_v29, %v8044_v47  ;;  %v8050_v21 = vrot.slane %v8049_v52, 4  ;;  %v8060_v8 = vshll.u32 %v7966_v49, 16  ;;  %v8066_v32 = vshll.u32 %v16493_v51, 16 }
 0x311   : > { %v16611_v63 = vsel %vm13649_vm2, %v8782_v23, %v8783_v54  ;;  %v8059_v50 = vrot.slane %v8057_v42, 4  ;;  %v8070_v34 = vshrl.u32 %v16493_v51, 16  ;;  %v8076_v1 = vshll.u32 %v16499_v38, 16 }
 0x312   : > { %v8055_v47 = vsel %vm13248_vm12, %v8050_v21, %v8054_v48  ;;  %v11718_v49 = vcombine.low %v16602_v40, %v16611_v63  ;;  %v8062_v45 = vrot.slane %v8060_v8, 5  ;;  %v8068_v31 = vrot.slane %v8066_v32, 5 }
 0x313   : > { %12783 = vmatmul.mubr.msk.bf16.gmra.mxu0 %vm1453_vm9, %v13063_v35  ;;  %v16623_v54 = vcombine.low %v8045_v22, %v8055_v47  ;;  %v8072_v29 = vrot.slane %v8070_v34, 4  ;;  %v8078_v51 = vrot.slane %v8076_v1, 5  ;;  %v11702_v52 = vrot.slane %v8691_v15, 9  ;;  %v16643_v34 = vld [vmem:[#allocation3 + $0x5c] sm:$0x1] }
 0x314   : > { %12786 = vmatprep.mubr.msk.bf16.mxu0 %vm1453_vm9, %v13064_v56  ;;  %v8063_v38 = vor.u32 %v8062_v45, %v8059_v50  ;;  %v8787_v48 = vrot.slane %v16607_v62, 5  ;;  %v8790_v23 = vrot.slane %v16615_v61, 5  ;;  %v8081_v42 = vshrl.u32 %v7969_v53, 16  ;;  %v16641_v56 = vld [vmem:[#allocation3 + $0x58] sm:$0xf] }
 0x315   : > { %12741 = vmatmul.mubr.msk.bf16.gmra.mxu1 %vm1453_vm9, %v11608_v9  ;;  %v8073_v35 = vor.u32 %v8072_v29, %v8068_v31  ;;  %v8084_v22 = vshll.u32 %v7969_v53, 16  ;;  %v8090_v15 = vshll.u32 %v16541_v7, 16  ;;  %v8094_v21 = vshrl.u32 %v16541_v7, 16  ;;  %v13065_v53 = vld [vmem:[#allocation3 + $0xc0] sm:$0xff]   ;;  %v7972_v29 = vld [vmem:[#allocation3 + $0x3c] sm:$0xf] }
 0x316   : > { %12744 = vmatprep.mubr.msk.bf16.mxu1 %vm1453_vm9, %v11609_v39  ;;  %v8064_v41 = vrot.slane %v8063_v38, 4  ;;  %v16639_v9 = vsel %vm13649_vm2, %v11702_v52, %v8787_v48  ;;  %v8789_v8 = vrot.slane %v8787_v48, 4  ;;  %v8083_v32 = vrot.slane %v8081_v42, 4 }
 0x317   : > { %v8074_v50 = vrot.slane %v8073_v35, 4  ;;  %v8086_v19 = vrot.slane %v8084_v22, 5  ;;  %v8092_v37 = vrot.slane %v8090_v15, 5  ;;  %v8096_v39 = vrot.slane %v8094_v21, 4 }
 0x318   : > { %v8069_v7 = vsel %vm13248_vm12, %v8064_v41, %v8068_v31  ;;  %v16649_v1 = vsel %vm13649_vm2, %v8789_v8, %v8790_v23  ;;  %v8100_v47 = vshll.u32 %v16543_v3, 16  ;;  %v11703_v45 = vrot.slane %v8692_v60, 9  ;;  %v7975_v60 = vld [vmem:[#allocation3 + $0x48] sm:$0xf] }
 0x319   : > { %v8079_v52 = vsel %vm13248_vm12, %v8074_v50, %v8078_v51  ;;  %v11719_v38 = vcombine.low %v16639_v9, %v16649_v1  ;;  %v8087_v48 = vor.u32 %v8086_v19, %v8083_v32  ;;  %v8097_v42 = vor.u32 %v8096_v39, %v8092_v37  ;;  %v16683_v50 = vld [vmem:[#allocation3 + $0x64] sm:$0xf]  ;;  %v16685_v19 = vld [vmem:[#allocation3 + $0x68] sm:$0x1]  ;;  %v16816_v1 = vld [vmem:[%s18549_s2 + $0x10] sm:$0x3] }
 0x31a   : > { %v16657_v35 = vcombine.low %v8069_v7, %v8079_v52  ;;  %v8102_v31 = vrot.slane %v8100_v47, 5  ;;  %v8794_v23 = vrot.slane %v16641_v56, 5  ;;  %v8797_v22 = vrot.slane %v16643_v34, 5 }
 0x31b   : > { %12787 = vmatmul.mubr.msk.bf16.gmra.mxu0 %vm1453_vm9, %v13065_v53  ;;  %v8088_v3 = vrot.slane %v8087_v48, 4  ;;  %v8098_v51 = vrot.slane %v8097_v42, 4  ;;  %v8105_v15 = vshrl.u32 %v7972_v29, 16  ;;  %v8108_v21 = vshll.u32 %v7972_v29, 16 }
 0x31c   : > { %12826 = vmatprep.mubr.msk.bf16.mxu0 %vm1453_vm9, %v11714_v14  ;;  %v16671_v41 = vsel %vm13649_vm2, %v11703_v45, %v8794_v23  ;;  %v8796_v8 = vrot.slane %v8794_v23, 4  ;;  %v8114_v32 = vshll.u32 %v16566_v26, 16  ;;  %v8118_v44 = vshrl.u32 %v16566_v26, 16 }
 0x31d   : > { %12745 = vmatmul.mubr.msk.bf16.gmra.mxu1 %vm1453_vm9, %v11610_v12  ;;  %v8093_v20 = vsel %vm13248_vm12, %v8088_v3, %v8092_v37  ;;  %v8103_v25 = vsel %vm13248_vm12, %v8098_v51, %v8102_v31  ;;  %v8107_v12 = vrot.slane %v8105_v15, 4  ;;  %v8110_v14 = vrot.slane %v8108_v21, 5  ;;  %v7978_v3 = vld [vmem:[#allocation3 + $0x54] sm:$0xf] }
 0x31e   : > { %12748 = vmatprep.mubr.msk.bf16.mxu1 %vm1453_vm9, %v11611_v28  ;;  %v16687_v39 = vcombine.low %v8093_v20, %v8103_v25  ;;  %v16691_v26 = vsel %vm13649_vm2, %v8796_v8, %v8797_v22  ;;  %v8116_v10 = vrot.slane %v8114_v32, 5  ;;  %v8120_v11 = vrot.slane %v8118_v44, 4  ;;  %v8694_v22 = vld [vmem:[#allocation3 + $0x6c] sm:$0xe]  ;;  %v16707_v8 = vld [vmem:[#allocation3 + $0x70] sm:$0xf] }
 0x31f   : > { %v11720_v28 = vcombine.low %v16671_v41, %v16691_v26  ;;  %v8111_v37 = vor.u32 %v8110_v14, %v8107_v12  ;;  %v8124_v53 = vshll.u32 %v16570_v0, 16  ;;  %v11704_v7 = vrot.slane %v8693_v27, 9  ;;  %v16716_v44 = vld [vmem:[#allocation3 + $0x74] sm:$0x1] }
 0x320   : > { %v8121_v47 = vor.u32 %v8120_v11, %v8116_v10  ;;  %v8801_v45 = vrot.slane %v16683_v50, 5  ;;  %v8804_v29 = vrot.slane %v16685_v19, 5  ;;  %v8129_v52 = vshrl.u32 %v7975_v60, 16 }
 0x321   : > { %v8112_v48 = vrot.slane %v8111_v37, 4  ;;  %v8126_v42 = vrot.slane %v8124_v53, 5  ;;  %v8132_v31 = vshll.u32 %v7975_v60, 16  ;;  %v8138_v23 = vshll.u32 %v16607_v62, 16 }
 0x322   : > { %v8122_v0 = vrot.slane %v8121_v47, 4  ;;  %v16705_v51 = vsel %vm13649_vm2, %v11704_v7, %v8801_v45  ;;  %v8803_v15 = vrot.slane %v8801_v45, 4  ;;  %v8131_v21 = vrot.slane %v8129_v52, 4 }
 0x323   : > { %12827 = vmatmul.mubr.msk.bf16.vlgmr.msra.gmra.mxu0 %vm1453_vm9, %v11715_v30  ;;  %v18787_v60 = vcombine.low %v16539_v59, %v16553_v6  ;;  %v8117_v32 = vsel %vm13248_vm12, %v8112_v48, %v8116_v10  ;;  %v8134_v18 = vrot.slane %v8132_v31, 5  ;;  %v8140_v2 = vrot.slane %v8138_v23, 5 }
 0x324   : > { %v8142_v30 = vshrl.u32 %v16607_v62, 16  ;;  %v18788_v27 = vcombine.low %v16447_v46, %v16478_v55  ;;  %v8127_v20 = vsel %vm13248_vm12, %v8122_v0, %v8126_v42  ;;  %v16726_v59 = vsel %vm13649_vm2, %v8803_v15, %v8804_v29  ;;  %v16745_v42 = vld [vmem:[#allocation3 + $0x7c] sm:$0xf] }
 0x325   : > { %12830 = vmatprep.mubr.msk.bf16.mxu0 %vm1453_vm9, %v18787_v60  ;;  %v8148_v6 = vshll.u32 %v16615_v61, 16  ;;  %v11705_v25 = vrot.slane %v8694_v22, 9  ;;  %v18789_v62 = vcombine.low %v16491_v58, %v16504_v24  ;;  %v16733_v12 = vcombine.low %v8117_v32, %v8127_v20  ;;  %v8695_v24 = vld [vmem:[#allocation3 + $0x78] sm:$0xe]  ;;  %v7981_v32 = vld [vmem:[#allocation3 + $0x60] sm:$0xf] }
 0x326   : > { %12749 = vmatmul.mubr.msk.bf16.gmra.mxu1 %vm1453_vm9, %v18788_v27  ;;  %v11721_v46 = vcombine.low %v16705_v51, %v16726_v59  ;;  %v8135_v55 = vor.u32 %v8134_v18, %v8131_v21  ;;  %v8144_v14 = vrot.slane %v8142_v30, 4  ;;  %v8808_v11 = vrot.slane %v16707_v8, 5 }
 0x327   : > { %12752 = vmatprep.mubr.msk.bf16.mxu1 %vm1453_vm9, %v18789_v62  ;;  %v8150_v10 = vrot.slane %v8148_v6, 5  ;;  %v8811_v37 = vrot.slane %v16716_v44, 5  ;;  %v8153_v53 = vshrl.u32 %v7978_v3, 16  ;;  %v8156_v47 = vshll.u32 %v7978_v3, 16  ;;  %v16749_v3 = vld [vmem:[#allocation3 + $0x80] sm:$0x1] }
 0x328   : > { %v8136_v61 = vrot.slane %v8135_v55, 4  ;;  %v8145_v7 = vor.u32 %v8144_v14, %v8140_v2  ;;  %v8162_v58 = vshll.u32 %v16641_v56, 16  ;;  %v16742_v45 = vsel %vm13649_vm2, %v11705_v25, %v8808_v11  ;;  %v7984_v25 = vld [vmem:[#allocation3 + $0x6c] sm:$0xf]  ;;  %v8696_v14 = vld [vmem:[#allocation3 + $0x84] sm:$0xe] }
 0x329   : > { %v8810_v29 = vrot.slane %v8808_v11, 4  ;;  %v8155_v52 = vrot.slane %v8153_v53, 4  ;;  %v8166_v48 = vshrl.u32 %v16641_v56, 16  ;;  %v8158_v22 = vrot.slane %v8156_v47, 5  ;;  %v16791_v53 = vld [vmem:[#allocation3 + $0x88] sm:$0xf] }
 0x32a   : > { %v8141_v31 = vsel %vm13248_vm12, %v8136_v61, %v8140_v2  ;;  %v8146_v23 = vrot.slane %v8145_v7, 4  ;;  %v8164_v0 = vrot.slane %v8162_v58, 5  ;;  %v8172_v21 = vshll.u32 %v16643_v34, 16  ;;  %v16793_v61 = vld [vmem:[#allocation3 + $0x8c] sm:$0x1] }
 0x32b   : > { %12831 = vmatmul.mubr.msk.bf16.gmra.mxu0 %vm1453_vm9, %v11717_v43  ;;  %v16757_v15 = vsel %vm13649_vm2, %v8810_v29, %v8811_v37  ;;  %v8168_v56 = vrot.slane %v8166_v48, 4  ;;  %v11706_v60 = vrot.slane %v8695_v24, 9  ;;  %v8159_v5 = vor.u32 %v8158_v22, %v8155_v52 }
 0x32c   : > { %12834 = vmatprep.mubr.msk.bf16.mxu0 %vm1453_vm9, %v11718_v49  ;;  %v8151_v18 = vsel %vm13248_vm12, %v8146_v23, %v8150_v10  ;;  %v11722_v36 = vcombine.low %v16742_v45, %v16757_v15  ;;  %v8815_v43 = vrot.slane %v16745_v42, 5  ;;  %v18790_v2 = vcombine.low %v16517_v33, %v16535_v4 }
 0x32d   : > { %v16773_v34 = vcombine.low %v8141_v31, %v8151_v18  ;;  %v8169_v30 = vor.u32 %v8168_v56, %v8164_v0  ;;  %v8174_v40 = vrot.slane %v8172_v21, 5  ;;  %v8818_v63 = vrot.slane %v16749_v3, 5 }
 0x32e   : > { %12753 = vmatmul.mubr.msk.bf16.gmra.mxu1 %vm1453_vm9, %v18790_v2  ;;  %v8160_v49 = vrot.slane %v8159_v5, 4  ;;  %v16780_v27 = vsel %vm13649_vm2, %v11706_v60, %v8815_v43  ;;  %v8817_v20 = vrot.slane %v8815_v43, 4  ;;  %v8177_v6 = vshrl.u32 %v7981_v32, 16  ;;  %v16829_v2 = vld [vmem:[#allocation3 + $0x98] sm:$0x1] }
 0x32f   : > { %12792 = vmatprep.mubr.msk.bf16.mxu1 %vm1453_vm9, %v16598_v57  ;;  %v8170_v33 = vrot.slane %v8169_v30, 4  ;;  %v8180_v4 = vshll.u32 %v7981_v32, 16  ;;  %v8186_v62 = vshll.u32 %v16683_v50, 16  ;;  %v8190_v55 = vshrl.u32 %v16683_v50, 16  ;;  %v16824_v32 = vld [vmem:[#allocation3 + $0x94] sm:$0xf] }
 0x330   : > { %v8165_v10 = vsel %vm13248_vm12, %v8160_v49, %v8164_v0  ;;  %v16788_v57 = vsel %vm13649_vm2, %v8817_v20, %v8818_v63  ;;  %v8179_v11 = vrot.slane %v8177_v6, 4  ;;  %v8196_v37 = vshll.u32 %v16685_v19, 16  ;;  %v8697_v0 = vld [vmem:[#allocation3 + $0x90] sm:$0xe] }
 0x331   : > { %v8175_v7 = vsel %vm13248_vm12, %v8170_v33, %v8174_v40  ;;  %v11723_v50 = vcombine.low %v16780_v27, %v16788_v57  ;;  %v8182_v47 = vrot.slane %v8180_v4, 5  ;;  %v8188_v58 = vrot.slane %v8186_v62, 5 }
 0x332   : > { %v16799_v24 = vcombine.low %v8165_v10, %v8175_v7  ;;  %v8192_v29 = vrot.slane %v8190_v55, 4  ;;  %v8198_v52 = vrot.slane %v8196_v37, 5  ;;  %v11707_v48 = vrot.slane %v8696_v14, 9 }
 0x333   : > { %12835 = vmatmul.mubr.msk.bf16.gmra.mxu0 %vm1453_vm9, %v11719_v38  ;;  %v8183_v19 = vor.u32 %v8182_v47, %v8179_v11  ;;  %v8822_v31 = vrot.slane %v16791_v53, 5  ;;  %v8825_v23 = vrot.slane %v16793_v61, 5  ;;  %v8201_v22 = vshrl.u32 %v7984_v25, 16  ;;  %v7990_v11 = vld [vmem:[#allocation3 + $0x84] sm:$0xf] }
 0x334   : > { %12838 = vmatprep.mubr.msk.bf16.mxu0 %vm1453_vm9, %v11720_v28  ;;  %v8193_v56 = vor.u32 %v8192_v29, %v8188_v58  ;;  %v8204_v21 = vshll.u32 %v7984_v25, 16  ;;  %v8210_v60 = vshll.u32 %v16707_v8, 16  ;;  %v8214_v9 = vshrl.u32 %v16707_v8, 16  ;;  %v8698_v29 = vld [vmem:[#allocation3 + $0x9c] sm:$0xe] }
 0x335   : > { %v8184_v38 = vrot.slane %v8183_v19, 4  ;;  %v16822_v41 = vsel %vm13649_vm2, %v11707_v48, %v8822_v31  ;;  %v8824_v26 = vrot.slane %v8822_v31, 4  ;;  %v8203_v28 = vrot.slane %v8201_v22, 4  ;;  %v16868_v19 = vld [vmem:[#allocation3 + $0xa0] sm:$0xf] }
 0x336   : > { %12793 = vmatmul.mubr.msk.bf16.vlgmr.msra.gmra.mxu1 %vm1453_vm9, %v16623_v54  ;;  %v8194_v8 = vrot.slane %v8193_v56, 4  ;;  %v8206_v18 = vrot.slane %v8204_v21, 5  ;;  %v8212_v5 = vrot.slane %v8210_v60, 5  ;;  %v8216_v43 = vrot.slane %v8214_v9, 4  ;;  %v16870_v31 = vld [vmem:[#allocation3 + $0xa4] sm:$0x1] }
 0x337   : > { %12859 = vmatpush3.bf16.msra.mxu1 %v16596_v13  ;;  %12796 = vmatprep.mubr.msk.bf16.mxu1 %vm1453_vm9, %v16657_v35  ;;  %v8189_v54 = vsel %vm13248_vm12, %v8184_v38, %v8188_v58  ;;  %v16835_v30 = vsel %vm13649_vm2, %v8824_v26, %v8825_v23  ;;  %v8220_v40 = vshll.u32 %v16716_v44, 16  ;;  %v11708_v63 = vrot.slane %v8697_v0, 9  ;;  %v7987_v13 = vld [vmem:[#allocation3 + $0x78] sm:$0xf] }
 0x338   : > { %12977 = vmatprep.subr.msk.bf16.mxu1 %vm1502_vm0, %v16816_v1  ;;  %v8199_v35 = vsel %vm13248_vm12, %v8194_v8, %v8198_v52  ;;  %v11724_v49 = vcombine.low %v16822_v41, %v16835_v30  ;;  %v8207_v20 = vor.u32 %v8206_v18, %v8203_v28  ;;  %v8217_v6 = vor.u32 %v8216_v43, %v8212_v5  ;;  %v16858_v52 = vpop.f32.mrf.mxu0  ;;  %v8699_v18 = vld [vmem:[#allocation3 + $0xa8] sm:$0xe] }
 0x339   : > { %v16844_v25 = vcombine.low %v8189_v54, %v8199_v35  ;;  %v8222_v33 = vrot.slane %v8220_v40, 5  ;;  %v8829_v4 = vrot.slane %v16824_v32, 5  ;;  %v8832_v44 = vrot.slane %v16829_v2, 5 }
 0x33a   : > { %v8208_v62 = vrot.slane %v8207_v20, 4  ;;  %v8218_v55 = vrot.slane %v8217_v6, 4  ;;  %v8225_v14 = vshrl.u32 %v7987_v13, 16  ;;  %v8228_v10 = vshll.u32 %v7987_v13, 16  ;;  %v16887_v38 = vpop.f32.mrf.mxu0 }
 0x33b   : > { %12839 = vmatmul.mubr.msk.bf16.gmra.mxu0 %vm1453_vm9, %v11721_v46  ;;  %v16854_v37 = vsel %vm13649_vm2, %v11708_v63, %v8829_v4  ;;  %v8831_v7 = vrot.slane %v8829_v4, 4  ;;  %v8234_v47 = vshll.u32 %v16745_v42, 16  ;;  %v8238_v58 = vshrl.u32 %v16745_v42, 16  ;;  %v16892_v63 = vld [vmem:[#allocation3 + $0xac] sm:$0xf] }
 0x33c   : > { %12842 = vmatprep.mubr.msk.bf16.mxu0 %vm1453_vm9, %v11722_v36  ;;  %v8213_v51 = vsel %vm13248_vm12, %v8208_v62, %v8212_v5  ;;  %v8223_v59 = vsel %vm13248_vm12, %v8218_v55, %v8222_v33  ;;  %v8227_v46 = vrot.slane %v8225_v14, 4  ;;  %v8230_v48 = vrot.slane %v8228_v10, 5  ;;  %v7993_v5 = vld [vmem:[#allocation3 + $0x90] sm:$0xf]  ;;  %v16908_v14 = vpop.f32.mrf.mxu0 }
 0x33d   : > { %v16874_v42 = vcombine.low %v8213_v51, %v8223_v59  ;;  %v16878_v45 = vsel %vm13649_vm2, %v8831_v7, %v8832_v44  ;;  %v8236_v15 = vrot.slane %v8234_v47, 5  ;;  %v8240_v36 = vrot.slane %v8238_v58, 4  ;;  %v16897_v33 = vld [vmem:[#allocation3 + $0xb0] sm:$0x1]  ;;  %v8700_v58 = vld [vmem:[#allocation3 + $0xb4] sm:$0xe] }
 0x33e   : > { %12797 = vmatmul.mubr.msk.bf16.gmra.mxu1 %vm1453_vm9, %v16687_v39  ;;  %v11725_v23 = vcombine.low %v16854_v37, %v16878_v45  ;;  %v8231_v22 = vor.u32 %v8230_v48, %v8227_v46  ;;  %v8244_v0 = vshll.u32 %v16749_v3, 16  ;;  %v11709_v56 = vrot.slane %v8698_v29, 9  ;;  %v16928_v46 = vld [vmem:[#allocation3 + $0xb8] sm:$0xf]  ;;  %v16930_v48 = vpop.f32.mrf.mxu0 }
 0x33f   : > { %12800 = vmatprep.mubr.msk.bf16.mxu1 %vm1453_vm9, %v16733_v12  ;;  %v8241_v21 = vor.u32 %v8240_v36, %v8236_v15  ;;  %v8836_v39 = vrot.slane %v16868_v19, 5  ;;  %v8839_v60 = vrot.slane %v16870_v31, 5  ;;  %v8249_v9 = vshrl.u32 %v7990_v11, 16 }
 0x340   : > { %v8232_v26 = vrot.slane %v8231_v22, 4  ;;  %v8246_v28 = vrot.slane %v8244_v0, 5  ;;  %v8252_v8 = vshll.u32 %v7990_v11, 16  ;;  %v8258_v12 = vshll.u32 %v16791_v53, 16  ;;  %v16934_v0 = vld [vmem:[#allocation3 + $0xbc] sm:$0x1] }
 0x341   : > { %v8242_v43 = vrot.slane %v8241_v21, 4  ;;  %v8837_v3 = vsel %vm13649_vm2, %v11709_v56, %v8836_v39  ;;  %v8838_v54 = vrot.slane %v8836_v39, 4  ;;  %v8251_v40 = vrot.slane %v8249_v9, 4 }
 0x342   : > { %v8237_v13 = vsel %vm13248_vm12, %v8232_v26, %v8236_v15  ;;  %v8254_v35 = vrot.slane %v8252_v8, 5  ;;  %v8260_v20 = vrot.slane %v8258_v12, 5  ;;  %v8262_v6 = vshrl.u32 %v16791_v53, 16 }
 0x343   : > { %12843 = vmatmul.mubr.msk.bf16.gmra.mxu0 %vm1453_vm9, %v11723_v50  ;;  %v8247_v4 = vsel %vm13248_vm12, %v8242_v43, %v8246_v28  ;;  %v8840_v44 = vsel %vm13649_vm2, %v8838_v54, %v8839_v60  ;;  %v8268_v62 = vshll.u32 %v16793_v61, 16  ;;  %v11710_v55 = vrot.slane %v8699_v18, 9  ;;  %v16948_v43 = vpop.f32.mrf.mxu0 }
 0x344   : > { %12846 = vmatprep.mubr.msk.bf16.mxu0 %vm1453_vm9, %v11724_v49  ;;  %v16914_v53 = vcombine.low %v8237_v13, %v8247_v4  ;;  %v11726_v27 = vcombine.low %v8837_v3, %v8840_v44  ;;  %v8255_v57 = vor.u32 %v8254_v35, %v8251_v40  ;;  %v8264_v50 = vrot.slane %v8262_v6, 4  ;;  %v7999_v35 = vld [vmem:[#allocation3 + $0xa8] sm:$0xf]  ;;  %v8701_v6 = vld [vmem:[#allocation3 + $0xc0] sm:$0xe] }
 0x345   : > { %v8270_v10 = vrot.slane %v8268_v62, 5  ;;  %v8843_v11 = vrot.slane %v16892_v63, 5  ;;  %v8846_v61 = vrot.slane %v16897_v33, 5  ;;  %v8273_v7 = vshrl.u32 %v7993_v5, 16 }
 0x346   : > { %12801 = vmatmul.mubr.msk.bf16.gmra.mxu1 %vm1453_vm9, %v16773_v34  ;;  %v8256_v41 = vrot.slane %v8255_v57, 4  ;;  %v8265_v30 = vor.u32 %v8264_v50, %v8260_v20  ;;  %v8276_v49 = vshll.u32 %v7993_v5, 16  ;;  %v8282_v47 = vshll.u32 %v16824_v32, 16 }
 0x347   : > { %12804 = vmatprep.mubr.msk.bf16.mxu1 %vm1453_vm9, %v16799_v24  ;;  %v16925_v29 = vsel %vm13649_vm2, %v11710_v55, %v8843_v11  ;;  %v8845_v34 = vrot.slane %v8843_v11, 4  ;;  %v8275_v51 = vrot.slane %v8273_v7, 4  ;;  %v8286_v59 = vshrl.u32 %v16824_v32, 16  ;;  %v7996_v32 = vld [vmem:[#allocation3 + $0x9c] sm:$0xf] }
 0x348   : > { %v8261_v24 = vsel %vm13248_vm12, %v8256_v41, %v8260_v20  ;;  %v8266_v15 = vrot.slane %v8265_v30, 4  ;;  %v8278_v36 = vrot.slane %v8276_v49, 5  ;;  %v8284_v22 = vrot.slane %v8282_v47, 5 }
 0x349   : > { %v8847_v56 = vsel %vm13649_vm2, %v8845_v34, %v8846_v61  ;;  %v8288_v21 = vrot.slane %v8286_v59, 4  ;;  %v8292_v39 = vshll.u32 %v16829_v2, 16  ;;  %v11711_v60 = vrot.slane %v8700_v58, 9  ;;  %v9515_v59 = vld [vmem:[#allocation3 + $0x18] sm:$0xf] }
 0x34a   : > { %v8271_v9 = vsel %vm13248_vm12, %v8266_v15, %v8270_v10  ;;  %v11727_v26 = vcombine.low %v16925_v29, %v8847_v56  ;;  %v8279_v28 = vor.u32 %v8278_v36, %v8275_v51  ;;  %v8850_v8 = vrot.slane %v16928_v46, 5 }
 0x34b   : > { %12847 = vmatmul.mubr.msk.bf16.gmra.mxu0 %vm1453_vm9, %v11725_v23  ;;  %v11675_v12 = vcombine.low %v8261_v24, %v8271_v9  ;;  %v8289_v18 = vor.u32 %v8288_v21, %v8284_v22  ;;  %v8294_v5 = vrot.slane %v8292_v39, 5  ;;  %v8853_v2 = vrot.slane %v16934_v0, 5 }
 0x34c   : > { %12850 = vmatprep.mubr.msk.bf16.mxu0 %vm1453_vm9, %v11726_v27  ;;  %v8280_v3 = vrot.slane %v8279_v28, 4  ;;  %v8851_v54 = vsel %vm13649_vm2, %v11711_v60, %v8850_v8  ;;  %v8852_v40 = vrot.slane %v8850_v8, 4  ;;  %v8297_v13 = vshrl.u32 %v7996_v32, 16  ;;  %v16966_v27 = vld [vmem:[#allocation3 + $0xc8] sm:$0x1] }
 0x34d   : > { %v8290_v37 = vrot.slane %v8289_v18, 4  ;;  %v8300_v45 = vshll.u32 %v7996_v32, 16  ;;  %v8306_v23 = vshll.u32 %v16868_v19, 16  ;;  %v8310_v20 = vshrl.u32 %v16868_v19, 16  ;;  %v16991_v28 = vld [vmem:[#allocation3 + $0x1c] sm:$0xf] }
 0x34e   : > { %12805 = vmatmul.mubr.msk.bf16.gmra.mxu1 %vm1453_vm9, %v16844_v25  ;;  %v8285_v4 = vsel %vm13248_vm12, %v8280_v3, %v8284_v22  ;;  %v8854_v44 = vsel %vm13649_vm2, %v8852_v40, %v8853_v2  ;;  %v8299_v62 = vrot.slane %v8297_v13, 4  ;;  %v8316_v55 = vshll.u32 %v16870_v31, 16  ;;  %v16964_v25 = vld [vmem:[#allocation3 + $0xc4] sm:$0xf] }
 0x34f   : > { %12808 = vmatprep.mubr.msk.bf16.mxu1 %vm1453_vm9, %v16874_v42  ;;  %v8295_v19 = vsel %vm13248_vm12, %v8290_v37, %v8294_v5  ;;  %v11728_v57 = vcombine.low %v8851_v54, %v8854_v44  ;;  %v8302_v50 = vrot.slane %v8300_v45, 5  ;;  %v8308_v10 = vrot.slane %v8306_v23, 5  ;;  %v16970_v42 = vpop.f32.mrf.mxu0  ;;  %v8002_v54 = vld [vmem:[#allocation3 + $0xb4] sm:$0xf]  ;;  %v16998_v45 = vpop.f32.mrf.mxu1 }
 0x350   : > { %v16972_v11 = vcombine.low %v8285_v4, %v8295_v19  ;;  %v8312_v61 = vrot.slane %v8310_v20, 4  ;;  %v8318_v7 = vrot.slane %v8316_v55, 5  ;;  %v11712_v41 = vrot.slane %v8701_v6, 9 }
 0x351   : > { %v8303_v30 = vor.u32 %v8302_v50, %v8299_v62  ;;  %v8857_v31 = vrot.slane %v16964_v25, 5  ;;  %v8860_v49 = vrot.slane %v16966_v27, 5  ;;  %v8321_v47 = vshrl.u32 %v7999_v35, 16  ;;  %v16981_v56 = vpop.f32.mrf.mxu0 }
 0x352   : > { %v8313_v58 = vor.u32 %v8312_v61, %v8308_v10  ;;  %v8324_v29 = vshll.u32 %v7999_v35, 16  ;;  %v8330_v34 = vshll.u32 %v16892_v63, 16  ;;  %v8334_v51 = vshrl.u32 %v16892_v63, 16  ;;  %v9518_v61 = vld [vmem:[#allocation3 + $0x24] sm:$0xf] }
 0x353   : > { %12851 = vmatmul.mubr.msk.bf16.gmra.mxu0 %vm1453_vm9, %v11727_v26  ;;  %v8304_v24 = vrot.slane %v8303_v30, 4  ;;  %v8858_v15 = vsel %vm13649_vm2, %v11712_v41, %v8857_v31  ;;  %v8859_v36 = vrot.slane %v8857_v31, 4  ;;  %v8323_v22 = vrot.slane %v8321_v47, 4 }
 0x354   : > { %12854 = vmatprep.mubr.msk.bf16.mxu0 %vm1453_vm9, %v11728_v57  ;;  %v8314_v21 = vrot.slane %v8313_v58, 4  ;;  %v8326_v39 = vrot.slane %v8324_v29, 5  ;;  %v8332_v60 = vrot.slane %v8330_v34, 5  ;;  %v8336_v32 = vrot.slane %v8334_v51, 4 }
 0x355   : > { %v8309_v63 = vsel %vm13248_vm12, %v8304_v24, %v8308_v10  ;;  %v8861_v9 = vsel %vm13649_vm2, %v8859_v36, %v8860_v49  ;;  %v8340_v26 = vshll.u32 %v16897_v33, 16  ;;  %v9564_v8 = vshrl.u32 %v9515_v59, 16  ;;  %v17000_v33 = vpop.f32.mrf.mxu0  ;;  %v17010_v49 = vpop.f32.mrf.mxu1 }
 0x356   : > { %12809 = vmatmul.mubr.msk.bf16.gmra.mxu1 %vm1453_vm9, %v16914_v53  ;;  %v8319_v18 = vsel %vm13248_vm12, %v8314_v21, %v8318_v7  ;;  %v11729_v5 = vcombine.low %v8858_v15, %v8861_v9  ;;  %v8327_v2 = vor.u32 %v8326_v39, %v8323_v22  ;;  %v8337_v3 = vor.u32 %v8336_v32, %v8332_v60  ;;  %v16996_v53 = vld [vmem:[#allocation3 + $0x20] sm:$0x1]  ;;  %v13106_v15 = vld [vmem:[%s18549_s2 + $0xe] sm:$0x3]  ;;  %v17023_v22 = vld [vmem:[#allocation3 + $0x28] sm:$0xf] }
 0x357   : > { %12812 = vmatprep.mubr.msk.bf16.mxu1 %vm1453_vm9, %v11675_v12  ;;  %v11677_v40 = vcombine.low %v8309_v63, %v8319_v18  ;;  %v8342_v13 = vrot.slane %v8340_v26, 5  ;;  %v9566_v35 = vrot.slane %v9564_v8, 4  ;;  %v9567_v37 = vshll.u32 %v9515_v59, 16  ;;  %18791 = vst [vmem:[#allocation12_spill] sm:$0xff] %v17000_v33  ;;  %v17012_v47 = vpop.f32.mrf.mxu0  ;;  %v8005_v8 = vld [vmem:[#allocation3 + $0xc0] sm:$0xf]  ;;  %v17030_v18 = vpop.f32.mrf.mxu1 }
 0x358   : > { %v8328_v23 = vrot.slane %v8327_v2, 4  ;;  %v8338_v20 = vrot.slane %v8337_v3, 4  ;;  %v9573_v12 = vshll.u32 %v16991_v28, 16  ;;  %v9577_v6 = vshrl.u32 %v16991_v28, 16 }
 0x359   : > { %v9569_v4 = vrot.slane %v9567_v37, 5  ;;  %v9583_v44 = vshll.u32 %v16996_v53, 16  ;;  %v8345_v62 = vshrl.u32 %v8002_v54, 16  ;;  %v8348_v55 = vshll.u32 %v8002_v54, 16 }
 0x35a   : > { %v8333_v19 = vsel %vm13248_vm12, %v8328_v23, %v8332_v60  ;;  %v8343_v57 = vsel %vm13248_vm12, %v8338_v20, %v8342_v13  ;;  %v9575_v50 = vrot.slane %v9573_v12, 5  ;;  %v9579_v10 = vrot.slane %v9577_v6, 4 }
 0x35b   : > { %12855 = vmatmul.mubr.msk.bf16.gmra.mxu0 %vm1453_vm9, %v11729_v5  ;;  %v11678_v7 = vcombine.low %v8333_v19, %v8343_v57  ;;  %v9570_v41 = vor.u32 %v9569_v4, %v9566_v35  ;;  %v9585_v30 = vrot.slane %v9583_v44, 5  ;;  %v8347_v31 = vrot.slane %v8345_v62, 4  ;;  %v17032_v5 = vpop.f32.mrf.mxu0  ;;  %v9521_v57 = vld [vmem:[#allocation3 + $0x30] sm:$0xf] }
 0x35c   : > { %v9580_v58 = vor.u32 %v9579_v10, %v9575_v50  ;;  %v8350_v29 = vrot.slane %v8348_v55, 5  ;;  %v8354_v34 = vshll.u32 %v16928_v46, 16  ;;  %v8358_v51 = vshrl.u32 %v16928_v46, 16 }
 0x35d   : > { %v9571_v59 = vrot.slane %v9570_v41, 4  ;;  %v8364_v24 = vshll.u32 %v16934_v0, 16  ;;  %v10046_v36 = vsel %vm1502_vm0, %v13106_v15, 0  ;;  %v9588_v21 = vshrl.u32 %v9518_v61, 16  ;;  %v17044_v10 = vpop.f32.mrf.mxu0 }
 0x35e   : > { %12813 = vmatmul.mubr.msk.bf16.gmra.mxu1 %vm1453_vm9, %v16972_v11  ;;  %v9581_v39 = vrot.slane %v9580_v58, 4  ;;  %v8351_v60 = vor.u32 %v8350_v29, %v8347_v31  ;;  %v8356_v46 = vrot.slane %v8354_v34, 5  ;;  %v8360_v32 = vrot.slane %v8358_v51, 4  ;;  %12893 = vmatpush3.bf16.msra.mxu0 %v10046_v36  ;;  %v17026_v11 = vld [vmem:[#allocation3 + $0x2c] sm:$0x1] }
 0x35f   : > { %12816 = vmatprep.mubr.msk.bf16.mxu1 %vm1453_vm9, %v11677_v40  ;;  %v9576_v0 = vsel %vm13248_vm12, %v9571_v59, %v9575_v50  ;;  %v8366_v63 = vrot.slane %v8364_v24, 5  ;;  %v9590_v9 = vrot.slane %v9588_v21, 4  ;;  %v9591_v26 = vshll.u32 %v9518_v61, 16  ;;  %v17042_v50 = vpop.f32.mrf.mxu1  ;;  %v17051_v59 = vld [vmem:[#allocation3 + $0x34] sm:$0xf] }
 0x360   : > { %v9586_v2 = vsel %vm13248_vm12, %v9581_v39, %v9585_v30  ;;  %v8352_v3 = vrot.slane %v8351_v60, 4  ;;  %v8361_v54 = vor.u32 %v8360_v32, %v8356_v46  ;;  %v9597_v40 = vshll.u32 %v17023_v22, 16 }
 0x361   : > { %v11780_v13 = vcombine.low %v9576_v0, %v9586_v2  ;;  %v9593_v35 = vrot.slane %v9591_v26, 5  ;;  %v9601_v37 = vshrl.u32 %v17023_v22, 16  ;;  %v9607_v23 = vshll.u32 %v17026_v11, 16  ;;  %v17061_v0 = vpop.f32.mrf.mxu0 }
 0x362   : > { %v8357_v20 = vsel %vm13248_vm12, %v8352_v3, %v8356_v46  ;;  %v8362_v12 = vrot.slane %v8361_v54, 4  ;;  %v9599_v6 = vrot.slane %v9597_v40, 5  ;;  %v8369_v4 = vshrl.u32 %v8005_v8, 16  ;;  %v17057_v46 = vld [vmem:[#allocation3 + $0x38] sm:$0x1] }
 0x363   : > { %12894 = vmatprep.mubr.msk.bf16.mxu0 %vm1453_vm9, %v11780_v13  ;;  %v9594_v44 = vor.u32 %v9593_v35, %v9590_v9  ;;  %v9603_v62 = vrot.slane %v9601_v37, 4  ;;  %v9609_v55 = vrot.slane %v9607_v23, 5  ;;  %v8372_v19 = vshll.u32 %v8005_v8, 16  ;;  %v17059_v32 = vpop.f32.mrf.mxu1  ;;  %v9524_v8 = vld [vmem:[#allocation3 + $0x3c] sm:$0xf] }
 0x364   : > { %v8367_v61 = vsel %vm13248_vm12, %v8362_v12, %v8366_v63  ;;  %v8371_v41 = vrot.slane %v8369_v4, 4  ;;  %v8378_v30 = vshll.u32 %v16964_v25, 16  ;;  %v8382_v31 = vshrl.u32 %v16964_v25, 16  ;;  %v17067_v13 = vld [vmem:[#allocation3 + $0x40] sm:$0xf] }
 0x365   : > { %v11679_v58 = vcombine.low %v8357_v20, %v8367_v61  ;;  %v9595_v29 = vrot.slane %v9594_v44, 4  ;;  %v9604_v34 = vor.u32 %v9603_v62, %v9599_v6  ;;  %v8374_v51 = vrot.slane %v8372_v19, 5  ;;  %v17070_v44 = vpop.f32.mrf.mxu1 }
 0x366   : > { %12817 = vmatmul.mubr.msk.bf16.gmra.mxu1 %vm1453_vm9, %v11678_v7  ;;  %v8380_v24 = vrot.slane %v8378_v30, 5  ;;  %v8384_v15 = vrot.slane %v8382_v31, 4  ;;  %v8388_v36 = vshll.u32 %v16966_v27, 16  ;;  %v9612_v21 = vshrl.u32 %v9521_v57, 16  ;;  %v9527_v30 = vld [vmem:[#allocation3 + $0x48] sm:$0xf] }
 0x367   : > { %12820 = vmatprep.mubr.msk.bf16.mxu1 %vm1453_vm9, %v11679_v58  ;;  %v9600_v39 = vsel %vm13248_vm12, %v9595_v29, %v9599_v6  ;;  %v9605_v60 = vrot.slane %v9604_v34, 4  ;;  %v8375_v25 = vor.u32 %v8374_v51, %v8371_v41  ;;  %v9615_v7 = vshll.u32 %v9521_v57, 16  ;;  %v17079_v57 = vld [vmem:[#allocation3 + $0x44] sm:$0x1]  ;;  %v13066_v34 = vld [vmem:[#allocation3 + $0x18] sm:$0xff]  }
 0x368   : > { %v8385_v63 = vor.u32 %v8384_v15, %v8380_v24  ;;  %v8390_v9 = vrot.slane %v8388_v36, 5  ;;  %v9614_v26 = vrot.slane %v9612_v21, 4  ;;  %v9621_v27 = vshll.u32 %v17051_v59, 16 }
 0x369   : > { %v9610_v2 = vsel %vm13248_vm12, %v9605_v60, %v9609_v55  ;;  %v8376_v3 = vrot.slane %v8375_v25, 4  ;;  %v9617_v54 = vrot.slane %v9615_v7, 5  ;;  %v9625_v40 = vshrl.u32 %v17051_v59, 16 }
 0x36a   : > { %v11781_v35 = vcombine.low %v9600_v39, %v9610_v2  ;;  %v8386_v37 = vrot.slane %v8385_v63, 4  ;;  %v9623_v23 = vrot.slane %v9621_v27, 5  ;;  %v9631_v20 = vshll.u32 %v17057_v46, 16  ;;  %v17072_v62 = vpop.f32.mrf.mxu0 }
 0x36b   : > { %v9618_v12 = vor.u32 %v9617_v54, %v9614_v26  ;;  %v9627_v6 = vrot.slane %v9625_v40, 4  ;;  %v9636_v4 = vshrl.u32 %v9524_v8, 16  ;;  %v8381_v55 = vsel %vm13248_vm12, %v8376_v3, %v8380_v24  ;;  %v17083_v24 = vld [vmem:[#allocation3 + $0x4c] sm:$0xf]  ;;  %v17098_v3 = vld [vmem:[#allocation3 + $0x50] sm:$0x1] }
 0x36c   : > { %12895 = vmatmul.mubr.msk.bf16.vlgmr.msra.gmra.mxu0 %vm1453_vm9, %v11781_v35  ;;  %v8391_v19 = vsel %vm13248_vm12, %v8386_v37, %v8390_v9  ;;  %v9639_v61 = vshll.u32 %v9524_v8, 16  ;;  %v9645_v41 = vshll.u32 %v17067_v13, 16  ;;  %v9633_v15 = vrot.slane %v9631_v20, 5  ;;  %v17091_v9 = vpop.f32.mrf.mxu1  ;;  %v17093_v26 = vpop.f32.mrf.mxu0 }
 0x36d   : > { %v11680_v31 = vcombine.low %v8381_v55, %v8391_v19  ;;  %v9619_v58 = vrot.slane %v9618_v12, 4  ;;  %v9628_v29 = vor.u32 %v9627_v6, %v9623_v23  ;;  %v9638_v51 = vrot.slane %v9636_v4, 4 }
 0x36e   : > { %v9641_v36 = vrot.slane %v9639_v61, 5  ;;  %v9647_v21 = vrot.slane %v9645_v41, 5  ;;  %v9649_v39 = vshrl.u32 %v17067_v13, 16  ;;  %v9655_v25 = vshll.u32 %v17079_v57, 16  ;;  %v9530_v61 = vld [vmem:[#allocation3 + $0x54] sm:$0xf]  ;;  %v17105_v41 = vpop.f32.mrf.mxu1 }
 0x36f   : > { %12821 = vmatmul.mubr.msk.bf16.gmra.mxu1 %vm1453_vm9, %v11680_v31  ;;  %v9629_v60 = vrot.slane %v9628_v29, 4  ;;  %v17089_v7 = vadd.f32 %v16858_v52, %v16998_v45  ;;  %v9660_v63 = vshrl.u32 %v9527_v30, 16  ;;  %v9624_v27 = vsel %vm13248_vm12, %v9619_v58, %v9623_v23  ;;  %18792 = vst [vmem:[#allocation15_spill] sm:$0xff] %v17105_v41  ;;  %v9542_v41 = vld [vmem:[#allocation3 + $0x84] sm:$0xf] }
 0x370   : > { %12860 = vmatprep.mubr.msk.bf16.mxu1 %vm1453_vm9, %v13066_v34  ;;  %v9642_v8 = vor.u32 %v9641_v36, %v9638_v51  ;;  %v9651_v2 = vrot.slane %v9649_v39, 4  ;;  %v9663_v54 = vshll.u32 %v9527_v30, 16  ;;  %v9669_v45 = vshll.u32 %v17083_v24, 16  ;;  %v17107_v30 = vpop.f32.mrf.mxu0  ;;  %v17116_v51 = vld [vmem:[#allocation3 + $0x58] sm:$0xf]  ;;  %v13067_v36 = vld [vmem:[#allocation3 + $0x24] sm:$0xff]  }
 0x371   : > { %v9634_v40 = vsel %vm13248_vm12, %v9629_v60, %v9633_v15  ;;  %v9662_v52 = vrot.slane %v9660_v63, 4  ;;  %v9673_v35 = vshrl.u32 %v17083_v24, 16  ;;  %v9657_v23 = vrot.slane %v9655_v25, 5  ;;  %v17124_v63 = vld [vmem:[#allocation3 + $0x5c] sm:$0x1] }
 0x372   : > { %v11782_v37 = vcombine.low %v9624_v27, %v9634_v40  ;;  %v9643_v20 = vrot.slane %v9642_v8, 4  ;;  %v9652_v12 = vor.u32 %v9651_v2, %v9647_v21  ;;  %v9665_v6 = vrot.slane %v9663_v54, 5 }
 0x373   : > { %v9671_v4 = vrot.slane %v9669_v45, 5  ;;  %v9675_v55 = vrot.slane %v9673_v35, 4  ;;  %v9679_v19 = vshll.u32 %v17098_v3, 16  ;;  %v10516_v29 = vsel %vm1502_vm0, %v16816_v1, 0 }
 0x374   : > { %12898 = vmatprep.mubr.msk.bf16.mxu0 %vm1453_vm9, %v11782_v37  ;;  %v9653_v31 = vrot.slane %v9652_v12, 4  ;;  %v9666_v58 = vor.u32 %v9665_v6, %v9662_v52  ;;  %v17114_v34 = vadd.f32 %v16887_v38, %v17010_v49  ;;  %v9648_v15 = vsel %vm13248_vm12, %v9643_v20, %v9647_v21  ;;  %v13068_v38 = vld [vmem:[#allocation3 + $0x30] sm:$0xff]   ;;  %v9533_v52 = vld [vmem:[#allocation3 + $0x60] sm:$0xf]  ;;  %v17139_v12 = vld [vmem:[#allocation3 + $0x64] sm:$0xf] }
 0x375   : > { %v9676_v39 = vor.u32 %v9675_v55, %v9671_v4  ;;  %v9681_v60 = vrot.slane %v9679_v19, 5  ;;  %v17122_v25 = vadd.f32 %v16908_v14, %v17030_v18  ;;  %v9684_v49 = vshrl.u32 %v9530_v61, 16  ;;  %v17133_v18 = vpop.f32.mrf.mxu0 }
 0x376   : > { %v9658_v1 = vsel %vm13248_vm12, %v9653_v31, %v9657_v23  ;;  %v9667_v27 = vrot.slane %v9666_v58, 4  ;;  %v9687_v8 = vshll.u32 %v9530_v61, 16  ;;  %v9693_v54 = vshll.u32 %v17116_v51, 16 }
 0x377   : > { %v11783_v2 = vcombine.low %v9648_v15, %v9658_v1  ;;  %12861 = vmatmul.mubr.msk.bf16.vlgmr.msra.gmra.mxu1 %vm1453_vm9, %v13067_v36  ;;  %v9677_v21 = vrot.slane %v9676_v39, 4  ;;  %v9697_v40 = vshrl.u32 %v17116_v51, 16  ;;  %v17131_v14 = vpop.f32.mrf.mxu1  ;;  %v9686_v35 = vrot.slane %v9684_v49, 4 }
 0x378   : > { %v9672_v45 = vsel %vm13248_vm12, %v9667_v27, %v9671_v4  ;;  %12927 = vmatpush3.bf16.msra.mxu1 %v10516_v29  ;;  %12864 = vmatprep.mubr.msk.bf16.mxu1 %vm1453_vm9, %v13068_v38  ;;  %v9689_v37 = vrot.slane %v9687_v8, 5  ;;  %v9703_v20 = vshll.u32 %v17124_v63, 16  ;;  %v9695_v23 = vrot.slane %v9693_v54, 5  ;;  %v17148_v4 = vld [vmem:[#allocation3 + $0x68] sm:$0x1] }
 0x379   : > { %12899 = vmatmul.mubr.msk.bf16.gmra.mxu0 %vm1453_vm9, %v11783_v2  ;;  %v9682_v6 = vsel %vm13248_vm12, %v9677_v21, %v9681_v60  ;;  %v9699_v55 = vrot.slane %v9697_v40, 4  ;;  %v17146_v19 = vadd.f32 %v16948_v43, %v17059_v32  ;;  %v9708_v29 = vshrl.u32 %v9533_v52, 16  ;;  %v17150_v15 = vpop.f32.mrf.mxu1  ;;  %v13069_v32 = vld [vmem:[#allocation3 + $0x3c] sm:$0xff]   ;;  %v9536_v2 = vld [vmem:[#allocation3 + $0x6c] sm:$0xf] }
 0x37a   : > { %v11784_v61 = vcombine.low %v9672_v45, %v9682_v6  ;;  %v9690_v31 = vor.u32 %v9689_v37, %v9686_v35  ;;  %v9705_v58 = vrot.slane %v9703_v20, 5  ;;  %v9711_v39 = vshll.u32 %v9533_v52, 16  ;;  %v17162_v45 = vld [vmem:[#allocation3 + $0x70] sm:$0xf]  ;;  %v13070_v6 = vld [vmem:[#allocation3 + $0x48] sm:$0xff]  }
 0x37b   : > { %18793 = vst [vmem:[#allocation14_spill] sm:$0xff] %v17146_v19  ;;  %v9700_v36 = vor.u32 %v9699_v55, %v9695_v23  ;;  %v9717_v1 = vshll.u32 %v17139_v12, 16  ;;  %v9721_v60 = vshrl.u32 %v17139_v12, 16  ;;  %v17154_v27 = vpop.f32.mrf.mxu0  ;;  %v9710_v38 = vrot.slane %v9708_v29, 4 }
 0x37c   : > { %12902 = vmatprep.mubr.msk.bf16.mxu0 %vm1453_vm9, %v11784_v61  ;;  %v9691_v43 = vrot.slane %v9690_v31, 4  ;;  %v9727_v49 = vshll.u32 %v17148_v4, 16  ;;  %v17160_v8 = vadd.f32 %v16970_v42, %v17070_v44  ;;  %v9713_v54 = vrot.slane %v9711_v39, 5  ;;  %v17172_v42 = vld [vmem:[#allocation3 + $0x74] sm:$0x1]  ;;  %v12667_v44 = vpop.f32.mrf.mxu1 }
 0x37d   : > { %v9701_v21 = vrot.slane %v9700_v36, 4  ;;  %v9719_v40 = vrot.slane %v9717_v1, 5  ;;  %v9723_v52 = vrot.slane %v9721_v60, 4  ;;  %v17164_v35 = vpop.f32.mrf.mxu0  ;;  %v17170_v55 = vadd.f32 %v16981_v56, %v17091_v9  ;;  %v9539_v9 = vld [vmem:[#allocation3 + $0x78] sm:$0xf] }
 0x37e   : > { %18794 = vst [vmem:[#allocation22_spill] sm:$0xff] %v17160_v8  ;;  %v9696_v37 = vsel %vm13248_vm12, %v9691_v43, %v9695_v23  ;;  %v9729_v20 = vrot.slane %v9727_v49, 5  ;;  %v9714_v31 = vor.u32 %v9713_v54, %v9710_v38  ;;  %v9732_v36 = vshrl.u32 %v9536_v2, 16 }
 0x37f   : > { %18795 = vst [vmem:[#allocation18_spill] sm:$0xff] %v17170_v55  ;;  %v9706_v61 = vsel %vm13248_vm12, %v9701_v21, %v9705_v58  ;;  %12865 = vmatmul.mubr.msk.bf16.gmra.mxu1 %vm1453_vm9, %v13069_v32  ;;  %v9724_v29 = vor.u32 %v9723_v52, %v9719_v40  ;;  %v9735_v23 = vshll.u32 %v9536_v2, 16  ;;  %v9741_v1 = vshll.u32 %v17162_v45, 16  ;;  %v17181_v58 = vld [vmem:[#allocation3 + $0x7c] sm:$0xf]  ;;  %v17183_v32 = vpop.f32.mrf.mxu0 }
 0x380   : > { %v11785_v39 = vcombine.low %v9696_v37, %v9706_v61  ;;  %12868 = vmatprep.mubr.msk.bf16.mxu1 %vm1453_vm9, %v13070_v6  ;;  %v9745_v56 = vshrl.u32 %v17162_v45, 16  ;;  %v9715_v60 = vrot.slane %v9714_v31, 4  ;;  %v9734_v49 = vrot.slane %v9732_v36, 4  ;;  %v17190_v52 = vld [vmem:[#allocation3 + $0x80] sm:$0x1]  ;;  %v6764_v37 = vpop.f32.mrf.mxu1 }
 0x381   : > { %v9725_v43 = vrot.slane %v9724_v29, 4  ;;  %v9751_v55 = vshll.u32 %v17172_v42, 16  ;;  %v9737_v38 = vrot.slane %v9735_v23, 5  ;;  %v9743_v21 = vrot.slane %v9741_v1, 5  ;;  %v13071_v1 = vld [vmem:[#allocation3 + $0x54] sm:$0xff]   ;;  %v17199_v8 = vpop.f32.mrf.mxu0 }
 0x382   : > { %12903 = vmatmul.mubr.msk.bf16.gmra.mxu0 %vm1453_vm9, %v11785_v39  ;;  %v9747_v54 = vrot.slane %v9745_v56, 4  ;;  %v17188_v2 = vadd.f32 %v17012_v47, %v17131_v14  ;;  %v9720_v6 = vsel %vm13248_vm12, %v9715_v60, %v9719_v40  ;;  %v9756_v29 = vshrl.u32 %v9539_v9, 16  ;;  %v13072_v60 = vld [vmem:[#allocation3 + $0x60] sm:$0xff]  }
 0x383   : > { %v9730_v61 = vsel %vm13248_vm12, %v9725_v43, %v9729_v20  ;;  %v9753_v31 = vrot.slane %v9751_v55, 5  ;;  %v9738_v39 = vor.u32 %v9737_v38, %v9734_v49  ;;  %v9759_v56 = vshll.u32 %v9539_v9, 16  ;;  %v17206_v9 = vld [vmem:[#allocation3 + $0x88] sm:$0xf] }
 0x384   : > { %18796 = vst [vmem:[#allocation29_spill] sm:$0xff] %v17188_v2  ;;  %v11786_v36 = vcombine.low %v9720_v6, %v9730_v61  ;;  %v9748_v23 = vor.u32 %v9747_v54, %v9743_v21  ;;  %v9758_v33 = vrot.slane %v9756_v29, 4  ;;  %v9765_v47 = vshll.u32 %v17181_v58, 16  ;;  %18798 = vst [vmem:[#allocation39_spill] sm:$0xff] %v17206_v9  ;;  %v17212_v29 = vld [vmem:[#allocation3 + $0x8c] sm:$0x1] }
 0x385   : > { %v9769_v14 = vshrl.u32 %v17181_v58, 16  ;;  %v9775_v2 = vshll.u32 %v17190_v52, 16  ;;  %v9739_v40 = vrot.slane %v9738_v39, 4  ;;  %v9761_v55 = vrot.slane %v9759_v56, 5  ;;  %18800 = vst [vmem:[#allocation5_spill] sm:$0xff] %v17212_v29 }
 0x386   : > { %12906 = vmatprep.mubr.msk.bf16.mxu0 %vm1453_vm9, %v11786_v36  ;;  %v9749_v20 = vrot.slane %v9748_v23, 4  ;;  %v17204_v43 = vadd.f32 %v17032_v5, %v17150_v15  ;;  %v12670_v49 = vpop.f32.mrf.mxu1  ;;  %v9767_v38 = vrot.slane %v9765_v47, 5  ;;  %v17210_v61 = vadd.f32 %v17044_v10, %v12667_v44 }
 0x387   : > { %12869 = vmatmul.mubr.msk.bf16.gmra.mxu1 %vm1453_vm9, %v13071_v1  ;;  %v9771_v54 = vrot.slane %v9769_v14, 4  ;;  %v9777_v6 = vrot.slane %v9775_v2, 5  ;;  %v9744_v36 = vsel %vm13248_vm12, %v9739_v40, %v9743_v21  ;;  %v9762_v15 = vor.u32 %v9761_v55, %v9758_v33  ;;  %v17222_v44 = vpop.f32.mrf.mxu0  ;;  %v9545_v33 = vld [vmem:[#allocation3 + $0x90] sm:$0xf]  ;;  %v17231_v55 = vld [vmem:[#allocation3 + $0x94] sm:$0xf] }
 0x388   : > { %18797 = vst [vmem:[#allocation26_spill] sm:$0xff] %v17204_v43  ;;  %18799 = vst [vmem:[#allocation24_spill] sm:$0xff] %v17210_v61  ;;  %v9754_v5 = vsel %vm13248_vm12, %v9749_v20, %v9753_v31  ;;  %12872 = vmatprep.mubr.msk.bf16.mxu1 %vm1453_vm9, %v13072_v60  ;;  %v17220_v39 = vadd.f32 %v17061_v0, %v6764_v37  ;;  %v6777_v23 = vpop.f32.mrf.mxu1  ;;  %v9780_v56 = vshrl.u32 %v9542_v41, 16  ;;  %v9783_v10 = vshll.u32 %v9542_v41, 16 }
 0x389   : > { %v11787_v1 = vcombine.low %v9744_v36, %v9754_v5  ;;  %v9772_v2 = vor.u32 %v9771_v54, %v9767_v38  ;;  %v9763_v47 = vrot.slane %v9762_v15, 4  ;;  %v9789_v14 = vshll.u32 %v17206_v9, 16  ;;  %18803 = vst [vmem:[#allocation21_spill] sm:$0xff] %v17231_v55  ;;  %v17233_v60 = vpop.f32.mrf.mxu0 }
 0x38a   : > { %18801 = vst [vmem:[#allocation20_spill] sm:$0xff] %v17220_v39  ;;  %v9793_v21 = vshrl.u32 %v17206_v9, 16  ;;  %v9799_v31 = vshll.u32 %v17212_v29, 16  ;;  %v9782_v0 = vrot.slane %v9780_v56, 4  ;;  %v9785_v37 = vrot.slane %v9783_v10, 5  ;;  %v12671_v41 = vpop.f32.mrf.mxu1  ;;  %v13073_v56 = vld [vmem:[#allocation3 + $0x6c] sm:$0xff]  }
 0x38b   : > { %12907 = vmatmul.mubr.msk.bf16.gmra.mxu0 %vm1453_vm9, %v11787_v1  ;;  %v9773_v40 = vrot.slane %v9772_v2, 4  ;;  %v17229_v20 = vadd.f32 %v17072_v62, %v12670_v49  ;;  %v9768_v54 = vsel %vm13248_vm12, %v9763_v47, %v9767_v38  ;;  %v9791_v36 = vrot.slane %v9789_v14, 5  ;;  %v17237_v39 = vld [vmem:[#allocation3 + $0x98] sm:$0x1]  ;;  %v17241_v10 = vpop.f32.mrf.mxu0 }
 0x38c   : > { %v9795_v5 = vrot.slane %v9793_v21, 4  ;;  %v9801_v15 = vrot.slane %v9799_v31, 5  ;;  %18804 = vst [vmem:[#allocation30_spill] sm:$0xff] %v17237_v39  ;;  %v9786_v2 = vor.u32 %v9785_v37, %v9782_v0  ;;  %v9804_v62 = vshrl.u32 %v9545_v33, 16  ;;  %v13074_v47 = vld [vmem:[#allocation3 + $0x78] sm:$0xff]  }
 0x38d   : > { %18802 = vst [vmem:[#allocation16_spill] sm:$0xff] %v17229_v20  ;;  %v9778_v1 = vsel %vm13248_vm12, %v9773_v40, %v9777_v6  ;;  %v9807_v49 = vshll.u32 %v9545_v33, 16  ;;  %v9813_v43 = vshll.u32 %v17231_v55, 16  ;;  %v9817_v38 = vshrl.u32 %v17231_v55, 16  ;;  %v6780_v40 = vpop.f32.mrf.mxu1  ;;  %v9548_v0 = vld [vmem:[#allocation3 + $0x9c] sm:$0xf]  ;;  %v17247_v37 = vpop.f32.mrf.mxu0 }
 0x38e   : > { %v11788_v20 = vcombine.low %v9768_v54, %v9778_v1  ;;  %v9796_v61 = vor.u32 %v9795_v5, %v9791_v36  ;;  %v9787_v14 = vrot.slane %v9786_v2, 4  ;;  %v9806_v21 = vrot.slane %v9804_v62, 4  ;;  %v17254_v2 = vld [vmem:[#allocation3 + $0xa0] sm:$0xf]  ;;  %v17261_v55 = vld [vmem:[#allocation3 + $0xa4] sm:$0x1] }
 0x38f   : > { %12873 = vmatmul.mubr.msk.bf16.gmra.mxu1 %vm1453_vm9, %v13073_v56  ;;  %v9809_v31 = vrot.slane %v9807_v49, 5  ;;  %v9823_v6 = vshll.u32 %v17237_v39, 16  ;;  %v9815_v54 = vrot.slane %v9813_v43, 5  ;;  %v9819_v5 = vrot.slane %v9817_v38, 4  ;;  %18806 = vst [vmem:[#allocation37_spill] sm:$0xff] %v17254_v2  ;;  %18808 = vst [vmem:[#allocation23_spill] sm:$0xff] %v17261_v55 }
 0x390   : > { %12910 = vmatprep.mubr.msk.bf16.mxu0 %vm1453_vm9, %v11788_v20  ;;  %v9797_v33 = vrot.slane %v9796_v61, 4  ;;  %12876 = vmatprep.mubr.msk.bf16.mxu1 %vm1453_vm9, %v13074_v47  ;;  %v17252_v1 = vadd.f32 %v17093_v26, %v6777_v23  ;;  %v9792_v56 = vsel %vm13248_vm12, %v9787_v14, %v9791_v36  ;;  %v17259_v39 = vadd.f32 %v17107_v30, %v12671_v41  ;;  %v9551_v30 = vld [vmem:[#allocation3 + $0xa8] sm:$0xf] }
 0x391   : > { %v9810_v62 = vor.u32 %v9809_v31, %v9806_v21  ;;  %v9825_v49 = vrot.slane %v9823_v6, 5  ;;  %v17263_v61 = vpop.f32.mrf.mxu0  ;;  %v9820_v20 = vor.u32 %v9819_v5, %v9815_v54  ;;  %v17268_v26 = vadd.f32 %v17133_v18, %v6780_v40 }
 0x392   : > { %18805 = vst [vmem:[#allocation17_spill] sm:$0xff] %v17252_v1  ;;  %18807 = vst [vmem:[#allocation19_spill] sm:$0xff] %v17259_v39  ;;  %v9802_v43 = vsel %vm13248_vm12, %v9797_v33, %v9801_v15  ;;  %v9828_v23 = vshrl.u32 %v9548_v0, 16  ;;  %v9831_v36 = vshll.u32 %v9548_v0, 16  ;;  %v9837_v14 = vshll.u32 %v17254_v2, 16 }
 0x393   : > { %18809 = vst [vmem:[#allocation31_spill] sm:$0xff] %v17268_v26  ;;  %v11789_v38 = vcombine.low %v9792_v56, %v9802_v43  ;;  %v9811_v47 = vrot.slane %v9810_v62, 4  ;;  %v17271_v41 = vpop.f32.mrf.mxu0  ;;  %v9821_v31 = vrot.slane %v9820_v20, 4  ;;  %v9841_v39 = vshrl.u32 %v17254_v2, 16  ;;  %v17275_v33 = vld [vmem:[#allocation3 + $0xac] sm:$0xf] }
 0x394   : > { %v12674_v21 = vpop.f32.mrf.mxu1  ;;  %v9830_v6 = vrot.slane %v9828_v23, 4  ;;  %v9847_v15 = vshll.u32 %v17261_v55, 16  ;;  %18810 = vst [vmem:[#allocation33_spill] sm:$0xff] %v17275_v33  ;;  %v9833_v40 = vrot.slane %v9831_v36, 5  ;;  %v9839_v0 = vrot.slane %v9837_v14, 5  ;;  %v13075_v56 = vld [vmem:[#allocation3 + $0x84] sm:$0xff]  }
 0x395   : > { %12911 = vmatmul.mubr.msk.bf16.gmra.mxu0 %vm1453_vm9, %v11789_v38  ;;  %v9816_v18 = vsel %vm13248_vm12, %v9811_v47, %v9815_v54  ;;  %v17281_v5 = vadd.f32 %v17154_v27, %v12674_v21  ;;  %v17283_v62 = vld [vmem:[#allocation3 + $0xb0] sm:$0x1]  ;;  %v17285_v20 = vpop.f32.mrf.mxu0  ;;  %v9826_v23 = vsel %vm13248_vm12, %v9821_v31, %v9825_v49  ;;  %v9843_v26 = vrot.slane %v9841_v39, 4  ;;  %v9554_v39 = vld [vmem:[#allocation3 + $0xb4] sm:$0xf] }
 0x396   : > { %18812 = vst [vmem:[#allocation28_spill] sm:$0xff] %v17283_v62  ;;  %v6793_v43 = vpop.f32.mrf.mxu1  ;;  %v9849_v1 = vrot.slane %v9847_v15, 5  ;;  %v9852_v38 = vshrl.u32 %v9551_v30, 16  ;;  %v13076_v55 = vld [vmem:[#allocation3 + $0x90] sm:$0xff]   ;;  %v11790_v2 = vcombine.low %v9816_v18, %v9826_v23  ;;  %v9834_v54 = vor.u32 %v9833_v40, %v9830_v6  ;;  %v17300_v40 = vld [vmem:[#allocation3 + $0xb8] sm:$0xf] }
 0x397   : > { %18811 = vst [vmem:[#allocation25_spill] sm:$0xff] %v17281_v5  ;;  %12877 = vmatmul.mubr.msk.bf16.gmra.mxu1 %vm1453_vm9, %v13075_v56  ;;  %v9855_v47 = vshll.u32 %v9551_v30, 16  ;;  %v9861_v27 = vshll.u32 %v17275_v33, 16  ;;  %v17291_v14 = vpop.f32.mrf.mxu0  ;;  %v9844_v21 = vor.u32 %v9843_v26, %v9839_v0  ;;  %v9865_v29 = vshrl.u32 %v17275_v33, 16  ;;  %18814 = vst [vmem:[#allocation4_spill] sm:$0xff] %v17300_v40 }
 0x398   : > { %v12675_v36 = vpop.f32.mrf.mxu1  ;;  %v9854_v5 = vrot.slane %v9852_v38, 4  ;;  %v9871_v49 = vshll.u32 %v17283_v62, 16  ;;  %12880 = vmatprep.mubr.msk.bf16.mxu1 %vm1453_vm9, %v13076_v55  ;;  %12914 = vmatprep.mubr.msk.bf16.mxu0 %vm1453_vm9, %v11790_v2  ;;  %v9835_v31 = vrot.slane %v9834_v54, 4  ;;  %v17298_v30 = vadd.f32 %v17164_v35, %v6793_v43  ;;  %v17312_v35 = vld [vmem:[#allocation3 + $0xbc] sm:$0x1] }
 0x399   : > { %v9857_v6 = vrot.slane %v9855_v47, 5  ;;  %v9863_v15 = vrot.slane %v9861_v27, 5  ;;  %v9845_v26 = vrot.slane %v9844_v21, 4  ;;  %v9867_v56 = vrot.slane %v9865_v29, 4  ;;  %18817 = vst [vmem:[#allocation27_spill] sm:$0xff] %v17312_v35 }
 0x39a   : > { %18813 = vst [vmem:[#allocation34_spill] sm:$0xff] %v17298_v30  ;;  %v6796_v18 = vpop.f32.mrf.mxu1  ;;  %v9873_v23 = vrot.slane %v9871_v49, 5  ;;  %v17303_v38 = vadd.f32 %v17183_v32, %v12675_v36  ;;  %v17305_v62 = vpop.f32.mrf.mxu0  ;;  %v9840_v55 = vsel %vm13248_vm12, %v9835_v31, %v9839_v0  ;;  %v9876_v43 = vshrl.u32 %v9554_v39, 16  ;;  %v9557_v36 = vld [vmem:[#allocation3 + $0xc0] sm:$0xf] }
 0x39b   : > { %v9858_v2 = vor.u32 %v9857_v6, %v9854_v5  ;;  %v17310_v54 = vadd.f32 %v17199_v8, %v6796_v18  ;;  %v9850_v29 = vsel %vm13248_vm12, %v9845_v26, %v9849_v1  ;;  %v9868_v27 = vor.u32 %v9867_v56, %v9863_v15  ;;  %v13077_v31 = vld [vmem:[#allocation3 + $0x9c] sm:$0xff]   ;;  %v13078_v6 = vld [vmem:[#allocation3 + $0xa8] sm:$0xff]   ;;  %v17321_v26 = vld [vmem:[#allocation3 + $0xc4] sm:$0xf] }
 0x39c   : > { %18815 = vst [vmem:[#allocation35_spill] sm:$0xff] %v17303_v38  ;;  %v12678_v47 = vpop.f32.mrf.mxu1  ;;  %v9879_v21 = vshll.u32 %v9554_v39, 16  ;;  %v9885_v32 = vshll.u32 %v17300_v40, 16  ;;  %v17317_v49 = vpop.f32.mrf.mxu0  ;;  %v11791_v38 = vcombine.low %v9840_v55, %v9850_v29  ;;  %v9878_v5 = vrot.slane %v9876_v43, 4  ;;  %v17332_v43 = vld [vmem:[#allocation3 + $0xc8] sm:$0x1] }
 0x39d   : > { %18816 = vst [vmem:[#allocation38_spill] sm:$0xff] %v17310_v54  ;;  %v9859_v0 = vrot.slane %v9858_v2, 4  ;;  %v9889_v8 = vshrl.u32 %v17300_v40, 16  ;;  %v9869_v54 = vrot.slane %v9868_v27, 4  ;;  %v9895_v1 = vshll.u32 %v17312_v35, 16 }
 0x39e   : > { %v6809_v18 = vpop.f32.mrf.mxu1  ;;  %v9881_v30 = vrot.slane %v9879_v21, 5  ;;  %v9887_v33 = vrot.slane %v9885_v32, 5  ;;  %v17323_v39 = vpop.f32.mrf.mxu0  ;;  %12915 = vmatmul.mubr.msk.bf16.gmra.mxu0 %vm1453_vm9, %v11791_v38  ;;  %v17329_v2 = vadd.f32 %v17222_v44, %v12678_v47  ;;  %v9900_v29 = vshrl.u32 %v9557_v36, 16 }
 0x39f   : > { %v9864_v56 = vsel %vm13248_vm12, %v9859_v0, %v9863_v15  ;;  %v9891_v55 = vrot.slane %v9889_v8, 4  ;;  %12881 = vmatmul.mubr.msk.bf16.gmra.mxu1 %vm1453_vm9, %v13077_v31  ;;  %v9874_v21 = vsel %vm13248_vm12, %v9869_v54, %v9873_v23  ;;  %v9897_v35 = vrot.slane %v9895_v1, 5 }
 0x3a0   : > { %18818 = vst [vmem:[#allocation32_spill] sm:$0xff] %v17329_v2  ;;  %v12679_v27 = vpop.f32.mrf.mxu1  ;;  %v9882_v32 = vor.u32 %v9881_v30, %v9878_v5  ;;  %v9903_v40 = vshll.u32 %v9557_v36, 16  ;;  %12884 = vmatprep.mubr.msk.bf16.mxu1 %vm1453_vm9, %v13078_v6  ;;  %v17337_v38 = vpop.f32.mrf.mxu0  ;;  %v11792_v15 = vcombine.low %v9864_v56, %v9874_v21  ;;  %v9902_v44 = vrot.slane %v9900_v29, 4  ;;  %v10241_v56 = vld [vmem:[#allocation3 + $0x18] sm:$0xe] }
 0x3a1   : > { %v9892_v0 = vor.u32 %v9891_v55, %v9887_v33  ;;  %v9909_v47 = vshll.u32 %v17321_v26, 16  ;;  %v9913_v19 = vshrl.u32 %v17321_v26, 16  ;;  %v9919_v9 = vshll.u32 %v17332_v43, 16  ;;  %v9560_v55 = vld [vmem:[#allocation3 + $0xcc] sm:$0xf] }
 0x3a2   : > { %v6812_v8 = vpop.f32.mrf.mxu1  ;;  %v9883_v31 = vrot.slane %v9882_v32, 4  ;;  %v9905_v2 = vrot.slane %v9903_v40, 5  ;;  %12918 = vmatprep.mubr.msk.bf16.mxu0 %vm1453_vm9, %v11792_v15  ;;  %v17344_v54 = vadd.f32 %v17233_v60, %v6809_v18  ;;  %v17347_v36 = vadd.f32 %v17241_v10, %v12679_v27  ;;  %v13079_v27 = vld [vmem:[#allocation3 + $0xb4] sm:$0xff]   ;;  %v13080_v15 = vld [vmem:[#allocation3 + $0xc0] sm:$0xff]  }
 0x3a3   : > { %v9893_v30 = vrot.slane %v9892_v0, 4  ;;  %v9911_v23 = vrot.slane %v9909_v47, 5  ;;  %v17349_v5 = vpop.f32.mrf.mxu0  ;;  %v17353_v6 = vadd.f32 %v16930_v48, %v17042_v50  ;;  %v9915_v1 = vrot.slane %v9913_v19, 4 }
 0x3a4   : > { %v9906_v40 = vor.u32 %v9905_v2, %v9902_v44  ;;  %v9888_v29 = vsel %vm13248_vm12, %v9883_v31, %v9887_v33  ;;  %v17360_v18 = vadd.f32 %v17247_v37, %v6812_v8  ;;  %v10307_v48 = vrot.slane %v16991_v28, 5  ;;  %v17368_v33 = vld [vmem:[#allocation3 + $0xd0] sm:$0xf] }
 0x3a5   : > { %v9898_v60 = vsel %vm13248_vm12, %v9893_v30, %v9897_v35  ;;  %v12682_v10 = vpop.f32.mrf.mxu1  ;;  %v17362_v21 = vpop.f32.mrf.mxu0  ;;  %v9916_v19 = vor.u32 %v9915_v1, %v9911_v23  ;;  %v9921_v0 = vrot.slane %v9919_v9, 5  ;;  %v11812_v35 = vrot.slane %v10241_v56, 9  ;;  %v17379_v30 = vld [vmem:[#allocation3 + $0xd4] sm:$0x1] }
 0x3a6   : > { %v11793_v50 = vcombine.low %v9888_v29, %v9898_v60  ;;  %v9907_v2 = vrot.slane %v9906_v40, 4  ;;  %v17366_v32 = vadd.f32 %v17263_v61, %v12682_v10  ;;  %v10309_v44 = vrot.slane %v10307_v48, 4 }
 0x3a7   : > { %12885 = vmatmul.mubr.msk.bf16.gmra.mxu1 %vm1453_vm9, %v13079_v27  ;;  %v6825_v37 = vpop.f32.mrf.mxu1  ;;  %v9924_v47 = vshrl.u32 %v9560_v55, 16  ;;  %v17371_v8 = vpop.f32.mrf.mxu0  ;;  %v9917_v28 = vrot.slane %v9916_v19, 4  ;;  %v10310_v31 = vrot.slane %v16996_v53, 5  ;;  %v9927_v9 = vshll.u32 %v9560_v55, 16  ;;  %v13081_v19 = vld [vmem:[#allocation3 + $0xcc] sm:$0xff]  }
 0x3a8   : > { %18819 = vst [vmem:[#allocation36_spill] sm:$0xff] %v17366_v32  ;;  %12919 = vmatmul.mubr.msk.bf16.gmra.mxu0 %vm1453_vm9, %v11793_v50  ;;  %12888 = vmatprep.mubr.msk.bf16.mxu1 %vm1453_vm9, %v13080_v15  ;;  %v17376_v61 = vadd.f32 %v17271_v41, %v6825_v37  ;;  %v9912_v40 = vsel %vm13248_vm12, %v9907_v2, %v9911_v23  ;;  %v9933_v29 = vshll.u32 %v17368_v33, 16  ;;  %v9937_v60 = vshrl.u32 %v17368_v33, 16  ;;  %v10242_v50 = vld [vmem:[#allocation3 + $0x24] sm:$0xe] }
 0x3a9   : > { %v12683_v1 = vpop.f32.mrf.mxu1  ;;  %v9926_v56 = vrot.slane %v9924_v47, 4  ;;  %v17385_v10 = vpop.f32.mrf.mxu0  ;;  %v9922_v41 = vsel %vm13248_vm12, %v9917_v28, %v9921_v0  ;;  %v10311_v53 = vsel %vm13649_vm2, %v10309_v44, %v10310_v31  ;;  %v9929_v55 = vrot.slane %v9927_v9, 5  ;;  %v10243_v28 = vld [vmem:[#allocation3 + $0x30] sm:$0xe] }
 0x3aa   : > { %18820 = vst [vmem:[#allocation40_spill] sm:$0xff] %v17376_v61  ;;  %v17390_v27 = vadd.f32 %v17285_v20, %v12683_v1  ;;  %v11794_v23 = vcombine.low %v9912_v40, %v9922_v41  ;;  %v9935_v15 = vrot.slane %v9933_v29, 5  ;;  %v9939_v37 = vrot.slane %v9937_v60, 4 }
 0x3ab   : > { %v6828_v2 = vpop.f32.mrf.mxu1  ;;  %v9943_v47 = vshll.u32 %v17379_v30, 16  ;;  %v17395_v61 = vpop.f32.mrf.mxu0  ;;  %v10308_v20 = vsel %vm13649_vm2, %v11812_v35, %v10307_v48  ;;  %v9930_v0 = vor.u32 %v9929_v55, %v9926_v56  ;;  %v10314_v44 = vrot.slane %v17023_v22, 5  ;;  %v10244_v35 = vld [vmem:[#allocation3 + $0x3c] sm:$0xe] }
 0x3ac   : > { %v17398_v32 = vadd.f32 %v17291_v14, %v6828_v2  ;;  %12922 = vmatprep.mubr.msk.bf16.mxu0 %vm1453_vm9, %v11794_v23  ;;  %v11829_v9 = vcombine.low %v10308_v20, %v10311_v53  ;;  %v9940_v40 = vor.u32 %v9939_v37, %v9935_v15  ;;  %v11813_v29 = vrot.slane %v10242_v50, 9 }
 0x3ad   : > { %v12686_v31 = vpop.f32.mrf.mxu1  ;;  %v9945_v1 = vrot.slane %v9943_v47, 5  ;;  %v17404_v60 = vpop.f32.mrf.mxu0  ;;  %v9931_v14 = vrot.slane %v9930_v0, 4  ;;  %v10316_v2 = vrot.slane %v10314_v44, 4  ;;  %v10317_v48 = vrot.slane %v17026_v11, 5 }
 0x3ae   : > { %v17407_v41 = vadd.f32 %v17305_v62, %v12686_v31  ;;  %v9941_v56 = vrot.slane %v9940_v40, 4  ;;  %v10315_v53 = vsel %vm13649_vm2, %v11813_v29, %v10314_v44  ;;  %v11814_v55 = vrot.slane %v10243_v28, 9 }
 0x3af   : > { %12889 = vmatmul.mubr.msk.bf16.gmra.mxu1 %vm1453_vm9, %v13081_v19  ;;  %v6841_v22 = vpop.f32.mrf.mxu1  ;;  %v10321_v50 = vrot.slane %v17051_v59, 5  ;;  %v17414_v23 = vpop.f32.mrf.mxu0  ;;  %v9936_v11 = vsel %vm13248_vm12, %v9931_v14, %v9935_v15  ;;  %v10318_v19 = vsel %vm13649_vm2, %v10316_v2, %v10317_v48  ;;  %v10328_v37 = vrot.slane %v17067_v13, 5  ;;  %v10246_v2 = vld [vmem:[#allocation3 + $0x54] sm:$0xe] }
 0x3b0   : > { %18821 = vst [vmem:[#allocation41_spill] sm:$0xff] %v17407_v41  ;;  %12928 = vmatprep.mubr.msk.bf16.mxu1 %vm1453_vm9, %v11829_v9  ;;  %v17418_v62 = vadd.f32 %v17317_v49, %v6841_v22  ;;  %v9946_v47 = vsel %vm13248_vm12, %v9941_v56, %v9945_v1  ;;  %v10324_v0 = vrot.slane %v17057_v46, 5  ;;  %v11815_v28 = vrot.slane %v10244_v35, 9  ;;  %v10245_v49 = vld [vmem:[#allocation3 + $0x48] sm:$0xe]  ;;  %v18839_v41 = vld [vmem:[#allocation27_spill] sm:$0xff] }
 0x3b1   : > { %v12687_v20 = vpop.f32.mrf.mxu1  ;;  %v10323_v59 = vrot.slane %v10321_v50, 4  ;;  %v17428_v44 = vpop.f32.mrf.mxu0  ;;  %v11795_v31 = vcombine.low %v9936_v11, %v9946_v47  ;;  %v11830_v15 = vcombine.low %v10315_v53, %v10318_v19  ;;  %v10330_v40 = vrot.slane %v10328_v37, 4  ;;  %v10247_v11 = vld [vmem:[#allocation3 + $0x60] sm:$0xe] }
 0x3b2   : > { %18822 = vst [vmem:[#allocation42_spill] sm:$0xff] %v17418_v62  ;;  %v17431_v9 = vadd.f32 %v17323_v39, %v12687_v20  ;;  %v10322_v13 = vsel %vm13649_vm2, %v11814_v55, %v10321_v50  ;;  %v10331_v46 = vrot.slane %v17079_v57, 5  ;;  %v10335_v14 = vrot.slane %v17083_v24, 5 }
 0x3b3   : > { %v6844_v29 = vpop.f32.mrf.mxu1  ;;  %v10325_v16 = vsel %vm13649_vm2, %v10323_v59, %v10324_v0  ;;  %v17437_v1 = vpop.f32.mrf.mxu0  ;;  %12923 = vmatmul.mubr.msk.bf16.gmra.mxu0 %vm1453_vm9, %v11795_v31  ;;  %v10329_v35 = vsel %vm13649_vm2, %v11815_v28, %v10328_v37  ;;  %v11816_v22 = vrot.slane %v10245_v49, 9  ;;  %v10338_v24 = vrot.slane %v17098_v3, 5 }
 0x3b4   : > { %18823 = vst [vmem:[#allocation43_spill] sm:$0xff] %v17431_v9  ;;  %v17443_v39 = vadd.f32 %v17337_v38, %v6844_v29  ;;  %v11831_v48 = vcombine.low %v10322_v13, %v10325_v16  ;;  %v10332_v53 = vsel %vm13649_vm2, %v10330_v40, %v10331_v46  ;;  %v10337_v57 = vrot.slane %v10335_v14, 4 }
 0x3b5   : > { %v12726_v56 = vpop.f32.mrf.mxu1  ;;  %v17449_v55 = vpop.f32.mrf.mxu0  ;;  %v10342_v50 = vrot.slane %v17116_v51, 5  ;;  %v11832_v19 = vcombine.low %v10329_v35, %v10332_v53  ;;  %v10336_v37 = vsel %vm13649_vm2, %v11816_v22, %v10335_v14  ;;  %v11817_v47 = vrot.slane %v10246_v2, 9 }
 0x3b6   : > { %18824 = vst [vmem:[#allocation46_spill] sm:$0xff] %v17443_v39  ;;  %v17454_v38 = vadd.f32 %v12726_v56, %v17089_v7  ;;  %v10339_v59 = vsel %vm13649_vm2, %v10337_v57, %v10338_v24  ;;  %v10345_v51 = vrot.slane %v17124_v63, 5  ;;  %v10349_v28 = vrot.slane %v17139_v12, 5  ;;  %v10248_v7 = vld [vmem:[#allocation3 + $0x6c] sm:$0xe] }
 0x3b7   : > { %12929 = vmatmul.mubr.msk.bf16.vlgmr.msra.gmra.mxu1 %vm1453_vm9, %v11830_v15  ;;  %v7443_v20 = vpop.f32.mrf.mxu1  ;;  %v17461_v0 = vpop.f32.mrf.mxu0  ;;  %v10344_v3 = vrot.slane %v10342_v50, 4  ;;  %v11833_v31 = vcombine.low %v10336_v37, %v10339_v59  ;;  %v17471_v15 = vsel %vm13649_vm2, %v11817_v47, %v10342_v50  ;;  %v11818_v40 = vrot.slane %v10247_v11, 9  ;;  %v10250_v57 = vld [vmem:[#allocation3 + $0x84] sm:$0xe] }
 0x3b8   : > { %12932 = vmatprep.mubr.msk.bf16.mxu1 %vm1453_vm9, %v11831_v48  ;;  %v17467_v49 = vadd.f32 %v7443_v20, %v17114_v34  ;;  %v10351_v12 = vrot.slane %v10349_v28, 4  ;;  %v10352_v16 = vrot.slane %v17148_v4, 5  ;;  %v10356_v46 = vrot.slane %v17162_v45, 5  ;;  %v10249_v34 = vld [vmem:[#allocation3 + $0x78] sm:$0xe] }
 0x3b9   : > { %v12727_v29 = vpop.f32.mrf.mxu1  ;;  %v17473_v13 = vpop.f32.mrf.mxu0  ;;  %v17477_v63 = vsel %vm13649_vm2, %v10344_v3, %v10345_v51  ;;  %v17488_v48 = vsel %vm13649_vm2, %v11818_v40, %v10349_v28  ;;  %v11819_v35 = vrot.slane %v10248_v7, 9  ;;  %v10359_v53 = vrot.slane %v17172_v42, 5  ;;  %v10251_v51 = vld [vmem:[#allocation3 + $0x90] sm:$0xe]  ;;  %v18826_v28 = vld [vmem:[#allocation14_spill] sm:$0xff] }
 0x3ba   : > { %v17482_v14 = vadd.f32 %v12727_v29, %v17122_v25  ;;  %v17494_v4 = vsel %vm13649_vm2, %v10351_v12, %v10352_v16  ;;  %v10358_v45 = vrot.slane %v10356_v46, 4  ;;  %v10363_v25 = vrot.slane %v17181_v58, 5  ;;  %v18834_v40 = vld [vmem:[#allocation18_spill] sm:$0xff] }
 0x3bb   : > { %v7446_v22 = vpop.f32.mrf.mxu1  ;;  %v17490_v56 = vpop.f32.mrf.mxu0  ;;  %v11835_v50 = vcombine.low %v17488_v48, %v17494_v4  ;;  %v17505_v11 = vsel %vm13649_vm2, %v11819_v35, %v10356_v46  ;;  %v11820_v37 = vrot.slane %v10249_v34, 9  ;;  %v10366_v59 = vrot.slane %v17190_v52, 5  ;;  %v18827_v48 = vld [vmem:[#allocation5_spill] sm:$0xff] }
 0x3bc   : > { %v17499_v24 = vadd.f32 %v7446_v22, %v17353_v6  ;;  %v17511_v42 = vsel %vm13649_vm2, %v10358_v45, %v10359_v53  ;;  %v10365_v58 = vrot.slane %v10363_v25, 4  ;;  %v18825_v6 = vld [vmem:[#allocation39_spill] sm:$0xff]  ;;  %v11821_v12 = vrot.slane %v10250_v57, 9  ;;  %v18828_v22 = vld [vmem:[#allocation21_spill] sm:$0xff]  ;;  %v10252_v45 = vld [vmem:[#allocation3 + $0x9c] sm:$0xe] }
 0x3bd   : > { %v12730_v47 = vpop.f32.mrf.mxu1  ;;  %v17507_v20 = vpop.f32.mrf.mxu0  ;;  %v10370_v3 = vrot.slane %v18825_v6, 5  ;;  %v17522_v29 = vsel %vm13649_vm2, %v11820_v37, %v10363_v25  ;;  %v10373_v35 = vrot.slane %v18827_v48, 5  ;;  %v10377_v4 = vrot.slane %v18828_v22, 5  ;;  %v18829_v53 = vld [vmem:[#allocation22_spill] sm:$0xff]  ;;  %v18831_v48 = vld [vmem:[#allocation37_spill] sm:$0xff]  ;;  %v18832_v22 = vld [vmem:[#allocation15_spill] sm:$0xff] }
 0x3be   : > { %v17516_v7 = vadd.f32 %v12730_v47, %v18826_v28  ;;  %v17529_v52 = vsel %vm13649_vm2, %v10365_v58, %v10366_v59  ;;  %v11822_v37 = vrot.slane %v10251_v51, 9  ;;  %v18830_v28 = vld [vmem:[#allocation30_spill] sm:$0xff]  ;;  %v11823_v51 = vrot.slane %v10252_v45, 9 }
 0x3bf   : > { %12933 = vmatmul.mubr.msk.bf16.gmra.mxu1 %vm1453_vm9, %v11832_v19  ;;  %v7459_v16 = vpop.f32.mrf.mxu1  ;;  %v17525_v46 = vpop.f32.mrf.mxu0  ;;  %v10372_v34 = vrot.slane %v10370_v3, 4  ;;  %v17539_v57 = vsel %vm13649_vm2, %v11821_v12, %v10370_v3  ;;  %v10379_v6 = vrot.slane %v10377_v4, 4 }
 0x3c0   : > { %12936 = vmatprep.mubr.msk.bf16.mxu1 %vm1453_vm9, %v11833_v31  ;;  %v7574_v25 = vadd.f32 %v7459_v16, %v18829_v53  ;;  %v10380_v31 = vrot.slane %v18830_v28, 5  ;;  %v10384_v16 = vrot.slane %v18831_v48, 5  ;;  %v18833_v53 = vld [vmem:[#allocation12_spill] sm:$0xff]  ;;  %v18835_v48 = vld [vmem:[#allocation23_spill] sm:$0xff] }
 0x3c1   : > { %v12731_v47 = vpop.f32.mrf.mxu1  ;;  %v17541_v58 = vpop.f32.mrf.mxu0  ;;  %v17545_v59 = vsel %vm13649_vm2, %v10372_v34, %v10373_v35  ;;  %v7041_v19 = vadd.f32 %v18833_v53, %v18832_v22  ;;  %v17558_v34 = vsel %vm13649_vm2, %v11822_v37, %v10377_v4  ;;  %v10387_v22 = vrot.slane %v18835_v48, 5  ;;  %v18836_v37 = vld [vmem:[#allocation4_spill] sm:$0xff] }
 0x3c2   : > { %v7577_v2 = vadd.f32 %v12731_v47, %v18834_v40  ;;  %v17562_v35 = vsel %vm13649_vm2, %v10379_v6, %v10380_v31  ;;  %v10386_v28 = vrot.slane %v10384_v16, 4  ;;  %v10254_v47 = vld [vmem:[#allocation3 + $0xb4] sm:$0xe]  ;;  %v17571_v9 = vsel %vm13649_vm2, %v11823_v51, %v10384_v16  ;;  %v18837_v31 = vld [vmem:[#allocation29_spill] sm:$0xff] }
 0x3c3   : > { %v7462_v12 = vpop.f32.mrf.mxu1  ;;  %v17554_v39 = vpop.f32.mrf.mxu0  ;;  %v10398_v6 = vrot.slane %v18836_v37, 5  ;;  %v11825_v16 = vrot.slane %v10254_v47, 9 }
 0x3c4   : > { %v7575_v53 = vadd.f32 %v7462_v12, %v7041_v19  ;;  %v17575_v4 = vsel %vm13649_vm2, %v10386_v28, %v10387_v22  ;;  %v18838_v12 = vcombine.low %v17471_v15, %v17477_v63  ;;  %v10401_v28 = vrot.slane %v18839_v41, 5  ;;  %v18840_v22 = vld [vmem:[#allocation26_spill] sm:$0xff]  ;;  %v18841_v63 = vld [vmem:[#allocation24_spill] sm:$0xff] }
 0x3c5   : > { %v12734_v45 = vpop.f32.mrf.mxu1  ;;  %v17567_v3 = vpop.f32.mrf.mxu0  ;;  %v10400_v51 = vrot.slane %v10398_v6, 4  ;;  %v17594_v19 = vsel %vm13649_vm2, %v11825_v16, %v10398_v6  ;;  %v17611_v6 = vadd.f32 %v17362_v21, %v17467_v49  ;;  %v18842_v16 = vld [vmem:[#allocation20_spill] sm:$0xff]  ;;  %v17629_v21 = vadd.f32 %v17404_v60, %v7574_v25 }
 0x3c6   : > { %v7580_v48 = vadd.f32 %v12734_v45, %v18837_v31  ;;  %v17632_v49 = vadd.f32 %v17414_v23, %v7577_v2  ;;  %v18846_v2 = vld [vmem:[#allocation17_spill] sm:$0xff] }
 0x3c7   : > { %12937 = vmatmul.mubr.msk.bf16.gmra.mxu1 %vm1453_vm9, %v18838_v12  ;;  %v7475_v40 = vpop.f32.mrf.mxu1  ;;  %v17585_v62 = vpop.f32.mrf.mxu0  ;;  %v17598_v15 = vsel %vm13649_vm2, %v10400_v51, %v10401_v28  ;;  %v17616_v51 = vadd.f32 %v17371_v8, %v17482_v14  ;;  %v17620_v28 = vadd.f32 %v17385_v10, %v17499_v24  ;;  %v17636_v14 = vadd.f32 %v17428_v44, %v7575_v53 }
 0x3c8   : > { %12940 = vmatprep.mubr.msk.bf16.mxu1 %vm1453_vm9, %v11835_v50  ;;  %v7578_v37 = vadd.f32 %v7475_v40, %v18840_v22  ;;  %v11842_v41 = vcombine.low %v17594_v19, %v17598_v15  ;;  %v17605_v50 = vadd.f32 %v17349_v5, %v17454_v38  ;;  %v17626_v38 = vadd.f32 %v17395_v61, %v17516_v7 }
 0x3c9   : > { %v12735_v45 = vpop.f32.mrf.mxu1  ;;  %v17590_v31 = vpop.f32.mrf.mxu0  ;;  %v17639_v10 = vadd.f32 %v17437_v1, %v7580_v48  ;;  %v18844_v24 = vcombine.low %v17505_v11, %v17511_v42  ;;  %v18845_v1 = vcombine.low %v17522_v29, %v17529_v52  ;;  %v18849_v52 = vld [vmem:[#allocation31_spill] sm:$0xff] }
 0x3ca   : > { %v7581_v47 = vadd.f32 %v12735_v45, %v18841_v63  ;;  %v18843_v63 = vld [vmem:[#allocation16_spill] sm:$0xff]  ;;  %v17648_v60 = vadd.f32 %v17449_v55, %v7578_v37  ;;  %v18847_v55 = vld [vmem:[#allocation19_spill] sm:$0xff] }
 0x3cb   : > { %v7478_v40 = vpop.f32.mrf.mxu1  ;;  %v17607_v12 = vpop.f32.mrf.mxu0 }
 0x3cc   : > { %v7579_v22 = vadd.f32 %v7478_v40, %v18842_v16  ;;  %v17651_v23 = vadd.f32 %v17461_v0, %v7581_v47  ;;  %v18848_v47 = vld [vmem:[#allocation33_spill] sm:$0xff] }
 0x3cd   : > { %v12738_v45 = vpop.f32.mrf.mxu1  ;;  %v17622_v5 = vpop.f32.mrf.mxu0  ;;  %v10391_v29 = vrot.slane %v18848_v47, 5 }
 0x3ce   : > { %v7584_v8 = vadd.f32 %v12738_v45, %v18843_v63  ;;  %v17654_v44 = vadd.f32 %v17473_v13, %v7579_v22  ;;  %v18850_v45 = vld [vmem:[#allocation25_spill] sm:$0xff] }
 0x3cf   : > { %12941 = vmatmul.mubr.msk.bf16.gmra.mxu1 %vm1453_vm9, %v18844_v24  ;;  %v7491_v61 = vpop.f32.mrf.mxu1  ;;  %v17645_v7 = vpop.f32.mrf.mxu0 }
 0x3d0   : > { %12944 = vmatprep.mubr.msk.bf16.mxu1 %vm1453_vm9, %v18845_v1  ;;  %v7582_v11 = vadd.f32 %v7491_v61, %v18846_v2  ;;  %v17662_v42 = vadd.f32 %v17490_v56, %v7584_v8  ;;  %v10393_v61 = vrot.slane %v10391_v29, 4  ;;  %v18853_v2 = vld [vmem:[#allocation34_spill] sm:$0xff] }
 0x3d1   : > { %v12739_v25 = vpop.f32.mrf.mxu1  ;;  %v17664_v53 = vpop.f32.mrf.mxu0 }
 0x3d2   : > { %v7585_v48 = vadd.f32 %v12739_v25, %v18847_v55  ;;  %v17668_v0 = vadd.f32 %v17507_v20, %v7582_v11  ;;  %v18851_v20 = vcombine.low %v17539_v57, %v17545_v59  ;;  %v10253_v25 = vld [vmem:[#allocation3 + $0xa8] sm:$0xe] }
 0x3d3   : > { %v7494_v13 = vpop.f32.mrf.mxu1  ;;  %v17670_v37 = vpop.f32.mrf.mxu0 }
 0x3d4   : > { %v7583_v40 = vadd.f32 %v7494_v13, %v18849_v52  ;;  %v17675_v16 = vadd.f32 %v17525_v46, %v7585_v48  ;;  %v18852_v46 = vcombine.low %v17558_v34, %v17562_v35  ;;  %v18854_v48 = vld [vmem:[#allocation28_spill] sm:$0xff]  ;;  %v18855_v13 = vld [vmem:[#allocation35_spill] sm:$0xff]  ;;  %v11824_v34 = vrot.slane %v10253_v25, 9 }
 0x3d5   : > { %v12742_v56 = vpop.f32.mrf.mxu1  ;;  %v17677_v22 = vpop.f32.mrf.mxu0  ;;  %v10394_v57 = vrot.slane %v18854_v48, 5 }
 0x3d6   : > { %v7588_v63 = vadd.f32 %v12742_v56, %v18850_v45  ;;  %v17681_v8 = vadd.f32 %v17541_v58, %v7583_v40  ;;  %v18856_v45 = vld [vmem:[#allocation38_spill] sm:$0xff] }
 0x3d7   : > { %12945 = vmatmul.mubr.msk.bf16.gmra.mxu1 %vm1453_vm9, %v18851_v20  ;;  %v7507_v24 = vpop.f32.mrf.mxu1  ;;  %v17687_v1 = vpop.f32.mrf.mxu0  ;;  %v10395_v35 = vsel %vm13649_vm2, %v10393_v61, %v10394_v57  ;;  %v10255_v57 = vld [vmem:[#allocation3 + $0xc0] sm:$0xe] }
 0x3d8   : > { %12948 = vmatprep.mubr.msk.bf16.mxu1 %vm1453_vm9, %v18852_v46  ;;  %v7586_v11 = vadd.f32 %v7507_v24, %v18853_v2  ;;  %v17695_v58 = vadd.f32 %v17554_v39, %v7588_v63  ;;  %v10405_v39 = vrot.slane %v17321_v26, 5  ;;  %v10392_v46 = vsel %vm13649_vm2, %v11824_v34, %v10391_v29  ;;  %v18857_v2 = vld [vmem:[#allocation32_spill] sm:$0xff] }
 0x3d9   : > { %v12743_v55 = vpop.f32.mrf.mxu1  ;;  %v17698_v59 = vpop.f32.mrf.mxu0  ;;  %v11841_v25 = vcombine.low %v10392_v46, %v10395_v35  ;;  %v18858_v26 = vcombine.low %v17571_v9, %v17575_v4  ;;  %v10408_v34 = vrot.slane %v17332_v43, 5 }
 0x3da   : > { %v7589_v47 = vadd.f32 %v12743_v55, %v18855_v13  ;;  %v17702_v52 = vadd.f32 %v17567_v3, %v7586_v11  ;;  %v10256_v13 = vld [vmem:[#allocation3 + $0xcc] sm:$0xe] }
 0x3db   : > { %v7510_v40 = vpop.f32.mrf.mxu1  ;;  %v17706_v56 = vpop.f32.mrf.mxu0 }
 0x3dc   : > { %v7587_v63 = vadd.f32 %v7510_v40, %v18856_v45  ;;  %v17711_v20 = vadd.f32 %v17585_v62, %v7589_v47  ;;  %v10407_v62 = vrot.slane %v10405_v39, 4  ;;  %v10412_v47 = vrot.slane %v17368_v33, 5 }
 0x3dd   : > { %v12746_v24 = vpop.f32.mrf.mxu1  ;;  %v17715_v3 = vpop.f32.mrf.mxu0  ;;  %v11827_v33 = vrot.slane %v10256_v13, 9 }
 0x3de   : > { %v7592_v11 = vadd.f32 %v12746_v24, %v18857_v2  ;;  %v17719_v61 = vadd.f32 %v17590_v31, %v7587_v63  ;;  %v11826_v63 = vrot.slane %v10255_v57, 9  ;;  %v10414_v46 = vrot.slane %v10412_v47, 4 }
 0x3df   : > { %12949 = vmatmul.mubr.msk.bf16.gmra.mxu1 %vm1453_vm9, %v18858_v26  ;;  %v7523_v55 = vpop.f32.mrf.mxu1  ;;  %v12789_v48 = vpop.f32.mrf.mxu0  ;;  %v10415_v2 = vrot.slane %v17379_v30, 5 }
 0x3e0   : > { %12952 = vmatprep.mubr.msk.bf16.mxu1 %vm1453_vm9, %v11841_v25  ;;  %v7590_v29 = vadd.f32 %v7523_v55, %v17344_v54  ;;  %v17729_v40 = vadd.f32 %v17607_v12, %v7592_v11  ;;  %v10409_v54 = vsel %vm13649_vm2, %v10407_v62, %v10408_v34  ;;  %v18859_v25 = vld [vmem:[#allocation36_spill] sm:$0xff] }
 0x3e1   : > { %v12747_v31 = vpop.f32.mrf.mxu1  ;;  %v7916_v9 = vpop.f32.mrf.mxu0  ;;  %v10416_v57 = vsel %vm13649_vm2, %v10414_v46, %v10415_v2 }
 0x3e2   : > { %v7593_v4 = vadd.f32 %v12747_v31, %v17347_v36  ;;  %v17734_v35 = vadd.f32 %v17622_v5, %v7590_v29  ;;  %v10406_v5 = vsel %vm13649_vm2, %v11826_v63, %v10405_v39  ;;  %v10413_v29 = vsel %vm13649_vm2, %v11827_v33, %v10412_v47  ;;  %v18861_v63 = vld [vmem:[#allocation41_spill] sm:$0xff] }
 0x3e3   : > { %v7526_v45 = vpop.f32.mrf.mxu1  ;;  %v17738_v24 = vpop.f32.mrf.mxu0  ;;  %v11843_v55 = vcombine.low %v10406_v5, %v10409_v54  ;;  %v11844_v34 = vcombine.low %v10413_v29, %v10416_v57 }
 0x3e4   : > { %v7591_v12 = vadd.f32 %v7526_v45, %v17360_v18  ;;  %v17743_v43 = vadd.f32 %v17645_v7, %v7593_v4  ;;  %v18860_v7 = vld [vmem:[#allocation40_spill] sm:$0xff] }
 0x3e5   : > { %v17747_v11 = vpop.f32.mrf.mxu0 }
 0x3e6   : > { %v12750_v36 = vpop.f32.mrf.mxu1  ;;  %v17751_v62 = vadd.f32 %v17664_v53, %v7591_v12  ;;  %v18862_v12 = vld [vmem:[#allocation42_spill] sm:$0xff] }
 0x3e7   : > { %v7596_v26 = vadd.f32 %v12750_v36, %v18859_v25  ;;  %12953 = vmatmul.mubr.msk.bf16.gmra.mxu1 %vm1453_vm9, %v11842_v41  ;;  %v17757_v30 = vpop.f32.mrf.mxu0  ;;  %v18863_v36 = vld [vmem:[#allocation43_spill] sm:$0xff] }
 0x3e8   : > { %v7539_v18 = vpop.f32.mrf.mxu1  ;;  %12956 = vmatprep.mubr.msk.bf16.mxu1 %vm1453_vm9, %v11843_v55  ;;  %v18864_v55 = vld [vmem:[#allocation46_spill] sm:$0xff] }
 0x3e9   : > { %v7594_v39 = vadd.f32 %v7539_v18, %v18860_v7  ;;  %v17766_v53 = vadd.f32 %v17670_v37, %v7596_v26  ;;  %v17768_v19 = vpop.f32.mrf.mxu0 }
 0x3ea   : > { %v12751_v13 = vpop.f32.mrf.mxu1 }
 0x3eb   : > { %v7597_v15 = vadd.f32 %v12751_v13, %v17390_v27  ;;  %v17772_v41 = vadd.f32 %v17677_v22, %v7594_v39  ;;  %v17774_v4 = vpop.f32.mrf.mxu0 }
 0x3ec   : > { %v7542_v31 = vpop.f32.mrf.mxu1 }
 0x3ed   : > { %v7595_v47 = vadd.f32 %v7542_v31, %v17398_v32  ;;  %v17778_v17 = vadd.f32 %v17687_v1, %v7597_v15  ;;  %v17780_v37 = vpop.f32.mrf.mxu0 }
 0x3ee   : > { %v12754_v45 = vpop.f32.mrf.mxu1 }
 0x3ef   : > { %v7600_v54 = vadd.f32 %v12754_v45, %v18861_v63  ;;  %v17784_v33 = vadd.f32 %v17698_v59, %v7595_v47  ;;  %12957 = vmatmul.mubr.msk.bf16.gmra.mxu1 %vm1453_vm9, %v11844_v34  ;;  %v17787_v22 = vpop.f32.mrf.mxu0 }
 0x3f0   : > { %v7555_v27 = vpop.f32.mrf.mxu1 }
 0x3f1   : > { %v7598_v46 = vadd.f32 %v7555_v27, %v18862_v12  ;;  %v17791_v32 = vadd.f32 %v17706_v56, %v7600_v54  ;;  %v17793_v2 = vpop.f32.mrf.mxu0 }
 0x3f2   : > { %v12755_v1 = vpop.f32.mrf.mxu1 }
 0x3f3   : > { %v7601_v5 = vadd.f32 %v12755_v1, %v18863_v36  ;;  %v17797_v25 = vadd.f32 %v17715_v3, %v7598_v46  ;;  %v17799_v26 = vpop.f32.mrf.mxu0 }
 0x3f4   : > { %v7558_v59 = vpop.f32.mrf.mxu1 }
 0x3f5   : > { %v7599_v18 = vadd.f32 %v7558_v59, %v18864_v55  ;;  %v17802_v7 = vadd.f32 %v12789_v48, %v7601_v5  ;;  %v17804_v29 = vpop.f32.mrf.mxu0 }
 0x3f6   : > { %v12794_v39 = vpop.f32.mrf.mxu1 }
 0x3f7   : > { %v17807_v56 = vadd.f32 %v12794_v39, %v17605_v50  ;;  %v17809_v57 = vadd.f32 %v7916_v9, %v7599_v18  ;;  %v17811_v15 = vpop.f32.mrf.mxu0 }
 0x3f8   : > { %v8527_v13 = vpop.f32.mrf.mxu1 }
 0x3f9   : > { %v17814_v3 = vadd.f32 %v8527_v13, %v17611_v6  ;;  %v17816_v34 = vpop.f32.mrf.mxu0 }
 0x3fa   : > { %v12795_v31 = vpop.f32.mrf.mxu1 }
 0x3fb   : > { %v17819_v48 = vadd.f32 %v12795_v31, %v17616_v51  ;;  %v17821_v45 = vpop.f32.mrf.mxu0 }
 0x3fc   : > { %v8530_v47 = vpop.f32.mrf.mxu1 }
 0x3fd   : > { %v17824_v50 = vadd.f32 %v8530_v47, %v17620_v28  ;;  %v17826_v63 = vpop.f32.mrf.mxu0 }
 0x3fe   : > { %v12798_v9 = vpop.f32.mrf.mxu1 }
 0x3ff   : > { %v17829_v54 = vadd.f32 %v12798_v9, %v17626_v38  ;;  %v17831_v27 = vpop.f32.mrf.mxu0 }
 0x400   : > { %v8543_v6 = vpop.f32.mrf.mxu1 }
 0x401   : > { %v17834_v12 = vadd.f32 %v8543_v6, %v17629_v21  ;;  %v17836_v46 = vpop.f32.mrf.mxu0 }
 0x402   : > { %v12799_v51 = vpop.f32.mrf.mxu1 }
 0x403   : > { %v17839_v1 = vadd.f32 %v12799_v51, %v17632_v49  ;;  %v17841_v36 = vpop.f32.mrf.mxu0 }
 0x404   : > { %v8546_v28 = vpop.f32.mrf.mxu1 }
 0x405   : > { %v17844_v5 = vadd.f32 %v8546_v28, %v17636_v14  ;;  %v17846_v59 = vpop.f32.mrf.mxu0 }
 0x406   : > { %v12802_v38 = vpop.f32.mrf.mxu1 }
 0x407   : > { %v17849_v55 = vadd.f32 %v12802_v38, %v17639_v10  ;;  %v17851_v18 = vpop.f32.mrf.mxu0 }
 0x408   : > { %v8559_v21 = vpop.f32.mrf.mxu1 }
 0x409   : > { %v17854_v39 = vadd.f32 %v8559_v21, %v17648_v60  ;;  %v17856_v13 = vpop.f32.mrf.mxu0 }
 0x40a   : > { %v12803_v49 = vpop.f32.mrf.mxu1 }
 0x40b   : > { %v17859_v31 = vadd.f32 %v12803_v49, %v17651_v23  ;;  %v17861_v47 = vpop.f32.mrf.mxu0 }
 0x40c   : > { %v8562_v14 = vpop.f32.mrf.mxu1  ;;  %18865 = vst [vmem:[#allocation44_spill] sm:$0xff] %v17861_v47 }
 0x40d   : > { %v17864_v9 = vadd.f32 %v8562_v14, %v17654_v44  ;;  %v17866_v6 = vpop.f32.mrf.mxu0 }
 0x40e   : > { %v12806_v10 = vpop.f32.mrf.mxu1  ;;  %18866 = vst [vmem:[#allocation45_spill] sm:$0xff] %v17866_v6 }
 0x40f   : > { %v17869_v51 = vadd.f32 %v12806_v10, %v17662_v42  ;;  %v17871_v28 = vpop.f32.mrf.mxu0 }
 0x410   : > { %v8575_v60 = vpop.f32.mrf.mxu1  ;;  %18867 = vst [vmem:[#allocation47_spill] sm:$0xff] %v17871_v28 }
 0x411   : > { %v17874_v38 = vadd.f32 %v8575_v60, %v17668_v0  ;;  %v17879_v49 = vpop.f32.mrf.mxu0 }
 0x412   : > { %v12807_v23 = vpop.f32.mrf.mxu1  ;;  %18868 = vst [vmem:[#allocation51_spill] sm:$0xff] %v17879_v49 }
 0x413   : > { %v17877_v21 = vadd.f32 %v12807_v23, %v17675_v16  ;;  %v17887_v10 = vpop.f32.mrf.mxu0 }
 0x414   : > { %v8578_v44 = vpop.f32.mrf.mxu1  ;;  %18869 = vst [vmem:[#allocation48_spill] sm:$0xff] %v17887_v10 }
 0x415   : > { %v17882_v14 = vadd.f32 %v8578_v44, %v17681_v8  ;;  %v17895_v23 = vpop.f32.mrf.mxu0 }
 0x416   : > { %v12810_v6 = vpop.f32.mrf.mxu1  ;;  %18870 = vst [vmem:[#allocation49_spill] sm:$0xff] %v17895_v23 }
 0x417   : > { %v17885_v42 = vadd.f32 %v12810_v6, %v17695_v58  ;;  %v17903_v6 = vpop.f32.mrf.mxu0 }
 0x418   : > { %v8591_v28 = vpop.f32.mrf.mxu1  ;;  %18871 = vst [vmem:[#allocation53_spill] sm:$0xff] %v17903_v6 }
 0x419   : > { %v17890_v0 = vadd.f32 %v8591_v28, %v17702_v52 }
 0x41a   : > { %v12811_v60 = vpop.f32.mrf.mxu1 }
 0x41b   : > { %v17893_v16 = vadd.f32 %v12811_v60, %v17711_v20  ;;  %v17911_v60 = vpop.f32.mrf.mxu0 }
 0x41c   : > { %v8594_v49 = vpop.f32.mrf.mxu1  ;;  %18872 = vst [vmem:[#allocation50_spill] sm:$0xff] %v17911_v60 }
 0x41d   : > { %v17898_v8 = vadd.f32 %v8594_v49, %v17719_v61  ;;  %v17916_v47 = vpop.f32.mrf.mxu0 }
 0x41e   : > { %v12814_v44 = vpop.f32.mrf.mxu1  ;;  %18873 = vst [vmem:[#allocation52_spill] sm:$0xff] %v17916_v47 }
 0x41f   : > { %v17901_v58 = vadd.f32 %v12814_v44, %v17729_v40  ;;  %v17924_v6 = vpop.f32.mrf.mxu0 }
 0x420   : > { %v8607_v10 = vpop.f32.mrf.mxu1  ;;  %18874 = vst [vmem:[#allocation56_spill] sm:$0xff] %v17924_v6 }
 0x421   : > { %v17906_v52 = vadd.f32 %v8607_v10, %v17734_v35 }
 0x422   : > { %v12815_v28 = vpop.f32.mrf.mxu1 }
 0x423   : > { %v17909_v20 = vadd.f32 %v12815_v28, %v17743_v43 }
 0x424   : > { %v8610_v23 = vpop.f32.mrf.mxu1 }
 0x425   : > { %v17914_v61 = vadd.f32 %v8610_v23, %v17751_v62  ;;  %v17932_v23 = vpop.f32.mrf.mxu0 }
 0x426   : > { %v12818_v49 = vpop.f32.mrf.mxu1  ;;  %18876 = vst [vmem:[#allocation58_spill] sm:$0xff] %v17932_v23 }
 0x427   : > { %v17919_v40 = vadd.f32 %v12818_v49, %v17766_v53  ;;  %v17937_v60 = vpop.f32.mrf.mxu0 }
 0x428   : > { %v8623_v44 = vpop.f32.mrf.mxu1  ;;  %18878 = vst [vmem:[#allocation60_spill] sm:$0xff] %v17937_v60 }
 0x429   : > { %v17922_v35 = vadd.f32 %v8623_v44, %v17772_v41 }
 0x42a   : > { %v12819_v10 = vpop.f32.mrf.mxu1 }
 0x42b   : > { %v17927_v43 = vadd.f32 %v12819_v10, %v17778_v17 }
 0x42c   : > { %v8626_v28 = vpop.f32.mrf.mxu1  ;;  %v17945_v6 = vpop.f32.mrf.mxu0 }
 0x42d   : > { %v17930_v62 = vadd.f32 %v8626_v28, %v17784_v33 }
 0x42f   : > { %18875 = vst [vmem:[#allocation54_spill] sm:$0xff] %v17930_v62  ;;  %v12822_v47 = vpop.f32.mrf.mxu1 }
 0x430   : > { %v17935_v53 = vadd.f32 %v12822_v47, %v17791_v32  ;;  %v17954_v47 = vpop.f32.mrf.mxu0 }
 0x431   : > { %v8639_v49 = vpop.f32.mrf.mxu1 }
 0x432   : > { %18877 = vst [vmem:[#allocation55_spill] sm:$0xff] %v17935_v53  ;;  %v17940_v41 = vadd.f32 %v8639_v49, %v17797_v25  ;;  %v17960_v49 = vpop.f32.mrf.mxu0 }
 0x433   : > { %v12823_v44 = vpop.f32.mrf.mxu1  ;;  %18882 = vst [vmem:[#allocation61_spill] sm:$0xff] %v17960_v49 }
 0x434   : > { %18879 = vst [vmem:[#allocation57_spill] sm:$0xff] %v17940_v41  ;;  %v17943_v17 = vadd.f32 %v12823_v44, %v17802_v7  ;;  %v17966_v23 = vpop.f32.mrf.mxu0 }
 0x435   : > { %v8642_v10 = vpop.f32.mrf.mxu1  ;;  %18885 = vst [vmem:[#allocation66_spill] sm:$0xff] %v17966_v23 }
 0x436   : > { %18880 = vst [vmem:[#allocation59_spill] sm:$0xff] %v17943_v17  ;;  %v17948_v33 = vadd.f32 %v8642_v10, %v17809_v57 }
 0x437   : > { %v17950_v28 = vpop.f32.mrf.mxu1 }
 0x438   : > { %18881 = vst [vmem:[#allocation62_spill] sm:$0xff] %v17948_v33 }
 0x439   : > { %v17952_v32 = vpop.f32.mrf.mxu1  ;;  %v17972_v33 = vpop.f32.mrf.mxu0 }
 0x43a   : > { %18888 = vst [vmem:[#allocation11_spill] sm:$0xff] %v17972_v33 }
 0x43b   : > { %v17956_v60 = vpop.f32.mrf.mxu1  ;;  %v17978_v53 = vpop.f32.mrf.mxu0 }
 0x43c   : > { %18890 = vst [vmem:[#allocation13_spill] sm:$0xff] %v17978_v53 }
 0x43d   : > { %v17958_v25 = vpop.f32.mrf.mxu1 }
 0x43f   : > { %v17962_v7 = vpop.f32.mrf.mxu1 }
 0x440   : > { %18883 = vst [vmem:[#allocation64_spill] sm:$0xff] %v17962_v7  ;;  %v17984_v7 = vpop.f32.mrf.mxu0 }
 0x441   : > { %v17964_v44 = vpop.f32.mrf.mxu1  ;;  %18893 = vst [vmem:[#allocation7_spill] sm:$0xff] %v17984_v7 }
 0x442   : > { %18884 = vst [vmem:[#allocation63_spill] sm:$0xff] %v17964_v44 }
 0x443   : > { %v17968_v57 = vpop.f32.mrf.mxu1 }
 0x444   : > { %18886 = vst [vmem:[#allocation65_spill] sm:$0xff] %v17968_v57  ;;  %v17990_v57 = vpop.f32.mrf.mxu0 }
 0x445   : > { %v17970_v10 = vpop.f32.mrf.mxu1  ;;  %18896 = vst [vmem:[#allocation14_spill] sm:$0xff] %v17990_v57 }
 0x446   : > { %18887 = vst [vmem:[#allocation67_spill] sm:$0xff] %v17970_v10 }
 0x447   : > { %v17974_v17 = vpop.f32.mrf.mxu1 }
 0x449   : > { %v17976_v41 = vpop.f32.mrf.mxu1 }
 0x44a   : > { %18889 = vst [vmem:[#allocation10_spill] sm:$0xff] %v17976_v41  ;;  %v17996_v41 = vpop.f32.mrf.mxu0 }
 0x44b   : > { %v17980_v62 = vpop.f32.mrf.mxu1  ;;  %18899 = vst [vmem:[#allocation22_spill] sm:$0xff] %v17996_v41 }
 0x44c   : > { %18891 = vst [vmem:[#allocation6_spill] sm:$0xff] %v17980_v62 }
 0x44d   : > { %v17982_v49 = vpop.f32.mrf.mxu1 }
 0x44e   : > { %18892 = vst [vmem:[#allocation8_spill] sm:$0xff] %v17982_v49  ;;  %v18002_v49 = vpop.f32.mrf.mxu0 }
 0x44f   : > { %v17986_v44 = vpop.f32.mrf.mxu1  ;;  %18902 = vst [vmem:[#allocation15_spill] sm:$0xff] %v18002_v49 }
 0x450   : > { %18894 = vst [vmem:[#allocation9_spill] sm:$0xff] %v17986_v44 }
 0x451   : > { %v17988_v23 = vpop.f32.mrf.mxu1 }
 0x452   : > { %18895 = vst [vmem:[#allocation39_spill] sm:$0xff] %v17988_v23  ;;  %v18008_v23 = vpop.f32.mrf.mxu0 }
 0x453   : > { %v17992_v10 = vpop.f32.mrf.mxu1  ;;  %18905 = vst [vmem:[#allocation23_spill] sm:$0xff] %v18008_v23 }
 0x454   : > { %18897 = vst [vmem:[#allocation5_spill] sm:$0xff] %v17992_v10 }
 0x455   : > { %v17994_v33 = vpop.f32.mrf.mxu1 }
 0x456   : > { %18898 = vst [vmem:[#allocation21_spill] sm:$0xff] %v17994_v33  ;;  %v18014_v33 = vpop.f32.mrf.mxu0 }
 0x457   : > { %v17998_v53 = vpop.f32.mrf.mxu1  ;;  %18908 = vst [vmem:[#allocation27_spill] sm:$0xff] %v18014_v33 }
 0x458   : > { %18900 = vst [vmem:[#allocation30_spill] sm:$0xff] %v17998_v53 }
 0x459   : > { %v18000_v62 = vpop.f32.mrf.mxu1 }
 0x45a   : > { %18901 = vst [vmem:[#allocation37_spill] sm:$0xff] %v18000_v62  ;;  %v18020_v62 = vpop.f32.mrf.mxu0 }
 0x45b   : > { %v18004_v7 = vpop.f32.mrf.mxu1 }
 0x45c   : > { %18903 = vst [vmem:[#allocation12_spill] sm:$0xff] %v18004_v7  ;;  %v18029_v23 = vpop.f32.mrf.mxu0 }
 0x45d   : > { %v18006_v44 = vpop.f32.mrf.mxu1 }
 0x45e   : > { %18904 = vst [vmem:[#allocation18_spill] sm:$0xff] %v18006_v44  ;;  %v18027_v44 = vld [vmem:[%s13229_s12 + $0x8] sm:$0xff]  }
 0x45f   : > { %v18010_v57 = vpop.f32.mrf.mxu1 }
 0x460   : > { %18906 = vst [vmem:[#allocation4_spill] sm:$0xff] %v18010_v57  ;;  %v18032_v57 = vld [vmem:[%s13229_s12] sm:$0xff]  }
 0x461   : > { %v18012_v10 = vpop.f32.mrf.mxu1 }
 0x462   : > { %18907 = vst [vmem:[#allocation29_spill] sm:$0xff] %v18012_v10  ;;  %v9126_v10 = vadd.f32 %v17738_v24, %v17807_v56  ;;  %v18052_v56 = vld [vmem:[%s13229_s12 + $0x18] sm:$0xff]  }
 0x463   : > { %v18016_v41 = vpop.f32.mrf.mxu1 }
 0x464   : > { %18909 = vst [vmem:[#allocation26_spill] sm:$0xff] %v18016_v41  ;;  %v9124_v41 = vadd.f32 %v17747_v11, %v17814_v3  ;;  %v18055_v11 = vld [vmem:[%s13229_s12 + $0x10] sm:$0xff]   ;;  %v18059_v3 = vadd.f32 %v17780_v37, %v17834_v12  ;;  %v18078_v37 = vadd.f32 %v17804_v29, %v17854_v39  ;;  %v18085_v12 = vld [vmem:[%s13229_s12 + $0x28] sm:$0xff]   ;;  %v18120_v39 = vadd.f32 %v17831_v27, %v17877_v21  ;;  %v18155_v27 = vld [vmem:[%s13229_s12 + $0x40] sm:$0xff]  }
 0x465   : > { %v18018_v53 = vpop.f32.mrf.mxu1 }
 0x466   : > { %18910 = vst [vmem:[#allocation24_spill] sm:$0xff] %v18018_v53  ;;  %v9127_v53 = vadd.f32 %v17757_v30, %v17819_v48  ;;  %v18063_v30 = vadd.f32 %v17787_v22, %v17839_v1  ;;  %v18080_v22 = vpop.f32.mrf.mxu0  ;;  %v18088_v1 = vld [vmem:[%s13229_s12 + $0x20] sm:$0xff]   ;;  %v9483_v21 = vadd.f32 %v17952_v32, %v9124_v41  ;;  %v18925_v41 = vld [vmem:[#allocation48_spill] sm:$0xff] }
 0x467   : > { %v18022_v49 = vpop.f32.mrf.mxu1 }
 0x468   : > { %18911 = vst [vmem:[#allocation20_spill] sm:$0xff] %v18022_v49  ;;  %v18048_v49 = vadd.f32 %v17774_v4, %v17829_v54  ;;  %v18108_v54 = vadd.f32 %v17826_v63, %v17874_v38  ;;  %v18160_v38 = vadd.f32 %v17856_v13, %v17898_v8  ;;  %v18180_v8 = vld [vmem:[%s13229_s12 + $0x58] sm:$0xff]   ;;  %v18196_v13 = vadd.f32 %v18925_v41, %v17919_v40 }
 0x469   : > { %v18024_v7 = vpop.f32.mrf.mxu1  ;;  %18922 = vst [vmem:[#allocation28_spill] sm:$0xff] %v18180_v8  ;;  %v10209_v41 = vadd.f32 %v17954_v47, %v9483_v21  ;;  %v18937_v47 = vld [vmem:[#allocation57_spill] sm:$0xff]  ;;  %v18938_v21 = vld [vmem:[#allocation56_spill] sm:$0xff] }
 0x46a   : > { %18912 = vst [vmem:[#allocation16_spill] sm:$0xff] %v18024_v7  ;;  %v18044_v7 = vadd.f32 %v17768_v19, %v17824_v50  ;;  %v18067_v19 = vadd.f32 %v17793_v2, %v17844_v5  ;;  %v18074_v50 = vadd.f32 %v17799_v26, %v17849_v55  ;;  %v18092_v26 = vadd.f32 %v17811_v15, %v17859_v31  ;;  %v18113_v31 = vld [vmem:[%s13229_s12 + $0x38] sm:$0xff]   ;;  %v18131_v15 = vpop.f32.mrf.mxu0 }
 0x46b   : > { %v18038_v33 = vpop.f32.mrf.mxu1  ;;  %v18096_v5 = vadd.f32 %v17816_v34, %v17864_v9  ;;  %v18104_v2 = vadd.f32 %v17821_v45, %v17869_v51  ;;  %v18116_v9 = vld [vmem:[%s13229_s12 + $0x30] sm:$0xff]   ;;  %v18124_v45 = vadd.f32 %v17836_v46, %v17882_v14  ;;  %v9485_v34 = vadd.f32 %v17950_v28, %v9126_v10  ;;  %v18140_v46 = vld [vmem:[%s13229_s12 + $0x48] sm:$0xff]  }
 0x46c   : > { %18913 = vst [vmem:[#allocation17_spill] sm:$0xff] %v18038_v33  ;;  %v18135_v55 = vadd.f32 %v17841_v36, %v17885_v42  ;;  %v18144_v14 = vadd.f32 %v17846_v59, %v17890_v0  ;;  %v18148_v28 = vadd.f32 %v17851_v18, %v17893_v16  ;;  %v18918_v59 = vld [vmem:[#allocation44_spill] sm:$0xff]  ;;  %v18919_v16 = vld [vmem:[#allocation45_spill] sm:$0xff]  ;;  %v18920_v42 = vld [vmem:[#allocation47_spill] sm:$0xff]  ;;  %v18183_v32 = vpop.f32.mrf.mxu0  ;;  %v18247_v8 = vadd.f32 %v18938_v21, %v18937_v47 }
 0x46d   : > { %v18069_v4 = vpop.f32.mrf.mxu1  ;;  %v18164_v0 = vadd.f32 %v18918_v59, %v17901_v58  ;;  %v18169_v36 = vadd.f32 %v18919_v16, %v17906_v52  ;;  %v18173_v63 = vadd.f32 %v18920_v42, %v17909_v20  ;;  %v9486_v58 = vadd.f32 %v17956_v60, %v9127_v53  ;;  %v18923_v52 = vld [vmem:[#allocation51_spill] sm:$0xff]  ;;  %v18192_v16 = vld [vmem:[%s13229_s12 + $0x50] sm:$0xff]   ;;  %v18926_v18 = vld [vmem:[#allocation49_spill] sm:$0xff] }
 0x46e   : > { %18914 = vst [vmem:[#allocation19_spill] sm:$0xff] %v18069_v4  ;;  %v18187_v59 = vadd.f32 %v18923_v52, %v17914_v61  ;;  %v10211_v20 = vadd.f32 %v17945_v6, %v9485_v34  ;;  %18924 = vst [vmem:[#allocation35_spill] sm:$0xff] %v18192_v16  ;;  %v18200_v60 = vadd.f32 %v18926_v18, %v17922_v35  ;;  %v18205_v53 = vld [vmem:[%s18552_s5] ss:$0 sm:$0xff]  ;;  %v18214_v18 = vld [vmem:[%s13229_s12 + $0x68] sm:$0xff]  }
 0x46f   : > { %v18098_v29 = vpop.f32.mrf.mxu1  ;;  %v9484_v52 = vadd.f32 %v17958_v25, %v18044_v7  ;;  %v18927_v42 = vld [vmem:[#allocation53_spill] sm:$0xff]  ;;  %v18227_v25 = vld [vmem:[%s18553_s6] ss:$0 sm:$0xff]  ;;  %v18933_v34 = vld [vmem:[#allocation64_spill] sm:$0xff]  ;;  %18939 = vst [vmem:[#allocation40_spill] sm:$0xff] %v18247_v8 }
 0x470   : > { %18915 = vst [vmem:[#allocation33_spill] sm:$0xff] %v18098_v29  ;;  %v18218_v24 = vadd.f32 %v18927_v42, %v17927_v43  ;;  %v18931_v42 = vld [vmem:[#allocation61_spill] sm:$0xff]  ;;  %v18934_v29 = vld [vmem:[#allocation55_spill] sm:$0xff]  ;;  %v18935_v4 = vld [vmem:[#allocation52_spill] sm:$0xff] }
 0x471   : > { %v18126_v51 = vpop.f32.mrf.mxu1  ;;  %v10212_v35 = vadd.f32 %v18931_v42, %v9486_v58  ;;  %v18940_v42 = vld [vmem:[#allocation66_spill] sm:$0xff] }
 0x472   : > { %18916 = vst [vmem:[#allocation31_spill] sm:$0xff] %v18126_v51  ;;  %v9489_v51 = vadd.f32 %v18933_v34, %v18048_v49  ;;  %v18941_v49 = vld [vmem:[#allocation63_spill] sm:$0xff]  ;;  %v18944_v16 = vld [vmem:[#allocation58_spill] sm:$0xff] }
 0x473   : > { %v18150_v10 = vpop.f32.mrf.mxu1  ;;  %v9487_v34 = vadd.f32 %v18941_v49, %v18059_v3  ;;  %v18948_v49 = vld [vmem:[#allocation62_spill] sm:$0xff] }
 0x474   : > { %18917 = vst [vmem:[#allocation25_spill] sm:$0xff] %v18150_v10  ;;  %v18929_v10 = vld [vmem:[#allocation50_spill] sm:$0xff] }
 0x475   : > { %v18175_v48 = vpop.f32.mrf.mxu1 }
 0x476   : > { %18921 = vst [vmem:[#allocation34_spill] sm:$0xff] %v18175_v48  ;;  %v18928_v48 = vld [vmem:[#allocation54_spill] sm:$0xff] }
 0x477   : > { %v12930_v61 = vpop.f32.mrf.mxu1  ;;  %v18222_v6 = vadd.f32 %v18929_v10, %v18928_v48  ;;  %v18237_v10 = vld [vmem:[%s13229_s12 + $0x60] sm:$0xff]   ;;  %v10210_v48 = vadd.f32 %v18940_v42, %v9484_v52 }
 0x478   : > { %v10681_v40 = vadd.f32 %v12930_v61, %v10211_v20  ;;  %v18231_v20 = vpop.f32.mrf.mxu0  ;;  %18932 = vst [vmem:[#allocation32_spill] sm:$0xff] %v18237_v10 }
 0x479   : > { %18930 = vst [vmem:[#allocation38_spill] sm:$0xff] %v18222_v6  ;;  %v10552_v7 = vpop.f32.mrf.mxu1  ;;  %v18243_v6 = vadd.f32 %v18935_v4, %v18934_v29  ;;  %v18942_v4 = vld [vmem:[#allocation65_spill] sm:$0xff] }
 0x47a   : > { %v10783_v61 = vmul.f32 %v18205_v53, %v10681_v40  ;;  %v10679_v43 = vadd.f32 %v10552_v7, %v10209_v41  ;;  %v9490_v29 = vadd.f32 %v18942_v4, %v18063_v30  ;;  %v18947_v30 = vld [vmem:[#allocation67_spill] sm:$0xff] }
 0x47b   : > { %18936 = vst [vmem:[#allocation36_spill] sm:$0xff] %v18243_v6  ;;  %v12931_v33 = vpop.f32.mrf.mxu1  ;;  %v18943_v6 = vld [vmem:[#allocation59_spill] sm:$0xff]  ;;  %v9488_v42 = vadd.f32 %v18947_v30, %v18067_v19  ;;  %v9493_v19 = vadd.f32 %v17974_v17, %v18074_v50 }
 0x47c   : > { %v10821_v58 = vadd.f32 %v18227_v25, %v10783_v61  ;;  %v10781_v41 = vmul.f32 %v18205_v53, %v10679_v43  ;;  %v10682_v7 = vadd.f32 %v12931_v33, %v10212_v35  ;;  %v18259_v47 = vadd.f32 %v18944_v16, %v18943_v6  ;;  %v18262_v61 = vpop.f32.mrf.mxu0  ;;  %v18949_v16 = vld [vmem:[#allocation60_spill] sm:$0xff]  ;;  %v18950_v4 = vld [vmem:[#allocation11_spill] sm:$0xff] }
 0x47d   : > { %v10555_v21 = vpop.f32.mrf.mxu1  ;;  %v18946_v33 = vunpack.c.l.bf16 %v18027_v44  ;;  %v18272_v6 = vadd.f32 %v18949_v16, %v18948_v49  ;;  %v10215_v40 = vadd.f32 %v18950_v4, %v9489_v51  ;;  %v18953_v30 = vld [vmem:[#allocation7_spill] sm:$0xff]  ;;  %v18954_v16 = vunpack.c.h.bf16 %v18027_v44  ;;  %v18955_v4 = vld [vmem:[#allocation10_spill] sm:$0xff] }
 0x47e   : > { %18945 = vst [vmem:[#allocation41_spill] sm:$0xff] %v18259_v47  ;;  %v10819_v52 = vadd.f32 %v18227_v25, %v10781_v41  ;;  %v10784_v3 = vmul.f32 %v18205_v53, %v10682_v7  ;;  %v10680_v43 = vadd.f32 %v10555_v21, %v10210_v48  ;;  %v18952_v7 = vld [vmem:[#allocation13_spill] sm:$0xff]  ;;  %v18291_v49 = vpop.f32.mrf.mxu0 }
 0x47f   : > { %v10853_v35 = vadd.f32 %v18946_v33, %v10821_v58  ;;  %v12934_v47 = vpop.f32.mrf.mxu1  ;;  %v18951_v58 = vunpack.c.l.bf16 %v18032_v57  ;;  %v10213_v21 = vadd.f32 %v18952_v7, %v9487_v34  ;;  %v18956_v7 = vld [vmem:[#allocation14_spill] sm:$0xff] }
 0x480   : > { %v10822_v41 = vadd.f32 %v18227_v25, %v10784_v3  ;;  %v10782_v48 = vmul.f32 %v18205_v53, %v10680_v43  ;;  %v10685_v51 = vadd.f32 %v12934_v47, %v10215_v40  ;;  %v10214_v8 = vadd.f32 %v18956_v7, %v9488_v42  ;;  %v18309_v42 = vpop.f32.mrf.mxu0 }
 0x481   : > { %v10885_v10 = vmax.f32 %v10853_v35, 0.0  ;;  %v10851_v33 = vadd.f32 %v18951_v58, %v10819_v52  ;;  %v10568_v35 = vpop.f32.mrf.mxu1  ;;  %v10216_v52 = vadd.f32 %v18953_v30, %v9490_v29  ;;  %v9491_v58 = vadd.f32 %v18955_v4, %v18078_v37 }
 0x482   : > { %v10854_v17 = vadd.f32 %v18954_v16, %v10822_v41  ;;  %v10820_v50 = vadd.f32 %v18227_v25, %v10782_v48  ;;  %v10787_v40 = vmul.f32 %v18205_v53, %v10685_v51  ;;  %v10683_v47 = vadd.f32 %v10568_v35, %v10213_v21  ;;  %v18958_v48 = vld [vmem:[#allocation6_spill] sm:$0xff] }
 0x483   : > { %v11933_v3 = vpack.c.bf16 %v10885_v10, %v10885_v10  ;;  %v10883_v43 = vmax.f32 %v10851_v33, 0.0  ;;  %v12935_v34 = vpop.f32.mrf.mxu1  ;;  %v18957_v33 = vunpack.c.h.bf16 %v18032_v57  ;;  %v9494_v30 = vadd.f32 %v18958_v48, %v18092_v26  ;;  %v18959_v35 = vld [vmem:[#allocation22_spill] sm:$0xff] }
 0x484   : > { %v10886_v10 = vmax.f32 %v10854_v17, 0.0  ;;  %v10686_v41 = vadd.f32 %v12935_v34, %v10216_v52  ;;  %v10825_v37 = vadd.f32 %v18227_v25, %v10787_v40  ;;  %v10785_v51 = vmul.f32 %v18205_v53, %v10683_v47  ;;  %v18960_v17 = vld [vmem:[#allocation8_spill] sm:$0xff] }
 0x485   : > { %11045 = vst.msk [vmem:[%s18287_s27 + $0x8] sm:$0xf] %vm280_vm1, %v11933_v3  ;;  %v11931_v29 = vpack.c.bf16 %v10883_v43, %v10883_v43  ;;  %v10852_v44 = vadd.f32 %v18957_v33, %v10820_v50  ;;  %v10571_v21 = vpop.f32.mrf.mxu1  ;;  %v10219_v16 = vadd.f32 %v18959_v35, %v9493_v19  ;;  %v9492_v26 = vadd.f32 %v18960_v17, %v18096_v5  ;;  %v18962_v19 = vld [vmem:[#allocation15_spill] sm:$0xff]  ;;  %v18963_v33 = vld [vmem:[#allocation9_spill] sm:$0xff]  ;;  %v18329_v35 = vpop.f32.mrf.mxu0 }
 0x486   : > { %v11934_v3 = vpack.c.bf16 %v10886_v10, %v10886_v10  ;;  %v10788_v57 = vmul.f32 %v18205_v53, %v10686_v41  ;;  %v10684_v52 = vadd.f32 %v10571_v21, %v10214_v8  ;;  %v18961_v50 = vunpack.c.l.bf16 %v18052_v56 }
 0x487   : > { %11043 = vst.msk [vmem:[%s18287_s27] sm:$0xf] %vm280_vm1, %v11931_v29  ;;  %v10884_v43 = vmax.f32 %v10852_v44, 0.0  ;;  %v10823_v40 = vadd.f32 %v18227_v25, %v10785_v51  ;;  %v12938_v47 = vpop.f32.mrf.mxu1  ;;  %v10217_v34 = vadd.f32 %v18962_v19, %v9491_v58  ;;  %v9497_v5 = vadd.f32 %v18963_v33, %v18104_v2  ;;  %v18965_v51 = vld [vmem:[#allocation23_spill] sm:$0xff] }
 0x488   : > { %v10857_v4 = vadd.f32 %v18961_v50, %v10825_v37  ;;  %11046 = vst.msk [vmem:[%s18287_s27 + $0xc] sm:$0xf] %vm280_vm1, %v11934_v3  ;;  %v10826_v29 = vadd.f32 %v18227_v25, %v10788_v57  ;;  %v10786_v10 = vmul.f32 %v18205_v53, %v10684_v52  ;;  %v10689_v8 = vadd.f32 %v12938_v47, %v10219_v16  ;;  %v18967_v57 = vld [vmem:[#allocation39_spill] sm:$0xff] }
 0x489   : > { %v11932_v7 = vpack.c.bf16 %v10884_v43, %v10884_v43  ;;  %v18964_v41 = vunpack.c.l.bf16 %v18055_v11  ;;  %v10584_v37 = vpop.f32.mrf.mxu1  ;;  %v10220_v21 = vadd.f32 %v18965_v51, %v9494_v30  ;;  %v18966_v58 = vunpack.c.h.bf16 %v18052_v56  ;;  %v18968_v30 = vld [vmem:[#allocation27_spill] sm:$0xff] }
 0x48a   : > { %v10889_v44 = vmax.f32 %v10857_v4, 0.0  ;;  %v10824_v16 = vadd.f32 %v18227_v25, %v10786_v10  ;;  %v10791_v43 = vmul.f32 %v18205_v53, %v10689_v8  ;;  %v10687_v2 = vadd.f32 %v10584_v37, %v10217_v34  ;;  %v18970_v10 = vld [vmem:[#allocation5_spill] sm:$0xff] }
 0x48b   : > { %v10855_v48 = vadd.f32 %v18964_v41, %v10823_v40  ;;  %11044 = vst.msk [vmem:[%s18287_s27 + $0x4] sm:$0xf] %vm280_vm1, %v11932_v7  ;;  %v10858_v3 = vadd.f32 %v18966_v58, %v10826_v29  ;;  %v9495_v52 = vadd.f32 %v18967_v57, %v18108_v54  ;;  %v12939_v4 = vpop.f32.mrf.mxu1  ;;  %v10218_v40 = vadd.f32 %v18968_v30, %v9492_v26  ;;  %v18972_v58 = vld [vmem:[#allocation21_spill] sm:$0xff] }
 0x48c   : > { %v11937_v17 = vpack.c.bf16 %v10889_v44, %v10889_v44  ;;  %v18969_v19 = vunpack.c.h.bf16 %v18055_v11  ;;  %v10829_v56 = vadd.f32 %v18227_v25, %v10791_v43  ;;  %v10789_v29 = vmul.f32 %v18205_v53, %v10687_v2  ;;  %v18349_v44 = vpop.f32.mrf.mxu0 }
 0x48d   : > { %v10887_v50 = vmax.f32 %v10855_v48, 0.0  ;;  %v10890_v47 = vmax.f32 %v10858_v3, 0.0  ;;  %v9498_v34 = vadd.f32 %v18970_v10, %v18120_v39  ;;  %v10690_v8 = vadd.f32 %v12939_v4, %v10220_v21  ;;  %v10587_v33 = vpop.f32.mrf.mxu1 }
 0x48e   : > { %v10856_v7 = vadd.f32 %v18969_v19, %v10824_v16  ;;  %11049 = vst.msk [vmem:[%s18287_s27 + $0x18] sm:$0xf] %vm280_vm1, %v11937_v17  ;;  %v10223_v26 = vadd.f32 %v18020_v62, %v9497_v5  ;;  %v18971_v48 = vunpack.c.l.bf16 %v18085_v12  ;;  %v10827_v51 = vadd.f32 %v18227_v25, %v10789_v29  ;;  %v18975_v29 = vld [vmem:[#allocation37_spill] sm:$0xff] }
 0x48f   : > { %v11935_v54 = vpack.c.bf16 %v10887_v50, %v10887_v50  ;;  %v11938_v11 = vpack.c.bf16 %v10890_v47, %v10890_v47  ;;  %v9496_v39 = vadd.f32 %v18972_v58, %v18124_v45  ;;  %v10792_v21 = vmul.f32 %v18205_v53, %v10690_v8  ;;  %v12942_v16 = vpop.f32.mrf.mxu1  ;;  %v18974_v50 = vld [vmem:[#allocation30_spill] sm:$0xff] }
 0x490   : > { %v10888_v41 = vmax.f32 %v10856_v7, 0.0  ;;  %v10861_v37 = vadd.f32 %v18971_v48, %v10829_v56  ;;  %v10688_v3 = vadd.f32 %v10587_v33, %v10218_v40  ;;  %v10221_v62 = vadd.f32 %v18029_v23, %v9495_v52  ;;  %v18369_v23 = vpop.f32.mrf.mxu0  ;;  %v18977_v48 = vld [vmem:[#allocation12_spill] sm:$0xff] }
 0x491   : > { %11047 = vst.msk [vmem:[%s18287_s27 + $0x10] sm:$0xf] %vm280_vm1, %v11935_v54  ;;  %11050 = vst.msk [vmem:[%s18287_s27 + $0x1c] sm:$0xf] %vm280_vm1, %v11938_v11  ;;  %v18973_v2 = vunpack.c.l.bf16 %v18088_v1  ;;  %v10693_v17 = vadd.f32 %v12942_v16, %v10223_v26  ;;  %v9501_v45 = vadd.f32 %v18974_v50, %v18135_v55  ;;  %v10830_v4 = vadd.f32 %v18227_v25, %v10792_v21  ;;  %v10600_v40 = vpop.f32.mrf.mxu1 }
 0x492   : > { %v11936_v5 = vpack.c.bf16 %v10888_v41, %v10888_v41  ;;  %v10893_v43 = vmax.f32 %v10861_v37, 0.0  ;;  %v10790_v30 = vmul.f32 %v18205_v53, %v10688_v3  ;;  %v10224_v47 = vadd.f32 %v18080_v22, %v9498_v34  ;;  %v18389_v3 = vpop.f32.mrf.mxu0 }
 0x493   : > { %v10859_v57 = vadd.f32 %v18973_v2, %v10827_v51  ;;  %v10795_v7 = vmul.f32 %v18205_v53, %v10693_v17  ;;  %v10691_v56 = vadd.f32 %v10600_v40, %v10221_v62  ;;  %v9499_v55 = vadd.f32 %v18975_v29, %v18144_v14  ;;  %v12943_v33 = vpop.f32.mrf.mxu1  ;;  %v18982_v40 = vld [vmem:[#allocation4_spill] sm:$0xff] }
 0x494   : > { %11048 = vst.msk [vmem:[%s18287_s27 + $0x14] sm:$0xf] %vm280_vm1, %v11936_v5  ;;  %v11941_v52 = vpack.c.bf16 %v10893_v43, %v10893_v43  ;;  %v18976_v10 = vunpack.c.h.bf16 %v18085_v12  ;;  %v10828_v8 = vadd.f32 %v18227_v25, %v10790_v30  ;;  %v10222_v22 = vadd.f32 %v18131_v15, %v9496_v39  ;;  %v18980_v5 = vld [vmem:[#allocation18_spill] sm:$0xff] }
 0x495   : > { %v10891_v19 = vmax.f32 %v10859_v57, 0.0  ;;  %v10833_v26 = vadd.f32 %v18227_v25, %v10795_v7  ;;  %v10793_v11 = vmul.f32 %v18205_v53, %v10691_v56  ;;  %v10694_v41 = vadd.f32 %v12943_v33, %v10224_v47  ;;  %v10603_v58 = vpop.f32.mrf.mxu1  ;;  %v18409_v7 = vpop.f32.mrf.mxu0 }
 0x496   : > { %v10862_v54 = vadd.f32 %v18976_v10, %v10830_v4  ;;  %11053 = vst.msk [vmem:[%s18287_s27 + $0x28] sm:$0xf] %vm280_vm1, %v11941_v52  ;;  %v9502_v14 = vadd.f32 %v18977_v48, %v18148_v28  ;;  %v18978_v12 = vunpack.c.h.bf16 %v18088_v1  ;;  %v10227_v21 = vadd.f32 %v18183_v32, %v9501_v45 }
 0x497   : > { %v11939_v34 = vpack.c.bf16 %v10891_v19, %v10891_v19  ;;  %v18979_v15 = vunpack.c.l.bf16 %v18113_v31  ;;  %v10831_v16 = vadd.f32 %v18227_v25, %v10793_v11  ;;  %v10796_v62 = vmul.f32 %v18205_v53, %v10694_v41  ;;  %v12946_v57 = vpop.f32.mrf.mxu1 }
 0x498   : > { %v10894_v37 = vmax.f32 %v10862_v54, 0.0  ;;  %v10860_v51 = vadd.f32 %v18978_v12, %v10828_v8  ;;  %v10692_v28 = vadd.f32 %v10603_v58, %v10222_v22  ;;  %v9500_v1 = vadd.f32 %v18980_v5, %v18160_v38  ;;  %v18984_v8 = vld [vmem:[#allocation29_spill] sm:$0xff] }
 0x499   : > { %11051 = vst.msk [vmem:[%s18287_s27 + $0x20] sm:$0xf] %vm280_vm1, %v11939_v34  ;;  %v10865_v39 = vadd.f32 %v18979_v15, %v10833_v26  ;;  %v10225_v32 = vadd.f32 %v18231_v20, %v9499_v55  ;;  %v18981_v50 = vunpack.c.l.bf16 %v18116_v9  ;;  %v10834_v4 = vadd.f32 %v18227_v25, %v10796_v62  ;;  %v10616_v19 = vpop.f32.mrf.mxu1 }
 0x49a   : > { %v11942_v43 = vpack.c.bf16 %v10894_v37, %v10894_v37  ;;  %v10892_v2 = vmax.f32 %v10860_v51, 0.0  ;;  %v10794_v30 = vmul.f32 %v18205_v53, %v10692_v28  ;;  %v9505_v47 = vadd.f32 %v18982_v40, %v18164_v0 }
 0x49b   : > { %v10897_v17 = vmax.f32 %v10865_v39, 0.0  ;;  %v10863_v45 = vadd.f32 %v18981_v50, %v10831_v16  ;;  %v10697_v52 = vadd.f32 %v12946_v57, %v10227_v21  ;;  %v10228_v20 = vadd.f32 %v18262_v61, %v9502_v14  ;;  %v12947_v34 = vpop.f32.mrf.mxu1  ;;  %v18986_v14 = vld [vmem:[#allocation26_spill] sm:$0xff]  ;;  %v18987_v16 = vld [vmem:[#allocation24_spill] sm:$0xff] }
 0x49c   : > { %11054 = vst.msk [vmem:[%s18287_s27 + $0x2c] sm:$0xf] %vm280_vm1, %v11942_v43  ;;  %v11940_v38 = vpack.c.bf16 %v10892_v2, %v10892_v2  ;;  %v18983_v55 = vunpack.c.h.bf16 %v18113_v31  ;;  %v10832_v54 = vadd.f32 %v18227_v25, %v10794_v30  ;;  %v9503_v0 = vadd.f32 %v18984_v8, %v18169_v36 }
 0x49d   : > { %v11945_v56 = vpack.c.bf16 %v10897_v17, %v10897_v17  ;;  %v10895_v29 = vmax.f32 %v10863_v45, 0.0  ;;  %v10799_v33 = vmul.f32 %v18205_v53, %v10697_v52  ;;  %v10695_v22 = vadd.f32 %v10616_v19, %v10225_v32  ;;  %v10619_v51 = vpop.f32.mrf.mxu1  ;;  %v18989_v17 = vld [vmem:[#allocation20_spill] sm:$0xff] }
 0x49e   : > { %v10866_v10 = vadd.f32 %v18983_v55, %v10834_v4  ;;  %11052 = vst.msk [vmem:[%s18287_s27 + $0x24] sm:$0xf] %vm280_vm1, %v11940_v38  ;;  %v10226_v61 = vadd.f32 %v18291_v49, %v9500_v1  ;;  %v18985_v31 = vunpack.c.h.bf16 %v18116_v9  ;;  %v10698_v48 = vadd.f32 %v12947_v34, %v10228_v20  ;;  %v12921_v49 = vpop.f32.mrf.mxu0  ;;  %v18994_v34 = vld [vmem:[#allocation17_spill] sm:$0xff] }
 0x49f   : > { %11057 = vst.msk [vmem:[%s18287_s27 + $0x38] sm:$0xf] %vm280_vm1, %v11945_v56  ;;  %v11943_v26 = vpack.c.bf16 %v10895_v29, %v10895_v29  ;;  %v9506_v36 = vadd.f32 %v18986_v14, %v18173_v63  ;;  %v10837_v37 = vadd.f32 %v18227_v25, %v10799_v33  ;;  %v10797_v12 = vmul.f32 %v18205_v53, %v10695_v22  ;;  %v12950_v1 = vpop.f32.mrf.mxu1 }
 0x4a0   : > { %v10898_v11 = vmax.f32 %v10866_v10, 0.0  ;;  %v10864_v41 = vadd.f32 %v18985_v31, %v10832_v54  ;;  %v10231_v58 = vadd.f32 %v18309_v42, %v9505_v47  ;;  %v10800_v9 = vmul.f32 %v18205_v53, %v10698_v48  ;;  %v10181_v47 = vpop.f32.mrf.mxu0  ;;  %v18995_v48 = vld [vmem:[#allocation28_spill] sm:$0xff] }
 0x4a1   : > { %11055 = vst.msk [vmem:[%s18287_s27 + $0x30] sm:$0xf] %vm280_vm1, %v11943_v26  ;;  %v10696_v39 = vadd.f32 %v10619_v51, %v10226_v61  ;;  %v9504_v62 = vadd.f32 %v18987_v16, %v18187_v59  ;;  %v18988_v63 = vunpack.c.l.bf16 %v18140_v46  ;;  %v10835_v5 = vadd.f32 %v18227_v25, %v10797_v12  ;;  %v10632_v30 = vpop.f32.mrf.mxu1  ;;  %v18998_v12 = vld [vmem:[#allocation19_spill] sm:$0xff] }
 0x4a2   : > { %v11946_v21 = vpack.c.bf16 %v10898_v11, %v10898_v11  ;;  %v10896_v15 = vmax.f32 %v10864_v41, 0.0  ;;  %v10229_v42 = vadd.f32 %v18329_v35, %v9503_v0  ;;  %v10838_v2 = vadd.f32 %v18227_v25, %v10800_v9  ;;  %v12924_v54 = vpop.f32.mrf.mxu0  ;;  %v18999_v16 = vld [vmem:[#allocation35_spill] sm:$0xff] }
 0x4a3   : > { %v10869_v28 = vadd.f32 %v18988_v63, %v10837_v37  ;;  %v10798_v57 = vmul.f32 %v18205_v53, %v10696_v39  ;;  %v10701_v32 = vadd.f32 %v12950_v1, %v10231_v58  ;;  %v9509_v59 = vadd.f32 %v18989_v17, %v18196_v13  ;;  %v18992_v13 = vld [vmem:[#allocation16_spill] sm:$0xff]  ;;  %v12951_v10 = vpop.f32.mrf.mxu1  ;;  %v18997_v37 = vld [vmem:[#allocation38_spill] sm:$0xff] }
 0x4a4   : > { %11058 = vst.msk [vmem:[%s18287_s27 + $0x3c] sm:$0xf] %vm280_vm1, %v11946_v21  ;;  %v11944_v43 = vpack.c.bf16 %v10896_v15, %v10896_v15  ;;  %v18990_v45 = vunpack.c.l.bf16 %v18155_v27  ;;  %v10232_v40 = vadd.f32 %v18349_v44, %v9506_v36  ;;  %v18991_v35 = vunpack.c.h.bf16 %v18140_v46 }
 0x4a5   : > { %v10901_v50 = vmax.f32 %v10869_v28, 0.0  ;;  %v10836_v52 = vadd.f32 %v18227_v25, %v10798_v57  ;;  %v10803_v19 = vmul.f32 %v18205_v53, %v10701_v32  ;;  %v10699_v20 = vadd.f32 %v10632_v30, %v10229_v42  ;;  %v10635_v11 = vpop.f32.mrf.mxu1 }
 0x4a6   : > { %v10867_v4 = vadd.f32 %v18990_v45, %v10835_v5  ;;  %11056 = vst.msk [vmem:[%s18287_s27 + $0x34] sm:$0xf] %vm280_vm1, %v11944_v43  ;;  %v10870_v38 = vadd.f32 %v18991_v35, %v10838_v2  ;;  %v9507_v56 = vadd.f32 %v18992_v13, %v18200_v60  ;;  %v10230_v44 = vadd.f32 %v18369_v23, %v9504_v62  ;;  %v19001_v2 = vld [vmem:[#allocation32_spill] sm:$0xff]  ;;  %v19003_v45 = vld [vmem:[#allocation33_spill] sm:$0xff] }
 0x4a7   : > { %v11949_v29 = vpack.c.bf16 %v10901_v50, %v10901_v50  ;;  %v18993_v46 = vunpack.c.h.bf16 %v18155_v27  ;;  %v10841_v33 = vadd.f32 %v18227_v25, %v10803_v19  ;;  %v10801_v22 = vmul.f32 %v18205_v53, %v10699_v20  ;;  %v12954_v21 = vpop.f32.mrf.mxu1  ;;  %v19002_v50 = vld [vmem:[#allocation36_spill] sm:$0xff] }
 0x4a8   : > { %v10899_v55 = vmax.f32 %v10867_v4, 0.0  ;;  %v10902_v8 = vmax.f32 %v10870_v38, 0.0  ;;  %v9510_v61 = vadd.f32 %v18994_v34, %v18218_v24  ;;  %v10702_v26 = vadd.f32 %v12951_v10, %v10232_v40 }
 0x4a9   : > { %v10868_v0 = vadd.f32 %v18993_v46, %v10836_v52  ;;  %11061 = vst.msk [vmem:[%s18287_s27 + $0x48] sm:$0xf] %vm280_vm1, %v11949_v29  ;;  %v10235_v23 = vadd.f32 %v18389_v3, %v9509_v59  ;;  %v18996_v27 = vunpack.c.l.bf16 %v18995_v48  ;;  %v10839_v36 = vadd.f32 %v18227_v25, %v10801_v22  ;;  %v10194_v3 = vpop.f32.mrf.mxu0  ;;  %v10648_v42 = vpop.f32.mrf.mxu1  ;;  %v19005_v29 = vld [vmem:[#allocation40_spill] sm:$0xff] }
 0x4aa   : > { %v11947_v60 = vpack.c.bf16 %v10899_v55, %v10899_v55  ;;  %v11950_v31 = vpack.c.bf16 %v10902_v8, %v10902_v8  ;;  %v9508_v51 = vadd.f32 %v18998_v12, %v18997_v37  ;;  %v10804_v24 = vmul.f32 %v18205_v53, %v10702_v26  ;;  %v19006_v55 = vld [vmem:[#allocation31_spill] sm:$0xff]  ;;  %v19008_v8 = vld [vmem:[#allocation25_spill] sm:$0xff] }
 0x4ab   : > { %v10900_v41 = vmax.f32 %v10868_v0, 0.0  ;;  %v10873_v14 = vadd.f32 %v18996_v27, %v10841_v33  ;;  %v10700_v58 = vadd.f32 %v10635_v11, %v10230_v44  ;;  %v10233_v15 = vadd.f32 %v18409_v7, %v9507_v56  ;;  %v12955_v38 = vpop.f32.mrf.mxu1  ;;  %v12925_v52 = vpop.f32.mrf.mxu0  ;;  %v19007_v44 = vld [vmem:[#allocation41_spill] sm:$0xff] }
 0x4ac   : > { %11059 = vst.msk [vmem:[%s18287_s27 + $0x40] sm:$0xf] %vm280_vm1, %v11947_v60  ;;  %11062 = vst.msk [vmem:[%s18287_s27 + $0x4c] sm:$0xf] %vm280_vm1, %v11950_v31  ;;  %v19000_v62 = vunpack.c.l.bf16 %v18999_v16  ;;  %v10705_v28 = vadd.f32 %v12954_v21, %v10235_v23  ;;  %v10842_v5 = vadd.f32 %v18227_v25, %v10804_v24  ;;  %v10236_v43 = vadd.f32 %v12921_v49, %v9510_v61  ;;  %v19011_v31 = vld [vmem:[#allocation34_spill] sm:$0xff]  ;;  %v12041_v21 = vld [vmem:[%s13229_s12 + $0x78] sm:$0xff]  }
 0x4ad   : > { %v11948_v9 = vpack.c.bf16 %v10900_v41, %v10900_v41  ;;  %v10905_v39 = vmax.f32 %v10873_v14, 0.0  ;;  %v10802_v1 = vmul.f32 %v18205_v53, %v10700_v58  ;;  %v12014_v57 = vunpack.c.h.bf16 %v19001_v2 }
 0x4ae   : > { %v10871_v63 = vadd.f32 %v19000_v62, %v10839_v36  ;;  %v10807_v17 = vmul.f32 %v18205_v53, %v10705_v28  ;;  %v10703_v59 = vadd.f32 %v10648_v42, %v10233_v15  ;;  %v9513_v4 = vadd.f32 %v19003_v45, %v19002_v50  ;;  %v10197_v36 = vpop.f32.mrf.mxu0 }
 0x4af   : > { %11060 = vst.msk [vmem:[%s18287_s27 + $0x44] sm:$0xf] %vm280_vm1, %v11948_v9  ;;  %v11953_v7 = vpack.c.bf16 %v10905_v39, %v10905_v39  ;;  %v19004_v30 = vunpack.c.h.bf16 %v18995_v48  ;;  %v10840_v35 = vadd.f32 %v18227_v25, %v10802_v1  ;;  %v10234_v49 = vadd.f32 %v10181_v47, %v9508_v51  ;;  %v10651_v47 = vpop.f32.mrf.mxu1  ;;  %v12040_v1 = vld [vmem:[%s13229_s12 + $0x70] sm:$0xff]  }
 0x4b0   : > { %v10903_v32 = vmax.f32 %v10871_v63, 0.0  ;;  %v10845_v20 = vadd.f32 %v18227_v25, %v10807_v17  ;;  %v10805_v13 = vmul.f32 %v18205_v53, %v10703_v59  ;;  %v10706_v56 = vadd.f32 %v12955_v38, %v10236_v43 }
 0x4b1   : > { %v10874_v40 = vadd.f32 %v19004_v30, %v10842_v5  ;;  %11065 = vst.msk [vmem:[%s18287_s27 + $0x58] sm:$0xf] %vm280_vm1, %v11953_v7  ;;  %v9511_v10 = vadd.f32 %v19006_v55, %v19005_v29  ;;  %v9514_v46 = vadd.f32 %v19008_v8, %v19007_v44  ;;  %v19009_v33 = vunpack.c.h.bf16 %v18999_v16  ;;  %v12958_v14 = vpop.f32.mrf.mxu1 }
 0x4b2   : > { %v11951_v19 = vpack.c.bf16 %v10903_v32, %v10903_v32  ;;  %v19010_v34 = vunpack.c.l.bf16 %v18214_v18  ;;  %v10843_v60 = vadd.f32 %v18227_v25, %v10805_v13  ;;  %v10808_v26 = vmul.f32 %v18205_v53, %v10706_v56 }
 0x4b3   : > { %v10906_v0 = vmax.f32 %v10874_v40, 0.0  ;;  %v10872_v22 = vadd.f32 %v19009_v33, %v10840_v35  ;;  %v10704_v11 = vadd.f32 %v10651_v47, %v10234_v49  ;;  %v10239_v23 = vadd.f32 %v12924_v54, %v9513_v4  ;;  %v10664_v39 = vpop.f32.mrf.mxu1 }
 0x4b4   : > { %11063 = vst.msk [vmem:[%s18287_s27 + $0x50] sm:$0xf] %vm280_vm1, %v11951_v19  ;;  %v10877_v61 = vadd.f32 %v19010_v34, %v10845_v20  ;;  %v9512_v41 = vadd.f32 %v19011_v31, %v18272_v6  ;;  %v19012_v12 = vunpack.c.l.bf16 %v19001_v2  ;;  %v10846_v24 = vadd.f32 %v18227_v25, %v10808_v26 }
 0x4b5   : > { %v11954_v48 = vpack.c.bf16 %v10906_v0, %v10906_v0  ;;  %v10904_v27 = vmax.f32 %v10872_v22, 0.0  ;;  %v10806_v58 = vmul.f32 %v18205_v53, %v10704_v11  ;;  %v10237_v15 = vadd.f32 %v10194_v3, %v9511_v10  ;;  %v12959_v7 = vpop.f32.mrf.mxu1 }
 0x4b6   : > { %v10909_v37 = vmax.f32 %v10877_v61, 0.0  ;;  %v10875_v51 = vadd.f32 %v19012_v12, %v10843_v60  ;;  %v10240_v54 = vadd.f32 %v12925_v52, %v9514_v46  ;;  %v10709_v9 = vadd.f32 %v12958_v14, %v10239_v23 }
 0x4b7   : > { %11066 = vst.msk [vmem:[%s18287_s27 + $0x5c] sm:$0xf] %vm280_vm1, %v11954_v48  ;;  %v11952_v6 = vpack.c.bf16 %v10904_v27, %v10904_v27  ;;  %v19013_v63 = vunpack.c.h.bf16 %v18214_v18  ;;  %v10844_v5 = vadd.f32 %v18227_v25, %v10806_v58  ;;  %v10238_v42 = vadd.f32 %v10197_v36, %v9512_v41  ;;  %v10667_v40 = vpop.f32.mrf.mxu1 }
 0x4b8   : > { %v11957_v16 = vpack.c.bf16 %v10909_v37, %v10909_v37  ;;  %v10907_v62 = vmax.f32 %v10875_v51, 0.0  ;;  %v12025_v3 = vunpack.c.l.bf16 %v12041_v21  ;;  %v10811_v43 = vmul.f32 %v18205_v53, %v10709_v9 }
 0x4b9   : > { %v10878_v28 = vadd.f32 %v19013_v63, %v10846_v24  ;;  %11064 = vst.msk [vmem:[%s18287_s27 + $0x54] sm:$0xf] %vm280_vm1, %v11952_v6  ;;  %v10707_v2 = vadd.f32 %v10664_v39, %v10237_v15  ;;  %v10876_v59 = vadd.f32 %v12014_v57, %v10844_v5  ;;  %v10710_v18 = vadd.f32 %v12959_v7, %v10240_v54 }
 0x4ba   : > { %11069 = vst.msk [vmem:[%s18287_s27 + $0x68] sm:$0xf] %vm280_vm1, %v11957_v16  ;;  %v11955_v32 = vpack.c.bf16 %v10907_v62, %v10907_v62  ;;  %v10849_v50 = vadd.f32 %v18227_v25, %v10811_v43  ;;  %v12021_v45 = vunpack.c.l.bf16 %v12040_v1  ;;  %v12026_v30 = vunpack.c.h.bf16 %v12041_v21 }
 0x4bb   : > { %v10910_v17 = vmax.f32 %v10878_v28, 0.0  ;;  %v10809_v4 = vmul.f32 %v18205_v53, %v10707_v2  ;;  %v10908_v38 = vmax.f32 %v10876_v59, 0.0  ;;  %v10812_v49 = vmul.f32 %v18205_v53, %v10710_v18 }
 0x4bc   : > { %11067 = vst.msk [vmem:[%s18287_s27 + $0x60] sm:$0xf] %vm280_vm1, %v11955_v32  ;;  %v10708_v52 = vadd.f32 %v10667_v40, %v10238_v42  ;;  %v10881_v19 = vadd.f32 %v12025_v3, %v10849_v50  ;;  %v12022_v56 = vunpack.c.h.bf16 %v12040_v1 }
 0x4bd   : > { %v11958_v35 = vpack.c.bf16 %v10910_v17, %v10910_v17  ;;  %v10847_v57 = vadd.f32 %v18227_v25, %v10809_v4  ;;  %v11956_v20 = vpack.c.bf16 %v10908_v38, %v10908_v38  ;;  %v10850_v13 = vadd.f32 %v18227_v25, %v10812_v49 }
 0x4be   : > { %v10810_v29 = vmul.f32 %v18205_v53, %v10708_v52  ;;  %v10913_v55 = vmax.f32 %v10881_v19, 0.0 }
 0x4bf   : > { %11070 = vst.msk [vmem:[%s18287_s27 + $0x6c] sm:$0xf] %vm280_vm1, %v11958_v35  ;;  %v10879_v10 = vadd.f32 %v12021_v45, %v10847_v57  ;;  %11068 = vst.msk [vmem:[%s18287_s27 + $0x64] sm:$0xf] %vm280_vm1, %v11956_v20  ;;  %v10882_v44 = vadd.f32 %v12026_v30, %v10850_v13 }
 0x4c0   : > { %v10848_v8 = vadd.f32 %v18227_v25, %v10810_v29  ;;  %v11961_v46 = vpack.c.bf16 %v10913_v55, %v10913_v55 }
 0x4c1   : > { %v10911_v0 = vmax.f32 %v10879_v10, 0.0  ;;  %v10914_v33 = vmax.f32 %v10882_v44, 0.0 }
 0x4c2   : > { %v10880_v22 = vadd.f32 %v12022_v56, %v10848_v8  ;;  %11073 = vst.msk [vmem:[%s18287_s27 + $0x78] sm:$0xf] %vm280_vm1, %v11961_v46 }
 0x4c3   : > { %v11959_v47 = vpack.c.bf16 %v10911_v0, %v10911_v0  ;;  %v11962_v34 = vpack.c.bf16 %v10914_v33, %v10914_v33 }
 0x4c4   : > { %v10912_v61 = vmax.f32 %v10880_v22, 0.0 }
 0x4c5   : > { %11071 = vst.msk [vmem:[%s18287_s27 + $0x70] sm:$0xf] %vm280_vm1, %v11959_v47  ;;  %11074 = vst.msk [vmem:[%s18287_s27 + $0x7c] sm:$0xf] %vm280_vm1, %v11962_v34 }
 0x4c6   : > { %v11960_v53 = vpack.c.bf16 %v10912_v61, %v10912_v61 }
 0x4c8   : > { %11072 = vst.msk [vmem:[%s18287_s27 + $0x74] sm:$0xf] %vm280_vm1, %v11960_v53 }
 0x4c9 PF: > { %s17_s24 = sadd.s32 1, %s13113_s24  }
 0x4ca   : > { %p14_p4 = scmp.ge.s32.totalorder %s17_s24, 4  }
 0x4cc   :  { %16 = sbr.rel (!%p14_p4) target bundleno = 1 (0x1), region = 100 }

</bundles_post_ra>
